<compile_context>
chip_gen: v5e
topology: v5e:2x2
jax: 0.10.0
libtpu: 0.0.40
codegen_flags: <defaults>
</compile_context>

<pallas_src>
import functools
import math

import jax
import jax.numpy as jnp
from jax import lax
from jax.experimental import pallas as pl
from jax.experimental.pallas import tpu as pltpu

CPAD = 128                       # padded channel width (lane dim) for every conv layer
APAD = 128                       # padded actor-head output lanes  (>= n_actions)
VPAD = 128                       # padded critic-head output lanes (real width = 1)
HID = 256                        # actor/critic hidden width (module spec)
CONV_CHANNELS = (64, 32, 16)     # FeatureExtractor conv output channels
VMEM_LIMIT = 32 * 1024 * 1024    # explicit scoped-VMEM limit (headroom on v7x's 64 MiB)


def _round_up(x, m):
    return ((x + m - 1) // m) * m


def _pad_to(x, shape):
    return jnp.pad(x, [(0, t - s) for s, t in zip(x.shape, shape)])


# --------------------------------------------------------------------------------------
# Fused conv stack kernel: conv1 -> ReLU -> conv2 -> ReLU -> conv3 -> ReLU, all in VMEM.
#   grid = (B,); one image per step (rows independent across batch -> "parallel" for v7x).
#   Each conv: 9 taps, tap loop outermost, each tap = ONE (OH*W,128)x(128,128) MXU dot.
# --------------------------------------------------------------------------------------
def _conv_stack_kernel(x_ref, w1_ref, b1_ref, w2_ref, b2_ref, w3_ref, b3_ref, o_ref):
    def shift_rows(v, s):
        # v: (M, 128).  result[r] = v[r + s] (circular).  Rows that wrap across an image
        # row boundary only ever land in output columns >= OW, which are discarded.
        if s == 0:
            return v
        return jnp.concatenate([v[s:, :], v[:s, :]], axis=0)

    def conv3x3_relu(x, w_ref, b_ref):
        # x: (Hin, W, 128) bf16 value (full width; caller tracks the valid-column count).
        hin, wd, cp = x.shape
        oh = hin - 2
        m = oh * wd
        acc = jnp.zeros((m, cp), jnp.float32)
        for dy in range(3):
            # Leading-dim slice + tile-aligned reshape (W multiple of 8) -> free.
            slab = x[dy:dy + oh, :, :].reshape(m, cp)
            for dx in range(3):
                acc = acc + jnp.dot(shift_rows(slab, dx), w_ref[dy * 3 + dx],
                                    preferred_element_type=jnp.float32)
        acc = jnp.maximum(acc + b_ref[...], 0.0)          # bias + ReLU epilogue (f32)
        return acc.astype(jnp.bfloat16).reshape(oh, wd, cp)

    a = x_ref[...]                                        # (H, W, 128) bf16
    a = conv3x3_relu(a, w1_ref, b1_ref)                   # (H-2, W, 128)
    a = conv3x3_relu(a, w2_ref, b2_ref)                   # (H-4, W, 128)
    a = conv3x3_relu(a, w3_ref, b3_ref)                   # (H-6, W, 128)
    o_ref[...] = a


def conv_stack(x_nhwc_pad, kp):
    B, H, W, Cp = x_nhwc_pad.shape
    OH3 = H - 6
    wspec = pl.BlockSpec((9, Cp, Cp), lambda b: (0, 0, 0))     # constant index -> no re-DMA
    bspec = pl.BlockSpec((1, Cp), lambda b: (0, 0))
    return pl.pallas_call(
        _conv_stack_kernel,
        out_shape=jax.ShapeDtypeStruct((B, OH3, W, Cp), jnp.bfloat16),
        grid_spec=pltpu.PrefetchScalarGridSpec(
            num_scalar_prefetch=0,
            grid=(B,),
            in_specs=[
                pl.BlockSpec((None, H, W, Cp), lambda b: (b, 0, 0, 0)),
                wspec, bspec, wspec, bspec, wspec, bspec,
            ],
            out_specs=pl.BlockSpec((None, OH3, W, Cp), lambda b: (b, 0, 0, 0)),
        ),
        compiler_params=pltpu.CompilerParams(
            dimension_semantics=("parallel",),
            vmem_limit_bytes=VMEM_LIMIT,
        ),
    )(x_nhwc_pad, kp["conv1_w"], kp["conv1_b"], kp["conv2_w"], kp["conv2_b"],
      kp["conv3_w"], kp["conv3_b"])


# --------------------------------------------------------------------------------------
# Fused MLP-heads kernel: trunk Linear+ReLU, merged actor1|critic1, actor tower (+ exact
# softmax), critic tower.  All weights fit in VMEM; hidden activations never leave VMEM.
# --------------------------------------------------------------------------------------
def _heads_kernel(xf_ref, wt_ref, bt_ref, wac1_ref, bac1_ref,
                  wa2_ref, ba2_ref, wa3_ref, ba3_ref,
                  wc2_ref, bc2_ref, wc3_ref, bc3_ref,
                  pi_ref, v_ref, *, n_actions, hid):
    def dense(h, w_ref, b_ref, relu=True):
        y = jnp.dot(h, w_ref[...], preferred_element_type=jnp.float32) + b_ref[...]
        return jnp.maximum(y, 0.0) if relu else y

    x = xf_ref[...]                                          # (BTH, KPAD) bf16
    feat = dense(x, wt_ref, bt_ref).astype(jnp.bfloat16)     # trunk Linear + ReLU

    # Actor-1 and critic-1 share `feat` -> ONE merged (nf, 2*hid) matmul, split in-kernel.
    h1 = dense(feat, wac1_ref, bac1_ref)                     # (BTH, 2*hid) f32
    ha = h1[:, :hid].astype(jnp.bfloat16)
    hc = h1[:, hid:].astype(jnp.bfloat16)

    # ---- actor tower + masked, max-shifted, EXACT softmax ----
    ha = dense(ha, wa2_ref, ba2_ref).astype(jnp.bfloat16)
    logits = dense(ha, wa3_ref, ba3_ref, relu=False)         # (BTH, APAD) f32
    lane = lax.broadcasted_iota(jnp.int32, logits.shape, 1)
    logits = jnp.where(lane < n_actions, logits, -jnp.inf)
    m = jnp.max(logits, axis=-1, keepdims=True)
    e = jnp.exp(logits - m)
    pi_ref[...] = (e / jnp.sum(e, axis=-1, keepdims=True)).astype(pi_ref.dtype)

    # ---- critic tower ----
    # NOTE: bf16 matmul inputs with f32 accumulation; switch to f32 weights here if value-
    # loss precision becomes critical for RL training (cost is negligible at this size).
    hc = dense(hc, wc2_ref, bc2_ref).astype(jnp.bfloat16)
    v_ref[...] = dense(hc, wc3_ref, bc3_ref, relu=False).astype(v_ref.dtype)


def mlp_heads(feats, kp, n_actions, hid=HID):
    bpad, kpad = feats.shape
    bth = min(bpad, 128)                       # big batch tile; >=2 grid steps when bpad>128

    def full(arr):
        nd = arr.ndim
        return pl.BlockSpec(arr.shape, lambda *_: (0,) * nd)

    names = ("lin", "ac1", "a2", "a3", "c2", "c3")
    operands, in_specs = [feats], [pl.BlockSpec((bth, kpad), lambda i: (i, 0))]
    for n in names:
        operands += [kp[f"{n}_w"], kp[f"{n}_b"]]
        in_specs += [full(kp[f"{n}_w"]), full(kp[f"{n}_b"])]

    kernel = functools.partial(_heads_kernel, n_actions=n_actions, hid=hid)
    pi, v = pl.pallas_call(
        kernel,
        out_shape=(jax.ShapeDtypeStruct((bpad, APAD), jnp.float32),
                   jax.ShapeDtypeStruct((bpad, VPAD), jnp.float32)),
        grid_spec=pltpu.PrefetchScalarGridSpec(
            num_scalar_prefetch=0,
            grid=(bpad // bth,),
            in_specs=in_specs,
            out_specs=(pl.BlockSpec((bth, APAD), lambda i: (i, 0)),
                       pl.BlockSpec((bth, VPAD), lambda i: (i, 0))),
        ),
        compiler_params=pltpu.CompilerParams(
            dimension_semantics=("parallel",),
            vmem_limit_bytes=VMEM_LIMIT,
        ),
    )(*operands)
    return pi, v


# --------------------------------------------------------------------------------------
# Parameter construction (PyTorch layouts) and conversion to kernel layouts.
# --------------------------------------------------------------------------------------
def init_torch_style_params(key, in_channels, n_actions, number_of_features, h, w):
    params = {}
    keys = iter(jax.random.split(key, 32))
    conv_cfg = [(in_channels, CONV_CHANNELS[0]),
                (CONV_CHANNELS[0], CONV_CHANNELS[1]),
                (CONV_CHANNELS[1], CONV_CHANNELS[2])]
    oh, ow = h, w
    for i, (ic, oc) in enumerate(conv_cfg, start=1):
        bound = 1.0 / math.sqrt(ic * 9)
        params[f"conv{i}_w"] = jax.random.uniform(next(keys), (oc, ic, 3, 3), jnp.float32, -bound, bound)
        params[f"conv{i}_b"] = jax.random.uniform(next(keys), (oc,), jnp.float32, -bound, bound)
        oh, ow = oh - 2, ow - 2
    kflat = CONV_CHANNELS[-1] * oh * ow

    def linear(kw, kb, out_d, in_d):
        bound = 1.0 / math.sqrt(in_d)
        return (jax.random.uniform(kw, (out_d, in_d), jnp.float32, -bound, bound),
                jax.random.uniform(kb, (out_d,), jnp.float32, -bound, bound))

    params["lin_w"], params["lin_b"] = linear(next(keys), next(keys), number_of_features, kflat)
    params["a1_w"], params["a1_b"] = linear(next(keys), next(keys), HID, number_of_features)
    params["a2_w"], params["a2_b"] = linear(next(keys), next(keys), HID, HID)
    params["a3_w"], params["a3_b"] = linear(next(keys), next(keys), n_actions, HID)
    params["c1_w"], params["c1_b"] = linear(next(keys), next(keys), HID, number_of_features)
    params["c2_w"], params["c2_b"] = linear(next(keys), next(keys), HID, HID)
    params["c3_w"], params["c3_b"] = linear(next(keys), next(keys), 1, HID)
    return params


def prepare_kernel_params(tp, h, w):
    """Convert PyTorch-layout params to padded, lane-dense bf16 kernel layouts (done once)."""
    kp = {}
    for i in (1, 2, 3):
        wt = tp[f"conv{i}_w"]                                   # (OC, IC, 3, 3)
        oc, ic = wt.shape[0], wt.shape[1]
        wt = jnp.transpose(wt, (2, 3, 1, 0)).reshape(9, ic, oc)  # (kh*kw, IC, OC)
        kp[f"conv{i}_w"] = _pad_to(wt, (9, CPAD, CPAD)).astype(jnp.bfloat16)
        kp[f"conv{i}_b"] = _pad_to(tp[f"conv{i}_b"][None, :], (1, CPAD)).astype(jnp.float32)

    # Trunk Linear: permute K rows from PyTorch NCHW-flatten order (c,oh,ow) to the NHWC
    # (oh,ow,c) order produced by the conv kernel's lane-dense output -> no wrapper transpose.
    oh3, ow3, oc3 = h - 6, w - 6, CONV_CHANNELS[-1]
    kflat = oc3 * oh3 * ow3
    kpad = _round_up(kflat, 128)
    lw = tp["lin_w"]                                            # (nf, kflat)
    nf = lw.shape[0]
    lw = lw.reshape(nf, oc3, oh3, ow3)
    lw = jnp.transpose(lw, (2, 3, 1, 0)).reshape(kflat, nf)     # rows ordered (oh, ow, c)
    kp["lin_w"] = _pad_to(lw, (kpad, nf)).astype(jnp.bfloat16)
    kp["lin_b"] = tp["lin_b"][None, :].astype(jnp.float32)

    # Merged actor-1 | critic-1 (shared trunk input): single (nf, 2*HID) weight.
    kp["ac1_w"] = jnp.concatenate([tp["a1_w"].T, tp["c1_w"].T], axis=1).astype(jnp.bfloat16)
    kp["ac1_b"] = jnp.concatenate([tp["a1_b"], tp["c1_b"]])[None, :].astype(jnp.float32)

    kp["a2_w"] = tp["a2_w"].T.astype(jnp.bfloat16)
    kp["a2_b"] = tp["a2_b"][None, :].astype(jnp.float32)
    kp["a3_w"] = _pad_to(tp["a3_w"].T, (HID, APAD)).astype(jnp.bfloat16)
    kp["a3_b"] = _pad_to(tp["a3_b"][None, :], (1, APAD)).astype(jnp.float32)
    kp["c2_w"] = tp["c2_w"].T.astype(jnp.bfloat16)
    kp["c2_b"] = tp["c2_b"][None, :].astype(jnp.float32)
    kp["c3_w"] = _pad_to(tp["c3_w"].T, (HID, VPAD)).astype(jnp.bfloat16)
    kp["c3_b"] = _pad_to(tp["c3_b"][None, :], (1, VPAD)).astype(jnp.float32)
    return kp


# --------------------------------------------------------------------------------------
# Forward pass (wrapper keeps PyTorch's NCHW at the API boundary only).
# --------------------------------------------------------------------------------------
def actor_critic_forward(kparams, x_nchw, *, n_actions):
    B, C, H, W = x_nchw.shape
    x = jnp.transpose(x_nchw, (0, 2, 3, 1))                     # NCHW -> NHWC (channels on lanes)
    x = jnp.pad(x, ((0, 0), (0, 0), (0, 0), (0, CPAD - C))).astype(jnp.bfloat16)

    act3 = conv_stack(x, kparams)                               # (B, H-6, W, 128) bf16, fused convs

    # Flatten valid box in NHWC order (matches the permuted lin_w); stays bf16, no transpose.
    oh3, ow3, oc3 = H - 6, W - 6, CONV_CHANNELS[-1]
    kflat = oh3 * ow3 * oc3
    kpad = kparams["lin_w"].shape[0]
    feats = act3[:, :, :ow3, :oc3].reshape(B, kflat)

    bpad = _round_up(B, 8)
    if bpad > 128:
        bpad = _round_up(bpad, 128)
    feats = jnp.pad(feats, ((0, bpad - B), (0, kpad - kflat)))

    pi_pad, v_pad = mlp_heads(feats, kparams, n_actions)
    return pi_pad[:B, :n_actions], v_pad[:B, :1]


# --------------------------------------------------------------------------------------
# Pure-JAX (f32) reference for validation.
# --------------------------------------------------------------------------------------
def reference_forward(tp, x_nchw):
    a = x_nchw
    for i in (1, 2, 3):
        a = lax.conv_general_dilated(a, tp[f"conv{i}_w"], window_strides=(1, 1),
                                     padding="VALID",
                                     dimension_numbers=("NCHW", "OIHW", "NCHW"))
        a = jnp.maximum(a + tp[f"conv{i}_b"][None, :, None, None], 0.0)
    feats = a.reshape(a.shape[0], -1)

    def lin(h, w, b, relu=True):
        y = h @ w.T + b
        return jnp.maximum(y, 0.0) if relu else y

    feat = lin(feats, tp["lin_w"], tp["lin_b"])
    h = lin(feat, tp["a1_w"], tp["a1_b"])
    h = lin(h, tp["a2_w"], tp["a2_b"])
    pi = jax.nn.softmax(lin(h, tp["a3_w"], tp["a3_b"], relu=False), axis=1)
    h = lin(feat, tp["c1_w"], tp["c1_b"])
    h = lin(h, tp["c2_w"], tp["c2_b"])
    v = lin(h, tp["c3_w"], tp["c3_b"], relu=False)
    return pi, v


if __name__ == "__main__":
    B, C, H, W = 2, 4, 16, 16
    n_actions = 8
    number_of_features = 256        # small-shape stand-in for the module's default 1024

    key = jax.random.PRNGKey(0)
    pkey, xkey = jax.random.split(key)
    tparams = init_torch_style_params(pkey, C, n_actions, number_of_features, H, W)
    kparams = prepare_kernel_params(tparams, H, W)
    x = jax.random.normal(xkey, (B, C, H, W), jnp.float32)

    fwd = jax.jit(functools.partial(actor_critic_forward, n_actions=n_actions))
    pi, v = fwd(kparams, x)
    jax.block_until_ready((pi, v))

    pi_ref, v_ref = reference_forward(tparams, x)
    assert pi.shape == (B, n_actions) and v.shape == (B, 1)
    assert bool(jnp.all(jnp.isfinite(pi))) and bool(jnp.all(jnp.isfinite(v)))
    assert float(jnp.max(jnp.abs(jnp.sum(pi, axis=1) - 1.0))) < 1e-2
    assert float(jnp.max(jnp.abs(pi - pi_ref))) < 5e-2      # bf16-MXU vs f32 reference
    assert float(jnp.max(jnp.abs(v - v_ref))) < 1e-1
    print("KERNEL_OK")
</pallas_src>

<mosaic_0001>
module attributes {stable_mosaic.version = 11 : i64} {
  func.func @_conv_stack_kernel(%arg0: i32, %arg1: memref<1x16x16x128xbf16, #tpu.memory_space<vmem>>, %arg2: memref<9x128x128xbf16, #tpu.memory_space<vmem>>, %arg3: memref<1x128xf32, #tpu.memory_space<vmem>>, %arg4: memref<9x128x128xbf16, #tpu.memory_space<vmem>>, %arg5: memref<1x128xf32, #tpu.memory_space<vmem>>, %arg6: memref<9x128x128xbf16, #tpu.memory_space<vmem>>, %arg7: memref<1x128xf32, #tpu.memory_space<vmem>>, %arg8: memref<1x10x16x128xbf16, #tpu.memory_space<vmem>>) attributes {dimension_semantics = [#tpu.dimension_semantics<parallel>], iteration_bounds = array<i64: 2>, scalar_prefetch = 0 : i64, scratch_operands = 0 : i64, tpu.core_type = #tpu.core_type<tc>, window_params = [{transform_indices = @transform_0, window_bounds = array<i64: 1, 16, 16, 128>}, {pipeline_mode = #tpu.pipeline_mode<synchronous>, transform_indices = @transform_1, window_bounds = array<i64: 9, 128, 128>}, {pipeline_mode = #tpu.pipeline_mode<synchronous>, transform_indices = @transform_2, window_bounds = array<i64: 1, 128>}, {pipeline_mode = #tpu.pipeline_mode<synchronous>, transform_indices = @transform_3, window_bounds = array<i64: 9, 128, 128>}, {pipeline_mode = #tpu.pipeline_mode<synchronous>, transform_indices = @transform_4, window_bounds = array<i64: 1, 128>}, {pipeline_mode = #tpu.pipeline_mode<synchronous>, transform_indices = @transform_5, window_bounds = array<i64: 9, 128, 128>}, {pipeline_mode = #tpu.pipeline_mode<synchronous>, transform_indices = @transform_6, window_bounds = array<i64: 1, 128>}, {transform_indices = @transform_7, window_bounds = array<i64: 1, 10, 16, 128>}]} {
    %c0 = arith.constant 0 : index
    %c0_0 = arith.constant 0 : index
    %c0_1 = arith.constant 0 : index
    %c0_2 = arith.constant 0 : index
    %0 = vector.load %arg1[%c0, %c0_0, %c0_1, %c0_2] : memref<1x16x16x128xbf16, #tpu.memory_space<vmem>>, vector<1x16x16x128xbf16>
    %1 = vector.shape_cast %0 : vector<1x16x16x128xbf16> to vector<16x16x128xbf16>
    %cst = arith.constant 0.000000e+00 : f32
    %2 = vector.broadcast %cst : f32 to vector<224x128xf32>
    %3 = vector.extract_strided_slice %1 {offsets = [0, 0, 0], sizes = [14, 16, 128], strides = [1, 1, 1]} : vector<16x16x128xbf16> to vector<14x16x128xbf16>
    %4 = vector.shape_cast %3 : vector<14x16x128xbf16> to vector<224x128xbf16>
    %c0_3 = arith.constant 0 : index
    %c0_4 = arith.constant 0 : index
    %c0_5 = arith.constant 0 : index
    %5 = vector.load %arg2[%c0_3, %c0_4, %c0_5] : memref<9x128x128xbf16, #tpu.memory_space<vmem>>, vector<1x128x128xbf16>
    %6 = vector.shape_cast %5 : vector<1x128x128xbf16> to vector<128x128xbf16>
    %cst_6 = arith.constant dense<0.000000e+00> : vector<224x128xf32>
    %7 = tpu.matmul %4, %6, %cst_6 {dimension_numbers = #tpu.dot_dimension_numbers<[1], [0], [0], [1], [0, 0, 1, 1], [], []>} : vector<224x128xbf16>, vector<128x128xbf16>, vector<224x128xf32> -> vector<224x128xf32>
    %8 = arith.addf %2, %7 : vector<224x128xf32>
    %9 = vector.extract_strided_slice %4 {offsets = [1, 0], sizes = [223, 128], strides = [1, 1]} : vector<224x128xbf16> to vector<223x128xbf16>
    %10 = vector.extract_strided_slice %4 {offsets = [0, 0], sizes = [1, 128], strides = [1, 1]} : vector<224x128xbf16> to vector<1x128xbf16>
    %11 = tpu.concatenate %9, %10 in 0 : vector<223x128xbf16>, vector<1x128xbf16> -> vector<224x128xbf16>
    %c1 = arith.constant 1 : index
    %c0_7 = arith.constant 0 : index
    %c0_8 = arith.constant 0 : index
    %12 = vector.load %arg2[%c1, %c0_7, %c0_8] : memref<9x128x128xbf16, #tpu.memory_space<vmem>>, vector<1x128x128xbf16>
    %13 = vector.shape_cast %12 : vector<1x128x128xbf16> to vector<128x128xbf16>
    %cst_9 = arith.constant dense<0.000000e+00> : vector<224x128xf32>
    %14 = tpu.matmul %11, %13, %cst_9 {dimension_numbers = #tpu.dot_dimension_numbers<[1], [0], [0], [1], [0, 0, 1, 1], [], []>} : vector<224x128xbf16>, vector<128x128xbf16>, vector<224x128xf32> -> vector<224x128xf32>
    %15 = arith.addf %8, %14 : vector<224x128xf32>
    %16 = vector.extract_strided_slice %4 {offsets = [2, 0], sizes = [222, 128], strides = [1, 1]} : vector<224x128xbf16> to vector<222x128xbf16>
    %17 = vector.extract_strided_slice %4 {offsets = [0, 0], sizes = [2, 128], strides = [1, 1]} : vector<224x128xbf16> to vector<2x128xbf16>
    %18 = tpu.concatenate %16, %17 in 0 : vector<222x128xbf16>, vector<2x128xbf16> -> vector<224x128xbf16>
    %c2 = arith.constant 2 : index
    %c0_10 = arith.constant 0 : index
    %c0_11 = arith.constant 0 : index
    %19 = vector.load %arg2[%c2, %c0_10, %c0_11] : memref<9x128x128xbf16, #tpu.memory_space<vmem>>, vector<1x128x128xbf16>
    %20 = vector.shape_cast %19 : vector<1x128x128xbf16> to vector<128x128xbf16>
    %cst_12 = arith.constant dense<0.000000e+00> : vector<224x128xf32>
    %21 = tpu.matmul %18, %20, %cst_12 {dimension_numbers = #tpu.dot_dimension_numbers<[1], [0], [0], [1], [0, 0, 1, 1], [], []>} : vector<224x128xbf16>, vector<128x128xbf16>, vector<224x128xf32> -> vector<224x128xf32>
    %22 = arith.addf %15, %21 : vector<224x128xf32>
    %23 = vector.extract_strided_slice %1 {offsets = [1, 0, 0], sizes = [14, 16, 128], strides = [1, 1, 1]} : vector<16x16x128xbf16> to vector<14x16x128xbf16>
    %24 = vector.shape_cast %23 : vector<14x16x128xbf16> to vector<224x128xbf16>
    %c3 = arith.constant 3 : index
    %c0_13 = arith.constant 0 : index
    %c0_14 = arith.constant 0 : index
    %25 = vector.load %arg2[%c3, %c0_13, %c0_14] : memref<9x128x128xbf16, #tpu.memory_space<vmem>>, vector<1x128x128xbf16>
    %26 = vector.shape_cast %25 : vector<1x128x128xbf16> to vector<128x128xbf16>
    %cst_15 = arith.constant dense<0.000000e+00> : vector<224x128xf32>
    %27 = tpu.matmul %24, %26, %cst_15 {dimension_numbers = #tpu.dot_dimension_numbers<[1], [0], [0], [1], [0, 0, 1, 1], [], []>} : vector<224x128xbf16>, vector<128x128xbf16>, vector<224x128xf32> -> vector<224x128xf32>
    %28 = arith.addf %22, %27 : vector<224x128xf32>
    %29 = vector.extract_strided_slice %24 {offsets = [1, 0], sizes = [223, 128], strides = [1, 1]} : vector<224x128xbf16> to vector<223x128xbf16>
    %30 = vector.extract_strided_slice %24 {offsets = [0, 0], sizes = [1, 128], strides = [1, 1]} : vector<224x128xbf16> to vector<1x128xbf16>
    %31 = tpu.concatenate %29, %30 in 0 : vector<223x128xbf16>, vector<1x128xbf16> -> vector<224x128xbf16>
    %c4 = arith.constant 4 : index
    %c0_16 = arith.constant 0 : index
    %c0_17 = arith.constant 0 : index
    %32 = vector.load %arg2[%c4, %c0_16, %c0_17] : memref<9x128x128xbf16, #tpu.memory_space<vmem>>, vector<1x128x128xbf16>
    %33 = vector.shape_cast %32 : vector<1x128x128xbf16> to vector<128x128xbf16>
    %cst_18 = arith.constant dense<0.000000e+00> : vector<224x128xf32>
    %34 = tpu.matmul %31, %33, %cst_18 {dimension_numbers = #tpu.dot_dimension_numbers<[1], [0], [0], [1], [0, 0, 1, 1], [], []>} : vector<224x128xbf16>, vector<128x128xbf16>, vector<224x128xf32> -> vector<224x128xf32>
    %35 = arith.addf %28, %34 : vector<224x128xf32>
    %36 = vector.extract_strided_slice %24 {offsets = [2, 0], sizes = [222, 128], strides = [1, 1]} : vector<224x128xbf16> to vector<222x128xbf16>
    %37 = vector.extract_strided_slice %24 {offsets = [0, 0], sizes = [2, 128], strides = [1, 1]} : vector<224x128xbf16> to vector<2x128xbf16>
    %38 = tpu.concatenate %36, %37 in 0 : vector<222x128xbf16>, vector<2x128xbf16> -> vector<224x128xbf16>
    %c5 = arith.constant 5 : index
    %c0_19 = arith.constant 0 : index
    %c0_20 = arith.constant 0 : index
    %39 = vector.load %arg2[%c5, %c0_19, %c0_20] : memref<9x128x128xbf16, #tpu.memory_space<vmem>>, vector<1x128x128xbf16>
    %40 = vector.shape_cast %39 : vector<1x128x128xbf16> to vector<128x128xbf16>
    %cst_21 = arith.constant dense<0.000000e+00> : vector<224x128xf32>
    %41 = tpu.matmul %38, %40, %cst_21 {dimension_numbers = #tpu.dot_dimension_numbers<[1], [0], [0], [1], [0, 0, 1, 1], [], []>} : vector<224x128xbf16>, vector<128x128xbf16>, vector<224x128xf32> -> vector<224x128xf32>
    %42 = arith.addf %35, %41 : vector<224x128xf32>
    %43 = vector.extract_strided_slice %1 {offsets = [2, 0, 0], sizes = [14, 16, 128], strides = [1, 1, 1]} : vector<16x16x128xbf16> to vector<14x16x128xbf16>
    %44 = vector.shape_cast %43 : vector<14x16x128xbf16> to vector<224x128xbf16>
    %c6 = arith.constant 6 : index
    %c0_22 = arith.constant 0 : index
    %c0_23 = arith.constant 0 : index
    %45 = vector.load %arg2[%c6, %c0_22, %c0_23] : memref<9x128x128xbf16, #tpu.memory_space<vmem>>, vector<1x128x128xbf16>
    %46 = vector.shape_cast %45 : vector<1x128x128xbf16> to vector<128x128xbf16>
    %cst_24 = arith.constant dense<0.000000e+00> : vector<224x128xf32>
    %47 = tpu.matmul %44, %46, %cst_24 {dimension_numbers = #tpu.dot_dimension_numbers<[1], [0], [0], [1], [0, 0, 1, 1], [], []>} : vector<224x128xbf16>, vector<128x128xbf16>, vector<224x128xf32> -> vector<224x128xf32>
    %48 = arith.addf %42, %47 : vector<224x128xf32>
    %49 = vector.extract_strided_slice %44 {offsets = [1, 0], sizes = [223, 128], strides = [1, 1]} : vector<224x128xbf16> to vector<223x128xbf16>
    %50 = vector.extract_strided_slice %44 {offsets = [0, 0], sizes = [1, 128], strides = [1, 1]} : vector<224x128xbf16> to vector<1x128xbf16>
    %51 = tpu.concatenate %49, %50 in 0 : vector<223x128xbf16>, vector<1x128xbf16> -> vector<224x128xbf16>
    %c7 = arith.constant 7 : index
    %c0_25 = arith.constant 0 : index
    %c0_26 = arith.constant 0 : index
    %52 = vector.load %arg2[%c7, %c0_25, %c0_26] : memref<9x128x128xbf16, #tpu.memory_space<vmem>>, vector<1x128x128xbf16>
    %53 = vector.shape_cast %52 : vector<1x128x128xbf16> to vector<128x128xbf16>
    %cst_27 = arith.constant dense<0.000000e+00> : vector<224x128xf32>
    %54 = tpu.matmul %51, %53, %cst_27 {dimension_numbers = #tpu.dot_dimension_numbers<[1], [0], [0], [1], [0, 0, 1, 1], [], []>} : vector<224x128xbf16>, vector<128x128xbf16>, vector<224x128xf32> -> vector<224x128xf32>
    %55 = arith.addf %48, %54 : vector<224x128xf32>
    %56 = vector.extract_strided_slice %44 {offsets = [2, 0], sizes = [222, 128], strides = [1, 1]} : vector<224x128xbf16> to vector<222x128xbf16>
    %57 = vector.extract_strided_slice %44 {offsets = [0, 0], sizes = [2, 128], strides = [1, 1]} : vector<224x128xbf16> to vector<2x128xbf16>
    %58 = tpu.concatenate %56, %57 in 0 : vector<222x128xbf16>, vector<2x128xbf16> -> vector<224x128xbf16>
    %c8 = arith.constant 8 : index
    %c0_28 = arith.constant 0 : index
    %c0_29 = arith.constant 0 : index
    %59 = vector.load %arg2[%c8, %c0_28, %c0_29] : memref<9x128x128xbf16, #tpu.memory_space<vmem>>, vector<1x128x128xbf16>
    %60 = vector.shape_cast %59 : vector<1x128x128xbf16> to vector<128x128xbf16>
    %cst_30 = arith.constant dense<0.000000e+00> : vector<224x128xf32>
    %61 = tpu.matmul %58, %60, %cst_30 {dimension_numbers = #tpu.dot_dimension_numbers<[1], [0], [0], [1], [0, 0, 1, 1], [], []>} : vector<224x128xbf16>, vector<128x128xbf16>, vector<224x128xf32> -> vector<224x128xf32>
    %62 = arith.addf %55, %61 : vector<224x128xf32>
    %c0_31 = arith.constant 0 : index
    %c0_32 = arith.constant 0 : index
    %63 = vector.load %arg3[%c0_31, %c0_32] : memref<1x128xf32, #tpu.memory_space<vmem>>, vector<1x128xf32>
    %64 = vector.broadcast %63 : vector<1x128xf32> to vector<224x128xf32>
    %65 = arith.addf %62, %64 : vector<224x128xf32>
    %cst_33 = arith.constant 0.000000e+00 : f32
    %66 = vector.broadcast %cst_33 : f32 to vector<224x128xf32>
    %67 = arith.maximumf %65, %66 : vector<224x128xf32>
    %68 = arith.truncf %67 : vector<224x128xf32> to vector<224x128xbf16>
    %69 = vector.shape_cast %68 : vector<224x128xbf16> to vector<14x16x128xbf16>
    %cst_34 = arith.constant 0.000000e+00 : f32
    %70 = vector.broadcast %cst_34 : f32 to vector<192x128xf32>
    %71 = vector.extract_strided_slice %69 {offsets = [0, 0, 0], sizes = [12, 16, 128], strides = [1, 1, 1]} : vector<14x16x128xbf16> to vector<12x16x128xbf16>
    %72 = vector.shape_cast %71 : vector<12x16x128xbf16> to vector<192x128xbf16>
    %c0_35 = arith.constant 0 : index
    %c0_36 = arith.constant 0 : index
    %c0_37 = arith.constant 0 : index
    %73 = vector.load %arg4[%c0_35, %c0_36, %c0_37] : memref<9x128x128xbf16, #tpu.memory_space<vmem>>, vector<1x128x128xbf16>
    %74 = vector.shape_cast %73 : vector<1x128x128xbf16> to vector<128x128xbf16>
    %cst_38 = arith.constant dense<0.000000e+00> : vector<192x128xf32>
    %75 = tpu.matmul %72, %74, %cst_38 {dimension_numbers = #tpu.dot_dimension_numbers<[1], [0], [0], [1], [0, 0, 1, 1], [], []>} : vector<192x128xbf16>, vector<128x128xbf16>, vector<192x128xf32> -> vector<192x128xf32>
    %76 = arith.addf %70, %75 : vector<192x128xf32>
    %77 = vector.extract_strided_slice %72 {offsets = [1, 0], sizes = [191, 128], strides = [1, 1]} : vector<192x128xbf16> to vector<191x128xbf16>
    %78 = vector.extract_strided_slice %72 {offsets = [0, 0], sizes = [1, 128], strides = [1, 1]} : vector<192x128xbf16> to vector<1x128xbf16>
    %79 = tpu.concatenate %77, %78 in 0 : vector<191x128xbf16>, vector<1x128xbf16> -> vector<192x128xbf16>
    %c1_39 = arith.constant 1 : index
    %c0_40 = arith.constant 0 : index
    %c0_41 = arith.constant 0 : index
    %80 = vector.load %arg4[%c1_39, %c0_40, %c0_41] : memref<9x128x128xbf16, #tpu.memory_space<vmem>>, vector<1x128x128xbf16>
    %81 = vector.shape_cast %80 : vector<1x128x128xbf16> to vector<128x128xbf16>
    %cst_42 = arith.constant dense<0.000000e+00> : vector<192x128xf32>
    %82 = tpu.matmul %79, %81, %cst_42 {dimension_numbers = #tpu.dot_dimension_numbers<[1], [0], [0], [1], [0, 0, 1, 1], [], []>} : vector<192x128xbf16>, vector<128x128xbf16>, vector<192x128xf32> -> vector<192x128xf32>
    %83 = arith.addf %76, %82 : vector<192x128xf32>
    %84 = vector.extract_strided_slice %72 {offsets = [2, 0], sizes = [190, 128], strides = [1, 1]} : vector<192x128xbf16> to vector<190x128xbf16>
    %85 = vector.extract_strided_slice %72 {offsets = [0, 0], sizes = [2, 128], strides = [1, 1]} : vector<192x128xbf16> to vector<2x128xbf16>
    %86 = tpu.concatenate %84, %85 in 0 : vector<190x128xbf16>, vector<2x128xbf16> -> vector<192x128xbf16>
    %c2_43 = arith.constant 2 : index
    %c0_44 = arith.constant 0 : index
    %c0_45 = arith.constant 0 : index
    %87 = vector.load %arg4[%c2_43, %c0_44, %c0_45] : memref<9x128x128xbf16, #tpu.memory_space<vmem>>, vector<1x128x128xbf16>
    %88 = vector.shape_cast %87 : vector<1x128x128xbf16> to vector<128x128xbf16>
    %cst_46 = arith.constant dense<0.000000e+00> : vector<192x128xf32>
    %89 = tpu.matmul %86, %88, %cst_46 {dimension_numbers = #tpu.dot_dimension_numbers<[1], [0], [0], [1], [0, 0, 1, 1], [], []>} : vector<192x128xbf16>, vector<128x128xbf16>, vector<192x128xf32> -> vector<192x128xf32>
    %90 = arith.addf %83, %89 : vector<192x128xf32>
    %91 = vector.extract_strided_slice %69 {offsets = [1, 0, 0], sizes = [12, 16, 128], strides = [1, 1, 1]} : vector<14x16x128xbf16> to vector<12x16x128xbf16>
    %92 = vector.shape_cast %91 : vector<12x16x128xbf16> to vector<192x128xbf16>
    %c3_47 = arith.constant 3 : index
    %c0_48 = arith.constant 0 : index
    %c0_49 = arith.constant 0 : index
    %93 = vector.load %arg4[%c3_47, %c0_48, %c0_49] : memref<9x128x128xbf16, #tpu.memory_space<vmem>>, vector<1x128x128xbf16>
    %94 = vector.shape_cast %93 : vector<1x128x128xbf16> to vector<128x128xbf16>
    %cst_50 = arith.constant dense<0.000000e+00> : vector<192x128xf32>
    %95 = tpu.matmul %92, %94, %cst_50 {dimension_numbers = #tpu.dot_dimension_numbers<[1], [0], [0], [1], [0, 0, 1, 1], [], []>} : vector<192x128xbf16>, vector<128x128xbf16>, vector<192x128xf32> -> vector<192x128xf32>
    %96 = arith.addf %90, %95 : vector<192x128xf32>
    %97 = vector.extract_strided_slice %92 {offsets = [1, 0], sizes = [191, 128], strides = [1, 1]} : vector<192x128xbf16> to vector<191x128xbf16>
    %98 = vector.extract_strided_slice %92 {offsets = [0, 0], sizes = [1, 128], strides = [1, 1]} : vector<192x128xbf16> to vector<1x128xbf16>
    %99 = tpu.concatenate %97, %98 in 0 : vector<191x128xbf16>, vector<1x128xbf16> -> vector<192x128xbf16>
    %c4_51 = arith.constant 4 : index
    %c0_52 = arith.constant 0 : index
    %c0_53 = arith.constant 0 : index
    %100 = vector.load %arg4[%c4_51, %c0_52, %c0_53] : memref<9x128x128xbf16, #tpu.memory_space<vmem>>, vector<1x128x128xbf16>
    %101 = vector.shape_cast %100 : vector<1x128x128xbf16> to vector<128x128xbf16>
    %cst_54 = arith.constant dense<0.000000e+00> : vector<192x128xf32>
    %102 = tpu.matmul %99, %101, %cst_54 {dimension_numbers = #tpu.dot_dimension_numbers<[1], [0], [0], [1], [0, 0, 1, 1], [], []>} : vector<192x128xbf16>, vector<128x128xbf16>, vector<192x128xf32> -> vector<192x128xf32>
    %103 = arith.addf %96, %102 : vector<192x128xf32>
    %104 = vector.extract_strided_slice %92 {offsets = [2, 0], sizes = [190, 128], strides = [1, 1]} : vector<192x128xbf16> to vector<190x128xbf16>
    %105 = vector.extract_strided_slice %92 {offsets = [0, 0], sizes = [2, 128], strides = [1, 1]} : vector<192x128xbf16> to vector<2x128xbf16>
    %106 = tpu.concatenate %104, %105 in 0 : vector<190x128xbf16>, vector<2x128xbf16> -> vector<192x128xbf16>
    %c5_55 = arith.constant 5 : index
    %c0_56 = arith.constant 0 : index
    %c0_57 = arith.constant 0 : index
    %107 = vector.load %arg4[%c5_55, %c0_56, %c0_57] : memref<9x128x128xbf16, #tpu.memory_space<vmem>>, vector<1x128x128xbf16>
    %108 = vector.shape_cast %107 : vector<1x128x128xbf16> to vector<128x128xbf16>
    %cst_58 = arith.constant dense<0.000000e+00> : vector<192x128xf32>
    %109 = tpu.matmul %106, %108, %cst_58 {dimension_numbers = #tpu.dot_dimension_numbers<[1], [0], [0], [1], [0, 0, 1, 1], [], []>} : vector<192x128xbf16>, vector<128x128xbf16>, vector<192x128xf32> -> vector<192x128xf32>
    %110 = arith.addf %103, %109 : vector<192x128xf32>
    %111 = vector.extract_strided_slice %69 {offsets = [2, 0, 0], sizes = [12, 16, 128], strides = [1, 1, 1]} : vector<14x16x128xbf16> to vector<12x16x128xbf16>
    %112 = vector.shape_cast %111 : vector<12x16x128xbf16> to vector<192x128xbf16>
    %c6_59 = arith.constant 6 : index
    %c0_60 = arith.constant 0 : index
    %c0_61 = arith.constant 0 : index
    %113 = vector.load %arg4[%c6_59, %c0_60, %c0_61] : memref<9x128x128xbf16, #tpu.memory_space<vmem>>, vector<1x128x128xbf16>
    %114 = vector.shape_cast %113 : vector<1x128x128xbf16> to vector<128x128xbf16>
    %cst_62 = arith.constant dense<0.000000e+00> : vector<192x128xf32>
    %115 = tpu.matmul %112, %114, %cst_62 {dimension_numbers = #tpu.dot_dimension_numbers<[1], [0], [0], [1], [0, 0, 1, 1], [], []>} : vector<192x128xbf16>, vector<128x128xbf16>, vector<192x128xf32> -> vector<192x128xf32>
    %116 = arith.addf %110, %115 : vector<192x128xf32>
    %117 = vector.extract_strided_slice %112 {offsets = [1, 0], sizes = [191, 128], strides = [1, 1]} : vector<192x128xbf16> to vector<191x128xbf16>
    %118 = vector.extract_strided_slice %112 {offsets = [0, 0], sizes = [1, 128], strides = [1, 1]} : vector<192x128xbf16> to vector<1x128xbf16>
    %119 = tpu.concatenate %117, %118 in 0 : vector<191x128xbf16>, vector<1x128xbf16> -> vector<192x128xbf16>
    %c7_63 = arith.constant 7 : index
    %c0_64 = arith.constant 0 : index
    %c0_65 = arith.constant 0 : index
    %120 = vector.load %arg4[%c7_63, %c0_64, %c0_65] : memref<9x128x128xbf16, #tpu.memory_space<vmem>>, vector<1x128x128xbf16>
    %121 = vector.shape_cast %120 : vector<1x128x128xbf16> to vector<128x128xbf16>
    %cst_66 = arith.constant dense<0.000000e+00> : vector<192x128xf32>
    %122 = tpu.matmul %119, %121, %cst_66 {dimension_numbers = #tpu.dot_dimension_numbers<[1], [0], [0], [1], [0, 0, 1, 1], [], []>} : vector<192x128xbf16>, vector<128x128xbf16>, vector<192x128xf32> -> vector<192x128xf32>
    %123 = arith.addf %116, %122 : vector<192x128xf32>
    %124 = vector.extract_strided_slice %112 {offsets = [2, 0], sizes = [190, 128], strides = [1, 1]} : vector<192x128xbf16> to vector<190x128xbf16>
    %125 = vector.extract_strided_slice %112 {offsets = [0, 0], sizes = [2, 128], strides = [1, 1]} : vector<192x128xbf16> to vector<2x128xbf16>
    %126 = tpu.concatenate %124, %125 in 0 : vector<190x128xbf16>, vector<2x128xbf16> -> vector<192x128xbf16>
    %c8_67 = arith.constant 8 : index
    %c0_68 = arith.constant 0 : index
    %c0_69 = arith.constant 0 : index
    %127 = vector.load %arg4[%c8_67, %c0_68, %c0_69] : memref<9x128x128xbf16, #tpu.memory_space<vmem>>, vector<1x128x128xbf16>
    %128 = vector.shape_cast %127 : vector<1x128x128xbf16> to vector<128x128xbf16>
    %cst_70 = arith.constant dense<0.000000e+00> : vector<192x128xf32>
    %129 = tpu.matmul %126, %128, %cst_70 {dimension_numbers = #tpu.dot_dimension_numbers<[1], [0], [0], [1], [0, 0, 1, 1], [], []>} : vector<192x128xbf16>, vector<128x128xbf16>, vector<192x128xf32> -> vector<192x128xf32>
    %130 = arith.addf %123, %129 : vector<192x128xf32>
    %c0_71 = arith.constant 0 : index
    %c0_72 = arith.constant 0 : index
    %131 = vector.load %arg5[%c0_71, %c0_72] : memref<1x128xf32, #tpu.memory_space<vmem>>, vector<1x128xf32>
    %132 = vector.broadcast %131 : vector<1x128xf32> to vector<192x128xf32>
    %133 = arith.addf %130, %132 : vector<192x128xf32>
    %cst_73 = arith.constant 0.000000e+00 : f32
    %134 = vector.broadcast %cst_73 : f32 to vector<192x128xf32>
    %135 = arith.maximumf %133, %134 : vector<192x128xf32>
    %136 = arith.truncf %135 : vector<192x128xf32> to vector<192x128xbf16>
    %137 = vector.shape_cast %136 : vector<192x128xbf16> to vector<12x16x128xbf16>
    %cst_74 = arith.constant 0.000000e+00 : f32
    %138 = vector.broadcast %cst_74 : f32 to vector<160x128xf32>
    %139 = vector.extract_strided_slice %137 {offsets = [0, 0, 0], sizes = [10, 16, 128], strides = [1, 1, 1]} : vector<12x16x128xbf16> to vector<10x16x128xbf16>
    %140 = vector.shape_cast %139 : vector<10x16x128xbf16> to vector<160x128xbf16>
    %c0_75 = arith.constant 0 : index
    %c0_76 = arith.constant 0 : index
    %c0_77 = arith.constant 0 : index
    %141 = vector.load %arg6[%c0_75, %c0_76, %c0_77] : memref<9x128x128xbf16, #tpu.memory_space<vmem>>, vector<1x128x128xbf16>
    %142 = vector.shape_cast %141 : vector<1x128x128xbf16> to vector<128x128xbf16>
    %cst_78 = arith.constant dense<0.000000e+00> : vector<160x128xf32>
    %143 = tpu.matmul %140, %142, %cst_78 {dimension_numbers = #tpu.dot_dimension_numbers<[1], [0], [0], [1], [0, 0, 1, 1], [], []>} : vector<160x128xbf16>, vector<128x128xbf16>, vector<160x128xf32> -> vector<160x128xf32>
    %144 = arith.addf %138, %143 : vector<160x128xf32>
    %145 = vector.extract_strided_slice %140 {offsets = [1, 0], sizes = [159, 128], strides = [1, 1]} : vector<160x128xbf16> to vector<159x128xbf16>
    %146 = vector.extract_strided_slice %140 {offsets = [0, 0], sizes = [1, 128], strides = [1, 1]} : vector<160x128xbf16> to vector<1x128xbf16>
    %147 = tpu.concatenate %145, %146 in 0 : vector<159x128xbf16>, vector<1x128xbf16> -> vector<160x128xbf16>
    %c1_79 = arith.constant 1 : index
    %c0_80 = arith.constant 0 : index
    %c0_81 = arith.constant 0 : index
    %148 = vector.load %arg6[%c1_79, %c0_80, %c0_81] : memref<9x128x128xbf16, #tpu.memory_space<vmem>>, vector<1x128x128xbf16>
    %149 = vector.shape_cast %148 : vector<1x128x128xbf16> to vector<128x128xbf16>
    %cst_82 = arith.constant dense<0.000000e+00> : vector<160x128xf32>
    %150 = tpu.matmul %147, %149, %cst_82 {dimension_numbers = #tpu.dot_dimension_numbers<[1], [0], [0], [1], [0, 0, 1, 1], [], []>} : vector<160x128xbf16>, vector<128x128xbf16>, vector<160x128xf32> -> vector<160x128xf32>
    %151 = arith.addf %144, %150 : vector<160x128xf32>
    %152 = vector.extract_strided_slice %140 {offsets = [2, 0], sizes = [158, 128], strides = [1, 1]} : vector<160x128xbf16> to vector<158x128xbf16>
    %153 = vector.extract_strided_slice %140 {offsets = [0, 0], sizes = [2, 128], strides = [1, 1]} : vector<160x128xbf16> to vector<2x128xbf16>
    %154 = tpu.concatenate %152, %153 in 0 : vector<158x128xbf16>, vector<2x128xbf16> -> vector<160x128xbf16>
    %c2_83 = arith.constant 2 : index
    %c0_84 = arith.constant 0 : index
    %c0_85 = arith.constant 0 : index
    %155 = vector.load %arg6[%c2_83, %c0_84, %c0_85] : memref<9x128x128xbf16, #tpu.memory_space<vmem>>, vector<1x128x128xbf16>
    %156 = vector.shape_cast %155 : vector<1x128x128xbf16> to vector<128x128xbf16>
    %cst_86 = arith.constant dense<0.000000e+00> : vector<160x128xf32>
    %157 = tpu.matmul %154, %156, %cst_86 {dimension_numbers = #tpu.dot_dimension_numbers<[1], [0], [0], [1], [0, 0, 1, 1], [], []>} : vector<160x128xbf16>, vector<128x128xbf16>, vector<160x128xf32> -> vector<160x128xf32>
    %158 = arith.addf %151, %157 : vector<160x128xf32>
    %159 = vector.extract_strided_slice %137 {offsets = [1, 0, 0], sizes = [10, 16, 128], strides = [1, 1, 1]} : vector<12x16x128xbf16> to vector<10x16x128xbf16>
    %160 = vector.shape_cast %159 : vector<10x16x128xbf16> to vector<160x128xbf16>
    %c3_87 = arith.constant 3 : index
    %c0_88 = arith.constant 0 : index
    %c0_89 = arith.constant 0 : index
    %161 = vector.load %arg6[%c3_87, %c0_88, %c0_89] : memref<9x128x128xbf16, #tpu.memory_space<vmem>>, vector<1x128x128xbf16>
    %162 = vector.shape_cast %161 : vector<1x128x128xbf16> to vector<128x128xbf16>
    %cst_90 = arith.constant dense<0.000000e+00> : vector<160x128xf32>
    %163 = tpu.matmul %160, %162, %cst_90 {dimension_numbers = #tpu.dot_dimension_numbers<[1], [0], [0], [1], [0, 0, 1, 1], [], []>} : vector<160x128xbf16>, vector<128x128xbf16>, vector<160x128xf32> -> vector<160x128xf32>
    %164 = arith.addf %158, %163 : vector<160x128xf32>
    %165 = vector.extract_strided_slice %160 {offsets = [1, 0], sizes = [159, 128], strides = [1, 1]} : vector<160x128xbf16> to vector<159x128xbf16>
    %166 = vector.extract_strided_slice %160 {offsets = [0, 0], sizes = [1, 128], strides = [1, 1]} : vector<160x128xbf16> to vector<1x128xbf16>
    %167 = tpu.concatenate %165, %166 in 0 : vector<159x128xbf16>, vector<1x128xbf16> -> vector<160x128xbf16>
    %c4_91 = arith.constant 4 : index
    %c0_92 = arith.constant 0 : index
    %c0_93 = arith.constant 0 : index
    %168 = vector.load %arg6[%c4_91, %c0_92, %c0_93] : memref<9x128x128xbf16, #tpu.memory_space<vmem>>, vector<1x128x128xbf16>
    %169 = vector.shape_cast %168 : vector<1x128x128xbf16> to vector<128x128xbf16>
    %cst_94 = arith.constant dense<0.000000e+00> : vector<160x128xf32>
    %170 = tpu.matmul %167, %169, %cst_94 {dimension_numbers = #tpu.dot_dimension_numbers<[1], [0], [0], [1], [0, 0, 1, 1], [], []>} : vector<160x128xbf16>, vector<128x128xbf16>, vector<160x128xf32> -> vector<160x128xf32>
    %171 = arith.addf %164, %170 : vector<160x128xf32>
    %172 = vector.extract_strided_slice %160 {offsets = [2, 0], sizes = [158, 128], strides = [1, 1]} : vector<160x128xbf16> to vector<158x128xbf16>
    %173 = vector.extract_strided_slice %160 {offsets = [0, 0], sizes = [2, 128], strides = [1, 1]} : vector<160x128xbf16> to vector<2x128xbf16>
    %174 = tpu.concatenate %172, %173 in 0 : vector<158x128xbf16>, vector<2x128xbf16> -> vector<160x128xbf16>
    %c5_95 = arith.constant 5 : index
    %c0_96 = arith.constant 0 : index
    %c0_97 = arith.constant 0 : index
    %175 = vector.load %arg6[%c5_95, %c0_96, %c0_97] : memref<9x128x128xbf16, #tpu.memory_space<vmem>>, vector<1x128x128xbf16>
    %176 = vector.shape_cast %175 : vector<1x128x128xbf16> to vector<128x128xbf16>
    %cst_98 = arith.constant dense<0.000000e+00> : vector<160x128xf32>
    %177 = tpu.matmul %174, %176, %cst_98 {dimension_numbers = #tpu.dot_dimension_numbers<[1], [0], [0], [1], [0, 0, 1, 1], [], []>} : vector<160x128xbf16>, vector<128x128xbf16>, vector<160x128xf32> -> vector<160x128xf32>
    %178 = arith.addf %171, %177 : vector<160x128xf32>
    %179 = vector.extract_strided_slice %137 {offsets = [2, 0, 0], sizes = [10, 16, 128], strides = [1, 1, 1]} : vector<12x16x128xbf16> to vector<10x16x128xbf16>
    %180 = vector.shape_cast %179 : vector<10x16x128xbf16> to vector<160x128xbf16>
    %c6_99 = arith.constant 6 : index
    %c0_100 = arith.constant 0 : index
    %c0_101 = arith.constant 0 : index
    %181 = vector.load %arg6[%c6_99, %c0_100, %c0_101] : memref<9x128x128xbf16, #tpu.memory_space<vmem>>, vector<1x128x128xbf16>
    %182 = vector.shape_cast %181 : vector<1x128x128xbf16> to vector<128x128xbf16>
    %cst_102 = arith.constant dense<0.000000e+00> : vector<160x128xf32>
    %183 = tpu.matmul %180, %182, %cst_102 {dimension_numbers = #tpu.dot_dimension_numbers<[1], [0], [0], [1], [0, 0, 1, 1], [], []>} : vector<160x128xbf16>, vector<128x128xbf16>, vector<160x128xf32> -> vector<160x128xf32>
    %184 = arith.addf %178, %183 : vector<160x128xf32>
    %185 = vector.extract_strided_slice %180 {offsets = [1, 0], sizes = [159, 128], strides = [1, 1]} : vector<160x128xbf16> to vector<159x128xbf16>
    %186 = vector.extract_strided_slice %180 {offsets = [0, 0], sizes = [1, 128], strides = [1, 1]} : vector<160x128xbf16> to vector<1x128xbf16>
    %187 = tpu.concatenate %185, %186 in 0 : vector<159x128xbf16>, vector<1x128xbf16> -> vector<160x128xbf16>
    %c7_103 = arith.constant 7 : index
    %c0_104 = arith.constant 0 : index
    %c0_105 = arith.constant 0 : index
    %188 = vector.load %arg6[%c7_103, %c0_104, %c0_105] : memref<9x128x128xbf16, #tpu.memory_space<vmem>>, vector<1x128x128xbf16>
    %189 = vector.shape_cast %188 : vector<1x128x128xbf16> to vector<128x128xbf16>
    %cst_106 = arith.constant dense<0.000000e+00> : vector<160x128xf32>
    %190 = tpu.matmul %187, %189, %cst_106 {dimension_numbers = #tpu.dot_dimension_numbers<[1], [0], [0], [1], [0, 0, 1, 1], [], []>} : vector<160x128xbf16>, vector<128x128xbf16>, vector<160x128xf32> -> vector<160x128xf32>
    %191 = arith.addf %184, %190 : vector<160x128xf32>
    %192 = vector.extract_strided_slice %180 {offsets = [2, 0], sizes = [158, 128], strides = [1, 1]} : vector<160x128xbf16> to vector<158x128xbf16>
    %193 = vector.extract_strided_slice %180 {offsets = [0, 0], sizes = [2, 128], strides = [1, 1]} : vector<160x128xbf16> to vector<2x128xbf16>
    %194 = tpu.concatenate %192, %193 in 0 : vector<158x128xbf16>, vector<2x128xbf16> -> vector<160x128xbf16>
    %c8_107 = arith.constant 8 : index
    %c0_108 = arith.constant 0 : index
    %c0_109 = arith.constant 0 : index
    %195 = vector.load %arg6[%c8_107, %c0_108, %c0_109] : memref<9x128x128xbf16, #tpu.memory_space<vmem>>, vector<1x128x128xbf16>
    %196 = vector.shape_cast %195 : vector<1x128x128xbf16> to vector<128x128xbf16>
    %cst_110 = arith.constant dense<0.000000e+00> : vector<160x128xf32>
    %197 = tpu.matmul %194, %196, %cst_110 {dimension_numbers = #tpu.dot_dimension_numbers<[1], [0], [0], [1], [0, 0, 1, 1], [], []>} : vector<160x128xbf16>, vector<128x128xbf16>, vector<160x128xf32> -> vector<160x128xf32>
    %198 = arith.addf %191, %197 : vector<160x128xf32>
    %c0_111 = arith.constant 0 : index
    %c0_112 = arith.constant 0 : index
    %199 = vector.load %arg7[%c0_111, %c0_112] : memref<1x128xf32, #tpu.memory_space<vmem>>, vector<1x128xf32>
    %200 = vector.broadcast %199 : vector<1x128xf32> to vector<160x128xf32>
    %201 = arith.addf %198, %200 : vector<160x128xf32>
    %cst_113 = arith.constant 0.000000e+00 : f32
    %202 = vector.broadcast %cst_113 : f32 to vector<160x128xf32>
    %203 = arith.maximumf %201, %202 : vector<160x128xf32>
    %204 = arith.truncf %203 : vector<160x128xf32> to vector<160x128xbf16>
    %205 = vector.shape_cast %204 : vector<160x128xbf16> to vector<10x16x128xbf16>
    %c0_114 = arith.constant 0 : index
    %c0_115 = arith.constant 0 : index
    %c0_116 = arith.constant 0 : index
    %c0_117 = arith.constant 0 : index
    %206 = vector.load %arg8[%c0_114, %c0_115, %c0_116, %c0_117] : memref<1x10x16x128xbf16, #tpu.memory_space<vmem>>, vector<1x10x16x128xbf16>
    %207 = vector.shape_cast %206 : vector<1x10x16x128xbf16> to vector<10x16x128xbf16>
    %208 = vector.shape_cast %205 : vector<10x16x128xbf16> to vector<1x10x16x128xbf16>
    tpu.vector_store %arg8[%c0_114, %c0_115, %c0_116, %c0_117], %208 {strides = array<i32>} : memref<1x10x16x128xbf16, #tpu.memory_space<vmem>>, vector<1x10x16x128xbf16>,
    return
  }
  func.func @transform_0(%arg0: i32) -> (i32, i32, i32, i32) {
    %c0_i32 = arith.constant 0 : i32
    %c0_i32_0 = arith.constant 0 : i32
    %c0_i32_1 = arith.constant 0 : i32
    %c0_i32_2 = arith.constant 0 : i32
    return %arg0, %c0_i32, %c0_i32_0, %c0_i32_1 : i32, i32, i32, i32
  }
  func.func @transform_1(%arg0: i32) -> (i32, i32, i32) {
    %c0_i32 = arith.constant 0 : i32
    %c0_i32_0 = arith.constant 0 : i32
    %c0_i32_1 = arith.constant 0 : i32
    %c0_i32_2 = arith.constant 0 : i32
    return %c0_i32, %c0_i32_0, %c0_i32_1 : i32, i32, i32
  }
  func.func @transform_2(%arg0: i32) -> (i32, i32) {
    %c0_i32 = arith.constant 0 : i32
    %c0_i32_0 = arith.constant 0 : i32
    %c0_i32_1 = arith.constant 0 : i32
    return %c0_i32, %c0_i32_0 : i32, i32
  }
  func.func @transform_3(%arg0: i32) -> (i32, i32, i32) {
    %c0_i32 = arith.constant 0 : i32
    %c0_i32_0 = arith.constant 0 : i32
    %c0_i32_1 = arith.constant 0 : i32
    %c0_i32_2 = arith.constant 0 : i32
    return %c0_i32, %c0_i32_0, %c0_i32_1 : i32, i32, i32
  }
  func.func @transform_4(%arg0: i32) -> (i32, i32) {
    %c0_i32 = arith.constant 0 : i32
    %c0_i32_0 = arith.constant 0 : i32
    %c0_i32_1 = arith.constant 0 : i32
    return %c0_i32, %c0_i32_0 : i32, i32
  }
  func.func @transform_5(%arg0: i32) -> (i32, i32, i32) {
    %c0_i32 = arith.constant 0 : i32
    %c0_i32_0 = arith.constant 0 : i32
    %c0_i32_1 = arith.constant 0 : i32
    %c0_i32_2 = arith.constant 0 : i32
    return %c0_i32, %c0_i32_0, %c0_i32_1 : i32, i32, i32
  }
  func.func @transform_6(%arg0: i32) -> (i32, i32) {
    %c0_i32 = arith.constant 0 : i32
    %c0_i32_0 = arith.constant 0 : i32
    %c0_i32_1 = arith.constant 0 : i32
    return %c0_i32, %c0_i32_0 : i32, i32
  }
  func.func @transform_7(%arg0: i32) -> (i32, i32, i32, i32) {
    %c0_i32 = arith.constant 0 : i32
    %c0_i32_0 = arith.constant 0 : i32
    %c0_i32_1 = arith.constant 0 : i32
    %c0_i32_2 = arith.constant 0 : i32
    return %arg0, %c0_i32, %c0_i32_0, %c0_i32_1 : i32, i32, i32, i32
  }
}

module attributes {stable_mosaic.version = 11 : i64} {
  func.func @_heads_kernel(%arg0: i32, %arg1: memref<8x1664xbf16, #tpu.memory_space<vmem>>, %arg2: memref<1664x256xbf16, #tpu.memory_space<vmem>>, %arg3: memref<1x256xf32, #tpu.memory_space<vmem>>, %arg4: memref<256x512xbf16, #tpu.memory_space<vmem>>, %arg5: memref<1x512xf32, #tpu.memory_space<vmem>>, %arg6: memref<256x256xbf16, #tpu.memory_space<vmem>>, %arg7: memref<1x256xf32, #tpu.memory_space<vmem>>, %arg8: memref<256x128xbf16, #tpu.memory_space<vmem>>, %arg9: memref<1x128xf32, #tpu.memory_space<vmem>>, %arg10: memref<256x256xbf16, #tpu.memory_space<vmem>>, %arg11: memref<1x256xf32, #tpu.memory_space<vmem>>, %arg12: memref<256x128xbf16, #tpu.memory_space<vmem>>, %arg13: memref<1x128xf32, #tpu.memory_space<vmem>>, %arg14: memref<8x128xf32, #tpu.memory_space<vmem>>, %arg15: memref<8x128xf32, #tpu.memory_space<vmem>>) attributes {dimension_semantics = [#tpu.dimension_semantics<parallel>], iteration_bounds = array<i64: 1>, scalar_prefetch = 0 : i64, scratch_operands = 0 : i64, tpu.core_type = #tpu.core_type<tc>, window_params = [{transform_indices = @transform_0, window_bounds = array<i64: 8, 1664>}, {pipeline_mode = #tpu.pipeline_mode<synchronous>, transform_indices = @transform_1, window_bounds = array<i64: 1664, 256>}, {pipeline_mode = #tpu.pipeline_mode<synchronous>, transform_indices = @transform_2, window_bounds = array<i64: 1, 256>}, {pipeline_mode = #tpu.pipeline_mode<synchronous>, transform_indices = @transform_3, window_bounds = array<i64: 256, 512>}, {pipeline_mode = #tpu.pipeline_mode<synchronous>, transform_indices = @transform_4, window_bounds = array<i64: 1, 512>}, {pipeline_mode = #tpu.pipeline_mode<synchronous>, transform_indices = @transform_5, window_bounds = array<i64: 256, 256>}, {pipeline_mode = #tpu.pipeline_mode<synchronous>, transform_indices = @transform_6, window_bounds = array<i64: 1, 256>}, {pipeline_mode = #tpu.pipeline_mode<synchronous>, transform_indices = @transform_7, window_bounds = array<i64: 256, 128>}, {pipeline_mode = #tpu.pipeline_mode<synchronous>, transform_indices = @transform_8, window_bounds = array<i64: 1, 128>}, {pipeline_mode = #tpu.pipeline_mode<synchronous>, transform_indices = @transform_9, window_bounds = array<i64: 256, 256>}, {pipeline_mode = #tpu.pipeline_mode<synchronous>, transform_indices = @transform_10, window_bounds = array<i64: 1, 256>}, {pipeline_mode = #tpu.pipeline_mode<synchronous>, transform_indices = @transform_11, window_bounds = array<i64: 256, 128>}, {pipeline_mode = #tpu.pipeline_mode<synchronous>, transform_indices = @transform_12, window_bounds = array<i64: 1, 128>}, {transform_indices = @transform_13, window_bounds = array<i64: 8, 128>}, {transform_indices = @transform_14, window_bounds = array<i64: 8, 128>}]} {
    %c0 = arith.constant 0 : index
    %c0_0 = arith.constant 0 : index
    %0 = vector.load %arg1[%c0, %c0_0] : memref<8x1664xbf16, #tpu.memory_space<vmem>>, vector<8x1664xbf16>
    %c0_1 = arith.constant 0 : index
    %c0_2 = arith.constant 0 : index
    %1 = vector.load %arg2[%c0_1, %c0_2] : memref<1664x256xbf16, #tpu.memory_space<vmem>>, vector<1664x256xbf16>
    %cst = arith.constant dense<0.000000e+00> : vector<8x256xf32>
    %2 = tpu.matmul %0, %1, %cst {dimension_numbers = #tpu.dot_dimension_numbers<[1], [0], [0], [1], [0, 0, 1, 1], [], []>} : vector<8x1664xbf16>, vector<1664x256xbf16>, vector<8x256xf32> -> vector<8x256xf32>
    %c0_3 = arith.constant 0 : index
    %c0_4 = arith.constant 0 : index
    %3 = vector.load %arg3[%c0_3, %c0_4] : memref<1x256xf32, #tpu.memory_space<vmem>>, vector<1x256xf32>
    %4 = vector.broadcast %3 : vector<1x256xf32> to vector<8x256xf32>
    %5 = arith.addf %2, %4 : vector<8x256xf32>
    %cst_5 = arith.constant 0.000000e+00 : f32
    %6 = vector.broadcast %cst_5 : f32 to vector<8x256xf32>
    %7 = arith.maximumf %5, %6 : vector<8x256xf32>
    %8 = arith.truncf %7 : vector<8x256xf32> to vector<8x256xbf16>
    %c0_6 = arith.constant 0 : index
    %c0_7 = arith.constant 0 : index
    %9 = vector.load %arg4[%c0_6, %c0_7] : memref<256x512xbf16, #tpu.memory_space<vmem>>, vector<256x512xbf16>
    %cst_8 = arith.constant dense<0.000000e+00> : vector<8x512xf32>
    %10 = tpu.matmul %8, %9, %cst_8 {dimension_numbers = #tpu.dot_dimension_numbers<[1], [0], [0], [1], [0, 0, 1, 1], [], []>} : vector<8x256xbf16>, vector<256x512xbf16>, vector<8x512xf32> -> vector<8x512xf32>
    %c0_9 = arith.constant 0 : index
    %c0_10 = arith.constant 0 : index
    %11 = vector.load %arg5[%c0_9, %c0_10] : memref<1x512xf32, #tpu.memory_space<vmem>>, vector<1x512xf32>
    %12 = vector.broadcast %11 : vector<1x512xf32> to vector<8x512xf32>
    %13 = arith.addf %10, %12 : vector<8x512xf32>
    %cst_11 = arith.constant 0.000000e+00 : f32
    %14 = vector.broadcast %cst_11 : f32 to vector<8x512xf32>
    %15 = arith.maximumf %13, %14 : vector<8x512xf32>
    %16 = vector.extract_strided_slice %15 {offsets = [0, 0], sizes = [8, 256], strides = [1, 1]} : vector<8x512xf32> to vector<8x256xf32>
    %17 = arith.truncf %16 : vector<8x256xf32> to vector<8x256xbf16>
    %18 = vector.extract_strided_slice %15 {offsets = [0, 256], sizes = [8, 256], strides = [1, 1]} : vector<8x512xf32> to vector<8x256xf32>
    %19 = arith.truncf %18 : vector<8x256xf32> to vector<8x256xbf16>
    %c0_12 = arith.constant 0 : index
    %c0_13 = arith.constant 0 : index
    %20 = vector.load %arg6[%c0_12, %c0_13] : memref<256x256xbf16, #tpu.memory_space<vmem>>, vector<256x256xbf16>
    %cst_14 = arith.constant dense<0.000000e+00> : vector<8x256xf32>
    %21 = tpu.matmul %17, %20, %cst_14 {dimension_numbers = #tpu.dot_dimension_numbers<[1], [0], [0], [1], [0, 0, 1, 1], [], []>} : vector<8x256xbf16>, vector<256x256xbf16>, vector<8x256xf32> -> vector<8x256xf32>
    %c0_15 = arith.constant 0 : index
    %c0_16 = arith.constant 0 : index
    %22 = vector.load %arg7[%c0_15, %c0_16] : memref<1x256xf32, #tpu.memory_space<vmem>>, vector<1x256xf32>
    %23 = vector.broadcast %22 : vector<1x256xf32> to vector<8x256xf32>
    %24 = arith.addf %21, %23 : vector<8x256xf32>
    %cst_17 = arith.constant 0.000000e+00 : f32
    %25 = vector.broadcast %cst_17 : f32 to vector<8x256xf32>
    %26 = arith.maximumf %24, %25 : vector<8x256xf32>
    %27 = arith.truncf %26 : vector<8x256xf32> to vector<8x256xbf16>
    %c0_18 = arith.constant 0 : index
    %c0_19 = arith.constant 0 : index
    %28 = vector.load %arg8[%c0_18, %c0_19] : memref<256x128xbf16, #tpu.memory_space<vmem>>, vector<256x128xbf16>
    %cst_20 = arith.constant dense<0.000000e+00> : vector<8x128xf32>
    %29 = tpu.matmul %27, %28, %cst_20 {dimension_numbers = #tpu.dot_dimension_numbers<[1], [0], [0], [1], [0, 0, 1, 1], [], []>} : vector<8x256xbf16>, vector<256x128xbf16>, vector<8x128xf32> -> vector<8x128xf32>
    %c0_21 = arith.constant 0 : index
    %c0_22 = arith.constant 0 : index
    %30 = vector.load %arg9[%c0_21, %c0_22] : memref<1x128xf32, #tpu.memory_space<vmem>>, vector<1x128xf32>
    %31 = vector.broadcast %30 : vector<1x128xf32> to vector<8x128xf32>
    %32 = arith.addf %29, %31 : vector<8x128xf32>
    %33 = tpu.iota {dimensions = array<i32: 1>} : vector<8x128xi32>
    %c8_i32 = arith.constant 8 : i32
    %34 = vector.broadcast %c8_i32 : i32 to vector<8x128xi32>
    %35 = arith.cmpi slt, %33, %34 : vector<8x128xi32>
    %cst_23 = arith.constant 0xFF800000 : f32
    %36 = vector.broadcast %cst_23 : f32 to vector<8x128xf32>
    %37 = arith.select %35, %32, %36 : vector<8x128xi1>, vector<8x128xf32>
    %cst_24 = arith.constant dense<0xFF800000> : vector<8xf32>
    %38 = vector.multi_reduction <maximumf>, %37, %cst_24 [1] : vector<8x128xf32> to vector<8xf32>
    %39 = vector.shape_cast %38 : vector<8xf32> to vector<8x1xf32>
    %40 = vector.broadcast %39 : vector<8x1xf32> to vector<8x128xf32>
    %41 = arith.subf %37, %40 : vector<8x128xf32>
    %42 = math.exp %41 : vector<8x128xf32>
    %cst_25 = arith.constant dense<0.000000e+00> : vector<8xf32>
    %43 = vector.multi_reduction <add>, %42, %cst_25 [1] : vector<8x128xf32> to vector<8xf32>
    %44 = vector.shape_cast %43 : vector<8xf32> to vector<8x1xf32>
    %45 = vector.broadcast %44 : vector<8x1xf32> to vector<8x128xf32>
    %46 = arith.divf %42, %45 : vector<8x128xf32>
    %c0_26 = arith.constant 0 : index
    %c0_27 = arith.constant 0 : index
    %47 = vector.load %arg14[%c0_26, %c0_27] : memref<8x128xf32, #tpu.memory_space<vmem>>, vector<8x128xf32>
    tpu.vector_store %arg14[%c0_26, %c0_27], %46 {strides = array<i32>} : memref<8x128xf32, #tpu.memory_space<vmem>>, vector<8x128xf32>,
    %c0_28 = arith.constant 0 : index
    %c0_29 = arith.constant 0 : index
    %48 = vector.load %arg10[%c0_28, %c0_29] : memref<256x256xbf16, #tpu.memory_space<vmem>>, vector<256x256xbf16>
    %cst_30 = arith.constant dense<0.000000e+00> : vector<8x256xf32>
    %49 = tpu.matmul %19, %48, %cst_30 {dimension_numbers = #tpu.dot_dimension_numbers<[1], [0], [0], [1], [0, 0, 1, 1], [], []>} : vector<8x256xbf16>, vector<256x256xbf16>, vector<8x256xf32> -> vector<8x256xf32>
    %c0_31 = arith.constant 0 : index
    %c0_32 = arith.constant 0 : index
    %50 = vector.load %arg11[%c0_31, %c0_32] : memref<1x256xf32, #tpu.memory_space<vmem>>, vector<1x256xf32>
    %51 = vector.broadcast %50 : vector<1x256xf32> to vector<8x256xf32>
    %52 = arith.addf %49, %51 : vector<8x256xf32>
    %cst_33 = arith.constant 0.000000e+00 : f32
    %53 = vector.broadcast %cst_33 : f32 to vector<8x256xf32>
    %54 = arith.maximumf %52, %53 : vector<8x256xf32>
    %55 = arith.truncf %54 : vector<8x256xf32> to vector<8x256xbf16>
    %c0_34 = arith.constant 0 : index
    %c0_35 = arith.constant 0 : index
    %56 = vector.load %arg12[%c0_34, %c0_35] : memref<256x128xbf16, #tpu.memory_space<vmem>>, vector<256x128xbf16>
    %cst_36 = arith.constant dense<0.000000e+00> : vector<8x128xf32>
    %57 = tpu.matmul %55, %56, %cst_36 {dimension_numbers = #tpu.dot_dimension_numbers<[1], [0], [0], [1], [0, 0, 1, 1], [], []>} : vector<8x256xbf16>, vector<256x128xbf16>, vector<8x128xf32> -> vector<8x128xf32>
    %c0_37 = arith.constant 0 : index
    %c0_38 = arith.constant 0 : index
    %58 = vector.load %arg13[%c0_37, %c0_38] : memref<1x128xf32, #tpu.memory_space<vmem>>, vector<1x128xf32>
    %59 = vector.broadcast %58 : vector<1x128xf32> to vector<8x128xf32>
    %60 = arith.addf %57, %59 : vector<8x128xf32>
    %c0_39 = arith.constant 0 : index
    %c0_40 = arith.constant 0 : index
    %61 = vector.load %arg15[%c0_39, %c0_40] : memref<8x128xf32, #tpu.memory_space<vmem>>, vector<8x128xf32>
    tpu.vector_store %arg15[%c0_39, %c0_40], %60 {strides = array<i32>} : memref<8x128xf32, #tpu.memory_space<vmem>>, vector<8x128xf32>,
    return
  }
  func.func @transform_0(%arg0: i32) -> (i32, i32) {
    %c0_i32 = arith.constant 0 : i32
    %c0_i32_0 = arith.constant 0 : i32
    return %arg0, %c0_i32 : i32, i32
  }
  func.func @transform_1(%arg0: i32) -> (i32, i32) {
    %c0_i32 = arith.constant 0 : i32
    %c0_i32_0 = arith.constant 0 : i32
    %c0_i32_1 = arith.constant 0 : i32
    return %c0_i32, %c0_i32_0 : i32, i32
  }
  func.func @transform_2(%arg0: i32) -> (i32, i32) {
    %c0_i32 = arith.constant 0 : i32
    %c0_i32_0 = arith.constant 0 : i32
    %c0_i32_1 = arith.constant 0 : i32
    return %c0_i32, %c0_i32_0 : i32, i32
  }
  func.func @transform_3(%arg0: i32) -> (i32, i32) {
    %c0_i32 = arith.constant 0 : i32
    %c0_i32_0 = arith.constant 0 : i32
    %c0_i32_1 = arith.constant 0 : i32
    return %c0_i32, %c0_i32_0 : i32, i32
  }
  func.func @transform_4(%arg0: i32) -> (i32, i32) {
    %c0_i32 = arith.constant 0 : i32
    %c0_i32_0 = arith.constant 0 : i32
    %c0_i32_1 = arith.constant 0 : i32
    return %c0_i32, %c0_i32_0 : i32, i32
  }
  func.func @transform_5(%arg0: i32) -> (i32, i32) {
    %c0_i32 = arith.constant 0 : i32
    %c0_i32_0 = arith.constant 0 : i32
    %c0_i32_1 = arith.constant 0 : i32
    return %c0_i32, %c0_i32_0 : i32, i32
  }
  func.func @transform_6(%arg0: i32) -> (i32, i32) {
    %c0_i32 = arith.constant 0 : i32
    %c0_i32_0 = arith.constant 0 : i32
    %c0_i32_1 = arith.constant 0 : i32
    return %c0_i32, %c0_i32_0 : i32, i32
  }
  func.func @transform_7(%arg0: i32) -> (i32, i32) {
    %c0_i32 = arith.constant 0 : i32
    %c0_i32_0 = arith.constant 0 : i32
    %c0_i32_1 = arith.constant 0 : i32
    return %c0_i32, %c0_i32_0 : i32, i32
  }
  func.func @transform_8(%arg0: i32) -> (i32, i32) {
    %c0_i32 = arith.constant 0 : i32
    %c0_i32_0 = arith.constant 0 : i32
    %c0_i32_1 = arith.constant 0 : i32
    return %c0_i32, %c0_i32_0 : i32, i32
  }
  func.func @transform_9(%arg0: i32) -> (i32, i32) {
    %c0_i32 = arith.constant 0 : i32
    %c0_i32_0 = arith.constant 0 : i32
    %c0_i32_1 = arith.constant 0 : i32
    return %c0_i32, %c0_i32_0 : i32, i32
  }
  func.func @transform_10(%arg0: i32) -> (i32, i32) {
    %c0_i32 = arith.constant 0 : i32
    %c0_i32_0 = arith.constant 0 : i32
    %c0_i32_1 = arith.constant 0 : i32
    return %c0_i32, %c0_i32_0 : i32, i32
  }
  func.func @transform_11(%arg0: i32) -> (i32, i32) {
    %c0_i32 = arith.constant 0 : i32
    %c0_i32_0 = arith.constant 0 : i32
    %c0_i32_1 = arith.constant 0 : i32
    return %c0_i32, %c0_i32_0 : i32, i32
  }
  func.func @transform_12(%arg0: i32) -> (i32, i32) {
    %c0_i32 = arith.constant 0 : i32
    %c0_i32_0 = arith.constant 0 : i32
    %c0_i32_1 = arith.constant 0 : i32
    return %c0_i32, %c0_i32_0 : i32, i32
  }
  func.func @transform_13(%arg0: i32) -> (i32, i32) {
    %c0_i32 = arith.constant 0 : i32
    %c0_i32_0 = arith.constant 0 : i32
    return %arg0, %c0_i32 : i32, i32
  }
  func.func @transform_14(%arg0: i32) -> (i32, i32) {
    %c0_i32 = arith.constant 0 : i32
    %c0_i32_0 = arith.constant 0 : i32
    return %arg0, %c0_i32 : i32, i32
  }
}

</mosaic_0001>

<bundles_post_ra>
// kernel: actor_critic_forward.3
= control target key start
LH: loop header
LB: loop body
LE: loop exit
PB: predicated region body
PF: predicated region fallthrough
CT: control target
= control target key end

     0   :  { %20 = vsyncpa [#allocation3], 0  ;;  %s5776_s0 = inlined_call_operand.vmem [shape: bf16[8,1664], index: 0, kind: input, shape index: {}]   ;;  %s5777_s1 = inlined_call_operand.hbm [shape: bf16[1664,256], index: 1, kind: input, shape index: {}]   ;;  %s5778_s2 = inlined_call_operand.vmem [shape: f32[1,256], index: 2, kind: input, shape index: {}]   ;;  %s5779_s3 = inlined_call_operand.vmem [shape: bf16[256,512], index: 3, kind: input, shape index: {}]   ;;  %s5780_s4 = inlined_call_operand.vmem [shape: f32[1,512], index: 4, kind: input, shape index: {}]   ;;  %s5781_s5 = inlined_call_operand.hbm [shape: bf16[256,256], index: 5, kind: input, shape index: {}]   ;;  %s5782_s6 = inlined_call_operand.vmem [shape: f32[1,256], index: 6, kind: input, shape index: {}]   ;;  %s5783_s7 = inlined_call_operand.vmem [shape: bf16[256,128], index: 7, kind: input, shape index: {}]   ;;  %s5784_s8 = inlined_call_operand.vmem [shape: f32[1,128], index: 8, kind: input, shape index: {}]   ;;  %s5785_s9 = inlined_call_operand.hbm [shape: bf16[256,256], index: 9, kind: input, shape index: {}]   ;;  %s5786_s10 = inlined_call_operand.vmem [shape: f32[1,256], index: 10, kind: input, shape index: {}]   ;;  %s5787_s11 = inlined_call_operand.hbm [shape: bf16[256,128], index: 11, kind: input, shape index: {}]   ;;  %s5788_s12 = inlined_call_operand.vmem [shape: f32[1,128], index: 12, kind: input, shape index: {}]   ;;  %s5789_s13 = inlined_call_operand.vmem [shape: f32[8,128], index: 13, kind: output, shape index: {0}]   ;;  %s5790_s14 = inlined_call_operand.vmem [shape: f32[8,128], index: 14, kind: output, shape index: {1}]  }
   0x1   :  { %21 = vsyncpa [#allocation5], 0 }
   0x2   :  { %22 = vsyncpa [#allocation8], 0  ;;  %s48_s15 = sshll.u32 %s5781_s5, 4  ;;  %s5083_s16 = smov [#allocation4]   ;;  %s49_s15 = int_to_ptr.hbm [resolvable:$true] %s48_s15 }
   0x3   :  { %s50_s17 = sshll.u32 %s5083_s16, 4  ;;  %s29_s20 = sshll.u32 %s5777_s1, 4  ;;  %s51_s17 = int_to_ptr.vmem [resolvable:$true] %s50_s17  ;;  %s30_s20 = int_to_ptr.hbm [resolvable:$true] %s29_s20 }
   0x4   :  { %s5084_s21 = smov 128   ;;  %s5085_s22 = smov 8  }
   0x5   :  { %56 = dma.hbm_to_vmem [thread:$0]  %s49_s15, 4096, %s51_s17, [#allocation5], %s5084_s21, %s5084_s21, %s5085_s22  }
   0x6   :  { %s5086_s23 = smov [#allocation2]   ;;  %s67_s27 = sshll.u32 %s5785_s9, 4  ;;  %s68_s27 = int_to_ptr.hbm [resolvable:$true] %s67_s27 }
   0x7   :  { %s31_s24 = sshll.u32 %s5086_s23, 4  ;;  %s82_s29 = sshll.u32 %s5787_s11, 4  ;;  %s32_s24 = int_to_ptr.vmem [resolvable:$true] %s31_s24  ;;  %s83_s29 = int_to_ptr.hbm [resolvable:$true] %s82_s29 }
   0x8   :  { %37 = dma.hbm_to_vmem [thread:$0]  %s30_s20, 26624, %s32_s24, [#allocation3], %s5084_s21, %s5084_s21, %s5085_s22  }
   0x9   :  { %s5087_s30 = smov [#allocation6]   ;;  %s5088_s1 = smov [#allocation7]  }
   0xa   :  { %s69_s16 = sshll.u32 %s5087_s30, 4  ;;  %s84_s15 = sshll.u32 %s5088_s1, 4  ;;  %s70_s16 = int_to_ptr.vmem [resolvable:$true] %s69_s16  ;;  %s85_s15 = int_to_ptr.vmem [resolvable:$true] %s84_s15 }
   0xb   :  { %75 = dma.hbm_to_vmem [thread:$0]  %s68_s27, 4096, %s70_s16, [#allocation5], %s5084_s21, %s5084_s21, %s5085_s22  }
   0xc   :  { %s5089_s17 = smov 64   ;;  %s5090_s18 = smov 4  }
   0xd   :  { %90 = dma.hbm_to_vmem [thread:$0]  %s83_s29, 2048, %s85_s15, [#allocation8], %s5089_s17, %s5089_s17, %s5090_s18  }
   0xe   :  { %5077 = dma.done.wait [#allocation3], 26624  }
   0xf   :  { %5078 = vsyncadd [#allocation3], 4294940672 }
  0x10   :  { %5079 = dma.done.wait [#allocation5], 8192  }
  0x11   :  { %5080 = vsyncadd [#allocation5], 4294959104 }
  0x12   :  { %5081 = dma.done.wait [#allocation8], 2048  }
  0x13   :  { %5082 = vsyncadd [#allocation8], 4294965248  ;;  %v3185_v0 = vld [vmem:[#allocation2 + $0x70] sm:$0xf]  ;;  %v4614_v1 = vld [vmem:[#allocation2 + $0x74] sm:$0xf0] }
  0x14   :  { %v3249_v2 = vld [vmem:[#allocation2 + $0xf0] sm:$0xf]  ;;  %v3186_v3 = vor.u32 %v4614_v1, %v3185_v0  ;;  %v4630_v4 = vld [vmem:[#allocation2 + $0xf4] sm:$0xf0]  ;;  %v3177_v11 = vld [vmem:[#allocation2 + $0x60] sm:$0xf] }
  0x15   :  { %v3313_v5 = vld [vmem:[#allocation2 + $0x170] sm:$0xf]  ;;  %v4646_v6 = vld [vmem:[#allocation2 + $0x174] sm:$0xf0]  ;;  %v3250_v7 = vor.u32 %v4630_v4, %v3249_v2  ;;  %v4612_v13 = vld [vmem:[#allocation2 + $0x64] sm:$0xf0] }
  0x16   :  { %v3314_v8 = vor.u32 %v4646_v6, %v3313_v5  ;;  %v3377_v9 = vld [vmem:[#allocation2 + $0x1f0] sm:$0xf]  ;;  %v4662_v10 = vld [vmem:[#allocation2 + $0x1f4] sm:$0xf0]  ;;  %1416 = vmatpush.bf16.msra.mxu0 %v3186_v3  ;;  %v3241_v14 = vld [vmem:[#allocation2 + $0xe0] sm:$0xf]  ;;  %v3178_v16 = vor.u32 %v4612_v13, %v3177_v11 }
  0x17   :  { %v3378_v12 = vor.u32 %v4662_v10, %v3377_v9  ;;  %v4628_v15 = vld [vmem:[#allocation2 + $0xe4] sm:$0xf0]  ;;  %1429 = vmatpush.bf16.msra.mxu1 %v3250_v7  ;;  %v3305_v18 = vld [vmem:[#allocation2 + $0x160] sm:$0xf]  ;;  %v3169_v23 = vld [vmem:[#allocation2 + $0x50] sm:$0xf] }
  0x18   :  { %1442 = vmatpush.bf16.msra.mxu2 %v3314_v8  ;;  %v3242_v17 = vor.u32 %v4628_v15, %v3241_v14  ;;  %v4644_v19 = vld [vmem:[#allocation2 + $0x164] sm:$0xf0]  ;;  %v3369_v20 = vld [vmem:[#allocation2 + $0x1e0] sm:$0xf]  ;;  %v4610_v24 = vld [vmem:[#allocation2 + $0x54] sm:$0xf0] }
  0x19   :  { %1455 = vmatpush.bf16.msra.mxu3 %v3378_v12  ;;  %v3306_v21 = vor.u32 %v4644_v19, %v3305_v18  ;;  %v4660_v22 = vld [vmem:[#allocation2 + $0x1e4] sm:$0xf0]  ;;  %v3233_v26 = vld [vmem:[#allocation2 + $0xd0] sm:$0xf]  ;;  %v4626_v27 = vld [vmem:[#allocation2 + $0xd4] sm:$0xf0]  ;;  %v3170_v29 = vor.u32 %v4610_v24, %v3169_v23 }
  0x1a   :  { %v3370_v25 = vor.u32 %v4660_v22, %v3369_v20  ;;  %v3297_v28 = vld [vmem:[#allocation2 + $0x150] sm:$0xf]  ;;  %1417 = vmatpush.bf16.msra.mxu0 %v3178_v16  ;;  %v4642_v30 = vld [vmem:[#allocation2 + $0x154] sm:$0xf0]  ;;  %v3234_v33 = vor.u32 %v4626_v27, %v3233_v26  ;;  %v3161_v35 = vld [vmem:[#allocation2 + $0x40] sm:$0xf] }
  0x1b   :  { %v3361_v31 = vld [vmem:[#allocation2 + $0x1d0] sm:$0xf]  ;;  %v4658_v32 = vld [vmem:[#allocation2 + $0x1d4] sm:$0xf0]  ;;  %1430 = vmatpush.bf16.msra.mxu1 %v3242_v17  ;;  %v3298_v34 = vor.u32 %v4642_v30, %v3297_v28  ;;  %v4608_v36 = vld [vmem:[#allocation2 + $0x44] sm:$0xf0] }
  0x1c   :  { %1443 = vmatpush.bf16.msra.mxu2 %v3306_v21  ;;  %v3225_v37 = vld [vmem:[#allocation2 + $0xc0] sm:$0xf]  ;;  %v3362_v38 = vor.u32 %v4658_v32, %v3361_v31  ;;  %v4624_v39 = vld [vmem:[#allocation2 + $0xc4] sm:$0xf0]  ;;  %v3162_v44 = vor.u32 %v4608_v36, %v3161_v35  ;;  %v3153_v47 = vld [vmem:[#allocation2 + $0x30] sm:$0xf] }
  0x1d   :  { %1456 = vmatpush.bf16.msra.mxu3 %v3370_v25  ;;  %v3289_v40 = vld [vmem:[#allocation2 + $0x140] sm:$0xf]  ;;  %v4640_v41 = vld [vmem:[#allocation2 + $0x144] sm:$0xf0]  ;;  %v3226_v45 = vor.u32 %v4624_v39, %v3225_v37  ;;  %v4606_v48 = vld [vmem:[#allocation2 + $0x34] sm:$0xf0] }
  0x1e   :  { %v3353_v42 = vld [vmem:[#allocation2 + $0x1c0] sm:$0xf]  ;;  %v4656_v43 = vld [vmem:[#allocation2 + $0x1c4] sm:$0xf0]  ;;  %1418 = vmatpush.bf16.msra.mxu0 %v3170_v29  ;;  %v3290_v46 = vor.u32 %v4640_v41, %v3289_v40  ;;  %v3217_v49 = vld [vmem:[#allocation2 + $0xb0] sm:$0xf]  ;;  %v3154_v56 = vor.u32 %v4606_v48, %v3153_v47 }
  0x1f   :  { %1431 = vmatpush.bf16.msra.mxu1 %v3234_v33  ;;  %v3354_v50 = vor.u32 %v4656_v43, %v3353_v42  ;;  %v4622_v51 = vld [vmem:[#allocation2 + $0xb4] sm:$0xf0]  ;;  %v3281_v52 = vld [vmem:[#allocation2 + $0x130] sm:$0xf]  ;;  %v3145_v59 = vld [vmem:[#allocation2 + $0x20] sm:$0xf] }
  0x20   :  { %1444 = vmatpush.bf16.msra.mxu2 %v3298_v34  ;;  %v4638_v53 = vld [vmem:[#allocation2 + $0x134] sm:$0xf0]  ;;  %v3345_v54 = vld [vmem:[#allocation2 + $0x1b0] sm:$0xf]  ;;  %v3218_v57 = vor.u32 %v4622_v51, %v3217_v49  ;;  %v4604_v60 = vld [vmem:[#allocation2 + $0x24] sm:$0xf0] }
  0x21   :  { %1457 = vmatpush.bf16.msra.mxu3 %v3362_v38  ;;  %v4654_v55 = vld [vmem:[#allocation2 + $0x1b4] sm:$0xf0]  ;;  %v3282_v58 = vor.u32 %v4638_v53, %v3281_v52  ;;  %v3209_v61 = vld [vmem:[#allocation2 + $0xa0] sm:$0xf]  ;;  %v4620_v63 = vld [vmem:[#allocation2 + $0xa4] sm:$0xf0]  ;;  %v3146_v4 = vor.u32 %v4604_v60, %v3145_v59 }
  0x22   :  { %1419 = vmatpush.bf16.msra.mxu0 %v3162_v44  ;;  %v3346_v62 = vor.u32 %v4654_v55, %v3345_v54  ;;  %v3273_v0 = vld [vmem:[#allocation2 + $0x120] sm:$0xf]  ;;  %v4636_v1 = vld [vmem:[#allocation2 + $0x124] sm:$0xf0]  ;;  %v3210_v5 = vor.u32 %v4620_v63, %v3209_v61  ;;  %v3137_v7 = vld [vmem:[#allocation2 + $0x10] sm:$0xf] }
  0x23   :  { %1432 = vmatpush.bf16.msra.mxu1 %v3226_v45  ;;  %v3337_v2 = vld [vmem:[#allocation2 + $0x1a0] sm:$0xf]  ;;  %v4652_v3 = vld [vmem:[#allocation2 + $0x1a4] sm:$0xf0]  ;;  %v3274_v6 = vor.u32 %v4636_v1, %v3273_v0  ;;  %v4602_v8 = vld [vmem:[#allocation2 + $0x14] sm:$0xf0] }
  0x24   :  { %1445 = vmatpush.bf16.msra.mxu2 %v3290_v46  ;;  %v3201_v9 = vld [vmem:[#allocation2 + $0x90] sm:$0xf]  ;;  %v3338_v10 = vor.u32 %v4652_v3, %v3337_v2  ;;  %v4618_v11 = vld [vmem:[#allocation2 + $0x94] sm:$0xf0]  ;;  %v3138_v16 = vor.u32 %v4602_v8, %v3137_v7  ;;  %v3129_v17 = vld [vmem:[#allocation2] sm:$0xf] }
  0x25   :  { %1458 = vmatpush.bf16.msra.mxu3 %v3354_v50  ;;  %v3265_v12 = vld [vmem:[#allocation2 + $0x110] sm:$0xf]  ;;  %v4634_v13 = vld [vmem:[#allocation2 + $0x114] sm:$0xf0]  ;;  %v4600_v18 = vld [vmem:[#allocation2 + $0x4] sm:$0xf0]  ;;  %v3202_v19 = vor.u32 %v4618_v11, %v3201_v9 }
  0x26   :  { %1420 = vmatpush.bf16.msra.mxu0 %v3154_v56  ;;  %v3329_v14 = vld [vmem:[#allocation2 + $0x190] sm:$0xf]  ;;  %v4650_v15 = vld [vmem:[#allocation2 + $0x194] sm:$0xf0]  ;;  %v3266_v20 = vor.u32 %v4634_v13, %v3265_v12  ;;  %v3193_v21 = vld [vmem:[#allocation2 + $0x80] sm:$0xf]  ;;  %v3130_v31 = vor.u32 %v4600_v18, %v3129_v17 }
  0x27   :  { %1433 = vmatpush.bf16.msra.mxu1 %v3218_v57  ;;  %v4616_v22 = vld [vmem:[#allocation2 + $0x84] sm:$0xf0]  ;;  %v3257_v23 = vld [vmem:[#allocation2 + $0x100] sm:$0xf]  ;;  %v3330_v24 = vor.u32 %v4650_v15, %v3329_v14  ;;  %v3441_v26 = vld [vmem:[#allocation2 + $0x270] sm:$0xf] }
  0x28   :  { %1446 = vmatpush.bf16.msra.mxu2 %v3282_v58  ;;  %v4632_v25 = vld [vmem:[#allocation2 + $0x104] sm:$0xf0]  ;;  %v4678_v27 = vld [vmem:[#allocation2 + $0x274] sm:$0xf0]  ;;  %v3505_v28 = vld [vmem:[#allocation2 + $0x2f0] sm:$0xf]  ;;  %v3194_v35 = vor.u32 %v4616_v22, %v3193_v21 }
  0x29   :  { %1459 = vmatpush.bf16.msra.mxu3 %v3346_v62  ;;  %v4694_v29 = vld [vmem:[#allocation2 + $0x2f4] sm:$0xf0]  ;;  %v3569_v30 = vld [vmem:[#allocation2 + $0x370] sm:$0xf]  ;;  %v3321_v33 = vld [vmem:[#allocation2 + $0x180] sm:$0xf]  ;;  %v3258_v36 = vor.u32 %v4632_v25, %v3257_v23  ;;  %v3442_v39 = vor.u32 %v4678_v27, %v3441_v26 }
  0x2a   :  { %1421 = vmatpush.bf16.msra.mxu0 %v3146_v4  ;;  %v4710_v32 = vld [vmem:[#allocation2 + $0x374] sm:$0xf0]  ;;  %v4648_v34 = vld [vmem:[#allocation2 + $0x184] sm:$0xf0]  ;;  %v3633_v37 = vld [vmem:[#allocation2 + $0x3f0] sm:$0xf]  ;;  %v3506_v40 = vor.u32 %v4694_v29, %v3505_v28 }
  0x2b   :  { %1434 = vmatpush.bf16.msra.mxu1 %v3210_v5  ;;  %v4726_v38 = vld [vmem:[#allocation2 + $0x3f4] sm:$0xf0]  ;;  %v3433_v41 = vld [vmem:[#allocation2 + $0x260] sm:$0xf]  ;;  %v3570_v42 = vor.u32 %v4710_v32, %v3569_v30  ;;  %v3322_v43 = vor.u32 %v4648_v34, %v3321_v33  ;;  %v4676_v44 = vld [vmem:[#allocation2 + $0x264] sm:$0xf0] }
  0x2c   :  { %1447 = vmatpush.bf16.msra.mxu2 %v3274_v6  ;;  %v3497_v45 = vld [vmem:[#allocation2 + $0x2e0] sm:$0xf]  ;;  %v4692_v46 = vld [vmem:[#allocation2 + $0x2e4] sm:$0xf0]  ;;  %v3634_v47 = vor.u32 %v4726_v38, %v3633_v37  ;;  %v3434_v52 = vor.u32 %v4676_v44, %v3433_v41  ;;  %v3425_v54 = vld [vmem:[#allocation2 + $0x250] sm:$0xf] }
  0x2d   :  { %1460 = vmatpush.bf16.msra.mxu3 %v3338_v10  ;;  %v3561_v48 = vld [vmem:[#allocation2 + $0x360] sm:$0xf]  ;;  %v4708_v49 = vld [vmem:[#allocation2 + $0x364] sm:$0xf0]  ;;  %v3498_v53 = vor.u32 %v4692_v46, %v3497_v45  ;;  %v4674_v55 = vld [vmem:[#allocation2 + $0x254] sm:$0xf0] }
  0x2e   :  { %1422 = vmatpush.bf16.msra.mxu0 %v3138_v16  ;;  %v3625_v50 = vld [vmem:[#allocation2 + $0x3e0] sm:$0xf]  ;;  %v4724_v51 = vld [vmem:[#allocation2 + $0x3e4] sm:$0xf0]  ;;  %v3562_v56 = vor.u32 %v4708_v49, %v3561_v48  ;;  %v3489_v57 = vld [vmem:[#allocation2 + $0x2d0] sm:$0xf]  ;;  %v3426_v3 = vor.u32 %v4674_v55, %v3425_v54 }
  0x2f   :  { %1435 = vmatpush.bf16.msra.mxu1 %v3202_v19  ;;  %v4690_v58 = vld [vmem:[#allocation2 + $0x2d4] sm:$0xf0]  ;;  %v110_v59 = vld [vmem:[%s5776_s0 + $0x8] sm:$0xff]  ;;  %v3626_v60 = vor.u32 %v4724_v51, %v3625_v50  ;;  %v3553_v61 = vld [vmem:[#allocation2 + $0x350] sm:$0xf] }
  0x30   :  { %1448 = vmatpush.bf16.msra.mxu2 %v3266_v20  ;;  %v4706_v62 = vld [vmem:[#allocation2 + $0x354] sm:$0xf0]  ;;  %v339_v63 = vunpack.c.l.b16 %v110_v59  ;;  %v340_v0 = vunpack.c.h.b16 %v110_v59  ;;  %v3617_v1 = vld [vmem:[#allocation2 + $0x3d0] sm:$0xf]  ;;  %v3490_v4 = vor.u32 %v4690_v58, %v3489_v57  ;;  %v3417_v5 = vld [vmem:[#allocation2 + $0x240] sm:$0xf] }
  0x31   :  { %1461 = vmatpush.bf16.msra.mxu3 %v3330_v24  ;;  %v4722_v2 = vld [vmem:[#allocation2 + $0x3d4] sm:$0xf0]  ;;  %v109_v7 = vld [vmem:[%s5776_s0] sm:$0xff]  ;;  %v3554_v8 = vor.u32 %v4706_v62, %v3553_v61  ;;  %v4672_v9 = vld [vmem:[#allocation2 + $0x244] sm:$0xf0] }
  0x32   :  { %1423 = vmatpush.bf16.msra.mxu0 %v3130_v31  ;;  %v5181_v6 = vpack.c.b16 %v339_v63, %v339_v63  ;;  %v3481_v10 = vld [vmem:[#allocation2 + $0x2c0] sm:$0xf]  ;;  %v4688_v11 = vld [vmem:[#allocation2 + $0x2c4] sm:$0xf0]  ;;  %v337_v12 = vunpack.c.l.b16 %v109_v7  ;;  %v5186_v13 = vpack.c.b16 %v340_v0, %v340_v0  ;;  %v338_v14 = vunpack.c.h.b16 %v109_v7  ;;  %v3409_v24 = vld [vmem:[#allocation2 + $0x230] sm:$0xf] }
  0x33   :  { %1436 = vmatpush.bf16.msra.mxu1 %v3194_v35  ;;  %v3618_v15 = vor.u32 %v4722_v2, %v3617_v1  ;;  %v3545_v16 = vld [vmem:[#allocation2 + $0x340] sm:$0xf]  ;;  %v4704_v17 = vld [vmem:[#allocation2 + $0x344] sm:$0xf0]  ;;  %v3418_v22 = vor.u32 %v4672_v9, %v3417_v5  ;;  %v3482_v23 = vor.u32 %v4688_v11, %v3481_v10  ;;  %v4670_v26 = vld [vmem:[#allocation2 + $0x234] sm:$0xf0] }
  0x34   :  { %1449 = vmatpush.bf16.msra.mxu2 %v3258_v36  ;;  %v3609_v18 = vld [vmem:[#allocation2 + $0x3c0] sm:$0xf]  ;;  %v4720_v19 = vld [vmem:[#allocation2 + $0x3c4] sm:$0xf0]  ;;  %v5189_v20 = vpack.c.b16 %v337_v12, %v337_v12  ;;  %v5192_v21 = vpack.c.b16 %v338_v14, %v338_v14  ;;  %v3546_v25 = vor.u32 %v4704_v17, %v3545_v16  ;;  %v3473_v27 = vld [vmem:[#allocation2 + $0x2b0] sm:$0xf]  ;;  %v3410_v34 = vor.u32 %v4670_v26, %v3409_v24 }
  0x35   :  { %1462 = vmatpush.bf16.msra.mxu3 %v3322_v43  ;;  %v4686_v28 = vld [vmem:[#allocation2 + $0x2b4] sm:$0xf0]  ;;  %v3610_v29 = vor.u32 %v4720_v19, %v3609_v18  ;;  %v3537_v30 = vld [vmem:[#allocation2 + $0x330] sm:$0xf]  ;;  %v3401_v36 = vld [vmem:[#allocation2 + $0x220] sm:$0xf] }
  0x36   :  { %1468 = vmatpush.bf16.msrb.mxu0 %v3442_v39  ;;  %v4702_v31 = vld [vmem:[#allocation2 + $0x334] sm:$0xf0]  ;;  %1437 = vmatmul.bf16.vlgmr.msra.gmra.mxu1 %v5192_v21  ;;  %v3601_v32 = vld [vmem:[#allocation2 + $0x3b0] sm:$0xf]  ;;  %v3474_v35 = vor.u32 %v4686_v28, %v3473_v27  ;;  %v4668_v38 = vld [vmem:[#allocation2 + $0x224] sm:$0xf0] }
  0x37   :  { %1481 = vmatpush.bf16.msrb.mxu1 %v3506_v40  ;;  %1450 = vmatmul.bf16.vlgmr.msra.gmra.mxu2 %v5181_v6  ;;  %v4718_v33 = vld [vmem:[#allocation2 + $0x3b4] sm:$0xf0]  ;;  %v3538_v37 = vor.u32 %v4702_v31, %v3537_v30  ;;  %v3465_v39 = vld [vmem:[#allocation2 + $0x2a0] sm:$0xf]  ;;  %v4684_v40 = vld [vmem:[#allocation2 + $0x2a4] sm:$0xf0]  ;;  %v3402_v46 = vor.u32 %v4668_v38, %v3401_v36 }
  0x38   :  { %1494 = vmatpush.bf16.msrb.mxu2 %v3570_v42  ;;  %1463 = vmatmul.bf16.vlgmr.msra.gmra.mxu3 %v5186_v13  ;;  %v3602_v41 = vor.u32 %v4718_v33, %v3601_v32  ;;  %v3529_v42 = vld [vmem:[#allocation2 + $0x320] sm:$0xf]  ;;  %v4700_v43 = vld [vmem:[#allocation2 + $0x324] sm:$0xf0]  ;;  %v3393_v48 = vld [vmem:[#allocation2 + $0x210] sm:$0xf] }
  0x39   :  { %1507 = vmatpush.bf16.msrb.mxu3 %v3634_v47  ;;  %1424 = vmatmul.bf16.vlgmr.msra.gmra.mxu0 %v5189_v20  ;;  %v3593_v44 = vld [vmem:[#allocation2 + $0x3a0] sm:$0xf]  ;;  %v4716_v45 = vld [vmem:[#allocation2 + $0x3a4] sm:$0xf0]  ;;  %v3466_v47 = vor.u32 %v4684_v40, %v3465_v39  ;;  %v3530_v49 = vor.u32 %v4700_v43, %v3529_v42  ;;  %v4666_v50 = vld [vmem:[#allocation2 + $0x214] sm:$0xf0] }
  0x3a   :  { %1469 = vmatpush.bf16.msrb.mxu0 %v3434_v52  ;;  %v3457_v51 = vld [vmem:[#allocation2 + $0x290] sm:$0xf]  ;;  %v4682_v52 = vld [vmem:[#allocation2 + $0x294] sm:$0xf0]  ;;  %v3385_v58 = vld [vmem:[#allocation2 + $0x200] sm:$0xf] }
  0x3b   :  { %1482 = vmatpush.bf16.msrb.mxu1 %v3498_v53  ;;  %v3594_v53 = vor.u32 %v4716_v45, %v3593_v44  ;;  %v3521_v54 = vld [vmem:[#allocation2 + $0x310] sm:$0xf]  ;;  %v4698_v55 = vld [vmem:[#allocation2 + $0x314] sm:$0xf0]  ;;  %v4664_v59 = vld [vmem:[#allocation2 + $0x204] sm:$0xf0]  ;;  %v3458_v61 = vor.u32 %v4682_v52, %v3457_v51 }
  0x3c   :  { %1495 = vmatpush.bf16.msrb.mxu2 %v3562_v56  ;;  %v3585_v56 = vld [vmem:[#allocation2 + $0x390] sm:$0xf]  ;;  %v4714_v57 = vld [vmem:[#allocation2 + $0x394] sm:$0xf0]  ;;  %v3449_v62 = vld [vmem:[#allocation2 + $0x280] sm:$0xf]  ;;  %v3522_v1 = vor.u32 %v4698_v55, %v3521_v54 }
  0x3d   :  { %1508 = vmatpush.bf16.msrb.mxu3 %v3626_v60  ;;  %v3394_v60 = vor.u32 %v4666_v50, %v3393_v48  ;;  %v4680_v63 = vld [vmem:[#allocation2 + $0x284] sm:$0xf0]  ;;  %v111_v0 = vld [vmem:[%s5776_s0 + $0x10] sm:$0xff]  ;;  %v3513_v2 = vld [vmem:[#allocation2 + $0x300] sm:$0xf]  ;;  %v3586_v5 = vor.u32 %v4714_v57, %v3585_v56 }
  0x3e   :  { %1470 = vmatpush.bf16.msrb.mxu0 %v3426_v3  ;;  %v4696_v3 = vld [vmem:[#allocation2 + $0x304] sm:$0xf0]  ;;  %v3697_v7 = vld [vmem:[#allocation2 + $0x470] sm:$0xf]  ;;  %v4758_v10 = vld [vmem:[#allocation2 + $0x4f4] sm:$0xf0]  ;;  %v341_v14 = vunpack.c.l.b16 %v111_v0  ;;  %v3450_v16 = vor.u32 %v4680_v63, %v3449_v62  ;;  %v342_v26 = vunpack.c.h.b16 %v111_v0 }
  0x3f   :  { %1483 = vmatpush.bf16.msrb.mxu1 %v3490_v4  ;;  %v112_v4 = vld [vmem:[%s5776_s0 + $0x18] sm:$0xff]  ;;  %v3761_v9 = vld [vmem:[#allocation2 + $0x4f0] sm:$0xf]  ;;  %v3577_v17 = vld [vmem:[#allocation2 + $0x380] sm:$0xf] }
  0x40   :  { %1496 = vmatpush.bf16.msrb.mxu2 %v3554_v8  ;;  %v4742_v8 = vld [vmem:[#allocation2 + $0x474] sm:$0xf0]  ;;  %v3825_v11 = vld [vmem:[#allocation2 + $0x570] sm:$0xf]  ;;  %v4712_v18 = vld [vmem:[#allocation2 + $0x384] sm:$0xf0]  ;;  %v343_v19 = vunpack.c.l.b16 %v112_v4  ;;  %v3762_v27 = vor.u32 %v4758_v10, %v3761_v9  ;;  %v5202_v36 = vpack.c.b16 %v341_v14, %v341_v14  ;;  %v5206_v43 = vpack.c.b16 %v342_v26, %v342_v26 }
  0x41   :  { %1509 = vmatpush.bf16.msrb.mxu3 %v3618_v15  ;;  %v4774_v12 = vld [vmem:[#allocation2 + $0x574] sm:$0xf0]  ;;  %v3386_v15 = vor.u32 %v4664_v59, %v3385_v58  ;;  %v3889_v24 = vld [vmem:[#allocation2 + $0x5f0] sm:$0xf]  ;;  %v4740_v30 = vld [vmem:[#allocation2 + $0x464] sm:$0xf0]  ;;  %v3578_v32 = vor.u32 %v4712_v18, %v3577_v17 }
  0x42   :  { %1471 = vmatpush.bf16.msrb.mxu0 %v3418_v22  ;;  %v3514_v22 = vor.u32 %v4696_v3, %v3513_v2  ;;  %v3826_v28 = vor.u32 %v4774_v12, %v3825_v11  ;;  %v3753_v31 = vld [vmem:[#allocation2 + $0x4e0] sm:$0xf]  ;;  %v4756_v33 = vld [vmem:[#allocation2 + $0x4e4] sm:$0xf0]  ;;  %v5204_v39 = vpack.c.b16 %v343_v19, %v343_v19  ;;  %v3745_v48 = vld [vmem:[#allocation2 + $0x4d0] sm:$0xf] }
  0x43   :  { %1484 = vmatpush.bf16.msrb.mxu1 %v3482_v23  ;;  %v3698_v23 = vor.u32 %v4742_v8, %v3697_v7  ;;  %v4788_v42 = vld [vmem:[#allocation2 + $0x5e4] sm:$0xf0]  ;;  %v3754_v44 = vor.u32 %v4756_v33, %v3753_v31  ;;  %v4754_v50 = vld [vmem:[#allocation2 + $0x4d4] sm:$0xf0]  ;;  %v3809_v51 = vld [vmem:[#allocation2 + $0x550] sm:$0xf] }
  0x44   :  { %1497 = vmatpush.bf16.msrb.mxu2 %v3546_v25  ;;  %v4790_v25 = vld [vmem:[#allocation2 + $0x5f4] sm:$0xf0]  ;;  %v3873_v55 = vld [vmem:[#allocation2 + $0x5d0] sm:$0xf]  ;;  %v3746_v57 = vor.u32 %v4754_v50, %v3745_v48  ;;  %v3673_v59 = vld [vmem:[#allocation2 + $0x440] sm:$0xf] }
  0x45   :  { %1510 = vmatpush.bf16.msrb.mxu3 %v3610_v29  ;;  %v3689_v29 = vld [vmem:[#allocation2 + $0x460] sm:$0xf]  ;;  %v3890_v38 = vor.u32 %v4790_v25, %v3889_v24  ;;  %v4770_v52 = vld [vmem:[#allocation2 + $0x554] sm:$0xf0]  ;;  %v4752_v62 = vld [vmem:[#allocation2 + $0x4c4] sm:$0xf0] }
  0x46   :  { %1472 = vmatpush.bf16.msrb.mxu0 %v3410_v34  ;;  %v3817_v34 = vld [vmem:[#allocation2 + $0x560] sm:$0xf]  ;;  %v3690_v40 = vor.u32 %v4740_v30, %v3689_v29  ;;  %v4786_v56 = vld [vmem:[#allocation2 + $0x5d4] sm:$0xf0]  ;;  %v3810_v58 = vor.u32 %v4770_v52, %v3809_v51  ;;  %v4768_v0 = vld [vmem:[#allocation2 + $0x544] sm:$0xf0] }
  0x47   :  { %1485 = vmatpush.bf16.msrb.mxu1 %v3474_v35  ;;  %v4772_v35 = vld [vmem:[#allocation2 + $0x564] sm:$0xf0]  ;;  %v3801_v63 = vld [vmem:[#allocation2 + $0x540] sm:$0xf]  ;;  %v3665_v8 = vld [vmem:[#allocation2 + $0x430] sm:$0xf] }
  0x48   :  { %1498 = vmatpush.bf16.msrb.mxu2 %v3538_v37  ;;  %v344_v37 = vunpack.c.h.b16 %v112_v4  ;;  %v3818_v45 = vor.u32 %v4772_v35, %v3817_v34  ;;  %v3865_v3 = vld [vmem:[#allocation2 + $0x5c0] sm:$0xf]  ;;  %v4784_v4 = vld [vmem:[#allocation2 + $0x5c4] sm:$0xf0]  ;;  %v3802_v7 = vor.u32 %v4768_v0, %v3801_v63  ;;  %v4734_v9 = vld [vmem:[#allocation2 + $0x434] sm:$0xf0] }
  0x49   :  { %1511 = vmatpush.bf16.msrb.mxu3 %v3602_v41  ;;  %v3881_v41 = vld [vmem:[#allocation2 + $0x5e0] sm:$0xf]  ;;  %v3729_v10 = vld [vmem:[#allocation2 + $0x4b0] sm:$0xf]  ;;  %v4750_v11 = vld [vmem:[#allocation2 + $0x4b4] sm:$0xf0] }
  0x4a   :  { %1473 = vmatpush.bf16.msrb.mxu0 %v3402_v46  ;;  %v3681_v46 = vld [vmem:[#allocation2 + $0x450] sm:$0xf]  ;;  %v4766_v14 = vld [vmem:[#allocation2 + $0x534] sm:$0xf0]  ;;  %v3730_v19 = vor.u32 %v4750_v11, %v3729_v10  ;;  %v4732_v24 = vld [vmem:[#allocation2 + $0x424] sm:$0xf0] }
  0x4b   :  { %1486 = vmatpush.bf16.msrb.mxu1 %v3466_v47  ;;  %v4738_v47 = vld [vmem:[#allocation2 + $0x454] sm:$0xf0]  ;;  %v3793_v12 = vld [vmem:[#allocation2 + $0x530] sm:$0xf]  ;;  %v3721_v25 = vld [vmem:[#allocation2 + $0x4a0] sm:$0xf] }
  0x4c   :  { %1499 = vmatpush.bf16.msrb.mxu2 %v3530_v49  ;;  %v5209_v49 = vpack.c.b16 %v344_v37, %v344_v37  ;;  %v3682_v54 = vor.u32 %v4738_v47, %v3681_v46  ;;  %v3857_v17 = vld [vmem:[#allocation2 + $0x5b0] sm:$0xf]  ;;  %v4782_v18 = vld [vmem:[#allocation2 + $0x5b4] sm:$0xf0]  ;;  %v4748_v26 = vld [vmem:[#allocation2 + $0x4a4] sm:$0xf0] }
  0x4d   :  { %1512 = vmatpush.bf16.msrb.mxu3 %v3594_v53  ;;  %v3882_v53 = vor.u32 %v4788_v42, %v3881_v41  ;;  %v3858_v29 = vor.u32 %v4782_v18, %v3857_v17  ;;  %v3849_v31 = vld [vmem:[#allocation2 + $0x5a0] sm:$0xf]  ;;  %v3649_v33 = vld [vmem:[#allocation2 + $0x410] sm:$0xf]  ;;  %v3722_v34 = vor.u32 %v4748_v26, %v3721_v25  ;;  %v4730_v37 = vld [vmem:[#allocation2 + $0x414] sm:$0xf0] }
  0x4e   :  { %1474 = vmatpush.bf16.msrb.mxu0 %v3394_v60  ;;  %v4736_v60 = vld [vmem:[#allocation2 + $0x444] sm:$0xf0]  ;;  %v3777_v41 = vld [vmem:[#allocation2 + $0x510] sm:$0xf]  ;;  %v4762_v42 = vld [vmem:[#allocation2 + $0x514] sm:$0xf0]  ;;  %v3650_v50 = vor.u32 %v4730_v37, %v3649_v33 }
  0x4f   :  { %1487 = vmatpush.bf16.msrb.mxu1 %v3458_v61  ;;  %v3737_v61 = vld [vmem:[#allocation2 + $0x4c0] sm:$0xf]  ;;  %v3674_v2 = vor.u32 %v4736_v60, %v3673_v59  ;;  %v4778_v46 = vld [vmem:[#allocation2 + $0x594] sm:$0xf0]  ;;  %v4728_v48 = vld [vmem:[#allocation2 + $0x404] sm:$0xf0] }
  0x50   :  { %1500 = vmatpush.bf16.msrb.mxu2 %v3522_v1  ;;  %v3874_v1 = vor.u32 %v4786_v56, %v3873_v55  ;;  %v3641_v47 = vld [vmem:[#allocation2 + $0x400] sm:$0xf]  ;;  %v4744_v52 = vld [vmem:[#allocation2 + $0x484] sm:$0xf0]  ;;  %v3778_v56 = vor.u32 %v4762_v42, %v3777_v41  ;;  %v4806_v60 = vld [vmem:[#allocation2 + $0x674] sm:$0xf0] }
  0x51   :  { %1513 = vmatpush.bf16.msrb.mxu3 %v3586_v5  ;;  %v3738_v5 = vor.u32 %v4752_v62, %v3737_v61  ;;  %v3705_v51 = vld [vmem:[#allocation2 + $0x480] sm:$0xf]  ;;  %v114_v59 = vld [vmem:[%s5776_s0 + $0x28] sm:$0xff]  ;;  %v4613_v61 = vld [vmem:[#allocation2 + $0x74] sm:$0xf] }
  0x52   :  { %1475 = vmatpush.bf16.msrb.mxu0 %v3386_v15  ;;  %v3866_v15 = vor.u32 %v4784_v4, %v3865_v3  ;;  %v3187_v63 = vld [vmem:[#allocation2 + $0x78] sm:$0xf0]  ;;  %v4629_v0 = vld [vmem:[#allocation2 + $0xf4] sm:$0xf]  ;;  %v3833_v3 = vld [vmem:[#allocation2 + $0x580] sm:$0xf] }
  0x53   :  { %1488 = vmatpush.bf16.msrb.mxu1 %v3450_v16  ;;  %v3666_v16 = vor.u32 %v4734_v9, %v3665_v8  ;;  %v4776_v4 = vld [vmem:[#allocation2 + $0x584] sm:$0xf0]  ;;  %v3706_v8 = vor.u32 %v4744_v52, %v3705_v51  ;;  %v3179_v26 = vld [vmem:[#allocation2 + $0x68] sm:$0xf0]  ;;  %v4643_v33 = vld [vmem:[#allocation2 + $0x164] sm:$0xf] }
  0x54   :  { %1501 = vmatpush.bf16.msrb.mxu2 %v3514_v22  ;;  %v3794_v22 = vor.u32 %v4766_v14, %v3793_v12  ;;  %v3190_v12 = vor.u32 %v4613_v61, %v3187_v63  ;;  %v4645_v14 = vld [vmem:[#allocation2 + $0x174] sm:$0xf]  ;;  %v3834_v18 = vor.u32 %v4776_v4, %v3833_v3  ;;  %v3171_v42 = vld [vmem:[#allocation2 + $0x58] sm:$0xf0]  ;;  %v4639_v61 = vld [vmem:[#allocation2 + $0x144] sm:$0xf] }
  0x55   :  { %1514 = vmatpush.bf16.msrb.mxu3 %v3578_v32  ;;  %1476 = vmatmul.bf16.vlgmr.msrb.gmra.mxu0 %v5202_v36  ;;  %v4780_v32 = vld [vmem:[#allocation2 + $0x5a4] sm:$0xf0]  ;;  %v4609_v41 = vld [vmem:[#allocation2 + $0x54] sm:$0xf]  ;;  %v3155_v4 = vld [vmem:[#allocation2 + $0x38] sm:$0xf0] }
  0x56   :  { %1520 = vmatpush.bf16.msra.mxu0 %v3698_v23  ;;  %1489 = vmatmul.bf16.vlgmr.msrb.gmra.mxu1 %v5206_v43  ;;  %v3657_v23 = vld [vmem:[#allocation2 + $0x420] sm:$0xf]  ;;  %v3174_v51 = vor.u32 %v4609_v41, %v3171_v42  ;;  %v4605_v3 = vld [vmem:[#allocation2 + $0x34] sm:$0xf] }
  0x57   :  { %1533 = vmatpush.bf16.msra.mxu1 %v3762_v27  ;;  %1502 = vmatmul.bf16.vlgmr.msrb.gmra.mxu2 %v5204_v39  ;;  %v3785_v27 = vld [vmem:[#allocation2 + $0x520] sm:$0xf]  ;;  %v3658_v30 = vor.u32 %v4732_v24, %v3657_v23  ;;  %v4611_v23 = vld [vmem:[#allocation2 + $0x64] sm:$0xf]  ;;  %v4633_v42 = vld [vmem:[#allocation2 + $0x114] sm:$0xf] }
  0x58   :  { %1546 = vmatpush.bf16.msra.mxu2 %v3826_v28  ;;  %1515 = vmatmul.bf16.vlgmr.msrb.gmra.mxu3 %v5209_v49  ;;  %v4764_v28 = vld [vmem:[#allocation2 + $0x524] sm:$0xf0] }
  0x59   :  { %1559 = vmatpush.bf16.msra.mxu3 %v3890_v38  ;;  %v3786_v35 = vor.u32 %v4764_v28, %v3785_v27  ;;  %v3713_v38 = vld [vmem:[#allocation2 + $0x490] sm:$0xf]  ;;  %v4627_v27 = vld [vmem:[#allocation2 + $0xe4] sm:$0xf]  ;;  %v3243_v28 = vld [vmem:[#allocation2 + $0xe8] sm:$0xf0] }
  0x5a   :  { %1521 = vmatpush.bf16.msra.mxu0 %v3690_v40  ;;  %v4746_v40 = vld [vmem:[#allocation2 + $0x494] sm:$0xf0]  ;;  %v3246_v37 = vor.u32 %v4627_v27, %v3243_v28  ;;  %v4635_v27 = vld [vmem:[#allocation2 + $0x124] sm:$0xf]  ;;  %v3275_v28 = vld [vmem:[#allocation2 + $0x128] sm:$0xf0] }
  0x5b   :  { %1534 = vmatpush.bf16.msra.mxu1 %v3754_v44  ;;  %v3841_v44 = vld [vmem:[#allocation2 + $0x590] sm:$0xf]  ;;  %v3714_v55 = vor.u32 %v4746_v40, %v3713_v38  ;;  %v4802_v40 = vld [vmem:[#allocation2 + $0x654] sm:$0xf0]  ;;  %v3278_v41 = vor.u32 %v4635_v27, %v3275_v28 }
  0x5c   :  { %1547 = vmatpush.bf16.msra.mxu2 %v3818_v45  ;;  %v3850_v45 = vor.u32 %v4780_v32, %v3849_v31  ;;  %v3842_v62 = vor.u32 %v4778_v46, %v3841_v44  ;;  %v3937_v38 = vld [vmem:[#allocation2 + $0x650] sm:$0xf]  ;;  %v4625_v44 = vld [vmem:[#allocation2 + $0xd4] sm:$0xf] }
  0x5d   :  { %1560 = vmatpush.bf16.msra.mxu3 %v3882_v53  ;;  %v3769_v53 = vld [vmem:[#allocation2 + $0x500] sm:$0xf] }
  0x5e   :  { %1522 = vmatpush.bf16.msra.mxu0 %v3682_v54  ;;  %v4760_v54 = vld [vmem:[#allocation2 + $0x504] sm:$0xf0] }
  0x5f   :  { %1535 = vmatpush.bf16.msra.mxu1 %v3746_v57  ;;  %v3953_v57 = vld [vmem:[#allocation2 + $0x670] sm:$0xf]  ;;  %v3770_v9 = vor.u32 %v4760_v54, %v3769_v53  ;;  %v3929_v53 = vld [vmem:[#allocation2 + $0x640] sm:$0xf]  ;;  %v4800_v54 = vld [vmem:[#allocation2 + $0x644] sm:$0xf0] }
  0x60   :  { %1548 = vmatpush.bf16.msra.mxu2 %v3810_v58  ;;  %v113_v58 = vld [vmem:[%s5776_s0 + $0x20] sm:$0xff]  ;;  %v3954_v11 = vor.u32 %v4806_v60, %v3953_v57  ;;  %v3930_v60 = vor.u32 %v4800_v54, %v3929_v53  ;;  %v115_v54 = vld [vmem:[%s5776_s0 + $0x30] sm:$0xf] }
  0x61   :  { %1561 = vmatpush.bf16.msra.mxu3 %v3874_v1  ;;  %v3642_v1 = vor.u32 %v4728_v48, %v3641_v47  ;;  %v346_v10 = vunpack.c.h.b16 %v113_v58  ;;  %v3938_v47 = vor.u32 %v4802_v40, %v3937_v38  ;;  %v4641_v48 = vld [vmem:[#allocation2 + $0x154] sm:$0xf]  ;;  %v4623_v57 = vld [vmem:[#allocation2 + $0xc4] sm:$0xf]  ;;  %v3203_v40 = vld [vmem:[#allocation2 + $0x98] sm:$0xf0] }
  0x62   :  { %1523 = vmatpush.bf16.msra.mxu0 %v3674_v2  ;;  %v3251_v2 = vld [vmem:[#allocation2 + $0xf8] sm:$0xf0]  ;;  %v4617_v38 = vld [vmem:[#allocation2 + $0x94] sm:$0xf]  ;;  %v4615_v53 = vld [vmem:[#allocation2 + $0x84] sm:$0xf] }
  0x63   :  { %1536 = vmatpush.bf16.msra.mxu1 %v3738_v5  ;;  %v345_v5 = vunpack.c.l.b16 %v113_v58  ;;  %v3254_v17 = vor.u32 %v4629_v0, %v3251_v2  ;;  %v3227_v58 = vld [vmem:[#allocation2 + $0xc8] sm:$0xf0]  ;;  %v4798_v2 = vld [vmem:[#allocation2 + $0x634] sm:$0xf0] }
  0x64   :  { %1549 = vmatpush.bf16.msra.mxu2 %v3802_v7  ;;  %v347_v7 = vunpack.c.l.b16 %v114_v59  ;;  %v3230_v0 = vor.u32 %v4623_v57, %v3227_v58  ;;  %v3379_v57 = vld [vmem:[#allocation2 + $0x1f8] sm:$0xf0] }
  0x65   :  { %1562 = vmatpush.bf16.msra.mxu3 %v3866_v15  ;;  %v3315_v15 = vld [vmem:[#allocation2 + $0x178] sm:$0xf0]  ;;  %v5220_v24 = vpack.c.b16 %v345_v5, %v345_v5  ;;  %v4621_v5 = vld [vmem:[#allocation2 + $0xb4] sm:$0xf] }
  0x66   :  { %1524 = vmatpush.bf16.msra.mxu0 %v3666_v16  ;;  %v348_v16 = vunpack.c.h.b16 %v114_v59  ;;  %v5222_v25 = vpack.c.b16 %v347_v7, %v347_v7  ;;  %v3219_v7 = vld [vmem:[#allocation2 + $0xb8] sm:$0xf0] }
  0x67   :  { %1537 = vmatpush.bf16.msra.mxu1 %v3730_v19  ;;  %v3945_v19 = vld [vmem:[#allocation2 + $0x660] sm:$0xf] }
  0x68   :  { %1550 = vmatpush.bf16.msra.mxu2 %v3794_v22  ;;  %v4804_v22 = vld [vmem:[#allocation2 + $0x664] sm:$0xf0]  ;;  %v5226_v31 = vpack.c.b16 %v348_v16, %v348_v16 }
  0x69   :  { %1563 = vmatpush.bf16.msra.mxu3 %v3858_v29  ;;  %v3318_v29 = vor.u32 %v4645_v14, %v3315_v15  ;;  %v3946_v32 = vor.u32 %v4804_v22, %v3945_v19  ;;  %v3222_v14 = vor.u32 %v4621_v5, %v3219_v7  ;;  %v3913_v15 = vld [vmem:[#allocation2 + $0x620] sm:$0xf]  ;;  %v4796_v16 = vld [vmem:[#allocation2 + $0x624] sm:$0xf0]  ;;  %v4619_v19 = vld [vmem:[#allocation2 + $0xa4] sm:$0xf] }
  0x6a   :  { %1525 = vmatpush.bf16.msra.mxu0 %v3658_v30  ;;  %v5224_v30 = vpack.c.b16 %v346_v10, %v346_v10  ;;  %v4637_v10 = vld [vmem:[#allocation2 + $0x134] sm:$0xf]  ;;  %v3211_v22 = vld [vmem:[#allocation2 + $0xa8] sm:$0xf0]  ;;  %v3571_v7 = vld [vmem:[#allocation2 + $0x378] sm:$0xf0] }
  0x6b   :  { %1538 = vmatpush.bf16.msra.mxu1 %v3722_v34  ;;  %v3307_v34 = vld [vmem:[#allocation2 + $0x168] sm:$0xf0]  ;;  %v4709_v5 = vld [vmem:[#allocation2 + $0x374] sm:$0xf] }
  0x6c   :  { %1551 = vmatpush.bf16.msra.mxu2 %v3786_v35  ;;  %v3182_v35 = vor.u32 %v4611_v23, %v3179_v26  ;;  %v3310_v46 = vor.u32 %v4643_v33, %v3307_v34  ;;  %v3914_v26 = vor.u32 %v4796_v16, %v3913_v15  ;;  %v3905_v33 = vld [vmem:[#allocation2 + $0x610] sm:$0xf]  ;;  %v4794_v34 = vld [vmem:[#allocation2 + $0x614] sm:$0xf0]  ;;  %v4675_v15 = vld [vmem:[#allocation2 + $0x264] sm:$0xf] }
  0x6d   :  { %1564 = vmatpush.bf16.msra.mxu3 %v3850_v45  ;;  %v3235_v45 = vld [vmem:[#allocation2 + $0xd8] sm:$0xf0]  ;;  %v3435_v16 = vld [vmem:[#allocation2 + $0x268] sm:$0xf0] }
  0x6e   :  { %1526 = vmatpush.bf16.msra.mxu0 %v3650_v50  ;;  %v3299_v50 = vld [vmem:[#allocation2 + $0x158] sm:$0xf0]  ;;  %v3238_v52 = vor.u32 %v4625_v44, %v3235_v45  ;;  %v3906_v45 = vor.u32 %v4794_v34, %v3905_v33  ;;  %v3438_v28 = vor.u32 %v4675_v15, %v3435_v16  ;;  %v4673_v34 = vld [vmem:[#allocation2 + $0x254] sm:$0xf]  ;;  %v3531_v15 = vld [vmem:[#allocation2 + $0x328] sm:$0xf0] }
  0x6f   :  { %1539 = vmatpush.bf16.msra.mxu1 %v3714_v55  ;;  %v4607_v55 = vld [vmem:[#allocation2 + $0x44] sm:$0xf]  ;;  %v3302_v59 = vor.u32 %v4641_v48, %v3299_v50  ;;  %v3267_v44 = vld [vmem:[#allocation2 + $0x118] sm:$0xf0] }
  0x70   :  { %1552 = vmatpush.bf16.msra.mxu2 %v3778_v56  ;;  %v3163_v56 = vld [vmem:[#allocation2 + $0x48] sm:$0xf0]  ;;  %v4599_v48 = vld [vmem:[#allocation2 + $0x4] sm:$0xf]  ;;  %v3270_v58 = vor.u32 %v4633_v42, %v3267_v44  ;;  %v3363_v33 = vld [vmem:[#allocation2 + $0x1d8] sm:$0xf0] }
  0x71   :  { %1565 = vmatpush.bf16.msra.mxu3 %v3842_v62  ;;  %v3291_v62 = vld [vmem:[#allocation2 + $0x148] sm:$0xf0]  ;;  %v3166_v63 = vor.u32 %v4607_v55, %v3163_v56  ;;  %v4661_v56 = vld [vmem:[#allocation2 + $0x1f4] sm:$0xf]  ;;  %v3555_v42 = vld [vmem:[#allocation2 + $0x358] sm:$0xf0] }
  0x72   :  { %1527 = vmatpush.bf16.msra.mxu0 %v3642_v1  ;;  %v3921_v1 = vld [vmem:[#allocation2 + $0x630] sm:$0xf]  ;;  %v3195_v55 = vld [vmem:[#allocation2 + $0x88] sm:$0xf0] }
  0x73   :  { %1540 = vmatpush.bf16.msra.mxu1 %v3706_v8  ;;  %v3294_v8 = vor.u32 %v4639_v61, %v3291_v62  ;;  %v4693_v61 = vld [vmem:[#allocation2 + $0x2f4] sm:$0xf] }
  0x74   :  { %1553 = vmatpush.bf16.msra.mxu2 %v3770_v9  ;;  %v3922_v9 = vor.u32 %v4798_v2, %v3921_v1  ;;  %v3259_v1 = vld [vmem:[#allocation2 + $0x108] sm:$0xf0]  ;;  %v349_v2 = vunpack.c.l.b16 %v115_v54 }
  0x75   :  { %1566 = vmatpush.bf16.msra.mxu3 %v3834_v18  ;;  %1528 = vmatmul.bf16.vlgmr.msra.gmra.mxu0 %v5220_v24  ;;  %v3147_v18 = vld [vmem:[#allocation2 + $0x28] sm:$0xf0] }
  0x76   :  { %1572 = vmatpush.bf16.msrb.mxu0 %v3954_v11  ;;  %1541 = vmatmul.bf16.vlgmr.msra.gmra.mxu1 %v5224_v30  ;;  %v3283_v11 = vld [vmem:[#allocation2 + $0x138] sm:$0xf0]  ;;  %v3483_v54 = vld [vmem:[#allocation2 + $0x2c8] sm:$0xf0] }
  0x77   :  { %1585 = vmatpush.bf16.msrb.mxu1 %v3190_v12  ;;  %1554 = vmatmul.bf16.vlgmr.msra.gmra.mxu2 %v5222_v25  ;;  %v3158_v12 = vor.u32 %v4605_v3, %v3155_v4  ;;  %v3286_v23 = vor.u32 %v4637_v10, %v3283_v11  ;;  %v3198_v4 = vor.u32 %v4615_v53, %v3195_v55  ;;  %v4659_v10 = vld [vmem:[#allocation2 + $0x1e4] sm:$0xf] }
  0x78   :  { %1598 = vmatpush.bf16.msrb.mxu2 %v3254_v17  ;;  %1567 = vmatmul.bf16.vlgmr.msra.gmra.mxu3 %v5226_v31  ;;  %v4603_v17 = vld [vmem:[#allocation2 + $0x24] sm:$0xf] }
  0x79   :  { %1611 = vmatpush.bf16.msrb.mxu3 %v3318_v29  ;;  %v3150_v29 = vor.u32 %v4603_v17, %v3147_v18  ;;  %v5235_v17 = vpack.c.b16 %v349_v2, %v349_v2  ;;  %v3574_v18 = vor.u32 %v4709_v5, %v3571_v7  ;;  %v4687_v53 = vld [vmem:[#allocation2 + $0x2c4] sm:$0xf]  ;;  %v3339_v7 = vld [vmem:[#allocation2 + $0x1a8] sm:$0xf0] }
  0x7a   :  { %1573 = vmatpush.bf16.msrb.mxu0 %v3946_v32  ;;  %v3214_v32 = vor.u32 %v4619_v19, %v3211_v22  ;;  %v4691_v19 = vld [vmem:[#allocation2 + $0x2e4] sm:$0xf]  ;;  %v3499_v22 = vld [vmem:[#allocation2 + $0x2e8] sm:$0xf0] }
  0x7b   :  { %1586 = vmatpush.bf16.msrb.mxu1 %v3182_v35  ;;  %v4601_v35 = vld [vmem:[#allocation2 + $0x14] sm:$0xf]  ;;  %v4703_v55 = vld [vmem:[#allocation2 + $0x344] sm:$0xf] }
  0x7c   :  { %1599 = vmatpush.bf16.msrb.mxu2 %v3246_v37  ;;  %v3139_v37 = vld [vmem:[#allocation2 + $0x18] sm:$0xf0] }
  0x7d   :  { %1612 = vmatpush.bf16.msrb.mxu3 %v3310_v46  ;;  %v3897_v46 = vld [vmem:[#allocation2 + $0x600] sm:$0xf]  ;;  %v3142_v50 = vor.u32 %v4601_v35, %v3139_v37  ;;  %v3427_v35 = vld [vmem:[#allocation2 + $0x258] sm:$0xf0] }
  0x7e   :  { %1574 = vmatpush.bf16.msrb.mxu0 %v3938_v47  ;;  %v4792_v47 = vld [vmem:[#allocation2 + $0x604] sm:$0xf0] }
  0x7f   :  { %1587 = vmatpush.bf16.msrb.mxu1 %v3174_v51  ;;  %v3206_v51 = vor.u32 %v4617_v38, %v3203_v40  ;;  %v3898_v62 = vor.u32 %v4792_v47, %v3897_v46  ;;  %v4689_v38 = vld [vmem:[#allocation2 + $0x2d4] sm:$0xf]  ;;  %v3491_v40 = vld [vmem:[#allocation2 + $0x2d8] sm:$0xf0]  ;;  %v4655_v46 = vld [vmem:[#allocation2 + $0x1c4] sm:$0xf] }
  0x80   :  { %1600 = vmatpush.bf16.msrb.mxu2 %v3238_v52  ;;  %v3131_v52 = vld [vmem:[#allocation2 + $0x8] sm:$0xf0]  ;;  %v3494_v47 = vor.u32 %v4689_v38, %v3491_v40  ;;  %v4647_v38 = vld [vmem:[#allocation2 + $0x184] sm:$0xf] }
  0x81   :  { %1613 = vmatpush.bf16.msrb.mxu3 %v3302_v59  ;;  %v4677_v59 = vld [vmem:[#allocation2 + $0x274] sm:$0xf]  ;;  %v3134_v3 = vor.u32 %v4599_v48, %v3131_v52  ;;  %v3355_v48 = vld [vmem:[#allocation2 + $0x1c8] sm:$0xf0] }
  0x82   :  { %1575 = vmatpush.bf16.msrb.mxu0 %v3930_v60  ;;  %v3443_v60 = vld [vmem:[#allocation2 + $0x278] sm:$0xf0]  ;;  %v3323_v40 = vld [vmem:[#allocation2 + $0x188] sm:$0xf0] }
  0x83   :  { %1588 = vmatpush.bf16.msrb.mxu1 %v3166_v63  ;;  %v3507_v63 = vld [vmem:[#allocation2 + $0x2f8] sm:$0xf0] }
  0x84   :  { %1601 = vmatpush.bf16.msrb.mxu2 %v3230_v0  ;;  %v4631_v0 = vld [vmem:[#allocation2 + $0x104] sm:$0xf]  ;;  %v3510_v11 = vor.u32 %v4693_v61, %v3507_v63  ;;  %v3411_v61 = vld [vmem:[#allocation2 + $0x238] sm:$0xf0]  ;;  %v4685_v63 = vld [vmem:[#allocation2 + $0x2b4] sm:$0xf] }
  0x85   :  { %1614 = vmatpush.bf16.msrb.mxu3 %v3294_v8  ;;  %v3382_v8 = vor.u32 %v4661_v56, %v3379_v57  ;;  %v4653_v57 = vld [vmem:[#allocation2 + $0x1b4] sm:$0xf] }
  0x86   :  { %1576 = vmatpush.bf16.msrb.mxu0 %v3922_v9  ;;  %v3446_v9 = vor.u32 %v4677_v59, %v3443_v60  ;;  %v3347_v59 = vld [vmem:[#allocation2 + $0x1b8] sm:$0xf0]  ;;  %v4669_v60 = vld [vmem:[#allocation2 + $0x234] sm:$0xf] }
  0x87   :  { %1589 = vmatpush.bf16.msrb.mxu1 %v3158_v12  ;;  %v3262_v12 = vor.u32 %v4631_v0, %v3259_v1  ;;  %v4701_v0 = vld [vmem:[#allocation2 + $0x334] sm:$0xf]  ;;  %v3539_v1 = vld [vmem:[#allocation2 + $0x338] sm:$0xf0]  ;;  %v3350_v2 = vor.u32 %v4653_v57, %v3347_v59 }
  0x88   :  { %1602 = vmatpush.bf16.msrb.mxu2 %v3222_v14  ;;  %v3371_v14 = vld [vmem:[#allocation2 + $0x1e8] sm:$0xf0]  ;;  %v4773_v59 = vld [vmem:[#allocation2 + $0x574] sm:$0xf] }
  0x89   :  { %1615 = vmatpush.bf16.msrb.mxu3 %v3286_v23  ;;  %v4707_v23 = vld [vmem:[#allocation2 + $0x364] sm:$0xf]  ;;  %v3374_v27 = vor.u32 %v4659_v10, %v3371_v14  ;;  %v3542_v10 = vor.u32 %v4701_v0, %v3539_v1 }
  0x8a   :  { %1577 = vmatpush.bf16.msrb.mxu0 %v3914_v26  ;;  %v3563_v26 = vld [vmem:[#allocation2 + $0x368] sm:$0xf0]  ;;  %v4699_v14 = vld [vmem:[#allocation2 + $0x324] sm:$0xf] }
  0x8b   :  { %1590 = vmatpush.bf16.msrb.mxu1 %v3150_v29  ;;  %v4657_v29 = vld [vmem:[#allocation2 + $0x1d4] sm:$0xf]  ;;  %v3566_v37 = vor.u32 %v4707_v23, %v3563_v26  ;;  %v3331_v23 = vld [vmem:[#allocation2 + $0x198] sm:$0xf0]  ;;  %v4739_v0 = vld [vmem:[#allocation2 + $0x464] sm:$0xf] }
  0x8c   :  { %1603 = vmatpush.bf16.msrb.mxu2 %v3214_v32  ;;  %v3502_v32 = vor.u32 %v4691_v19, %v3499_v22  ;;  %v3366_v44 = vor.u32 %v4657_v29, %v3363_v33  ;;  %v4649_v19 = vld [vmem:[#allocation2 + $0x194] sm:$0xf] }
  0x8d   :  { %1616 = vmatpush.bf16.msrb.mxu3 %v3278_v41  ;;  %v4705_v41 = vld [vmem:[#allocation2 + $0x354] sm:$0xf] }
  0x8e   :  { %1578 = vmatpush.bf16.msrb.mxu0 %v3906_v45  ;;  %v3430_v45 = vor.u32 %v4673_v34, %v3427_v35  ;;  %v3558_v52 = vor.u32 %v4705_v41, %v3555_v42  ;;  %v4665_v26 = vld [vmem:[#allocation2 + $0x214] sm:$0xf]  ;;  %v3523_v34 = vld [vmem:[#allocation2 + $0x318] sm:$0xf0]  ;;  %v3334_v35 = vor.u32 %v4649_v19, %v3331_v23  ;;  %v4663_v41 = vld [vmem:[#allocation2 + $0x204] sm:$0xf] }
  0x8f   :  { %1591 = vmatpush.bf16.msrb.mxu1 %v3142_v50  ;;  %v4671_v50 = vld [vmem:[#allocation2 + $0x244] sm:$0xf]  ;;  %v4681_v29 = vld [vmem:[#allocation2 + $0x294] sm:$0xf]  ;;  %v3747_v19 = vld [vmem:[#allocation2 + $0x4d8] sm:$0xf0] }
  0x90   :  { %1604 = vmatpush.bf16.msrb.mxu2 %v3206_v51  ;;  %v3419_v51 = vld [vmem:[#allocation2 + $0x248] sm:$0xf0]  ;;  %v4697_v33 = vld [vmem:[#allocation2 + $0x314] sm:$0xf] }
  0x91   :  { %1617 = vmatpush.bf16.msrb.mxu3 %v3270_v58  ;;  %v3422_v56 = vor.u32 %v4671_v50, %v3419_v51  ;;  %v3486_v58 = vor.u32 %v4687_v53, %v3483_v54  ;;  %v3635_v50 = vld [vmem:[#allocation2 + $0x3f8] sm:$0xf0]  ;;  %v4741_v51 = vld [vmem:[#allocation2 + $0x474] sm:$0xf] }
  0x92   :  { %1579 = vmatpush.bf16.msrb.mxu0 %v3898_v62  ;;  %v4757_v53 = vld [vmem:[#allocation2 + $0x4f4] sm:$0xf]  ;;  %v3763_v54 = vld [vmem:[#allocation2 + $0x4f8] sm:$0xf0] }
  0x93   :  { %1592 = vmatpush.bf16.msrb.mxu1 %v3134_v3  ;;  %v3414_v3 = vor.u32 %v4669_v60, %v3411_v61  ;;  %v3827_v60 = vld [vmem:[#allocation2 + $0x578] sm:$0xf0] }
  0x94   :  { %1605 = vmatpush.bf16.msrb.mxu2 %v3198_v4  ;;  %v4651_v4 = vld [vmem:[#allocation2 + $0x1a4] sm:$0xf] }
  0x95   :  { %1618 = vmatpush.bf16.msrb.mxu3 %v3262_v12  ;;  %1580 = vmatmul.bf16.vlgmr.msrb.gmra.mxu0 %v5235_v17  ;;  %v3467_v12 = vld [vmem:[#allocation2 + $0x2a8] sm:$0xf0]  ;;  %v3342_v16 = vor.u32 %v4651_v4, %v3339_v7 }
  0x96   :  { %1624 = vmatpush.bf16.msra.mxu0 %v3382_v8  ;;  %1593 = vmatmul.bf16.vlgmr.msrb.gmra.mxu1 %v5189_v20  ;;  %v3358_v20 = vor.u32 %v4655_v46, %v3355_v48  ;;  %v4667_v8 = vld [vmem:[#allocation2 + $0x224] sm:$0xf]  ;;  %v3451_v46 = vld [vmem:[#allocation2 + $0x288] sm:$0xf0]  ;;  %v4725_v48 = vld [vmem:[#allocation2 + $0x3f4] sm:$0xf] }
  0x97   :  { %1637 = vmatpush.bf16.msra.mxu1 %v3446_v9  ;;  %1606 = vmatmul.bf16.vlgmr.msrb.gmra.mxu2 %v5192_v21  ;;  %v3547_v21 = vld [vmem:[#allocation2 + $0x348] sm:$0xf0] }
  0x98   :  { %1650 = vmatpush.bf16.msra.mxu2 %v3510_v11  ;;  %1619 = vmatmul.bf16.vlgmr.msrb.gmra.mxu3 %v5181_v6  ;;  %v3550_v62 = vor.u32 %v4703_v55, %v3547_v21  ;;  %v3475_v6 = vld [vmem:[#allocation2 + $0x2b8] sm:$0xf0]  ;;  %v3403_v9 = vld [vmem:[#allocation2 + $0x228] sm:$0xf0]  ;;  %v4683_v11 = vld [vmem:[#allocation2 + $0x2a4] sm:$0xf]  ;;  %v3326_v55 = vor.u32 %v4647_v38, %v3323_v40 }
  0x99   :  { %1663 = vmatpush.bf16.msra.mxu3 %v3574_v18  ;;  %v3478_v5 = vor.u32 %v4685_v63, %v3475_v6  ;;  %v3406_v18 = vor.u32 %v4667_v8, %v3403_v9  ;;  %v3470_v22 = vor.u32 %v4683_v11, %v3467_v12  ;;  %v4723_v63 = vld [vmem:[#allocation2 + $0x3e4] sm:$0xf]  ;;  %v3627_v6 = vld [vmem:[#allocation2 + $0x3e8] sm:$0xf0]  ;;  %v4721_v12 = vld [vmem:[#allocation2 + $0x3d4] sm:$0xf] }
  0x9a   :  { %1625 = vmatpush.bf16.msra.mxu0 %v3374_v27  ;;  %v3395_v27 = vld [vmem:[#allocation2 + $0x218] sm:$0xf0]  ;;  %v3755_v4 = vld [vmem:[#allocation2 + $0x4e8] sm:$0xf0]  ;;  %v3630_v7 = vor.u32 %v4723_v63, %v3627_v6  ;;  %v4771_v8 = vld [vmem:[#allocation2 + $0x564] sm:$0xf] }
  0x9b   :  { %1638 = vmatpush.bf16.msra.mxu1 %v3438_v28  ;;  %v3534_v28 = vor.u32 %v4699_v14, %v3531_v15  ;;  %v3819_v9 = vld [vmem:[#allocation2 + $0x568] sm:$0xf0]  ;;  %v3619_v14 = vld [vmem:[#allocation2 + $0x3d8] sm:$0xf0]  ;;  %v4737_v15 = vld [vmem:[#allocation2 + $0x454] sm:$0xf] }
  0x9c   :  { %1651 = vmatpush.bf16.msra.mxu2 %v3502_v32  ;;  %v3459_v32 = vld [vmem:[#allocation2 + $0x298] sm:$0xf0]  ;;  %v3622_v23 = vor.u32 %v4721_v12, %v3619_v14  ;;  %v4767_v40 = vld [vmem:[#allocation2 + $0x544] sm:$0xf]  ;;  %v3787_v63 = vld [vmem:[#allocation2 + $0x528] sm:$0xf0] }
  0x9d   :  { %1664 = vmatpush.bf16.msra.mxu3 %v3566_v37  ;;  %v3398_v37 = vor.u32 %v4665_v26, %v3395_v27  ;;  %v3462_v42 = vor.u32 %v4681_v29, %v3459_v32  ;;  %v4769_v26 = vld [vmem:[#allocation2 + $0x554] sm:$0xf]  ;;  %v3811_v27 = vld [vmem:[#allocation2 + $0x558] sm:$0xf0]  ;;  %v4719_v32 = vld [vmem:[#allocation2 + $0x3c4] sm:$0xf] }
  0x9e   :  { %1626 = vmatpush.bf16.msra.mxu0 %v3366_v44  ;;  %v3387_v44 = vld [vmem:[#allocation2 + $0x208] sm:$0xf0]  ;;  %v4761_v14 = vld [vmem:[#allocation2 + $0x514] sm:$0xf] }
  0x9f   :  { %1639 = vmatpush.bf16.msra.mxu1 %v3430_v45  ;;  %v4679_v45 = vld [vmem:[#allocation2 + $0x284] sm:$0xf]  ;;  %v3390_v21 = vor.u32 %v4663_v41, %v3387_v44  ;;  %v4717_v44 = vld [vmem:[#allocation2 + $0x3b4] sm:$0xf] }
  0xa0   :  { %1652 = vmatpush.bf16.msra.mxu2 %v3494_v47  ;;  %v3526_v47 = vor.u32 %v4697_v33, %v3523_v34  ;;  %v3454_v57 = vor.u32 %v4679_v45, %v3451_v46  ;;  %v3611_v33 = vld [vmem:[#allocation2 + $0x3c8] sm:$0xf0]  ;;  %v3603_v45 = vld [vmem:[#allocation2 + $0x3b8] sm:$0xf0]  ;;  %v4733_v46 = vld [vmem:[#allocation2 + $0x434] sm:$0xf] }
  0xa1   :  { %1665 = vmatpush.bf16.msra.mxu3 %v3558_v52  ;;  %v3699_v52 = vld [vmem:[#allocation2 + $0x478] sm:$0xf0]  ;;  %v3675_v34 = vld [vmem:[#allocation2 + $0x448] sm:$0xf0]  ;;  %v3614_v38 = vor.u32 %v4719_v32, %v3611_v33  ;;  %v4789_v32 = vld [vmem:[#allocation2 + $0x5f4] sm:$0xf] }
  0xa2   :  { %1627 = vmatpush.bf16.msra.mxu0 %v3358_v20  ;;  %v4695_v20 = vld [vmem:[#allocation2 + $0x304] sm:$0xf]  ;;  %v3702_v61 = vor.u32 %v4741_v51, %v3699_v52  ;;  %v3606_v51 = vor.u32 %v4717_v44, %v3603_v45  ;;  %v4765_v52 = vld [vmem:[#allocation2 + $0x534] sm:$0xf] }
  0xa3   :  { %1640 = vmatpush.bf16.msra.mxu1 %v3422_v56  ;;  %v3515_v56 = vld [vmem:[#allocation2 + $0x308] sm:$0xf0] }
  0xa4   :  { %1653 = vmatpush.bf16.msra.mxu2 %v3486_v58  ;;  %v3638_v58 = vor.u32 %v4725_v48, %v3635_v50  ;;  %v3518_v1 = vor.u32 %v4695_v20, %v3515_v56  ;;  %v4749_v48 = vld [vmem:[#allocation2 + $0x4b4] sm:$0xf]  ;;  %v3731_v50 = vld [vmem:[#allocation2 + $0x4b8] sm:$0xf0]  ;;  %v3595_v20 = vld [vmem:[#allocation2 + $0x3a8] sm:$0xf0] }
  0xa5   :  { %1666 = vmatpush.bf16.msra.mxu3 %v3550_v62  ;;  %v3766_v62 = vor.u32 %v4757_v53, %v3763_v54  ;;  %v3795_v53 = vld [vmem:[#allocation2 + $0x538] sm:$0xf0]  ;;  %v4731_v56 = vld [vmem:[#allocation2 + $0x424] sm:$0xf] }
  0xa6   :  { %1628 = vmatpush.bf16.msra.mxu0 %v3350_v2  ;;  %v3691_v2 = vld [vmem:[#allocation2 + $0x468] sm:$0xf0] }
  0xa7   :  { %1641 = vmatpush.bf16.msra.mxu1 %v3414_v3  ;;  %v4755_v3 = vld [vmem:[#allocation2 + $0x4e4] sm:$0xf] }
  0xa8   :  { %1654 = vmatpush.bf16.msra.mxu2 %v3478_v5  ;;  %v3830_v5 = vor.u32 %v4773_v59, %v3827_v60  ;;  %v3758_v11 = vor.u32 %v4755_v3, %v3755_v4  ;;  %v3723_v59 = vld [vmem:[#allocation2 + $0x4a8] sm:$0xf0]  ;;  %v3798_v60 = vor.u32 %v4765_v52, %v3795_v53  ;;  %v3587_v3 = vld [vmem:[#allocation2 + $0x398] sm:$0xf0]  ;;  %v4729_v4 = vld [vmem:[#allocation2 + $0x414] sm:$0xf] }
  0xa9   :  { %1667 = vmatpush.bf16.msra.mxu3 %v3542_v10  ;;  %v3694_v10 = vor.u32 %v4739_v0, %v3691_v2  ;;  %v4713_v2 = vld [vmem:[#allocation2 + $0x394] sm:$0xf]  ;;  %v4073_v53 = vld [vmem:[%s5779_s3 + $0xe0] sm:$0xf] }
  0xaa   :  { %1629 = vmatpush.bf16.msra.mxu0 %v3342_v16  ;;  %v3683_v16 = vld [vmem:[#allocation2 + $0x458] sm:$0xf0]  ;;  %v3590_v12 = vor.u32 %v4713_v2, %v3587_v3  ;;  %v3867_v2 = vld [vmem:[#allocation2 + $0x5c8] sm:$0xf0] }
  0xab   :  { %1642 = vmatpush.bf16.msra.mxu1 %v3406_v18  ;;  %v4753_v18 = vld [vmem:[#allocation2 + $0x4d4] sm:$0xf]  ;;  %v3931_v3 = vld [vmem:[#allocation2 + $0x648] sm:$0xf0] }
  0xac   :  { %1655 = vmatpush.bf16.msra.mxu2 %v3470_v22  ;;  %v3822_v22 = vor.u32 %v4771_v8, %v3819_v9  ;;  %v3750_v29 = vor.u32 %v4753_v18, %v3747_v19  ;;  %v4745_v8 = vld [vmem:[#allocation2 + $0x494] sm:$0xf]  ;;  %v3715_v9 = vld [vmem:[#allocation2 + $0x498] sm:$0xf0] }
  0xad   :  { %1668 = vmatpush.bf16.msra.mxu3 %v3534_v28  ;;  %v3686_v28 = vor.u32 %v4737_v15, %v3683_v16  ;;  %v3779_v15 = vld [vmem:[#allocation2 + $0x518] sm:$0xf0]  ;;  %v4711_v16 = vld [vmem:[#allocation2 + $0x384] sm:$0xf] }
  0xae   :  { %1630 = vmatpush.bf16.msra.mxu0 %v3334_v35  ;;  %v4751_v35 = vld [vmem:[#allocation2 + $0x4c4] sm:$0xf]  ;;  %v3782_v33 = vor.u32 %v4761_v14, %v3779_v15  ;;  %v4825_v14 = vld [vmem:[%s5779_s3 + $0x8c] sm:$0xf0]  ;;  %v4797_v15 = vld [vmem:[#allocation2 + $0x634] sm:$0xf] }
  0xaf   :  { %1643 = vmatpush.bf16.msra.mxu1 %v3398_v37  ;;  %v3739_v37 = vld [vmem:[#allocation2 + $0x4c8] sm:$0xf0] }
  0xb0   :  { %1656 = vmatpush.bf16.msra.mxu2 %v3462_v42  ;;  %v3742_v42 = vor.u32 %v4751_v35, %v3739_v37  ;;  %v3955_v35 = vld [vmem:[#allocation2 + $0x678] sm:$0xf0] }
  0xb1   :  { %1669 = vmatpush.bf16.msra.mxu3 %v3526_v47  ;;  %v3667_v47 = vld [vmem:[#allocation2 + $0x438] sm:$0xf0] }
  0xb2   :  { %1631 = vmatpush.bf16.msra.mxu0 %v3326_v55  ;;  %v3670_v54 = vor.u32 %v4733_v46, %v3667_v47  ;;  %v3734_v55 = vor.u32 %v4749_v48, %v3731_v50  ;;  %v4787_v47 = vld [vmem:[#allocation2 + $0x5e4] sm:$0xf]  ;;  %v3883_v48 = vld [vmem:[#allocation2 + $0x5e8] sm:$0xf0] }
  0xb3   :  { %1644 = vmatpush.bf16.msra.mxu1 %v3390_v21  ;;  %v4715_v21 = vld [vmem:[#allocation2 + $0x3a4] sm:$0xf] }
  0xb4   :  { %1657 = vmatpush.bf16.msra.mxu2 %v3454_v57  ;;  %v3659_v57 = vld [vmem:[#allocation2 + $0x428] sm:$0xf0]  ;;  %v4803_v50 = vld [vmem:[#allocation2 + $0x664] sm:$0xf] }
  0xb5   :  { %1670 = vmatpush.bf16.msra.mxu3 %v3518_v1  ;;  %1632 = vmatmul.bf16.vlgmr.msra.gmra.mxu0 %v5186_v13  ;;  %v4735_v13 = vld [vmem:[#allocation2 + $0x444] sm:$0xf]  ;;  %v3662_v0 = vor.u32 %v4731_v56, %v3659_v57  ;;  %v4833_v56 = vld [vmem:[%s5779_s3 + $0xcc] sm:$0xf0] }
  0xb6   :  { %1676 = vmatpush.bf16.msrb.mxu0 %v3638_v58  ;;  %1645 = vmatmul.bf16.vlgmr.msra.gmra.mxu1 %v5202_v36  ;;  %v3803_v36 = vld [vmem:[#allocation2 + $0x548] sm:$0xf0]  ;;  %v3678_v41 = vor.u32 %v4735_v13, %v3675_v34  ;;  %v4747_v58 = vld [vmem:[#allocation2 + $0x4a4] sm:$0xf]  ;;  %v5245_v6 = vpop.f32.mrf.mxu0  ;;  %v3891_v13 = vld [vmem:[#allocation2 + $0x5f8] sm:$0xf0] }
  0xb7   :  { %1689 = vmatpush.bf16.msrb.mxu1 %v3702_v61  ;;  %1658 = vmatmul.bf16.vlgmr.msra.gmra.mxu2 %v5206_v43  ;;  %v3814_v43 = vor.u32 %v4769_v26, %v3811_v27  ;;  %v3598_v61 = vor.u32 %v4715_v21, %v3595_v20  ;;  %v3726_v1 = vor.u32 %v4747_v58, %v3723_v59  ;;  %v4727_v26 = vld [vmem:[#allocation2 + $0x404] sm:$0xf]  ;;  %v3643_v27 = vld [vmem:[#allocation2 + $0x408] sm:$0xf0]  ;;  %v4805_v34 = vld [vmem:[#allocation2 + $0x674] sm:$0xf] }
  0xb8   :  { %1702 = vmatpush.bf16.msrb.mxu2 %v3766_v62  ;;  %1671 = vmatmul.bf16.vlgmr.msra.gmra.mxu3 %v5204_v39  ;;  %v3806_v39 = vor.u32 %v4767_v40, %v3803_v36  ;;  %v4763_v62 = vld [vmem:[#allocation2 + $0x524] sm:$0xf]  ;;  %v3646_v36 = vor.u32 %v4727_v26, %v3643_v27  ;;  %v3894_v44 = vor.u32 %v4789_v32, %v3891_v13  ;;  %v4057_v20 = vld [vmem:[%s5779_s3 + $0xc0] sm:$0xf]  ;;  %v4785_v58 = vld [vmem:[#allocation2 + $0x5d4] sm:$0xf] }
  0xb9   :  { %1715 = vmatpush.bf16.msrb.mxu3 %v3830_v5  ;;  %v5247_v5 = vpop.f32.mrf.mxu1  ;;  %v3958_v45 = vor.u32 %v4805_v34, %v3955_v35  ;;  %v3886_v21 = vor.u32 %v4787_v47, %v3883_v48  ;;  %v3875_v59 = vld [vmem:[#allocation2 + $0x5d8] sm:$0xf0]  ;;  %v4779_v27 = vld [vmem:[#allocation2 + $0x5a4] sm:$0xf]  ;;  %v3915_v32 = vld [vmem:[#allocation2 + $0x628] sm:$0xf0] }
  0xba   :  { %1677 = vmatpush.bf16.msrb.mxu0 %v3630_v7  ;;  %v3651_v7 = vld [vmem:[#allocation2 + $0x418] sm:$0xf0]  ;;  %v4821_v13 = vld [vmem:[%s5779_s3 + $0x6c] sm:$0xf0] }
  0xbb   :  { %1690 = vmatpush.bf16.msrb.mxu1 %v3694_v10  ;;  %v3790_v10 = vor.u32 %v4763_v62, %v3787_v63  ;;  %v5251_v18 = vpop.f32.mrf.mxu3  ;;  %v3654_v19 = vor.u32 %v4729_v4, %v3651_v7  ;;  %v4058_v62 = vor.u32 %v4833_v56, %v4057_v20  ;;  %v3878_v63 = vor.u32 %v4785_v58, %v3875_v59  ;;  %v4781_v7 = vld [vmem:[#allocation2 + $0x5b4] sm:$0xf]  ;;  %v3899_v20 = vld [vmem:[#allocation2 + $0x608] sm:$0xf0]  ;;  %v4835_v56 = vld [vmem:[%s5779_s3 + $0xe4] sm:$0xf] }
  0xbc   :  { %1703 = vmatpush.bf16.msrb.mxu2 %v3758_v11  ;;  %v5249_v11 = vpop.f32.mrf.mxu2 }
  0xbd   :  { %1716 = vmatpush.bf16.msrb.mxu3 %v3822_v22  ;;  %v3718_v22 = vor.u32 %v4745_v8, %v3715_v9 }
  0xbe   :  { %1678 = vmatpush.bf16.msrb.mxu0 %v3622_v23  ;;  %v3579_v23 = vld [vmem:[#allocation2 + $0x388] sm:$0xf0]  ;;  %v1427_v40 = vpop.f32.mrf.mxu0 }
  0xbf   :  { %1691 = vmatpush.bf16.msrb.mxu1 %v3686_v28  ;;  %v4743_v28 = vld [vmem:[#allocation2 + $0x484] sm:$0xf]  ;;  %v3582_v37 = vor.u32 %v4711_v16, %v3579_v23  ;;  %v3923_v16 = vld [vmem:[#allocation2 + $0x638] sm:$0xf0]  ;;  %v4817_v40 = vld [vmem:[%s5779_s3 + $0x4c] sm:$0xf0] }
  0xc0   :  { %1704 = vmatpush.bf16.msrb.mxu2 %v3750_v29  ;;  %v3707_v29 = vld [vmem:[#allocation2 + $0x488] sm:$0xf0]  ;;  %v3926_v26 = vor.u32 %v4797_v15, %v3923_v16 }
  0xc1   :  { %1717 = vmatpush.bf16.msrb.mxu3 %v3814_v43  ;;  %v4759_v43 = vld [vmem:[#allocation2 + $0x504] sm:$0xf] }
  0xc2   :  { %1679 = vmatpush.bf16.msrb.mxu0 %v3614_v38  ;;  %v3771_v38 = vld [vmem:[#allocation2 + $0x508] sm:$0xf0] }
  0xc3   :  { %1692 = vmatpush.bf16.msrb.mxu1 %v3678_v41  ;;  %v3710_v41 = vor.u32 %v4743_v28, %v3707_v29  ;;  %v3774_v46 = vor.u32 %v4759_v43, %v3771_v38  ;;  %v1466_v52 = vpop.f32.mrf.mxu3  ;;  %v3851_v28 = vld [vmem:[#allocation2 + $0x5a8] sm:$0xf0]  ;;  %v4795_v29 = vld [vmem:[#allocation2 + $0x624] sm:$0xf]  ;;  %v3993_v38 = vld [vmem:[%s5779_s3 + $0x40] sm:$0xf] }
  0xc4   :  { %1705 = vmatpush.bf16.msrb.mxu2 %v3742_v42  ;;  %v1440_v42 = vpop.f32.mrf.mxu1  ;;  %v3994_v48 = vor.u32 %v4817_v40, %v3993_v38  ;;  %v4813_v52 = vld [vmem:[%s5779_s3 + $0x2c] sm:$0xf0]  ;;  %v4815_v40 = vld [vmem:[%s5779_s3 + $0x44] sm:$0xf] }
  0xc5   :  { %1718 = vmatpush.bf16.msrb.mxu3 %v3806_v39  ;;  %v1453_v39 = vpop.f32.mrf.mxu2  ;;  %v3843_v42 = vld [vmem:[#allocation2 + $0x598] sm:$0xf0] }
  0xc6   :  { %1680 = vmatpush.bf16.msrb.mxu0 %v3606_v51  ;;  %v3947_v51 = vld [vmem:[#allocation2 + $0x668] sm:$0xf0] }
  0xc7   :  { %1693 = vmatpush.bf16.msrb.mxu1 %v3670_v54  ;;  %v4837_v54 = vld [vmem:[%s5779_s3 + $0xec] sm:$0xf0]  ;;  %v3950_v57 = vor.u32 %v4803_v50, %v3947_v51  ;;  %v5304_v50 = vld [vmem:[%s5778_s2] sm:$0x3] }
  0xc8   :  { %1706 = vmatpush.bf16.msrb.mxu2 %v3734_v55  ;;  %v4074_v55 = vor.u32 %v4837_v54, %v4073_v53  ;;  %v3977_v51 = vld [vmem:[%s5779_s3 + $0x20] sm:$0xf]  ;;  %v4775_v54 = vld [vmem:[#allocation2 + $0x584] sm:$0xf]  ;;  %v326_v58 = vperm.slane %v5304_v50, 0 }
  0xc9   :  { %1719 = vmatpush.bf16.msrb.mxu3 %v3798_v60  ;;  %v4801_v60 = vld [vmem:[#allocation2 + $0x654] sm:$0xf] }
  0xca   :  { %1681 = vmatpush.bf16.msrb.mxu0 %v3598_v61  ;;  %v3939_v61 = vld [vmem:[#allocation2 + $0x658] sm:$0xf0] }
  0xcb   :  { %1694 = vmatpush.bf16.msrb.mxu1 %v3662_v0  ;;  %v3942_v0 = vor.u32 %v4801_v60, %v3939_v61  ;;  %v3978_v60 = vor.u32 %v4813_v52, %v3977_v51  ;;  %v4811_v51 = vld [vmem:[%s5779_s3 + $0x24] sm:$0xf]  ;;  %v3979_v52 = vld [vmem:[%s5779_s3 + $0x30] sm:$0xf0] }
  0xcc   :  { %1707 = vmatpush.bf16.msrb.mxu2 %v3726_v1  ;;  %v4783_v1 = vld [vmem:[#allocation2 + $0x5c4] sm:$0xf] }
  0xcd   :  { %1720 = vmatpush.bf16.msrb.mxu3 %v3790_v10  ;;  %v3859_v10 = vld [vmem:[#allocation2 + $0x5b8] sm:$0xf0] }
  0xce   :  { %1682 = vmatpush.bf16.msrb.mxu0 %v3590_v12  ;;  %v4025_v12 = vld [vmem:[%s5779_s3 + $0x80] sm:$0xf]  ;;  %v3862_v23 = vor.u32 %v4781_v7, %v3859_v10  ;;  %v4065_v10 = vld [vmem:[%s5779_s3 + $0xc8] sm:$0xf] }
  0xcf   :  { %1695 = vmatpush.bf16.msrb.mxu1 %v3654_v19 }
  0xd0   :  { %1708 = vmatpush.bf16.msrb.mxu2 %v3718_v22  ;;  %v4026_v22 = vor.u32 %v4825_v14, %v4025_v12  ;;  %v4834_v12 = vld [vmem:[%s5779_s3 + $0xd4] sm:$0xf0]  ;;  %v4827_v14 = vld [vmem:[%s5779_s3 + $0xa4] sm:$0xf] }
  0xd1   :  { %1721 = vmatpush.bf16.msrb.mxu3 %v3782_v33  ;;  %v4009_v33 = vld [vmem:[%s5779_s3 + $0x60] sm:$0xf]  ;;  %v4066_v16 = vor.u32 %v4834_v12, %v4065_v10 }
  0xd2   :  { %1683 = vmatpush.bf16.msrb.mxu0 %v3582_v37  ;;  %v5275_v8 = vpop.f32.mrf.mxu0  ;;  %v4010_v35 = vor.u32 %v4821_v13, %v4009_v33  ;;  %v3854_v37 = vor.u32 %v4779_v27, %v3851_v28 }
  0xd3   :  { %1696 = vmatpush.bf16.msrb.mxu1 %v3646_v36  ;;  %v5283_v19 = vpop.f32.mrf.mxu1  ;;  %v3918_v36 = vor.u32 %v4795_v29, %v3915_v32  ;;  %v4819_v32 = vld [vmem:[%s5779_s3 + $0x64] sm:$0xf] }
  0xd4   :  { %1709 = vmatpush.bf16.msrb.mxu2 %v3710_v41  ;;  %v4777_v41 = vld [vmem:[#allocation2 + $0x594] sm:$0xf] }
  0xd5   :  { %1722 = vmatpush.bf16.msrb.mxu3 %v3774_v46  ;;  %1684 = vmatmul.bf16.vlgmr.msrb.gmra.mxu0 %v5209_v49  ;;  %v4799_v49 = vld [vmem:[#allocation2 + $0x644] sm:$0xf]  ;;  %v3907_v46 = vld [vmem:[#allocation2 + $0x618] sm:$0xf0]  ;;  %v3846_v39 = vor.u32 %v4777_v41, %v3843_v42  ;;  %v4017_v41 = vld [vmem:[%s5779_s3 + $0x68] sm:$0xf] }
  0xd6   :  { %1728 = vmatpush.bf16.msra.mxu0 %v3894_v44  ;;  %1697 = vmatmul.bf16.vlgmr.msrb.gmra.mxu1 %v5220_v24  ;;  %v4829_v24 = vld [vmem:[%s5779_s3 + $0xac] sm:$0xf0]  ;;  %v3934_v9 = vor.u32 %v4799_v49, %v3931_v3  ;;  %v4838_v49 = vld [vmem:[%s5779_s3 + $0xf4] sm:$0xf0]  ;;  %v4831_v3 = vld [vmem:[%s5779_s3 + $0xc4] sm:$0xf] }
  0xd7   :  { %1741 = vmatpush.bf16.msra.mxu1 %v3958_v45  ;;  %1710 = vmatmul.bf16.vlgmr.msrb.gmra.mxu2 %v5224_v30  ;;  %v4041_v30 = vld [vmem:[%s5779_s3 + $0xa0] sm:$0xf]  ;;  %v4793_v45 = vld [vmem:[#allocation2 + $0x614] sm:$0xf]  ;;  %v4822_v42 = vld [vmem:[%s5779_s3 + $0x74] sm:$0xf0] }
  0xd8   :  { %2152 = vmatpush.bf16.msra.mxu2 %v4074_v55  ;;  %1723 = vmatmul.bf16.vlgmr.msrb.gmra.mxu3 %v5222_v25  ;;  %v4042_v4 = vor.u32 %v4829_v24, %v4041_v30  ;;  %v3870_v25 = vor.u32 %v4783_v1, %v3867_v2  ;;  %v3910_v53 = vor.u32 %v4793_v45, %v3907_v46  ;;  %v3835_v55 = vld [vmem:[#allocation2 + $0x588] sm:$0xf0]  ;;  %v4081_v2 = vld [vmem:[%s5779_s3 + $0xe8] sm:$0xf]  ;;  %v4059_v30 = vld [vmem:[%s5779_s3 + $0xd0] sm:$0xf0] }
  0xd9   :  { %v3838_v61 = vor.u32 %v4775_v54, %v3835_v55  ;;  %v4082_v7 = vor.u32 %v4838_v49, %v4081_v2  ;;  %v4018_v46 = vor.u32 %v4822_v42, %v4017_v41 }
  0xda   :  { %1729 = vmatpush.bf16.msra.mxu0 %v3886_v21  ;;  %v5291_v34 = vpop.f32.mrf.mxu2  ;;  %v1479_v43 = vpop.f32.mrf.mxu0  ;;  %v4791_v21 = vld [vmem:[#allocation2 + $0x604] sm:$0xf] }
  0xdb   :  { %1742 = vmatpush.bf16.msra.mxu1 %v3950_v57  ;;  %v5299_v44 = vpop.f32.mrf.mxu3  ;;  %v1492_v47 = vpop.f32.mrf.mxu1  ;;  %v4075_v57 = vld [vmem:[%s5779_s3 + $0xf0] sm:$0xf0] }
  0xdc   :  { %2153 = vmatpush.bf16.msra.mxu2 %v4058_v62  ;;  %v3961_v62 = vld [vmem:[%s5779_s3] sm:$0xf]  ;;  %v4078_v1 = vor.u32 %v4835_v56, %v4075_v57  ;;  %v3985_v56 = vld [vmem:[%s5779_s3 + $0x28] sm:$0xf]  ;;  %v4814_v57 = vld [vmem:[%s5779_s3 + $0x34] sm:$0xf0] }
  0xde   :  { %1730 = vmatpush.bf16.msra.mxu0 %v3878_v63  ;;  %v4809_v63 = vld [vmem:[%s5779_s3 + $0xc] sm:$0xf0] }
  0xdf   :  { %1743 = vmatpush.bf16.msra.mxu1 %v3942_v0  ;;  %v3902_v0 = vor.u32 %v4791_v21, %v3899_v20  ;;  %v3982_v20 = vor.u32 %v4811_v51, %v3979_v52  ;;  %v4865_v51 = vld [vmem:[%s5779_s3 + $0x1cc] sm:$0xf0]  ;;  %v4863_v52 = vld [vmem:[%s5779_s3 + $0x1c4] sm:$0xf] }
  0xe0   :  { %2154 = vmatpush.bf16.msra.mxu2 %v4042_v4  ;;  %v1426_v4 = vadd.f32 %v5245_v6, %v326_v58  ;;  %v4043_v6 = vld [vmem:[%s5779_s3 + $0xb0] sm:$0xf0]  ;;  %v4807_v58 = vld [vmem:[%s5779_s3 + $0x4] sm:$0xf] }
  0xe2   :  { %1731 = vmatpush.bf16.msra.mxu0 %v3870_v25  ;;  %v1505_v59 = vpop.f32.mrf.mxu2  ;;  %v3962_v25 = vor.u32 %v4809_v63, %v3961_v62  ;;  %v1439_v15 = vadd.f32 %v5247_v5, %v1426_v4  ;;  %v3986_v63 = vor.u32 %v4814_v57, %v3985_v56  ;;  %v4169_v57 = vld [vmem:[%s5779_s3 + $0x1a0] sm:$0xf] }
  0xe3   :  { %1744 = vmatpush.bf16.msra.mxu1 %v3934_v9  ;;  %v1518_v24 = vpop.f32.mrf.mxu3  ;;  %v4062_v9 = vor.u32 %v4831_v3, %v4059_v30  ;;  %v4832_v30 = vld [vmem:[%s5779_s3 + $0xcc] sm:$0xf] }
  0xe4   :  { %2155 = vmatpush.bf16.msra.mxu2 %v4026_v22  ;;  %v4046_v22 = vor.u32 %v4827_v14, %v4043_v6  ;;  %v1452_v27 = vadd.f32 %v5249_v11, %v1439_v15  ;;  %v4011_v11 = vld [vmem:[%s5779_s3 + $0x70] sm:$0xf0]  ;;  %v4067_v24 = vld [vmem:[%s5779_s3 + $0xd8] sm:$0xf0]  ;;  %v4824_v6 = vld [vmem:[%s5779_s3 + $0x8c] sm:$0xf] }
  0xe5   :  { %v4014_v38 = vor.u32 %v4819_v32, %v4011_v11  ;;  %v4035_v15 = vld [vmem:[%s5779_s3 + $0x98] sm:$0xf0] }
  0xe6   :  { %1732 = vmatpush.bf16.msra.mxu0 %v3862_v23  ;;  %v4823_v23 = vld [vmem:[%s5779_s3 + $0x84] sm:$0xf]  ;;  %v1465_v33 = vadd.f32 %v5251_v18, %v1452_v27  ;;  %v3995_v18 = vld [vmem:[%s5779_s3 + $0x50] sm:$0xf0]  ;;  %v4003_v32 = vld [vmem:[%s5779_s3 + $0x58] sm:$0xf0] }
  0xe7   :  { %1745 = vmatpush.bf16.msra.mxu1 %v3926_v26  ;;  %v4027_v26 = vld [vmem:[%s5779_s3 + $0x90] sm:$0xf0]  ;;  %v3998_v47 = vor.u32 %v4815_v40, %v3995_v18  ;;  %v4869_v40 = vld [vmem:[%s5779_s3 + $0x1ec] sm:$0xf0]  ;;  %v4867_v18 = vld [vmem:[%s5779_s3 + $0x1e4] sm:$0xf] }
  0xe8   :  { %2156 = vmatpush.bf16.msra.mxu2 %v4010_v35  ;;  %v4030_v28 = vor.u32 %v4823_v23, %v4027_v26  ;;  %v4033_v35 = vld [vmem:[%s5779_s3 + $0x88] sm:$0xf]  ;;  %v4820_v23 = vld [vmem:[%s5779_s3 + $0x6c] sm:$0xf]  ;;  %v4019_v26 = vld [vmem:[%s5779_s3 + $0x78] sm:$0xf0] }
  0xea   :  { %1733 = vmatpush.bf16.msra.mxu0 %v3854_v37  ;;  %v4826_v37 = vld [vmem:[%s5779_s3 + $0x94] sm:$0xf0] }
  0xeb   :  { %1746 = vmatpush.bf16.msra.mxu1 %v3918_v36  ;;  %v4034_v43 = vor.u32 %v4826_v37, %v4033_v35  ;;  %v1478_v36 = vadd.f32 %v5275_v8, %v1465_v33  ;;  %v4818_v8 = vld [vmem:[%s5779_s3 + $0x54] sm:$0xf0]  ;;  %v3987_v35 = vld [vmem:[%s5779_s3 + $0x38] sm:$0xf0] }
  0xec   :  { %2157 = vmatpush.bf16.msra.mxu2 %v3994_v48  ;;  %v4001_v48 = vld [vmem:[%s5779_s3 + $0x48] sm:$0xf] }
  0xed   :  { %v1491_v54 = vadd.f32 %v5283_v19, %v1478_v36  ;;  %v4002_v21 = vor.u32 %v4818_v8, %v4001_v48  ;;  %v3963_v19 = vld [vmem:[%s5779_s3 + $0x10] sm:$0xf0]  ;;  %v4808_v48 = vld [vmem:[%s5779_s3 + $0xc] sm:$0xf]  ;;  %v3971_v8 = vld [vmem:[%s5779_s3 + $0x18] sm:$0xf0] }
  0xee   :  { %1734 = vmatpush.bf16.msra.mxu0 %v3846_v39 }
  0xef   :  { %1747 = vmatpush.bf16.msra.mxu1 %v3910_v53  ;;  %v1504_v59 = vadd.f32 %v5291_v34, %v1491_v54  ;;  %v4810_v34 = vld [vmem:[%s5779_s3 + $0x14] sm:$0xf0]  ;;  %v4187_v54 = vld [vmem:[%s5779_s3 + $0x1d0] sm:$0xf0] }
  0xf0   :  { %2158 = vmatpush.bf16.msra.mxu2 %v3978_v60  ;;  %v4836_v60 = vld [vmem:[%s5779_s3 + $0xec] sm:$0xf] }
  0xf1   :  { %v1517_v3 = vadd.f32 %v5299_v44, %v1504_v59  ;;  %v4051_v44 = vld [vmem:[%s5779_s3 + $0xb8] sm:$0xf0] }
  0xf2   :  { %1735 = vmatpush.bf16.msra.mxu0 %v3838_v61  ;;  %v1529_v29 = vpop.f32.mrf.mxu0  ;;  %v4083_v61 = vld [vmem:[%s5779_s3 + $0xf8] sm:$0xf0] }
  0xf3   :  { %1748 = vmatpush.bf16.msra.mxu1 %v3902_v0  ;;  %v1542_v13 = vpop.f32.mrf.mxu1  ;;  %v3966_v0 = vor.u32 %v4807_v58, %v3963_v19  ;;  %v4086_v2 = vor.u32 %v4836_v60, %v4083_v61  ;;  %v4861_v58 = vld [vmem:[%s5779_s3 + $0x1ac] sm:$0xf0]  ;;  %v4859_v19 = vld [vmem:[%s5779_s3 + $0x1a4] sm:$0xf]  ;;  %v4171_v60 = vld [vmem:[%s5779_s3 + $0x1b0] sm:$0xf0] }
  0xf4   :  { %2159 = vmatpush.bf16.msra.mxu2 %v3962_v25  ;;  %v1530_v25 = vadd.f32 %v1529_v29, %v1517_v3  ;;  %v4816_v29 = vld [vmem:[%s5779_s3 + $0x4c] sm:$0xf]  ;;  %v4170_v59 = vor.u32 %v4861_v58, %v4169_v57  ;;  %v4179_v58 = vld [vmem:[%s5779_s3 + $0x1b8] sm:$0xf0] }
  0xf5   :  { %1736 = vmatmul.bf16.vlgmr.msra.gmra.mxu0 %v5226_v31  ;;  %v4049_v31 = vld [vmem:[%s5779_s3 + $0xa8] sm:$0xf]  ;;  %v4006_v33 = vor.u32 %v4816_v29, %v4003_v32 }
  0xf6   :  { %2178 = vmatpush.bf16.msrb.mxu0 %v4078_v1  ;;  %1749 = vmatmul.bf16.vlgmr.msra.gmra.mxu1 %v5235_v17  ;;  %v4830_v17 = vld [vmem:[%s5779_s3 + $0xb4] sm:$0xf0]  ;;  %v3969_v1 = vld [vmem:[%s5779_s3 + $0x8] sm:$0xf]  ;;  %v1543_v10 = vadd.f32 %v1542_v13, %v1530_v25  ;;  %v4812_v13 = vld [vmem:[%s5779_s3 + $0x2c] sm:$0xf] }
  0xf7   :  { %v4050_v5 = vor.u32 %v4830_v17, %v4049_v31  ;;  %v3970_v4 = vor.u32 %v4810_v34, %v3969_v1  ;;  %v4857_v1 = vld [vmem:[%s5779_s3 + $0x18c] sm:$0xf0]  ;;  %v4855_v34 = vld [vmem:[%s5779_s3 + $0x184] sm:$0xf] }
  0xf8   :  { %2204 = vmatpush.bf16.msrb.mxu2 %v4082_v7  ;;  %v4070_v7 = vor.u32 %v4832_v30, %v4067_v24  ;;  %v4137_v30 = vld [vmem:[%s5779_s3 + $0x160] sm:$0xf]  ;;  %v4853_v24 = vld [vmem:[%s5779_s3 + $0x16c] sm:$0xf0] }
  0xfa   :  { %2179 = vmatpush.bf16.msrb.mxu0 %v4062_v9  ;;  %v1555_v45 = vpop.f32.mrf.mxu2  ;;  %v1531_v53 = vpop.f32.mrf.mxu0  ;;  %v4828_v9 = vld [vmem:[%s5779_s3 + $0xac] sm:$0xf] }
  0xfb   :  { %v1568_v39 = vpop.f32.mrf.mxu3  ;;  %v1544_v55 = vpop.f32.mrf.mxu1  ;;  %v4054_v12 = vor.u32 %v4828_v9, %v4051_v44  ;;  %v1556_v14 = vadd.f32 %v1555_v45, %v1543_v10  ;;  %v4203_v45 = vld [vmem:[%s5779_s3 + $0x1f0] sm:$0xf0]  ;;  %v4121_v44 = vld [vmem:[%s5779_s3 + $0x140] sm:$0xf]  ;;  %v4849_v10 = vld [vmem:[%s5779_s3 + $0x14c] sm:$0xf0] }
  0xfc   :  { %2205 = vmatpush.bf16.msrb.mxu2 %v4066_v16  ;;  %v4038_v16 = vor.u32 %v4824_v6, %v4035_v15  ;;  %v3974_v55 = vor.u32 %v4808_v48, %v3971_v8  ;;  %v4139_v9 = vld [vmem:[%s5779_s3 + $0x170] sm:$0xf0]  ;;  %v4847_v6 = vld [vmem:[%s5779_s3 + $0x144] sm:$0xf] }
  0xfd   :  { %v4123_v15 = vld [vmem:[%s5779_s3 + $0x150] sm:$0xf0] }
  0xfe   :  { %2180 = vmatpush.bf16.msrb.mxu0 %v4046_v22  ;;  %v1569_v22 = vadd.f32 %v1568_v39, %v1556_v14  ;;  %v4185_v39 = vld [vmem:[%s5779_s3 + $0x1c0] sm:$0xf] }
  0xff   :  { %v4186_v53 = vor.u32 %v4865_v51, %v4185_v39  ;;  %v4193_v39 = vld [vmem:[%s5779_s3 + $0x1c8] sm:$0xf]  ;;  %v4866_v51 = vld [vmem:[%s5779_s3 + $0x1d4] sm:$0xf0] }
 0x100   :  { %2206 = vmatpush.bf16.msrb.mxu2 %v4050_v5  ;;  %v4022_v5 = vor.u32 %v4820_v23, %v4019_v26  ;;  %v4126_v26 = vor.u32 %v4847_v6, %v4123_v15  ;;  %v4131_v6 = vld [vmem:[%s5779_s3 + $0x158] sm:$0xf0] }
 0x102   :  { %2181 = vmatpush.bf16.msrb.mxu0 %v4030_v28  ;;  %v1557_v62 = vpop.f32.mrf.mxu2 }
 0x103   :  { %v1570_v49 = vpop.f32.mrf.mxu3  ;;  %v4174_v62 = vor.u32 %v4859_v19, %v4171_v60 }
 0x104   :  { %2207 = vmatpush.bf16.msrb.mxu2 %v4034_v43  ;;  %v4155_v49 = vld [vmem:[%s5779_s3 + $0x190] sm:$0xf0] }
 0x105   :  { %v4158_v3 = vor.u32 %v4855_v34, %v4155_v49 }
 0x106   :  { %2182 = vmatpush.bf16.msrb.mxu0 %v4014_v38  ;;  %v4201_v38 = vld [vmem:[%s5779_s3 + $0x1e0] sm:$0xf] }
 0x107   :  { %v4202_v42 = vor.u32 %v4869_v40, %v4201_v38  ;;  %v4209_v38 = vld [vmem:[%s5779_s3 + $0x1e8] sm:$0xf]  ;;  %v4870_v40 = vld [vmem:[%s5779_s3 + $0x1f4] sm:$0xf0] }
 0x108   :  { %2208 = vmatpush.bf16.msrb.mxu2 %v4018_v46  ;;  %v3990_v46 = vor.u32 %v4812_v13, %v3987_v35  ;;  %v4839_v13 = vld [vmem:[%s5779_s3 + $0x104] sm:$0xf]  ;;  %v4210_v48 = vor.u32 %v4870_v40, %v4209_v38 }
 0x109   :  { %2165 = vmatpush.bf16.msra.mxu3 %v4202_v42 }
 0x10a   :  { %2183 = vmatpush.bf16.msrb.mxu0 %v3998_v47  ;;  %v4206_v47 = vor.u32 %v4867_v18, %v4203_v45  ;;  %v4868_v18 = vld [vmem:[%s5779_s3 + $0x1ec] sm:$0xf]  ;;  %v327_v45 = vperm.slane %v5304_v50, 1  ;;  %v4195_v50 = vld [vmem:[%s5779_s3 + $0x1d8] sm:$0xf0] }
 0x10c   :  { %2209 = vmatpush.bf16.msrb.mxu2 %v4002_v21  ;;  %2191 = vmatpush.bf16.msrb.mxu1 %v4206_v47  ;;  %v4190_v21 = vor.u32 %v4863_v52, %v4187_v54  ;;  %v4864_v52 = vld [vmem:[%s5779_s3 + $0x1cc] sm:$0xf]  ;;  %v4194_v54 = vor.u32 %v4866_v51, %v4193_v39 }
 0x10d   :  { %2166 = vmatpush.bf16.msra.mxu3 %v4186_v53 }
 0x10e   :  { %2184 = vmatpush.bf16.msrb.mxu0 %v3982_v20 }
 0x110   :  { %2210 = vmatpush.bf16.msrb.mxu2 %v3986_v63  ;;  %2192 = vmatpush.bf16.msrb.mxu1 %v4190_v21 }
 0x111   :  { %2167 = vmatpush.bf16.msra.mxu3 %v4170_v59 }
 0x112   :  { %2185 = vmatpush.bf16.msrb.mxu0 %v3966_v0  ;;  %v1581_v27 = vpop.f32.mrf.mxu0  ;;  %v4153_v0 = vld [vmem:[%s5779_s3 + $0x180] sm:$0xf] }
 0x113   :  { %v1582_v31 = vadd.f32 %v1581_v27, %v1569_v22  ;;  %v5455_v17 = vpop.f32.mrf.mxu1  ;;  %v4105_v27 = vld [vmem:[%s5779_s3 + $0x120] sm:$0xf] }
 0x114   :  { %2211 = vmatpush.bf16.msrb.mxu2 %v3970_v4  ;;  %2193 = vmatpush.bf16.msrb.mxu1 %v4174_v62  ;;  %v4851_v4 = vld [vmem:[%s5779_s3 + $0x164] sm:$0xf]  ;;  %v1595_v53 = vadd.f32 %v5455_v17, %v327_v45  ;;  %v4860_v17 = vld [vmem:[%s5779_s3 + $0x1ac] sm:$0xf]  ;;  %v4161_v62 = vld [vmem:[%s5779_s3 + $0x188] sm:$0xf] }
 0x115   :  { %v1754_v28 = vmax.f32 %v1582_v31, 0.0  ;;  %v4142_v14 = vor.u32 %v4851_v4, %v4139_v9  ;;  %v4845_v31 = vld [vmem:[%s5779_s3 + $0x12c] sm:$0xf0]  ;;  %v4182_v19 = vor.u32 %v4860_v17, %v4179_v58  ;;  %v4129_v9 = vld [vmem:[%s5779_s3 + $0x148] sm:$0xf] }
 0x116   :  { %2230 = vmatpush.bf16.msra.mxu0 %v4086_v2  ;;  %v4154_v2 = vor.u32 %v4857_v1, %v4153_v0  ;;  %v4106_v29 = vor.u32 %v4845_v31, %v4105_v27  ;;  %v4858_v0 = vld [vmem:[%s5779_s3 + $0x194] sm:$0xf0]  ;;  %v4856_v1 = vld [vmem:[%s5779_s3 + $0x18c] sm:$0xf]  ;;  %v4113_v31 = vld [vmem:[%s5779_s3 + $0x128] sm:$0xf] }
 0x117   :  { %v1756_v11 = vpack.c.bf16 %v1754_v28, %v1754_v28  ;;  %v4107_v28 = vld [vmem:[%s5779_s3 + $0x130] sm:$0xf0]  ;;  %v4162_v34 = vor.u32 %v4858_v0, %v4161_v62  ;;  %v4267_v62 = vld [vmem:[#allocation4 + $0x68] sm:$0xf0]  ;;  %v4323_v0 = vld [vmem:[#allocation4 + $0xd8] sm:$0xf0] }
 0x118   :  { %2168 = vmatpush.bf16.msra.mxu3 %v4154_v2  ;;  %2194 = vmatpush.bf16.msrb.mxu1 %v4158_v3  ;;  %v4145_v3 = vld [vmem:[%s5779_s3 + $0x168] sm:$0xf]  ;;  %v4885_v17 = vld [vmem:[#allocation4 + $0x74] sm:$0xf] }
 0x119   :  { %2160 = vmatmul.bf16.vlgmr.msra.gmra.mxu2 %v1756_v11  ;;  %2186 = vmatmul.bf16.vlgmr.msrb.gmra.mxu0 %v1756_v11 }
 0x11a   :  { %2231 = vmatpush.bf16.msra.mxu0 %v4070_v7  ;;  %v5469_v37 = vpop.f32.mrf.mxu2  ;;  %v1583_v43 = vpop.f32.mrf.mxu0  ;;  %v4138_v7 = vor.u32 %v4853_v24, %v4137_v30  ;;  %v4854_v30 = vld [vmem:[%s5779_s3 + $0x174] sm:$0xf0]  ;;  %v4852_v24 = vld [vmem:[%s5779_s3 + $0x16c] sm:$0xf] }
 0x11b   :  { %v5480_v36 = vpop.f32.mrf.mxu3  ;;  %v1596_v41 = vpop.f32.mrf.mxu1  ;;  %v4091_v43 = vld [vmem:[%s5779_s3 + $0x110] sm:$0xf0]  ;;  %v1608_v21 = vadd.f32 %v5469_v37, %v1595_v53 }
 0x11c   :  { %2169 = vmatpush.bf16.msra.mxu3 %v4138_v7  ;;  %2195 = vmatpush.bf16.msrb.mxu1 %v4142_v14  ;;  %v4211_v41 = vld [vmem:[%s5779_s3 + $0x1f8] sm:$0xf0]  ;;  %v4094_v47 = vor.u32 %v4839_v13, %v4091_v43  ;;  %v4146_v7 = vor.u32 %v4854_v30, %v4145_v3  ;;  %v4848_v14 = vld [vmem:[%s5779_s3 + $0x14c] sm:$0xf]  ;;  %v4842_v13 = vld [vmem:[%s5779_s3 + $0x114] sm:$0xf0] }
 0x11d   :  { %v4214_v8 = vor.u32 %v4868_v18, %v4211_v41  ;;  %v1621_v59 = vadd.f32 %v5480_v36, %v1608_v21  ;;  %v4163_v36 = vld [vmem:[%s5779_s3 + $0x198] sm:$0xf0]  ;;  %v4134_v27 = vor.u32 %v4848_v14, %v4131_v6  ;;  %v4840_v43 = vld [vmem:[%s5779_s3 + $0x10c] sm:$0xf]  ;;  %v4899_v21 = vld [vmem:[#allocation4 + $0xe4] sm:$0xf] }
 0x11e   :  { %2232 = vmatpush.bf16.msra.mxu0 %v4054_v12  ;;  %v4166_v2 = vor.u32 %v4856_v1, %v4163_v36  ;;  %v4902_v36 = vld [vmem:[#allocation4 + $0xf4] sm:$0xf0]  ;;  %v4259_v3 = vld [vmem:[#allocation4 + $0x58] sm:$0xf0]  ;;  %v4329_v30 = vld [vmem:[#allocation4 + $0xe0] sm:$0xf] }
 0x120   :  { %2196 = vmatpush.bf16.msrb.mxu1 %v4126_v26 }
 0x122   :  { %2233 = vmatpush.bf16.msra.mxu0 %v4038_v16  ;;  %v1609_v20 = vpop.f32.mrf.mxu2  ;;  %v4122_v16 = vor.u32 %v4849_v10, %v4121_v44  ;;  %v4850_v44 = vld [vmem:[%s5779_s3 + $0x154] sm:$0xf0] }
 0x123   :  { %v1622_v56 = vpop.f32.mrf.mxu3  ;;  %v4177_v20 = vld [vmem:[%s5779_s3 + $0x1a8] sm:$0xf]  ;;  %v4130_v26 = vor.u32 %v4850_v44, %v4129_v9  ;;  %v4886_v9 = vld [vmem:[#allocation4 + $0x74] sm:$0xf0] }
 0x124   :  { %2170 = vmatpush.bf16.msra.mxu3 %v4122_v16  ;;  %v4862_v56 = vld [vmem:[%s5779_s3 + $0x1b4] sm:$0xf0] }
 0x125   :  { %v4178_v57 = vor.u32 %v4862_v56, %v4177_v20  ;;  %v4331_v56 = vld [vmem:[#allocation4 + $0xe8] sm:$0xf0] }
 0x126   :  { %2234 = vmatpush.bf16.msra.mxu0 %v4022_v5  ;;  %v4843_v5 = vld [vmem:[%s5779_s3 + $0x124] sm:$0xf] }
 0x127   :  { %v4110_v32 = vor.u32 %v4843_v5, %v4107_v28  ;;  %v4846_v5 = vld [vmem:[%s5779_s3 + $0x134] sm:$0xf0]  ;;  %v4844_v28 = vld [vmem:[%s5779_s3 + $0x12c] sm:$0xf] }
 0x128   :  { %2171 = vmatpush.bf16.msra.mxu3 %v4106_v29 }
 0x129   :  { %2212 = vmatmul.bf16.vlgmr.msrb.gmra.mxu2 %v1756_v11  ;;  %2197 = vmatpush.bf16.msrb.mxu1 %v4110_v32  ;;  %v4114_v32 = vor.u32 %v4846_v5, %v4113_v31  ;;  %v4265_v31 = vld [vmem:[#allocation4 + $0x60] sm:$0xf]  ;;  %v4884_v5 = vld [vmem:[#allocation4 + $0x64] sm:$0xf0] }
 0x12a   :  { %2235 = vmatpush.bf16.msra.mxu0 %v4006_v33  ;;  %v4841_v33 = vld [vmem:[%s5779_s3 + $0x10c] sm:$0xf0] }
 0x12d   :  { %2198 = vmatpush.bf16.msrb.mxu1 %v4094_v47 }
 0x12e   :  { %2236 = vmatpush.bf16.msra.mxu0 %v3990_v46 }
 0x131   :  { %2243 = vmatpush.bf16.msra.mxu1 %v4214_v8 }
 0x132   :  { %2237 = vmatpush.bf16.msra.mxu0 %v3974_v55  ;;  %v5515_v61 = vpop.f32.mrf.mxu0  ;;  %v4198_v55 = vor.u32 %v4864_v52, %v4195_v50 }
 0x133   :  { %v5517_v63 = vpop.f32.mrf.mxu1  ;;  %v1634_v49 = vadd.f32 %v5515_v61, %v1621_v59  ;;  %v4147_v61 = vld [vmem:[%s5779_s3 + $0x178] sm:$0xf0]  ;;  %v4334_v59 = vor.u32 %v4899_v21, %v4331_v56  ;;  %v4889_v21 = vld [vmem:[#allocation4 + $0x94] sm:$0xf]  ;;  %v4241_v56 = vld [vmem:[#allocation4 + $0x30] sm:$0xf] }
 0x135   :  { %2238 = vmatmul.bf16.vlgmr.msra.gmra.mxu0 %v1756_v11  ;;  %v4089_v11 = vld [vmem:[%s5779_s3 + $0x100] sm:$0xf]  ;;  %2244 = vmatpush.bf16.msra.mxu1 %v4198_v55  ;;  %v1647_v15 = vadd.f32 %v5517_v63, %v1634_v49  ;;  %v4115_v63 = vld [vmem:[%s5779_s3 + $0x138] sm:$0xf0]  ;;  %v4881_v49 = vld [vmem:[#allocation4 + $0x54] sm:$0xf] }
 0x136   :  { %v4090_v42 = vor.u32 %v4841_v33, %v4089_v11  ;;  %v4118_v11 = vor.u32 %v4844_v28, %v4115_v63  ;;  %v4097_v33 = vld [vmem:[%s5779_s3 + $0x108] sm:$0xf]  ;;  %v4339_v55 = vld [vmem:[#allocation4 + $0xf8] sm:$0xf0]  ;;  %v4262_v14 = vor.u32 %v4881_v49, %v4259_v3  ;;  %v4893_v63 = vld [vmem:[#allocation4 + $0xb4] sm:$0xf] }
 0x137   :  { %v4098_v18 = vor.u32 %v4842_v13, %v4097_v33  ;;  %v4313_v13 = vld [vmem:[#allocation4 + $0xc0] sm:$0xf]  ;;  %v4283_v49 = vld [vmem:[#allocation4 + $0x88] sm:$0xf0]  ;;  %v4529_v3 = vld [vmem:[#allocation6 + $0xf0] sm:$0xf] }
 0x138   :  { %2172 = vmatpush.bf16.msra.mxu3 %v4090_v42 }
 0x139   :  { %2245 = vmatpush.bf16.msra.mxu1 %v4182_v19  ;;  %v4883_v19 = vld [vmem:[#allocation4 + $0x64] sm:$0xf] }
 0x13a   :  { %v5540_v25 = vpop.f32.mrf.mxu2  ;;  %v1635_v12 = vpop.f32.mrf.mxu0  ;;  %v4270_v1 = vor.u32 %v4883_v19, %v4267_v62  ;;  %v4297_v19 = vld [vmem:[#allocation4 + $0xa0] sm:$0xf]  ;;  %v4227_v62 = vld [vmem:[#allocation4 + $0x18] sm:$0xf0] }
 0x13b   :  { %v5557_v22 = vpop.f32.mrf.mxu3  ;;  %v1648_v23 = vpop.f32.mrf.mxu1  ;;  %v4150_v12 = vor.u32 %v4852_v24, %v4147_v61  ;;  %v1660_v29 = vadd.f32 %v5540_v25, %v1647_v15  ;;  %v4099_v25 = vld [vmem:[%s5779_s3 + $0x118] sm:$0xf0]  ;;  %v4900_v24 = vld [vmem:[#allocation4 + $0xe4] sm:$0xf0]  ;;  %v4273_v61 = vld [vmem:[#allocation4 + $0x70] sm:$0xf] }
 0x13c   :  { %2217 = vmatpush.bf16.msrb.mxu3 %v4210_v48  ;;  %v4102_v41 = vor.u32 %v4840_v43, %v4099_v25  ;;  %v4274_v6 = vor.u32 %v4886_v9, %v4273_v61  ;;  %v4321_v15 = vld [vmem:[#allocation4 + $0xd0] sm:$0xf]  ;;  %v4877_v25 = vld [vmem:[#allocation4 + $0x34] sm:$0xf] }
 0x13d   :  { %2246 = vmatpush.bf16.msra.mxu1 %v4166_v2  ;;  %v1673_v38 = vadd.f32 %v5557_v22, %v1660_v29  ;;  %v4901_v22 = vld [vmem:[#allocation4 + $0xf4] sm:$0xf]  ;;  %v4307_v29 = vld [vmem:[#allocation4 + $0xb8] sm:$0xf0]  ;;  %v4257_v43 = vld [vmem:[#allocation4 + $0x50] sm:$0xf] }
 0x13e   :  { %v4342_v20 = vor.u32 %v4901_v22, %v4339_v55  ;;  %2462 = vmatpush.bf16.msra.mxu2 %v4274_v6  ;;  %v4465_v9 = vld [vmem:[#allocation6 + $0x70] sm:$0xf] }
 0x140   :  { %2218 = vmatpush.bf16.msrb.mxu3 %v4194_v54 }
 0x141   :  { %2247 = vmatpush.bf16.msra.mxu1 %v4150_v12  ;;  %v4315_v12 = vld [vmem:[#allocation4 + $0xc8] sm:$0xf0] }
 0x142   :  { %v1661_v35 = vpop.f32.mrf.mxu2 }
 0x143   :  { %v1674_v46 = vpop.f32.mrf.mxu3 }
 0x144   :  { %2219 = vmatpush.bf16.msrb.mxu3 %v4178_v57  ;;  %v4275_v57 = vld [vmem:[#allocation4 + $0x78] sm:$0xf0] }
 0x145   :  { %2248 = vmatpush.bf16.msra.mxu1 %v4134_v27 }
 0x148   :  { %2220 = vmatpush.bf16.msrb.mxu3 %v4162_v34  ;;  %v4337_v34 = vld [vmem:[#allocation4 + $0xf0] sm:$0xf] }
 0x149   :  { %2249 = vmatpush.bf16.msra.mxu1 %v4118_v11  ;;  %v4338_v2 = vor.u32 %v4902_v36, %v4337_v34  ;;  %v4266_v11 = vor.u32 %v4884_v5, %v4265_v31  ;;  %v4289_v31 = vld [vmem:[#allocation4 + $0x90] sm:$0xf]  ;;  %v4890_v5 = vld [vmem:[#allocation4 + $0x94] sm:$0xf0] }
 0x14b   :  { %2463 = vmatpush.bf16.msra.mxu2 %v4266_v11  ;;  %v4233_v11 = vld [vmem:[#allocation4 + $0x20] sm:$0xf] }
 0x14c   :  { %2221 = vmatpush.bf16.msrb.mxu3 %v4146_v7  ;;  %v4330_v7 = vor.u32 %v4900_v24, %v4329_v30  ;;  %v4950_v24 = vld [vmem:[#allocation6 + $0xf4] sm:$0xf0] }
 0x14d   :  { %2250 = vmatpush.bf16.msra.mxu1 %v4102_v41  ;;  %v4310_v41 = vor.u32 %v4893_v63, %v4307_v29  ;;  %v4290_v63 = vor.u32 %v4890_v5, %v4289_v31  ;;  %v4946_v29 = vld [vmem:[#allocation6 + $0xd4] sm:$0xf0]  ;;  %v4917_v31 = vld [vmem:[%s5783_s7 + $0x70] sm:$0xff] }
 0x14e   :  { %v4909_v5 = vld [vmem:[%s5783_s7 + $0x30] sm:$0xff] }
 0x150   :  { %2222 = vmatpush.bf16.msrb.mxu3 %v4130_v26  ;;  %v4898_v26 = vld [vmem:[#allocation4 + $0xd4] sm:$0xf0] }
 0x152   :  { %v1685_v37 = vpop.f32.mrf.mxu0 }
 0x153   :  { %v1698_v60 = vpop.f32.mrf.mxu1  ;;  %v1686_v42 = vadd.f32 %v1685_v37, %v1673_v38  ;;  %v4278_v37 = vor.u32 %v4885_v17, %v4275_v57  ;;  %v4243_v38 = vld [vmem:[#allocation4 + $0x38] sm:$0xf0]  ;;  %v4878_v17 = vld [vmem:[#allocation4 + $0x34] sm:$0xf0] }
 0x154   :  { %2223 = vmatpush.bf16.msrb.mxu3 %v4114_v32  ;;  %v4322_v32 = vor.u32 %v4898_v26, %v4321_v15  ;;  %v4291_v57 = vld [vmem:[#allocation4 + $0x98] sm:$0xf0]  ;;  %v4521_v15 = vld [vmem:[#allocation6 + $0xe0] sm:$0xf] }
 0x155   :  { %v1699_v45 = vadd.f32 %v1698_v60, %v1686_v42  ;;  %v4897_v60 = vld [vmem:[#allocation4 + $0xd4] sm:$0xf]  ;;  %2488 = vmatpush.bf16.msrb.mxu0 %v4278_v37  ;;  %v4891_v42 = vld [vmem:[#allocation4 + $0xa4] sm:$0xf] }
 0x158   :  { %2224 = vmatpush.bf16.msrb.mxu3 %v4098_v18 }
 0x159   :  { %2489 = vmatpush.bf16.msrb.mxu0 %v4270_v1  ;;  %v4294_v1 = vor.u32 %v4889_v21, %v4291_v57  ;;  %v4441_v21 = vld [vmem:[#allocation6 + $0x40] sm:$0xf] }
 0x15a   :  { %v1711_v4 = vpop.f32.mrf.mxu2  ;;  %v1687_v10 = vpop.f32.mrf.mxu0  ;;  %v4489_v57 = vld [vmem:[#allocation6 + $0xa0] sm:$0xf] }
 0x15b   :  { %v1724_v16 = vpop.f32.mrf.mxu3  ;;  %v1700_v23 = vpop.f32.mrf.mxu1  ;;  %v1712_v46 = vadd.f32 %v1711_v4, %v1699_v45  ;;  %v4326_v4 = vor.u32 %v4897_v60, %v4323_v0  ;;  %v4895_v10 = vld [vmem:[#allocation4 + $0xc4] sm:$0xf]  ;;  %v4299_v45 = vld [vmem:[#allocation4 + $0xa8] sm:$0xf0]  ;;  %v4873_v60 = vld [vmem:[#allocation4 + $0x14] sm:$0xf]  ;;  %v4242_v0 = vor.u32 %v4878_v17, %v4241_v56 }
 0x15c   :  { %v4251_v23 = vld [vmem:[#allocation4 + $0x48] sm:$0xf0]  ;;  %v4318_v28 = vor.u32 %v4895_v10, %v4315_v12  ;;  %v4302_v55 = vor.u32 %v4891_v42, %v4299_v45  ;;  %v4230_v30 = vor.u32 %v4873_v60, %v4227_v62  ;;  %v4934_v10 = vld [vmem:[#allocation6 + $0x74] sm:$0xf0]  ;;  %v4944_v42 = vld [vmem:[#allocation6 + $0xc4] sm:$0xf0] }
 0x15d   :  { %v1725_v47 = vadd.f32 %v1724_v16, %v1712_v46  ;;  %v4879_v16 = vld [vmem:[#allocation4 + $0x44] sm:$0xf]  ;;  %2490 = vmatpush.bf16.msrb.mxu0 %v4262_v14  ;;  %v4530_v14 = vor.u32 %v4950_v24, %v4529_v3  ;;  %v4928_v56 = vld [vmem:[#allocation6 + $0x44] sm:$0xf0]  ;;  %v4926_v60 = vld [vmem:[#allocation6 + $0x34] sm:$0xf0] }
 0x15e   :  { %v4254_v33 = vor.u32 %v4879_v16, %v4251_v23  ;;  %v4948_v16 = vld [vmem:[#allocation6 + $0xe4] sm:$0xf0]  ;;  %v4466_v23 = vor.u32 %v4934_v10, %v4465_v9  ;;  %v4442_v17 = vor.u32 %v4928_v56, %v4441_v21  ;;  %v1822_v10 = vld [vmem:[%s5780_s4] sm:$0xf] }
 0x15f   :  { %v4936_v24 = vld [vmem:[#allocation6 + $0x84] sm:$0xf0] }
 0x161   :  { %2491 = vmatpush.bf16.msrb.mxu0 %v4254_v33  ;;  %v4876_v33 = vld [vmem:[#allocation4 + $0x24] sm:$0xf0] }
 0x162   :  { %v1713_v35 = vpop.f32.mrf.mxu2 }
 0x163   :  { %v1726_v40 = vpop.f32.mrf.mxu3  ;;  %v4896_v35 = vld [vmem:[#allocation4 + $0xc4] sm:$0xf0] }
 0x164   :  { %v4882_v40 = vld [vmem:[#allocation4 + $0x54] sm:$0xf0]  ;;  %v4314_v46 = vor.u32 %v4896_v35, %v4313_v13  ;;  %v4457_v13 = vld [vmem:[#allocation6 + $0x60] sm:$0xf]  ;;  %v4234_v35 = vor.u32 %v4876_v33, %v4233_v11 }
 0x165   :  { %v4258_v18 = vor.u32 %v4882_v40, %v4257_v43  ;;  %v4932_v43 = vld [vmem:[#allocation6 + $0x64] sm:$0xf0] }
 0x166   :  { %v4888_v40 = vld [vmem:[#allocation4 + $0x84] sm:$0xf0] }
 0x167   :  { %2464 = vmatpush.bf16.msra.mxu2 %v4258_v18  ;;  %v4505_v18 = vld [vmem:[#allocation6 + $0xc0] sm:$0xf] }
 0x168   :  { %v4506_v45 = vor.u32 %v4944_v42, %v4505_v18  ;;  %v1827_v18 = vperm.slane %v1822_v10, 3  ;;  %v4906_v42 = vld [vmem:[%s5783_s7 + $0x18] sm:$0xff] }
 0x172   :  { %v1737_v48 = vpop.f32.mrf.mxu0 }
 0x173   :  { %v1738_v8 = vadd.f32 %v1737_v48, %v1725_v47  ;;  %v1750_v39 = vpop.f32.mrf.mxu1  ;;  %v4305_v47 = vld [vmem:[#allocation4 + $0xb0] sm:$0xf] }
 0x175   :  { %v1751_v51 = vadd.f32 %v1750_v39, %v1738_v8  ;;  %v4246_v8 = vor.u32 %v4877_v25, %v4243_v38  ;;  %v4894_v39 = vld [vmem:[#allocation4 + $0xb4] sm:$0xf0]  ;;  %v4458_v25 = vor.u32 %v4932_v43, %v4457_v13  ;;  %v4281_v38 = vld [vmem:[#allocation4 + $0x80] sm:$0xf] }
 0x177   :  { %v1755_v52 = vmax.f32 %v1751_v51, 0.0  ;;  %v4249_v51 = vld [vmem:[#allocation4 + $0x40] sm:$0xf]  ;;  %2492 = vmatpush.bf16.msrb.mxu0 %v4246_v8 }
 0x179   :  { %v1757_v50 = vpack.c.bf16 %v1755_v52, %v1755_v52  ;;  %v4880_v52 = vld [vmem:[#allocation4 + $0x44] sm:$0xf0] }
 0x17a   :  { %v1739_v53 = vpop.f32.mrf.mxu0  ;;  %v4250_v22 = vor.u32 %v4880_v52, %v4249_v51  ;;  %v4497_v52 = vld [vmem:[#allocation6 + $0xb0] sm:$0xf] }
 0x17b   :  { %v1752_v54 = vpop.f32.mrf.mxu1  ;;  %2173 = vmatmul.bf16.vlgmr.msra.gmra.mxu3 %v1757_v50  ;;  %2199 = vmatmul.bf16.vlgmr.msrb.gmra.mxu1 %v1757_v50  ;;  %v4235_v53 = vld [vmem:[#allocation4 + $0x28] sm:$0xf0] }
 0x17c   :  { %2501 = vmatpush.bf16.msrb.mxu1 %v4342_v20  ;;  %2475 = vmatpush.bf16.msra.mxu3 %v4338_v2  ;;  %v4306_v20 = vor.u32 %v4894_v39, %v4305_v47  ;;  %v4887_v2 = vld [vmem:[#allocation4 + $0x84] sm:$0xf]  ;;  %v4874_v47 = vld [vmem:[#allocation4 + $0x14] sm:$0xf0] }
 0x17d   :  { %2465 = vmatpush.bf16.msra.mxu2 %v4250_v22  ;;  %v4286_v12 = vor.u32 %v4887_v2, %v4283_v49  ;;  %v4930_v39 = vld [vmem:[#allocation6 + $0x54] sm:$0xf0]  ;;  %v4217_v22 = vld [vmem:[#allocation4] sm:$0xf]  ;;  %v4924_v49 = vld [vmem:[#allocation6 + $0x24] sm:$0xf0] }
 0x17e   :  { %v4425_v2 = vld [vmem:[#allocation6 + $0x20] sm:$0xf] }
 0x17f   :  { %v4426_v3 = vor.u32 %v4924_v49, %v4425_v2  ;;  %v4903_v2 = vld [vmem:[%s5783_s7] sm:$0xff]  ;;  %v4933_v49 = vld [vmem:[#allocation6 + $0x74] sm:$0xf] }
 0x180   :  { %2502 = vmatpush.bf16.msrb.mxu1 %v4334_v59  ;;  %2476 = vmatpush.bf16.msra.mxu3 %v4330_v7  ;;  %v4892_v59 = vld [vmem:[#allocation4 + $0xa4] sm:$0xf0]  ;;  %v4219_v7 = vld [vmem:[#allocation4 + $0x8] sm:$0xf0] }
 0x181   :  { %v4298_v34 = vor.u32 %v4892_v59, %v4297_v19  ;;  %2466 = vmatpush.bf16.msra.mxu2 %v4242_v0  ;;  %v4433_v59 = vld [vmem:[#allocation6 + $0x30] sm:$0xf] }
 0x182   :  { %v4434_v62 = vor.u32 %v4926_v60, %v4433_v59  ;;  %v4481_v0 = vld [vmem:[#allocation6 + $0x90] sm:$0xf]  ;;  %v4958_v59 = vld [vmem:[#allocation7 + $0x38] sm:$0xff]  ;;  %v4904_v60 = vld [vmem:[%s5783_s7 + $0x8] sm:$0xff] }
 0x184   :  { %2503 = vmatpush.bf16.msrb.mxu1 %v4326_v4  ;;  %2477 = vmatpush.bf16.msra.mxu3 %v4322_v32  ;;  %v4871_v4 = vld [vmem:[#allocation4 + $0x4] sm:$0xf] }
 0x185   :  { %v4222_v6 = vor.u32 %v4871_v4, %v4219_v7  ;;  %2467 = vmatpush.bf16.msra.mxu2 %v4234_v35  ;;  %v4417_v7 = vld [vmem:[#allocation6 + $0x10] sm:$0xf] }
 0x188   :  { %2504 = vmatpush.bf16.msrb.mxu1 %v4318_v28  ;;  %2478 = vmatpush.bf16.msra.mxu3 %v4314_v46  ;;  %v4513_v28 = vld [vmem:[#allocation6 + $0xd0] sm:$0xf] }
 0x189   :  { %v4514_v32 = vor.u32 %v4946_v29, %v4513_v28  ;;  %v4225_v46 = vld [vmem:[#allocation4 + $0x10] sm:$0xf]  ;;  %v1824_v28 = vperm.slane %v1822_v10, 0 }
 0x18a   :  { %v4226_v8 = vor.u32 %v4874_v47, %v4225_v46 }
 0x18b   :  { %2225 = vmatmul.bf16.vlgmr.msrb.gmra.mxu3 %v1757_v50  ;;  %2251 = vmatmul.bf16.vlgmr.msra.gmra.mxu1 %v1757_v50  ;;  %v4875_v50 = vld [vmem:[#allocation4 + $0x24] sm:$0xf] }
 0x18c   :  { %2505 = vmatpush.bf16.msrb.mxu1 %v4310_v41  ;;  %v4238_v37 = vor.u32 %v4875_v50, %v4235_v53  ;;  %2479 = vmatpush.bf16.msra.mxu3 %v4306_v20  ;;  %v4282_v41 = vor.u32 %v4888_v40, %v4281_v38  ;;  %v4942_v50 = vld [vmem:[#allocation6 + $0xb4] sm:$0xf0]  ;;  %v4907_v38 = vld [vmem:[%s5783_s7 + $0x20] sm:$0xff] }
 0x18d   :  { %2468 = vmatpush.bf16.msra.mxu2 %v4226_v8  ;;  %v4498_v53 = vor.u32 %v4942_v50, %v4497_v52  ;;  %v4905_v8 = vld [vmem:[%s5783_s7 + $0x10] sm:$0xff]  ;;  %v4912_v50 = vld [vmem:[%s5783_s7 + $0x48] sm:$0xff] }
 0x18e   :  { %2493 = vmatpush.bf16.msrb.mxu0 %v4238_v37  ;;  %v4940_v37 = vld [vmem:[#allocation6 + $0xa4] sm:$0xf0] }
 0x18f   :  { %v4490_v19 = vor.u32 %v4940_v37, %v4489_v57  ;;  %v4531_v37 = vld [vmem:[#allocation6 + $0xf8] sm:$0xf0] }
 0x190   :  { %2506 = vmatpush.bf16.msrb.mxu1 %v4302_v55  ;;  %2480 = vmatpush.bf16.msra.mxu3 %v4298_v34  ;;  %v4872_v55 = vld [vmem:[#allocation4 + $0x4] sm:$0xf0] }
 0x191   :  { %v4218_v20 = vor.u32 %v4872_v55, %v4217_v22 }
 0x192   :  { %2494 = vmatpush.bf16.msrb.mxu0 %v4230_v30  ;;  %v4473_v30 = vld [vmem:[#allocation6 + $0x80] sm:$0xf] }
 0x193   :  { %2469 = vmatpush.bf16.msra.mxu2 %v4218_v20  ;;  %v4474_v4 = vor.u32 %v4936_v24, %v4473_v30  ;;  %v4911_v20 = vld [vmem:[%s5783_s7 + $0x40] sm:$0xff]  ;;  %v4945_v24 = vld [vmem:[#allocation6 + $0xd4] sm:$0xf] }
 0x194   :  { %2507 = vmatpush.bf16.msrb.mxu1 %v4294_v1  ;;  %2481 = vmatpush.bf16.msra.mxu3 %v4290_v63  ;;  %v4938_v1 = vld [vmem:[#allocation6 + $0x94] sm:$0xf0] }
 0x195   :  { %v4482_v34 = vor.u32 %v4938_v1, %v4481_v0  ;;  %v4523_v0 = vld [vmem:[#allocation6 + $0xe8] sm:$0xf0] }
 0x196   :  { %v5687_v58 = vpop.f32.mrf.mxu0  ;;  %2495 = vmatpush.bf16.msrb.mxu0 %v4222_v6 }
 0x198   :  { %2508 = vmatpush.bf16.msrb.mxu1 %v4286_v12  ;;  %2482 = vmatpush.bf16.msra.mxu3 %v4282_v41  ;;  %v4409_v12 = vld [vmem:[#allocation6] sm:$0xf] }
 0x19a   :  { %2901 = vmatpush.bf16.msra.mxu0 %v4466_v23  ;;  %v4910_v23 = vld [vmem:[%s5783_s7 + $0x38] sm:$0xff] }
 0x19b   :  { %2650 = vmatpush.bf16.msrb.mxu2 %v4910_v23  ;;  %v4929_v23 = vld [vmem:[#allocation6 + $0x54] sm:$0xf] }
 0x19c   :  { %v5689_v44 = vpop.f32.mrf.mxu2  ;;  %2914 = vmatpush.bf16.msra.mxu1 %v4530_v14  ;;  %v4920_v14 = vld [vmem:[#allocation6 + $0x4] sm:$0xf0] }
 0x19d   :  { %v4410_v6 = vor.u32 %v4920_v14, %v4409_v12  ;;  %v2162_v11 = vadd.f32 %v5689_v44, %v1824_v28  ;;  %v4914_v44 = vld [vmem:[%s5783_s7 + $0x58] sm:$0xff]  ;;  %v4943_v14 = vld [vmem:[#allocation6 + $0xc4] sm:$0xf] }
 0x19e   :  { %v2189_v27 = vpop.f32.mrf.mxu0  ;;  %2902 = vmatpush.bf16.msra.mxu0 %v4458_v25  ;;  %v4915_v25 = vld [vmem:[%s5783_s7 + $0x60] sm:$0xff] }
 0x19f   :  { %v4522_v27 = vor.u32 %v4948_v16, %v4521_v15  ;;  %v1825_v15 = vperm.slane %v1822_v10, 1  ;;  %v4918_v16 = vld [vmem:[%s5783_s7 + $0x78] sm:$0xff]  ;;  %2651 = vmatpush.bf16.msrb.mxu2 %v4909_v5 }
 0x1a0   :  { %2663 = vmatpush.bf16.msrb.mxu3 %v4918_v16  ;;  %v4955_v16 = vld [vmem:[#allocation7 + $0x20] sm:$0xff]  ;;  %v4499_v5 = vld [vmem:[#allocation6 + $0xb8] sm:$0xf0] }
 0x1a1   :  { %2915 = vmatpush.bf16.msra.mxu1 %v4522_v27 }
 0x1a4   :  { %v2163_v48 = vpop.f32.mrf.mxu2  ;;  %2664 = vmatpush.bf16.msrb.mxu3 %v4917_v31  ;;  %v4941_v31 = vld [vmem:[#allocation6 + $0xb4] sm:$0xf] }
 0x1a5   :  { %2916 = vmatpush.bf16.msra.mxu1 %v4514_v32  ;;  %v4449_v48 = vld [vmem:[#allocation6 + $0x50] sm:$0xf]  ;;  %v4916_v32 = vld [vmem:[%s5783_s7 + $0x68] sm:$0xff]  ;;  %v4502_v28 = vor.u32 %v4941_v31, %v4499_v5  ;;  %v4963_v5 = vld [vmem:[#allocation7 + $0x60] sm:$0xff] }
 0x1a6   :  { %v4450_v51 = vor.u32 %v4930_v39, %v4449_v48  ;;  %v4913_v48 = vld [vmem:[%s5783_s7 + $0x50] sm:$0xff]  ;;  %v1826_v39 = vperm.slane %v1822_v10, 2  ;;  %v4459_v10 = vld [vmem:[#allocation6 + $0x68] sm:$0xf0] }
 0x1a7   :  { %v4964_v31 = vld [vmem:[#allocation7 + $0x68] sm:$0xff] }
 0x1a8   :  { %2903 = vmatpush.bf16.msra.mxu0 %v4450_v51  ;;  %2665 = vmatpush.bf16.msrb.mxu3 %v4916_v32  ;;  %v4443_v32 = vld [vmem:[#allocation6 + $0x48] sm:$0xf0] }
 0x1a9   :  { %2917 = vmatpush.bf16.msra.mxu1 %v4506_v45 }
 0x1ac   :  { %v5693_v36 = vpop.f32.mrf.mxu2  ;;  %2904 = vmatpush.bf16.msra.mxu0 %v4442_v17  ;;  %2666 = vmatpush.bf16.msrb.mxu3 %v4915_v25  ;;  %v4435_v25 = vld [vmem:[#allocation6 + $0x38] sm:$0xf0] }
 0x1ad   :  { %2918 = vmatpush.bf16.msra.mxu1 %v4498_v53 }
 0x1b0   :  { %2905 = vmatpush.bf16.msra.mxu0 %v4434_v62  ;;  %2667 = vmatpush.bf16.msrb.mxu3 %v4914_v44  ;;  %v4947_v62 = vld [vmem:[#allocation6 + $0xe4] sm:$0xf]  ;;  %v4952_v44 = vld [vmem:[#allocation7 + $0x8] sm:$0xff] }
 0x1b1   :  { %2919 = vmatpush.bf16.msra.mxu1 %v4490_v19  ;;  %v4526_v1 = vor.u32 %v4947_v62, %v4523_v0 }
 0x1b2   :  { %v5691_v54 = vpop.f32.mrf.mxu0 }
 0x1b3   :  { %v2240_v46 = vadd.f32 %v5691_v54, %v1827_v18  ;;  %v2214_v54 = vadd.f32 %v5693_v36, %v1826_v39  ;;  %v4949_v36 = vld [vmem:[#allocation6 + $0xf4] sm:$0xf]  ;;  %v4483_v18 = vld [vmem:[#allocation6 + $0x98] sm:$0xf0]  ;;  %v4951_v39 = vld [vmem:[#allocation7] sm:$0xff] }
 0x1b4   :  { %v2215_v26 = vpop.f32.mrf.mxu2  ;;  %2906 = vmatpush.bf16.msra.mxu0 %v4426_v3  ;;  %2668 = vmatpush.bf16.msrb.mxu3 %v4913_v48  ;;  %v4534_v19 = vor.u32 %v4949_v36, %v4531_v37  ;;  %v4467_v3 = vld [vmem:[#allocation6 + $0x78] sm:$0xf0]  ;;  %v4475_v48 = vld [vmem:[#allocation6 + $0x88] sm:$0xf0] }
 0x1b5   :  { %2920 = vmatpush.bf16.msra.mxu1 %v4482_v34  ;;  %v2188_v26 = vadd.f32 %v5687_v58, %v1825_v15  ;;  %v4908_v58 = vld [vmem:[%s5783_s7 + $0x28] sm:$0xff]  ;;  %v4957_v34 = vld [vmem:[#allocation7 + $0x30] sm:$0xff]  ;;  %v4470_v30 = vor.u32 %v4933_v49, %v4467_v3 }
 0x1b6   :  { %2652 = vmatpush.bf16.msrb.mxu2 %v4908_v58 }
 0x1b8   :  { %2669 = vmatpush.bf16.msrb.mxu3 %v4912_v50 }
 0x1b9   :  { %2921 = vmatpush.bf16.msra.mxu1 %v4474_v4  ;;  %v4515_v4 = vld [vmem:[#allocation6 + $0xd8] sm:$0xf0] }
 0x1ba   :  { %v2241_v61 = vpop.f32.mrf.mxu0  ;;  %2653 = vmatpush.bf16.msrb.mxu2 %v4907_v38 }
 0x1bb   :  { %v4922_v61 = vld [vmem:[#allocation6 + $0x14] sm:$0xf0] }
 0x1bc   :  { %v4418_v9 = vor.u32 %v4922_v61, %v4417_v7  ;;  %2670 = vmatpush.bf16.msrb.mxu3 %v4911_v20  ;;  %v4518_v7 = vor.u32 %v4945_v24, %v4515_v4  ;;  %v4956_v61 = vld [vmem:[#allocation7 + $0x28] sm:$0xff]  ;;  %v2735_v24 = vld [vmem:[%s5786_s10] sm:$0x3] }
 0x1be   :  { %2907 = vmatpush.bf16.msra.mxu0 %v4418_v9  ;;  %2654 = vmatpush.bf16.msrb.mxu2 %v4906_v42  ;;  %v4931_v9 = vld [vmem:[#allocation6 + $0x64] sm:$0xf] }
 0x1bf   :  { %v4462_v12 = vor.u32 %v4931_v9, %v4459_v10  ;;  %v4923_v42 = vld [vmem:[#allocation6 + $0x24] sm:$0xf] }
 0x1c2   :  { %2908 = vmatpush.bf16.msra.mxu0 %v4410_v6  ;;  %2655 = vmatpush.bf16.msrb.mxu2 %v4905_v8  ;;  %v4507_v6 = vld [vmem:[#allocation6 + $0xc8] sm:$0xf0] }
 0x1c3   :  { %v4510_v15 = vor.u32 %v4943_v14, %v4507_v6 }
 0x1c6   :  { %2656 = vmatpush.bf16.msrb.mxu2 %v4904_v60 }
 0x1ca   :  { %2657 = vmatpush.bf16.msrb.mxu2 %v4903_v2 }
 0x1f8   :  { %v2200_v27 = vpop.f32.mrf.mxu1 }
 0x1f9   :  { %v2201_v63 = vadd.f32 %v2200_v27, %v2188_v26  ;;  %v4451_v26 = vld [vmem:[#allocation6 + $0x58] sm:$0xf0] }
 0x1fa   :  { %v4454_v27 = vor.u32 %v4929_v23, %v4451_v26  ;;  %v4966_v26 = vld [vmem:[#allocation7 + $0x78] sm:$0xff] }
 0x1fb   :  { %v2257_v29 = vmax.f32 %v2201_v63, 0.0  ;;  %v4954_v63 = vld [vmem:[#allocation7 + $0x18] sm:$0xff] }
 0x1fd   :  { %v2261_v33 = vpack.c.bf16 %v2257_v29, %v2257_v29  ;;  %v4927_v29 = vld [vmem:[#allocation6 + $0x44] sm:$0xf] }
 0x1fe   :  { %v2174_v13 = vpop.f32.mrf.mxu3  ;;  %v4446_v58 = vor.u32 %v4927_v29, %v4443_v32  ;;  %v4960_v29 = vld [vmem:[#allocation7 + $0x48] sm:$0xff]  ;;  %v4959_v32 = vld [vmem:[#allocation7 + $0x40] sm:$0xff] }
 0x1ff   :  { %v2175_v35 = vadd.f32 %v2174_v13, %v2162_v11  ;;  %2483 = vmatmul.bf16.vlgmr.msra.gmra.mxu3 %v2261_v33  ;;  %2509 = vmatmul.bf16.vlgmr.msrb.gmra.mxu1 %v2261_v33  ;;  %v4939_v11 = vld [vmem:[#allocation6 + $0xa4] sm:$0xf]  ;;  %v4491_v33 = vld [vmem:[#allocation6 + $0xa8] sm:$0xf0] }
 0x200   :  { %v2202_v43 = vpop.f32.mrf.mxu1  ;;  %2940 = vmatpush.bf16.msra.mxu3 %v4534_v19  ;;  %v4494_v13 = vor.u32 %v4939_v11, %v4491_v33  ;;  %3102 = vmatpush.bf16.msrb.mxu1 %v4966_v26 }
 0x201   :  { %v2256_v40 = vmax.f32 %v2175_v35, 0.0  ;;  %v4953_v35 = vld [vmem:[#allocation7 + $0x10] sm:$0xff] }
 0x202   :  { %v4925_v43 = vld [vmem:[#allocation6 + $0x34] sm:$0xf] }
 0x203   :  { %v2260_v41 = vpack.c.bf16 %v2256_v40, %v2256_v40  ;;  %v4438_v38 = vor.u32 %v4925_v43, %v4435_v25  ;;  %v4937_v40 = vld [vmem:[#allocation6 + $0x94] sm:$0xf] }
 0x204   :  { %2941 = vmatpush.bf16.msra.mxu3 %v4526_v1 }
 0x205   :  { %2470 = vmatmul.bf16.vlgmr.msra.gmra.mxu2 %v2260_v41  ;;  %2496 = vmatmul.bf16.vlgmr.msrb.gmra.mxu0 %v2260_v41  ;;  %v4486_v41 = vor.u32 %v4937_v40, %v4483_v18 }
 0x206   :  { %v2176_v45 = vpop.f32.mrf.mxu3  ;;  %3089 = vmatpush.bf16.msrb.mxu0 %v4958_v59  ;;  %2927 = vmatpush.bf16.msra.mxu2 %v4470_v30 }
 0x207   :  { %v4427_v45 = vld [vmem:[#allocation6 + $0x28] sm:$0xf0] }
 0x208   :  { %v2252_v47 = vpop.f32.mrf.mxu1  ;;  %2942 = vmatpush.bf16.msra.mxu3 %v4518_v7 }
 0x209   :  { %v2253_v51 = vadd.f32 %v2252_v47, %v2240_v46  ;;  %v4430_v46 = vor.u32 %v4923_v42, %v4427_v45  ;;  %v4935_v47 = vld [vmem:[#allocation6 + $0x84] sm:$0xf] }
 0x20a   :  { %3090 = vmatpush.bf16.msrb.mxu0 %v4957_v34  ;;  %2928 = vmatpush.bf16.msra.mxu2 %v4462_v12  ;;  %v4478_v8 = vor.u32 %v4935_v47, %v4475_v48 }
 0x20b   :  { %v2259_v52 = vmax.f32 %v2253_v51, 0.0  ;;  %v4921_v51 = vld [vmem:[#allocation6 + $0x14] sm:$0xf] }
 0x20c   :  { %2943 = vmatpush.bf16.msra.mxu3 %v4510_v15 }
 0x20d   :  { %v5741_v53 = vpack.c.bf16 %v2259_v52, %v2259_v52  ;;  %v4419_v52 = vld [vmem:[#allocation6 + $0x18] sm:$0xf0] }
 0x20e   :  { %v2226_v22 = vpop.f32.mrf.mxu3  ;;  %3091 = vmatpush.bf16.msrb.mxu0 %v4956_v61  ;;  %2929 = vmatpush.bf16.msra.mxu2 %v4454_v27  ;;  %v4422_v50 = vor.u32 %v4921_v51, %v4419_v52  ;;  %v2737_v61 = vperm.slane %v2735_v24, 0  ;;  %v4965_v27 = vld [vmem:[#allocation7 + $0x70] sm:$0xff] }
 0x20f   :  { %v2227_v55 = vadd.f32 %v2226_v22, %v2214_v54  ;;  %2922 = vmatmul.bf16.vlgmr.msra.gmra.mxu1 %v5741_v53  ;;  %v4919_v54 = vld [vmem:[#allocation6 + $0x4] sm:$0xf]  ;;  %v4411_v22 = vld [vmem:[#allocation6 + $0x8] sm:$0xf0] }
 0x210   :  { %v2254_v21 = vpop.f32.mrf.mxu1  ;;  %2944 = vmatpush.bf16.msra.mxu3 %v4502_v28  ;;  %v4414_v20 = vor.u32 %v4919_v54, %v4411_v22  ;;  %3103 = vmatpush.bf16.msrb.mxu1 %v4965_v27  ;;  %v4962_v28 = vld [vmem:[#allocation7 + $0x58] sm:$0xff]  ;;  %v4976_v22 = vld [vmem:[%s5788_s12] ss:$0 sm:$0xff] }
 0x211   :  { %v2258_v56 = vmax.f32 %v2227_v55, 0.0  ;;  %v2296_v21 = vld [vmem:[%s5782_s6] sm:$0x3] }
 0x212   :  { %3092 = vmatpush.bf16.msrb.mxu0 %v4955_v16  ;;  %2930 = vmatpush.bf16.msra.mxu2 %v4446_v58  ;;  %v2298_v60 = vperm.slane %v2296_v21, 0  ;;  %v2676_v58 = vlaneseq }
 0x213   :  { %v5747_v17 = vpack.c.bf16 %v2258_v56, %v2258_v56  ;;  %v2299_v56 = vperm.slane %v2296_v21, 1 }
 0x214   :  { %2945 = vmatpush.bf16.msra.mxu3 %v4494_v13  ;;  %3104 = vmatpush.bf16.msrb.mxu1 %v4964_v31  ;;  %v2677_v11 = vand.u32 127, %v2676_v58 }
 0x215   :  { %2909 = vmatmul.bf16.vlgmr.msra.gmra.mxu0 %v5747_v17 }
 0x216   :  { %v2228_v57 = vpop.f32.mrf.mxu3  ;;  %3093 = vmatpush.bf16.msrb.mxu0 %v4954_v63  ;;  %2931 = vmatpush.bf16.msra.mxu2 %v4438_v38  ;;  %v4961_v63 = vld [vmem:[#allocation7 + $0x50] sm:$0xff]  ;;  %vm2678_vm0 = vcmp.lt.s32.totalorder %v2677_v11, 8 }
 0x218   :  { %2946 = vmatpush.bf16.msra.mxu3 %v4486_v41  ;;  %3105 = vmatpush.bf16.msrb.mxu1 %v4963_v5 }
 0x21a   :  { %3094 = vmatpush.bf16.msrb.mxu0 %v4953_v35  ;;  %2932 = vmatpush.bf16.msra.mxu2 %v4430_v46 }
 0x21c   :  { %2947 = vmatpush.bf16.msra.mxu3 %v4478_v8  ;;  %3106 = vmatpush.bf16.msrb.mxu1 %v4962_v28 }
 0x21e   :  { %3095 = vmatpush.bf16.msrb.mxu0 %v4952_v44  ;;  %2933 = vmatpush.bf16.msra.mxu2 %v4422_v50  ;;  %v2738_v44 = vperm.slane %v2735_v24, 1 }
 0x220   :  { %3107 = vmatpush.bf16.msrb.mxu1 %v4961_v63 }
 0x222   :  { %3096 = vmatpush.bf16.msrb.mxu0 %v4951_v39  ;;  %2934 = vmatpush.bf16.msra.mxu2 %v4414_v20 }
 0x224   :  { %3108 = vmatpush.bf16.msrb.mxu1 %v4960_v29 }
 0x228   :  { %3109 = vmatpush.bf16.msrb.mxu1 %v4959_v32 }
 0x27c   :  { %v2510_v55 = vpop.f32.mrf.mxu1 }
 0x282   :  { %v2484_v57 = vpop.f32.mrf.mxu3  ;;  %v2497_v36 = vpop.f32.mrf.mxu0 }
 0x283   :  { %v2498_v37 = vadd.f32 %v2497_v36, %v2299_v56 }
 0x284   :  { %v2512_v19 = vpop.f32.mrf.mxu1 }
 0x285   :  { %v2511_v59 = vadd.f32 %v2510_v55, %v2498_v37 }
 0x287   :  { %v2515_v62 = vmax.f32 %v2511_v59, 0.0 }
 0x288   :  { %v2471_v0 = vpop.f32.mrf.mxu2 }
 0x289   :  { %v2517_v1 = vpack.c.bf16 %v2515_v62, %v2515_v62  ;;  %v2472_v34 = vadd.f32 %v2471_v0, %v2298_v60 }
 0x28a   :  { %v2486_v2 = vpop.f32.mrf.mxu3  ;;  %v2499_v49 = vpop.f32.mrf.mxu0 }
 0x28b   :  { %v2485_v3 = vadd.f32 %v2484_v57, %v2472_v34  ;;  %2671 = vmatmul.bf16.vlgmr.msrb.gmra.mxu3 %v2517_v1 }
 0x28c   :  { %v2923_v30 = vpop.f32.mrf.mxu1 }
 0x28d   :  { %v2514_v4 = vmax.f32 %v2485_v3, 0.0 }
 0x28f   :  { %v2516_v7 = vpack.c.bf16 %v2514_v4, %v2514_v4 }
 0x290   :  { %v2473_v9 = vpop.f32.mrf.mxu2 }
 0x291   :  { %2658 = vmatmul.bf16.vlgmr.msrb.gmra.mxu2 %v2516_v7 }
 0x292   :  { %v2910_v10 = vpop.f32.mrf.mxu0 }
 0x293   :  { %v2911_v12 = vadd.f32 %v2910_v10, %v2737_v61 }
 0x294   :  { %v2925_v14 = vpop.f32.mrf.mxu1 }
 0x295   :  { %v2924_v6 = vadd.f32 %v2923_v30, %v2911_v12 }
 0x297   :  { %v2953_v15 = vmax.f32 %v2924_v6, 0.0 }
 0x299   :  { %v2955_v16 = vpack.c.bf16 %v2953_v15, %v2953_v15 }
 0x29a   :  { %v2912_v23 = vpop.f32.mrf.mxu0 }
 0x29b   :  { %2948 = vmatmul.bf16.vlgmr.msra.gmra.mxu3 %v5741_v53  ;;  %3097 = vmatmul.bf16.vlgmr.msrb.gmra.mxu0 %v2955_v16 }
 0x2a1   :  { %2935 = vmatmul.bf16.vlgmr.msra.gmra.mxu2 %v5747_v17  ;;  %v4975_v17 = vld [vmem:[%s5784_s8] ss:$0 sm:$0xff] }
 0x30e   :  { %v2672_v53 = vpop.f32.mrf.mxu3 }
 0x314   :  { %v2659_v33 = vpop.f32.mrf.mxu2 }
 0x315   :  { %v2660_v13 = vadd.f32 %v4975_v17, %v2659_v33 }
 0x316   :  { %v2674_v35 = vpop.f32.mrf.mxu3 }
 0x317   :  { %v2673_v43 = vadd.f32 %v2672_v53, %v2660_v13 }
 0x318   :  { %v3098_v25 = vpop.f32.mrf.mxu0 }
 0x319   :  { %v2679_v38 = vsel %vm2678_vm0, %v2673_v43, -inf  ;;  %v3099_v55 = vadd.f32 %v4976_v22, %v3098_v25 }
 0x31a   :  { %2680 = vmax.xlane.f32.xlu0 %v2679_v38 }
 0x31c   :  { %v2661_v40 = vpop.f32.mrf.mxu2 }
 0x31e   :  { %v2949_v18 = vpop.f32.mrf.mxu3 }
 0x320   :  { %v3100_v41 = vpop.f32.mrf.mxu0 }
 0x324   :  { %v2936_v42 = vpop.f32.mrf.mxu2 }
 0x325   :  { %v2937_v45 = vadd.f32 %v2936_v42, %v2738_v44 }
 0x326   :  { %v2951_v46 = vpop.f32.mrf.mxu3 }
 0x327   :  { %v2950_v47 = vadd.f32 %v2949_v18, %v2937_v45 }
 0x329   :  { %v2954_v48 = vmax.f32 %v2950_v47, 0.0 }
 0x32b   :  { %v2956_v8 = vpack.c.bf16 %v2954_v48, %v2954_v48 }
 0x32c   :  { %v2938_v39 = vpop.f32.mrf.mxu2 }
 0x32d   :  { %3110 = vmatmul.bf16.vlgmr.msrb.gmra.mxu1 %v2956_v8 }
 0x38d   :  { %v2681_v51 = vpop.xlane.xlu0 %2680 }
 0x38e   :  { %v2682_v52 = vsub.f32 %v2679_v38, %v2681_v51 }
 0x390   :  { %v2683_v50 = vmul.f32 1.442695, %v2682_v52 }
 0x392   :  { %4977 = vpow2.f32 %v2683_v50 }
 0x398   :  { %v4978_v54 = vpop.eup %4977 }
 0x399   :  { %2685 = vadd.xlane.f32.xlu0 %v4978_v54 }
 0x3aa   :  { %v3111_v21 = vpop.f32.mrf.mxu1 }
 0x3ab   :  { %v3112_v20 = vadd.f32 %v3111_v21, %v3099_v55 }
 0x3ad   :  { %3115 = vst [vmem:[%s5790_s14] sm:$0xff] %v3112_v20 }
 0x3b2   :  { %v3113_v56 = vpop.f32.mrf.mxu1 }
 0x40c   :  { %v2686_v57 = vpop.xlane.xlu0 %2685 }
 0x40d   :  { %4979 = vrcp.f32 %v2686_v57  ;;  %v2698_v59 = vand.u32 2147483648, %v2686_v57  ;;  %v2696_v62 = vand.u32 2147483647, %v2686_v57  ;;  %vm2692_vm2 = vweird.f32 %v2686_v57 }
 0x40f   :  { %v2699_v1 = vor.u32 1.1754944e-38, %v2698_v59  ;;  %vm2697_vm4 = vcmp.eq.f32.partialorder %v2696_v62, 8.507059e+37 }
 0x413   :  { %v4980_v36 = vpop.eup %4979 }
 0x414   :  { %v2688_v37 = vmul.f32 %v4980_v36, %v2686_v57  ;;  %vm2693_vm1 = vweird.f32 %v4980_v36 }
 0x415   :  { %vm2694_vm3 = vmor %vm2692_vm2, %vm2693_vm1 }
 0x416   :  { %v2689_v19 = vsub.f32 1.0, %v2688_v37 }
 0x418   :  { %v2690_v60 = vmul.f32 %v4980_v36, %v2689_v19 }
 0x41a   :  { %v2691_v0 = vadd.f32 %v4980_v36, %v2690_v60 }
 0x41c   :  { %v2695_v34 = vsel %vm2694_vm3, %v4980_v36, %v2691_v0 }
 0x41d   :  { %v2700_v2 = vsel %vm2697_vm4, %v2699_v1, %v2695_v34 }
 0x41e   :  { %v2701_v49 = vmul.f32 %v4978_v54, %v2700_v2 }
 0x420   :  { %2702 = vst [vmem:[%s5789_s13] sm:$0xff] %v2701_v49 }
 0x421   :  { %3124 = vsyncpa [#allocation3], 1 }
 0x422   :  { %3125 = vsyncpa [#allocation5], 1 }
 0x423   :  { %3126 = vsyncpa [#allocation8], 1 }

// kernel: actor_critic_forward.2
= control target key start
LH: loop header
LB: loop body
LE: loop exit
PB: predicated region body
PF: predicated region fallthrough
CT: control target
= control target key end

     0   :  { %12 = vsyncpa [#allocation3], 0  ;;  %s9491_s0 = inlined_call_operand.vmem [shape: bf16[2,16,16,128], index: 0, kind: input, shape index: {}]   ;;  %s9492_s1 = inlined_call_operand.vmem [shape: bf16[9,128,128], index: 1, kind: input, shape index: {}]   ;;  %s9493_s2 = inlined_call_operand.vmem [shape: f32[1,128], index: 2, kind: input, shape index: {}]   ;;  %s9494_s3 = inlined_call_operand.hbm [shape: bf16[9,128,128], index: 3, kind: input, shape index: {}]   ;;  %s9495_s4 = inlined_call_operand.vmem [shape: f32[1,128], index: 4, kind: input, shape index: {}]   ;;  %s9496_s5 = inlined_call_operand.hbm [shape: bf16[9,128,128], index: 5, kind: input, shape index: {}]   ;;  %s9497_s6 = inlined_call_operand.vmem [shape: f32[1,128], index: 6, kind: input, shape index: {}]   ;;  %s9498_s7 = inlined_call_operand.vmem [shape: bf16[2,10,16,128], index: 7, kind: output, shape index: {}]  }
   0x1   :  { %13 = vsyncpa [#allocation5], 0  ;;  %s7201_s24 = smov 0  }
   0x2 LB: > { %s219_s27 = sshll.u32 %s9494_s3, 4  ;;  %s7210_s28 = sadd.s32 4294967295, %s7155_s24   ;;  %s7155_s24 = sphi %s7201_s24, %s19_s24   ;;  %s220_s27 = int_to_ptr.hbm [resolvable:$true] %s219_s27 }
   0x3   : > { %p5657_p0 = scmp.ge.s32.totalorder %s7155_s24, 1  ;;  %p202_p1 = scmp.lt.s32.totalorder %s7155_s24, 3 }
   0x4   : > { %p7056_p2 = scmp.eq.s32.totalorder %s7210_s28, 0  ;;  %s7157_s30 = smov [#allocation2]  }
   0x5   : > { %p7215_p3 = pnand %p5657_p0, %p202_p1  ;;  %s221_s8 = sshll.u32 %s7157_s30, 4  ;;  %s222_s8 = int_to_ptr.vmem [resolvable:$true] %s221_s8 }
   0x6   : > { %s236_s11 = sshll.u32 %s9496_s5, 4  ;;  %s7158_s12 = smov [#allocation4]   ;;  %s237_s11 = int_to_ptr.hbm [resolvable:$true] %s236_s11 }
   0x7   : > { %p7049_p4 = pneg %p7215_p3  ;;  %s238_s13 = sshll.u32 %s7158_s12, 4  ;;  %s239_s13 = int_to_ptr.vmem [resolvable:$true] %s238_s13 }
   0x8   : > { %s7159_s14 = smov 64   ;;  %s7160_s15 = smov 4  }
   0x9   : > { %p7050_p5 = pnand %p7056_p2, %p7049_p4  ;;  %265 = sbr.rel (%p7215_p3) target bundleno = 1770 (0x6ea), region = 48 }
   0xb   : > { %7052 = dma.hbm_to_vmem [thread:$0]  (!%p7050_p5), %s220_s27, 9216, %s222_s8, [#allocation3], %s7159_s14, %s7159_s14, %s7160_s15  }
   0xc   : > { %7055 = dma.hbm_to_vmem [thread:$0]  (!%p7050_p5), %s237_s11, 9216, %s239_s13, [#allocation5], %s7159_s14, %s7159_s14, %s7160_s15  }
   0xe   : > { %7146 = dma.done.wait (%p7056_p2), [#allocation3], 9216  }
   0xf   : > { %7148 = vsyncadd (%p7056_p2), [#allocation3], 4294958080 }
  0x10   : > { %7150 = dma.done.wait (%p7056_p2), [#allocation5], 9216  }
  0x11   : > { %7152 = vsyncadd (%p7056_p2), [#allocation5], 4294958080  ;;  %v6742_v0 = vld [vmem:[%s9492_s1 + $0x78] sm:$0xff]  ;;  %p303_p6 = scmp.lt.s32.totalorder %s7210_s28, 1  ;;  %v6741_v2 = vld [vmem:[%s9492_s1 + $0x70] sm:$0xff]  ;;  %vm563_vm1 = vcmask 1047552  }
  0x12   : > { %v7242_v1 = vld [vmem:[%s9492_s1 + $0x38] sm:$0xff]  ;;  %631 = vmatpush.bf16.msra.mxu0 %v6742_v0  ;;  %7016 = vmatpush.bf16.msra.mxu2 %v6742_v0  ;;  %v7252_v3 = vld [vmem:[%s9492_s1 + $0x30] sm:$0xff]  ;;  %v6740_v4 = vld [vmem:[%s9492_s1 + $0x68] sm:$0xff]  ;;  %vm431_vm0 = vsmask.f32 7424  ;;  %v9519_v60 = vmov 0 }
  0x13   : > { %772 = vmatpush.bf16.msra.mxu1 %v7242_v1  ;;  %s9687_s28 = smov (!%p303_p6, %s7210_s28), 1  ;;  %v7264_v5 = vld [vmem:[%s9492_s1 + $0x28] sm:$0xff]  ;;  %v6739_v6 = vld [vmem:[%s9492_s1 + $0x60] sm:$0xff]  ;;  %v6738_v8 = vld [vmem:[%s9492_s1 + $0x58] sm:$0xff]  ;;  %vm851_vm3 = vcmask 1046528  }
  0x14   : > { %s6713_s30 = sshll.u32 %s9687_s28, 7  ;;  %v7274_v7 = vld [vmem:[%s9492_s1 + $0x20] sm:$0xff]  ;;  %v7291_v10 = vld [vmem:[%s9492_s1 + $0x18] sm:$0xff]  ;;  %v6737_v12 = vld [vmem:[%s9492_s1 + $0x50] sm:$0xff]  ;;  %s7040_s9 = smul.u32 80, %s9687_s28 }
  0x15   : > { %s7279_s14 = scalar_lea.vmem %s9491_s0, %s6713_s30  ;;  %v6729_v17 = vld [vmem:[%s9492_s1 + $0x10] sm:$0xff]  ;;  %v6736_v20 = vld [vmem:[%s9492_s1 + $0x48] sm:$0xff]  ;;  %v6735_v26 = vld [vmem:[%s9492_s1 + $0x40] sm:$0xff] }
  0x16   : > { %632 = vmatpush.bf16.msra.mxu0 %v6741_v2  ;;  %7017 = vmatpush.bf16.msra.mxu2 %v6741_v2  ;;  %v7285_v9 = vld [vmem:[%s7279_s14 + $0x58] sm:$0xff]  ;;  %v7294_v11 = vld [vmem:[%s7279_s14] sm:$0xff]   ;;  %v7300_v13 = vld [vmem:[%s7279_s14 + $0x8] sm:$0xff]   ;;  %s9398_s12 = scalar_lea.vmem %s9498_s7, %s7040_s9 }
  0x17   : > { %773 = vmatpush.bf16.msra.mxu1 %v7252_v3  ;;  %v435_v14 = vshll.u32 %v7294_v11, 16  ;;  %v7304_v15 = vld [vmem:[%s7279_s14 + $0x60] sm:$0xff]  ;;  %v520_v16 = vshll.u32 %v7285_v9, 16  ;;  %v433_v18 = vshrl.u32 %v7294_v11, 16  ;;  %v440_v19 = vshll.u32 %v7300_v13, 16  ;;  %v6728_v25 = vld [vmem:[%s9492_s1 + $0x8] sm:$0xff]  ;;  %vm7382_vm2 = vmand %vm563_vm1, %vm431_vm0 }
  0x18   : > { %v524_v23 = vshrl.u32 %v7285_v9, 16  ;;  %v528_v24 = vshll.u32 %v7304_v15, 16  ;;  %v6727_v31 = vld [vmem:[%s9492_s1] sm:$0xff]  ;;  %v6766_v32 = vld [vmem:[%s9492_s1 + $0x138] sm:$0xff]  ;;  %v6765_v35 = vld [vmem:[%s9492_s1 + $0x130] sm:$0xff]  ;;  %v444_v39 = vshrl.u32 %v7300_v13, 16  ;;  %v6945_v49 = vunpack.c.l.b16 %v7294_v11 }
  0x19   : > { %v437_v21 = vrot.slane %v435_v14, 1  ;;  %v7316_v22 = vrot.slane %v520_v16, 1  ;;  %v442_v28 = vrot.slane %v440_v19, 1  ;;  %v7344_v36 = vld [vmem:[%s7279_s14 + $0x68] sm:$0xff]  ;;  %v7347_v37 = vld [vmem:[%s7279_s14 + $0x10] sm:$0xff]   ;;  %v532_v41 = vshrl.u32 %v7304_v15, 16 }
  0x1a   : > { %633 = vmatpush.bf16.msra.mxu0 %v6740_v4  ;;  %7018 = vmatpush.bf16.msra.mxu2 %v6740_v4  ;;  %v530_v30 = vrot.slane %v528_v24, 1  ;;  %v6764_v38 = vld [vmem:[%s9492_s1 + $0x128] sm:$0xff]  ;;  %v448_v40 = vshll.u32 %v7347_v37, 16  ;;  %v536_v42 = vshll.u32 %v7344_v36, 16  ;;  %v7371_v50 = vld [vmem:[%s7279_s14 + $0x18] sm:$0xff]  ;;  %v7373_v51 = vpack.c.b16 %v6945_v49, %v6945_v49  ;;  %v7398_v0 = vld [vmem:[%s7279_s14 + $0x20] sm:$0xff] }
  0x1b   : > { %774 = vmatpush.bf16.msra.mxu1 %v7264_v5  ;;  %v438_v27 = vor.u32 %v437_v21, %v433_v18  ;;  %v526_v29 = vor.u32 %v524_v23, %v7316_v22  ;;  %v446_v43 = vor.u32 %v444_v39, %v442_v28  ;;  %v452_v52 = vshrl.u32 %v7347_v37, 16  ;;  %v6750_v63 = vld [vmem:[%s9492_s1 + $0xb8] sm:$0xff]  ;;  %v6757_v4 = vld [vmem:[%s9492_s1 + $0xf0] sm:$0xff]  ;;  %v6747_v14 = vld [vmem:[%s9492_s1 + $0xa0] sm:$0xff] }
  0x1c   : > { %v450_v44 = vrot.slane %v448_v40, 1  ;;  %v534_v45 = vor.u32 %v532_v41, %v530_v30  ;;  %v538_v46 = vrot.slane %v536_v42, 1  ;;  %v456_v53 = vshll.u32 %v7371_v50, 16  ;;  %v6758_v2 = vld [vmem:[%s9492_s1 + $0xf8] sm:$0xff]  ;;  %v6755_v16 = vld [vmem:[%s9492_s1 + $0xe0] sm:$0xff]  ;;  %v7436_v19 = vld [vmem:[%s7279_s14 + $0x28] sm:$0xff] }
  0x1d   : > { %v443_v33 = vsel %vm431_vm0, %v438_v27, %v442_v28  ;;  %v7335_v34 = vsel %vm431_vm0, %v526_v29, %v530_v30  ;;  %v540_v54 = vshrl.u32 %v7344_v36, 16  ;;  %v559_v55 = vshll.u32 %v7373_v51, 16  ;;  %1141 = vmatpush.bf16.msra.mxu3 %v6758_v2  ;;  %v6746_v18 = vld [vmem:[%s9492_s1 + $0x98] sm:$0xff]  ;;  %v6745_v21 = vld [vmem:[%s9492_s1 + $0x90] sm:$0xff]  ;;  %v6744_v27 = vld [vmem:[%s9492_s1 + $0x88] sm:$0xff] }
  0x1e   : > { %634 = vmatpush.bf16.msra.mxu0 %v6739_v6  ;;  %7019 = vmatpush.bf16.msra.mxu2 %v6739_v6  ;;  %v7360_v47 = vsel %vm431_vm0, %v446_v43, %v450_v44  ;;  %v7363_v48 = vsel %vm431_vm0, %v534_v45, %v538_v46  ;;  %v454_v56 = vor.u32 %v452_v52, %v450_v44  ;;  %v458_v57 = vrot.slane %v456_v53, 1  ;;  %v6762_v23 = vld [vmem:[%s9492_s1 + $0x118] sm:$0xff]  ;;  %v6753_v24 = vld [vmem:[%s9492_s1 + $0xd0] sm:$0xff]  ;;  %v6752_v28 = vld [vmem:[%s9492_s1 + $0xc8] sm:$0xff] }
  0x1f   : > { %775 = vmatpush.bf16.msra.mxu1 %v7274_v7  ;;  %v7379_v58 = vor.u32 %v540_v54, %v538_v46  ;;  %v561_v59 = vrot.slane %v559_v55, 1  ;;  %v9520_v60 = vsel %vm7382_vm2, 4294967295, %v9519_v60  ;;  %v464_v6 = vshll.u32 %v7398_v0, 16  ;;  %v7486_v44 = vld [vmem:[%s7279_s14 + $0x38] sm:$0xff] }
  0x20   : > { %9521 = vst [vmem:[#allocation8_spill] sm:$0xff] %v9520_v60  ;;  %v7387_v61 = vsel %vm431_vm0, %v454_v56, %v458_v57  ;;  %v476_v39 = vshrl.u32 %v7436_v19, 16  ;;  %v6782_v45 = vld [vmem:[%s9492_s1 + $0x1b8] sm:$0xff]  ;;  %v488_v49 = vshll.u32 %v7486_v44, 16  ;;  %v852_v54 = vrot.slane %v7294_v11, 1 }
  0x21   : > { %v565_v62 = vsel %vm7382_vm2, %v7379_v58, %v561_v59  ;;  %1142 = vmatpush.bf16.msra.mxu3 %v6757_v4  ;;  %v853_v55 = vrot.slane %v7300_v13, 1  ;;  %v7503_v59 = vld [vmem:[%s7279_s14 + $0x40] sm:$0xff]  ;;  %v855_v2 = vrot.slane %v7347_v37, 1 }
  0x22   : > { %635 = vmatpush.bf16.msra.mxu0 %v6738_v8  ;;  %7020 = vmatpush.bf16.msra.mxu2 %v6738_v8  ;;  %v6756_v8 = vld [vmem:[%s9492_s1 + $0xe8] sm:$0xff]  ;;  %v490_v53 = vrot.slane %v488_v49, 1  ;;  %9522 = vst [vmem:[#allocation9_spill] sm:$0xff] %v7503_v59 }
  0x23   : > { %776 = vmatpush.bf16.msra.mxu1 %v7291_v10  ;;  %v7516_v4 = vsel %vm851_vm3, %v853_v55, %v855_v2 }
  0x25   : > { %1143 = vmatpush.bf16.msra.mxu3 %v6756_v8  ;;  %v500_v8 = vshrl.u32 %v7503_v59, 16 }
  0x26   : > { %636 = vmatpush.bf16.msra.mxu0 %v6737_v12  ;;  %7021 = vmatpush.bf16.msra.mxu2 %v6737_v12  ;;  %v466_v12 = vrot.slane %v464_v6, 1  ;;  %v7525_v6 = vld [vmem:[%s7279_s14 + $0x48] sm:$0xff] }
  0x27   : > { %777 = vmatpush.bf16.msra.mxu1 %v6729_v17  ;;  %9523 = vst [vmem:[#allocation10_spill] sm:$0xff] %v7525_v6 }
  0x29   : > { %1144 = vmatpush.bf16.msra.mxu3 %v6755_v16 }
  0x2a   : > { %637 = vmatpush.bf16.msra.mxu0 %v6736_v20  ;;  %7022 = vmatpush.bf16.msra.mxu2 %v6736_v20  ;;  %v6754_v20 = vld [vmem:[%s9492_s1 + $0xd8] sm:$0xff] }
  0x2b   : > { %778 = vmatpush.bf16.msra.mxu1 %v6728_v25 }
  0x2d   : > { %1145 = vmatpush.bf16.msra.mxu3 %v6754_v20  ;;  %v857_v20 = vrot.slane %v7371_v50, 1 }
  0x2e   : > { %638 = vmatpush.bf16.msra.mxu0 %v6735_v26  ;;  %7023 = vmatpush.bf16.msra.mxu2 %v6735_v26  ;;  %v472_v26 = vshll.u32 %v7436_v19, 16 }
  0x2f   : > { %779 = vmatpush.bf16.msra.mxu1 %v6727_v31 }
  0x30   : > { %v474_v30 = vrot.slane %v472_v26, 1 }
  0x31   : > { %639 = vmatmul.bf16.vlgmr.msra.gmra.mxu0 %v443_v33  ;;  %694 = vmatmul.bf16.vlgmr.msra.gmra.mxu2 %v7335_v34 }
  0x32   : > { %1330 = vmatpush.bf16.msrb.mxu0 %v6766_v32  ;;  %7024 = vmatpush.bf16.msrb.mxu2 %v7242_v1  ;;  %v6763_v1 = vld [vmem:[%s9492_s1 + $0x120] sm:$0xff]  ;;  %v478_v41 = vor.u32 %v476_v39, %v474_v30 }
  0x33   : > { %780 = vmatmul.bf16.vlgmr.msra.gmra.mxu1 %v7294_v11  ;;  %1146 = vmatpush.bf16.msra.mxu3 %v6753_v24  ;;  %v6751_v32 = vld [vmem:[%s9492_s1 + $0xc0] sm:$0xff]  ;;  %v6760_v11 = vld [vmem:[%s9492_s1 + $0x108] sm:$0xff] }
  0x36   : > { %1331 = vmatpush.bf16.msrb.mxu0 %v6765_v35  ;;  %7025 = vmatpush.bf16.msrb.mxu2 %v7252_v3  ;;  %v6749_v3 = vld [vmem:[%s9492_s1 + $0xb0] sm:$0xff] }
  0x37   : > { %1147 = vmatpush.bf16.msra.mxu3 %v6752_v28  ;;  %v7471_v35 = vld [vmem:[%s7279_s14 + $0x30] sm:$0xff] }
  0x38   : > { %v480_v40 = vshll.u32 %v7471_v35, 16  ;;  %v484_v46 = vshrl.u32 %v7471_v35, 16 }
  0x3a   : > { %1332 = vmatpush.bf16.msrb.mxu0 %v6764_v38  ;;  %7026 = vmatpush.bf16.msrb.mxu2 %v7264_v5  ;;  %v460_v5 = vshrl.u32 %v7371_v50, 16  ;;  %v6761_v38 = vld [vmem:[%s9492_s1 + $0x110] sm:$0xff]  ;;  %v482_v42 = vrot.slane %v480_v40, 1 }
  0x3b   : > { %1148 = vmatpush.bf16.msra.mxu3 %v6751_v32 }
  0x3c   : > { %v7480_v43 = vsel %vm431_vm0, %v478_v41, %v482_v42  ;;  %v486_v52 = vor.u32 %v484_v46, %v482_v42  ;;  %v6769_v41 = vld [vmem:[%s9492_s1 + $0x150] sm:$0xff] }
  0x3e   : > { %7027 = vmatpush.bf16.msrb.mxu2 %v7274_v7  ;;  %1333 = vmatpush.bf16.msrb.mxu0 %v6763_v1  ;;  %v6748_v7 = vld [vmem:[%s9492_s1 + $0xa8] sm:$0xff]  ;;  %v7497_v56 = vsel %vm431_vm0, %v486_v52, %v490_v53  ;;  %v859_v52 = vrot.slane %v7398_v0, 1 }
  0x3f   : > { %1149 = vmatmul.bf16.vlgmr.msra.gmra.mxu3 %v7300_v13 }
  0x41   : > { %644 = vmatmul.bf16.gmra.mxu0 %v7360_v47  ;;  %699 = vmatmul.bf16.gmra.mxu2 %v7363_v48 }
  0x42   : > { %7028 = vmatpush.bf16.msrb.mxu2 %v7291_v10  ;;  %v462_v10 = vor.u32 %v460_v5, %v458_v57  ;;  %1334 = vmatpush.bf16.msrb.mxu0 %v6762_v23  ;;  %v854_v57 = vsel %vm851_vm3, %v852_v54, %v853_v55  ;;  %v6781_v5 = vld [vmem:[%s9492_s1 + $0x1b0] sm:$0xff]  ;;  %v6780_v55 = vld [vmem:[%s9492_s1 + $0x1a8] sm:$0xff] }
  0x43   : > { %785 = vmatmul.bf16.gmra.mxu1 %v7300_v13  ;;  %v492_v13 = vshrl.u32 %v7486_v44, 16 }
  0x46   : > { %7029 = vmatpush.bf16.msrb.mxu2 %v6729_v17  ;;  %v7427_v17 = vsel %vm431_vm0, %v462_v10, %v466_v12  ;;  %1335 = vmatpush.bf16.msrb.mxu0 %v6761_v38  ;;  %v504_v10 = vshll.u32 %v7525_v6, 16  ;;  %v508_v38 = vshrl.u32 %v7525_v6, 16 }
  0x4a   : > { %7030 = vmatpush.bf16.msrb.mxu2 %v6728_v25  ;;  %v468_v25 = vshrl.u32 %v7398_v0, 16  ;;  %1336 = vmatpush.bf16.msrb.mxu0 %v6760_v11 }
  0x4c   : > { %v470_v29 = vor.u32 %v468_v25, %v466_v12  ;;  %v6773_v12 = vld [vmem:[%s9492_s1 + $0x170] sm:$0xff]  ;;  %v7547_v25 = vsel %vm851_vm3, %v855_v2, %v857_v20  ;;  %v6798_v2 = vld [vmem:[%s9492_s1 + $0x238] sm:$0xff] }
  0x4d   : > { %9524 = vst [vmem:[#allocation11_spill] sm:$0xff] %v7547_v25 }
  0x4e   : > { %7031 = vmatpush.bf16.msrb.mxu2 %v6727_v31  ;;  %v6743_v31 = vld [vmem:[%s9492_s1 + $0x80] sm:$0xff]  ;;  %v7465_v33 = vsel %vm431_vm0, %v470_v29, %v474_v30  ;;  %v7558_v29 = vld [vmem:[%s7279_s14 + $0x50] sm:$0xff]  ;;  %v6770_v30 = vld [vmem:[%s9492_s1 + $0x158] sm:$0xff] }
  0x4f   : > { %1154 = vmatmul.bf16.gmra.mxu3 %v7347_v37  ;;  %9525 = vst [vmem:[#allocation12_spill] sm:$0xff] %v7558_v29  ;;  %v512_v39 = vshll.u32 %v7558_v29, 16 }
  0x51   : > { %649 = vmatmul.bf16.gmra.mxu0 %v7387_v61  ;;  %704 = vmatmul.bf16.gmra.mxu2 %v565_v62  ;;  %v496_v62 = vshll.u32 %v7503_v59, 16  ;;  %v514_v49 = vrot.slane %v512_v39, 1 }
  0x52   : > { %963 = vmatpush.bf16.msra.mxu2 %v6750_v63  ;;  %v494_v63 = vor.u32 %v492_v13, %v490_v53  ;;  %v6768_v53 = vld [vmem:[%s9492_s1 + $0x148] sm:$0xff]  ;;  %v7587_v13 = vsel %vm851_vm3, %v857_v20, %v859_v52 }
  0x53   : > { %790 = vmatmul.bf16.gmra.mxu1 %v7347_v37  ;;  %v498_v1 = vrot.slane %v496_v62, 1  ;;  %9526 = vst [vmem:[#allocation13_spill] sm:$0xff] %v7587_v13 }
  0x55   : > { %v502_v16 = vor.u32 %v500_v8, %v498_v1  ;;  %v516_v8 = vshrl.u32 %v7558_v29, 16 }
  0x56   : > { %964 = vmatpush.bf16.msra.mxu2 %v6749_v3  ;;  %v7513_v3 = vsel %vm431_vm0, %v494_v63, %v498_v1  ;;  %v6767_v63 = vld [vmem:[%s9492_s1 + $0x140] sm:$0xff] }
  0x5a   : > { %965 = vmatpush.bf16.msra.mxu2 %v6748_v7  ;;  %v6774_v7 = vld [vmem:[%s9492_s1 + $0x178] sm:$0xff] }
  0x5b   : > { %1510 = vmatpush.bf16.msrb.mxu1 %v6774_v7 }
  0x5e   : > { %966 = vmatpush.bf16.msra.mxu2 %v6747_v14  ;;  %v6759_v14 = vld [vmem:[%s9492_s1 + $0x100] sm:$0xff] }
  0x5f   : > { %1159 = vmatmul.bf16.gmra.mxu3 %v7371_v50  ;;  %1511 = vmatpush.bf16.msrb.mxu1 %v6773_v12 }
  0x60   : > { %1337 = vmatpush.bf16.msrb.mxu0 %v6759_v14  ;;  %v518_v14 = vor.u32 %v516_v8, %v514_v49  ;;  %v865_v8 = vrot.slane %v7486_v44, 1 }
  0x61   : > { %654 = vmatmul.bf16.gmra.mxu0 %v7427_v17  ;;  %835 = vmatmul.bf16.vlgmr.msrb.gmra.mxu2 %v7285_v9 }
  0x62   : > { %967 = vmatpush.bf16.msra.mxu2 %v6746_v18  ;;  %v506_v18 = vrot.slane %v504_v10, 1 }
  0x63   : > { %795 = vmatmul.bf16.gmra.mxu1 %v7371_v50 }
  0x64   : > { %v7544_v24 = vsel %vm431_vm0, %v502_v16, %v506_v18  ;;  %v510_v46 = vor.u32 %v508_v38, %v506_v18  ;;  %2057 = vmatpush.bf16.msra.mxu0 %v6798_v2  ;;  %v861_v16 = vrot.slane %v7436_v19, 1 }
  0x66   : > { %968 = vmatpush.bf16.msra.mxu2 %v6745_v21  ;;  %v6772_v21 = vld [vmem:[%s9492_s1 + $0x168] sm:$0xff]  ;;  %v7584_v11 = vsel %vm431_vm0, %v510_v46, %v514_v49  ;;  %v6797_v46 = vld [vmem:[%s9492_s1 + $0x230] sm:$0xff] }
  0x67   : > { %1512 = vmatpush.bf16.msrb.mxu1 %v6772_v21  ;;  %v7607_v21 = vsel %vm431_vm0, %v518_v14, %v7316_v22  ;;  %v6789_v22 = vld [vmem:[%s9492_s1 + $0x1f0] sm:$0xff] }
  0x68   : > { %2058 = vmatpush.bf16.msra.mxu0 %v6797_v46  ;;  %v6796_v46 = vld [vmem:[%s9492_s1 + $0x228] sm:$0xff] }
  0x6a   : > { %969 = vmatpush.bf16.msra.mxu2 %v6744_v27  ;;  %v6771_v27 = vld [vmem:[%s9492_s1 + $0x160] sm:$0xff] }
  0x6b   : > { %1513 = vmatpush.bf16.msrb.mxu1 %v6771_v27 }
  0x6c   : > { %2059 = vmatpush.bf16.msra.mxu0 %v6796_v46 }
  0x6e   : > { %970 = vmatpush.bf16.msra.mxu2 %v6743_v31 }
  0x6f   : > { %1164 = vmatmul.bf16.gmra.mxu3 %v7398_v0  ;;  %1514 = vmatpush.bf16.msrb.mxu1 %v6770_v30 }
  0x71   : > { %659 = vmatmul.bf16.gmra.mxu0 %v7465_v33  ;;  %840 = vmatmul.bf16.gmra.mxu2 %v7304_v15 }
  0x72   : > { %1688 = vmatpush.bf16.msrb.mxu2 %v6782_v45  ;;  %v6790_v45 = vld [vmem:[%s9492_s1 + $0x1f8] sm:$0xff] }
  0x73   : > { %800 = vmatmul.bf16.gmra.mxu1 %v7398_v0  ;;  %1877 = vmatpush.bf16.msrb.mxu3 %v6790_v45 }
  0x74   : > { %1515 = vmatpush.bf16.msrb.mxu1 %v6769_v41  ;;  %v863_v41 = vrot.slane %v7471_v35, 1 }
  0x76   : > { %1689 = vmatpush.bf16.msrb.mxu2 %v6781_v5 }
  0x77   : > { %1878 = vmatpush.bf16.msrb.mxu3 %v6789_v22  ;;  %v6778_v22 = vld [vmem:[%s9492_s1 + $0x198] sm:$0xff] }
  0x78   : > { %1516 = vmatpush.bf16.msrb.mxu1 %v6768_v53 }
  0x7a   : > { %1690 = vmatpush.bf16.msrb.mxu2 %v6780_v55 }
  0x7c   : > { %1517 = vmatpush.bf16.msrb.mxu1 %v6767_v63 }
  0x7f   : > { %1169 = vmatmul.bf16.gmra.mxu3 %v7436_v19 }
  0x81   : > { %664 = vmatmul.bf16.gmra.mxu0 %v7480_v43  ;;  %845 = vmatmul.bf16.gmra.mxu2 %v7344_v36 }
  0x83   : > { %805 = vmatmul.bf16.gmra.mxu1 %v7436_v19 }
  0x8f   : > { %1174 = vmatmul.bf16.gmra.mxu3 %v7471_v35 }
  0x91   : > { %669 = vmatmul.bf16.gmra.mxu0 %v7497_v56  ;;  %971 = vmatmul.bf16.vlgmr.msra.gmra.mxu2 %v854_v57 }
  0x93   : > { %810 = vmatmul.bf16.gmra.mxu1 %v7471_v35 }
  0x9f   : > { %1179 = vmatmul.bf16.gmra.mxu3 %v7486_v44 }
  0xa1   : > { %674 = vmatmul.bf16.gmra.mxu0 %v7513_v3  ;;  %976 = vmatmul.bf16.gmra.mxu2 %v7516_v4 }
  0xa3   : > { %815 = vmatmul.bf16.gmra.mxu1 %v7486_v44 }
  0xae   : > { %v640_v23 = vpop.f32.mrf.mxu0 }
  0xaf   : > { %1184 = vmatmul.bf16.gmra.mxu3 %v7503_v59 }
  0xb0   : > { %v781_v26 = vpop.f32.mrf.mxu1 }
  0xb1   : > { %v7552_v28 = vadd.f32 %v781_v26, %v640_v23  ;;  %679 = vmatmul.bf16.gmra.mxu0 %v7544_v24  ;;  %981 = vmatmul.bf16.gmra.mxu2 %v7547_v25  ;;  %v7610_v23 = vsel %vm851_vm3, %v859_v52, %v861_v16  ;;  %v7631_v52 = vsel %vm851_vm3, %v861_v16, %v863_v41 }
  0xb2   : > { %9527 = vst [vmem:[#allocation14_spill] sm:$0xff] %v7610_v23 }
  0xb3   : > { %820 = vmatmul.bf16.gmra.mxu1 %v7503_v59  ;;  %9528 = vst [vmem:[#allocation15_spill] sm:$0xff] %v7631_v52 }
  0xb4   : > { %v7564_v31 = vpop.f32.mrf.mxu2 }
  0xb6   : > { %v642_v32 = vpop.f32.mrf.mxu0 }
  0xb8   : > { %v783_v40 = vpop.f32.mrf.mxu1 }
  0xb9   : > { %v7571_v42 = vadd.f32 %v783_v40, %v642_v32  ;;  %v6779_v40 = vld [vmem:[%s9492_s1 + $0x1a0] sm:$0xff] }
  0xba   : > { %1691 = vmatpush.bf16.msrb.mxu2 %v6779_v40 }
  0xbc   : > { %v697_v54 = vpop.f32.mrf.mxu2 }
  0xbe   : > { %v645_v57 = vpop.f32.mrf.mxu0  ;;  %1692 = vmatpush.bf16.msrb.mxu2 %v6778_v22 }
  0xbf   : > { %1189 = vmatmul.bf16.gmra.mxu3 %v7525_v6 }
  0xc0   : > { %v786_v62 = vpop.f32.mrf.mxu1 }
  0xc1   : > { %v7592_v1 = vadd.f32 %v786_v62, %v645_v57  ;;  %684 = vmatmul.bf16.gmra.mxu0 %v7584_v11  ;;  %986 = vmatmul.bf16.gmra.mxu2 %v7587_v13 }
  0xc2   : > { %v1150_v40 = vpop.f32.mrf.mxu3 }
  0xc3   : > { %825 = vmatmul.bf16.gmra.mxu1 %v7525_v6 }
  0xc4   : > { %v700_v5 = vpop.f32.mrf.mxu2 }
  0xc6   : > { %v647_v7 = vpop.f32.mrf.mxu0 }
  0xc8   : > { %v788_v10 = vpop.f32.mrf.mxu1 }
  0xc9   : > { %v7602_v12 = vadd.f32 %v788_v10, %v647_v7 }
  0xcc   : > { %v702_v18 = vpop.f32.mrf.mxu2 }
  0xce   : > { %v650_v20 = vpop.f32.mrf.mxu0 }
  0xcf   : > { %1194 = vmatmul.bf16.gmra.mxu3 %v7558_v29 }
  0xd0   : > { %v791_v26 = vpop.f32.mrf.mxu1 }
  0xd1   : > { %v7612_v27 = vadd.f32 %v791_v26, %v650_v20  ;;  %689 = vmatmul.bf16.gmra.mxu0 %v7607_v21  ;;  %991 = vmatmul.bf16.gmra.mxu2 %v7610_v23 }
  0xd3   : > { %830 = vmatmul.bf16.gmra.mxu1 %v7558_v29 }
  0xd4   : > { %v705_v30 = vpop.f32.mrf.mxu2 }
  0xd6   : > { %v652_v32 = vpop.f32.mrf.mxu0 }
  0xd8   : > { %v793_v38 = vpop.f32.mrf.mxu1 }
  0xd9   : > { %v7621_v39 = vadd.f32 %v793_v38, %v652_v32 }
  0xdc   : > { %v707_v45 = vpop.f32.mrf.mxu2 }
  0xde   : > { %v655_v49 = vpop.f32.mrf.mxu0 }
  0xdf   : > { %1199 = vmatmul.bf16.gmra.mxu3 %v7285_v9 }
  0xe0   : > { %v796_v53 = vpop.f32.mrf.mxu1 }
  0xe1   : > { %v7633_v55 = vadd.f32 %v796_v53, %v655_v49  ;;  %996 = vmatmul.bf16.gmra.mxu2 %v7631_v52  ;;  %1338 = vmatmul.bf16.vlgmr.msrb.gmra.mxu0 %v7360_v47  ;;  %v7648_v47 = vsel %vm851_vm3, %v863_v41, %v865_v8  ;;  %v867_v49 = vrot.slane %v7503_v59, 1 }
  0xe2   : > { %9531 = vst [vmem:[#allocation18_spill] sm:$0xff] %v7648_v47 }
  0xe3   : > { %1518 = vmatmul.bf16.vlgmr.msrb.gmra.mxu1 %v7516_v4 }
  0xe4   : > { %v836_v57 = vpop.f32.mrf.mxu2 }
  0xe5   : > { %v7640_v62 = vadd.f32 %v836_v57, %v7564_v31  ;;  %v6788_v31 = vld [vmem:[%s9492_s1 + $0x1e8] sm:$0xff] }
  0xe6   : > { %v657_v63 = vpop.f32.mrf.mxu0  ;;  %1879 = vmatpush.bf16.msrb.mxu3 %v6788_v31 }
  0xe7   : > { %9529 = vst [vmem:[#allocation16_spill] sm:$0xff] %v7640_v62 }
  0xe8   : > { %v798_v2 = vpop.f32.mrf.mxu1 }
  0xe9   : > { %v7642_v7 = vadd.f32 %v798_v2, %v657_v63  ;;  %v7673_v63 = vsel %vm851_vm3, %v865_v8, %v867_v49 }
  0xea   : > { %9534 = vst [vmem:[#allocation21_spill] sm:$0xff] %v7673_v63 }
  0xec   : > { %v838_v10 = vpop.f32.mrf.mxu2 }
  0xed   : > { %v7645_v14 = vadd.f32 %v838_v10, %v697_v54  ;;  %v1152_v10 = vpop.f32.mrf.mxu3 }
  0xee   : > { %v660_v16 = vpop.f32.mrf.mxu0 }
  0xef   : > { %9530 = vst [vmem:[#allocation17_spill] sm:$0xff] %v7645_v14  ;;  %1204 = vmatmul.bf16.gmra.mxu3 %v7304_v15 }
  0xf0   : > { %v801_v4 = vpop.f32.mrf.mxu1 }
  0xf1   : > { %v7650_v20 = vadd.f32 %v801_v4, %v660_v16  ;;  %1001 = vmatmul.bf16.gmra.mxu2 %v7648_v47  ;;  %1343 = vmatmul.bf16.gmra.mxu0 %v7387_v61 }
  0xf3   : > { %1523 = vmatmul.bf16.gmra.mxu1 %v7547_v25 }
  0xf4   : > { %v841_v54 = vpop.f32.mrf.mxu2 }
  0xf5   : > { %v7659_v26 = vadd.f32 %v841_v54, %v700_v5  ;;  %v1155_v22 = vpop.f32.mrf.mxu3 }
  0xf6   : > { %v662_v32 = vpop.f32.mrf.mxu0 }
  0xf7   : > { %9532 = vst [vmem:[#allocation19_spill] sm:$0xff] %v7659_v26 }
  0xf8   : > { %v803_v38 = vpop.f32.mrf.mxu1 }
  0xf9   : > { %v7664_v41 = vadd.f32 %v803_v38, %v662_v32  ;;  %v869_v32 = vrot.slane %v7525_v6, 1 }
  0xfc   : > { %v843_v53 = vpop.f32.mrf.mxu2 }
  0xfd   : > { %v7670_v5 = vadd.f32 %v843_v53, %v702_v18  ;;  %v6787_v53 = vld [vmem:[%s9492_s1 + $0x1e0] sm:$0xff] }
  0xfe   : > { %v665_v57 = vpop.f32.mrf.mxu0  ;;  %1880 = vmatpush.bf16.msrb.mxu3 %v6787_v53 }
  0xff   : > { %9533 = vst [vmem:[#allocation20_spill] sm:$0xff] %v7670_v5  ;;  %1209 = vmatmul.bf16.gmra.mxu3 %v7344_v36 }
 0x100   : > { %v806_v2 = vpop.f32.mrf.mxu1 }
 0x101   : > { %v7675_v16 = vadd.f32 %v806_v2, %v665_v57  ;;  %1006 = vmatmul.bf16.gmra.mxu2 %v7673_v63  ;;  %1348 = vmatmul.bf16.gmra.mxu0 %v7427_v17  ;;  %v7692_v2 = vsel %vm851_vm3, %v867_v49, %v869_v32 }
 0x102   : > { %9537 = vst [vmem:[#allocation24_spill] sm:$0xff] %v7692_v2 }
 0x103   : > { %1528 = vmatmul.bf16.gmra.mxu1 %v7587_v13 }
 0x104   : > { %v846_v4 = vpop.f32.mrf.mxu2 }
 0x105   : > { %v7681_v31 = vadd.f32 %v846_v4, %v705_v30  ;;  %v1157_v4 = vpop.f32.mrf.mxu3 }
 0x106   : > { %v667_v18 = vpop.f32.mrf.mxu0 }
 0x107   : > { %9535 = vst [vmem:[#allocation22_spill] sm:$0xff] %v7681_v31 }
 0x108   : > { %v808_v54 = vpop.f32.mrf.mxu1 }
 0x109   : > { %v7683_v8 = vadd.f32 %v808_v54, %v667_v18  ;;  %v6777_v18 = vld [vmem:[%s9492_s1 + $0x190] sm:$0xff]  ;;  %v6795_v54 = vld [vmem:[%s9492_s1 + $0x220] sm:$0xff] }
 0x10a   : > { %1693 = vmatpush.bf16.msrb.mxu2 %v6777_v18  ;;  %2060 = vmatpush.bf16.msra.mxu0 %v6795_v54 }
 0x10c   : > { %v848_v38 = vpop.f32.mrf.mxu2 }
 0x10d   : > { %v7686_v46 = vadd.f32 %v848_v38, %v707_v45 }
 0x10e   : > { %v670_v57 = vpop.f32.mrf.mxu0 }
 0x10f   : > { %9536 = vst [vmem:[#allocation23_spill] sm:$0xff] %v7686_v46 }
 0x110   : > { %v811_v30 = vpop.f32.mrf.mxu1 }
 0x111   : > { %v7694_v31 = vadd.f32 %v811_v30, %v670_v57  ;;  %1011 = vmatmul.bf16.gmra.mxu2 %v7692_v2  ;;  %1353 = vmatmul.bf16.gmra.mxu0 %v7465_v33  ;;  %v1160_v30 = vpop.f32.mrf.mxu3 }
 0x113   : > { %1533 = vmatmul.bf16.gmra.mxu1 %v7610_v23  ;;  %v871_v23 = vrot.slane %v7558_v29, 1 }
 0x114   : > { %v972_v45 = vpop.f32.mrf.mxu2 }
 0x115   : > { %v1042_v49 = vadd.f32 %v972_v45, %v7552_v28  ;;  %v7714_v28 = vsel %vm851_vm3, %v869_v32, %v871_v23 }
 0x116   : > { %v672_v38 = vpop.f32.mrf.mxu0 }
 0x117   : > { %v7707_v57 = vadd.f32 %v1150_v40, %v1042_v49 }
 0x118   : > { %v813_v53 = vpop.f32.mrf.mxu1 }
 0x119   : > { %v7709_v46 = vadd.f32 %v813_v53, %v672_v38  ;;  %v1162_v13 = vpop.f32.mrf.mxu3  ;;  %v873_v38 = vrot.slane %v7285_v9, 1  ;;  %v6794_v9 = vld [vmem:[%s9492_s1 + $0x218] sm:$0xff] }
 0x11a   : > { %2061 = vmatpush.bf16.msra.mxu0 %v6794_v9 }
 0x11c   : > { %v974_v18 = vpop.f32.mrf.mxu2 }
 0x11d   : > { %v1043_v6 = vadd.f32 %v974_v18, %v7571_v42 }
 0x11e   : > { %v675_v5 = vpop.f32.mrf.mxu0 }
 0x11f   : > { %v7716_v26 = vadd.f32 %v1152_v10, %v1043_v6 }
 0x120   : > { %v816_v45 = vpop.f32.mrf.mxu1 }
 0x121   : > { %v7718_v59 = vadd.f32 %v816_v45, %v675_v5  ;;  %1016 = vmatmul.bf16.gmra.mxu2 %v7714_v28  ;;  %1358 = vmatmul.bf16.gmra.mxu0 %v7480_v43  ;;  %v1165_v6 = vpop.f32.mrf.mxu3  ;;  %v6786_v5 = vld [vmem:[%s9492_s1 + $0x1d8] sm:$0xff] }
 0x122   : > { %1881 = vmatpush.bf16.msrb.mxu3 %v6786_v5 }
 0x123   : > { %1538 = vmatmul.bf16.gmra.mxu1 %v7631_v52 }
 0x124   : > { %v977_v40 = vpop.f32.mrf.mxu2 }
 0x125   : > { %v1044_v42 = vadd.f32 %v977_v40, %v7592_v1  ;;  %v6776_v1 = vld [vmem:[%s9492_s1 + $0x188] sm:$0xff] }
 0x126   : > { %v677_v49 = vpop.f32.mrf.mxu0  ;;  %1694 = vmatpush.bf16.msrb.mxu2 %v6776_v1 }
 0x127   : > { %v7725_v54 = vadd.f32 %v1155_v22, %v1044_v42  ;;  %v7738_v22 = vsel %vm851_vm3, %v871_v23, %v873_v38 }
 0x128   : > { %v818_v32 = vpop.f32.mrf.mxu1 }
 0x129   : > { %v7727_v10 = vadd.f32 %v818_v32, %v677_v49  ;;  %v1167_v49 = vpop.f32.mrf.mxu3 }
 0x12c   : > { %v979_v53 = vpop.f32.mrf.mxu2 }
 0x12d   : > { %v1045_v18 = vadd.f32 %v979_v53, %v7602_v12 }
 0x12e   : > { %v680_v45 = vpop.f32.mrf.mxu0 }
 0x12f   : > { %v7740_v42 = vadd.f32 %v1157_v4, %v1045_v18 }
 0x130   : > { %v821_v40 = vpop.f32.mrf.mxu1 }
 0x131   : > { %v7742_v32 = vadd.f32 %v821_v40, %v680_v45  ;;  %1021 = vmatmul.bf16.gmra.mxu2 %v7738_v22  ;;  %1363 = vmatmul.bf16.gmra.mxu0 %v7497_v56  ;;  %v1170_v18 = vpop.f32.mrf.mxu3  ;;  %v875_v45 = vrot.slane %v7304_v15, 1 }
 0x133   : > { %1543 = vmatmul.bf16.gmra.mxu1 %v7648_v47  ;;  %v7759_v9 = vsel %vm851_vm3, %v873_v38, %v875_v45 }
 0x134   : > { %v982_v12 = vpop.f32.mrf.mxu2 }
 0x135   : > { %v1046_v23 = vadd.f32 %v982_v12, %v7612_v27 }
 0x136   : > { %v682_v4 = vpop.f32.mrf.mxu0 }
 0x137   : > { %v7752_v53 = vadd.f32 %v1160_v30, %v1046_v23  ;;  %v7768_v30 = vld [vmem:[%s7279_s14 + $0x70] sm:$0xff] }
 0x138   : > { %v823_v5 = vpop.f32.mrf.mxu1  ;;  %1214 = vmatmul.bf16.gmra.mxu3 %v7768_v30 }
 0x139   : > { %v7754_v1 = vadd.f32 %v823_v5, %v682_v4  ;;  %v1172_v27 = vpop.f32.mrf.mxu3  ;;  %v6775_v4 = vld [vmem:[%s9492_s1 + $0x180] sm:$0xff]  ;;  %v7784_v5 = vrot.slane %v7344_v36, 1 }
 0x13a   : > { %1695 = vmatpush.bf16.msrb.mxu2 %v6775_v4  ;;  %v6783_v4 = vld [vmem:[%s9492_s1 + $0x1c0] sm:$0xff] }
 0x13c   : > { %v984_v40 = vpop.f32.mrf.mxu2 }
 0x13d   : > { %v1047_v52 = vadd.f32 %v984_v40, %v7621_v39 }
 0x13e   : > { %v685_v47 = vpop.f32.mrf.mxu0 }
 0x13f   : > { %v7761_v14 = vadd.f32 %v1162_v13, %v1047_v52  ;;  %v6785_v13 = vld [vmem:[%s9492_s1 + $0x1d0] sm:$0xff] }
 0x140   : > { %v826_v29 = vpop.f32.mrf.mxu1  ;;  %1882 = vmatpush.bf16.msrb.mxu3 %v6785_v13  ;;  %v7795_v13 = vsel %vm851_vm3, %v875_v45, %v7784_v5 }
 0x141   : > { %v7763_v12 = vadd.f32 %v826_v29, %v685_v47  ;;  %1026 = vmatmul.bf16.gmra.mxu2 %v7759_v9  ;;  %1368 = vmatmul.bf16.gmra.mxu0 %v7513_v3  ;;  %v1175_v38 = vpop.f32.mrf.mxu3 }
 0x143   : > { %1548 = vmatmul.bf16.gmra.mxu1 %v7673_v63 }
 0x144   : > { %v987_v15 = vpop.f32.mrf.mxu2 }
 0x145   : > { %v1048_v39 = vadd.f32 %v987_v15, %v7633_v55  ;;  %v6784_v55 = vld [vmem:[%s9492_s1 + $0x1c8] sm:$0xff]  ;;  %v6793_v15 = vld [vmem:[%s9492_s1 + $0x210] sm:$0xff] }
 0x146   : > { %v687_v52 = vpop.f32.mrf.mxu0  ;;  %1883 = vmatpush.bf16.msrb.mxu3 %v6784_v55  ;;  %2062 = vmatpush.bf16.msra.mxu0 %v6793_v15 }
 0x147   : > { %v7776_v47 = vadd.f32 %v1165_v6, %v1048_v39 }
 0x148   : > { %v828_v29 = vpop.f32.mrf.mxu1 }
 0x149   : > { %v7778_v23 = vadd.f32 %v828_v29, %v687_v52  ;;  %v1177_v29 = vpop.f32.mrf.mxu3 }
 0x14a   : > { %1884 = vmatpush.bf16.msrb.mxu3 %v6783_v4 }
 0x14c   : > { %v989_v40 = vpop.f32.mrf.mxu2 }
 0x14d   : > { %v1049_v6 = vadd.f32 %v989_v40, %v7642_v7  ;;  %1885 = vmatmul.bf16.vlgmr.msrb.gmra.mxu3 %v7387_v61 }
 0x14e   : > { %v690_v39 = vpop.f32.mrf.mxu0 }
 0x14f   : > { %v7797_v52 = vadd.f32 %v1167_v49, %v1049_v6 }
 0x150   : > { %v831_v36 = vpop.f32.mrf.mxu1 }
 0x151   : > { %v7802_v7 = vadd.f32 %v831_v36, %v690_v39  ;;  %1031 = vmatmul.bf16.gmra.mxu2 %v7795_v13  ;;  %1373 = vmatmul.bf16.gmra.mxu0 %v7544_v24  ;;  %v1180_v15 = vpop.f32.mrf.mxu3  ;;  %v892_v39 = vrot.slane %v7373_v51, 1 }
 0x153   : > { %1553 = vmatmul.bf16.gmra.mxu1 %v7692_v2  ;;  %v896_v4 = vsel %vm851_vm3, %v7784_v5, %v892_v39  ;;  %v6814_v39 = vld [vmem:[#allocation2 + $0x78] sm:$0xff] }
 0x154   : > { %v992_v45 = vpop.f32.mrf.mxu2  ;;  %2507 = vmatpush.bf16.msra.mxu1 %v6814_v39 }
 0x155   : > { %v1050_v55 = vadd.f32 %v992_v45, %v7650_v20 }
 0x156   : > { %v692_v49 = vpop.f32.mrf.mxu0 }
 0x157   : > { %v7809_v6 = vadd.f32 %v1170_v18, %v1050_v55  ;;  %v6806_v55 = vld [vmem:[#allocation2 + $0x38] sm:$0xff] }
 0x158   : > { %v833_v40 = vpop.f32.mrf.mxu1  ;;  %2636 = vmatpush.bf16.msra.mxu2 %v6806_v55 }
 0x159   : > { %v7811_v63 = vadd.f32 %v833_v40, %v692_v49  ;;  %v1182_v45 = vpop.f32.mrf.mxu3 }
 0x15c   : > { %v994_v36 = vpop.f32.mrf.mxu2 }
 0x15d   : > { %v1051_v62 = vadd.f32 %v994_v36, %v7664_v41  ;;  %1890 = vmatmul.bf16.gmra.mxu3 %v7427_v17  ;;  %v6792_v36 = vld [vmem:[%s9492_s1 + $0x208] sm:$0xff] }
 0x15e   : > { %v1339_v25 = vpop.f32.mrf.mxu0  ;;  %2063 = vmatpush.bf16.msra.mxu0 %v6792_v36 }
 0x15f   : > { %v7817_v2 = vadd.f32 %v1172_v27, %v1051_v62  ;;  %v1409_v61 = vadd.f32 %v1339_v25, %v7707_v57 }
 0x160   : > { %v1519_v20 = vpop.f32.mrf.mxu1 }
 0x161   : > { %v7820_v18 = vadd.f32 %v1519_v20, %v1409_v61  ;;  %1036 = vmatmul.bf16.gmra.mxu2 %v896_v4  ;;  %1378 = vmatmul.bf16.gmra.mxu0 %v7584_v11  ;;  %v1185_v27 = vpop.f32.mrf.mxu3 }
 0x163   : > { %1558 = vmatmul.bf16.gmra.mxu1 %v7714_v28 }
 0x164   : > { %v997_v51 = vpop.f32.mrf.mxu2 }
 0x165   : > { %v1052_v41 = vadd.f32 %v997_v51, %v7675_v16 }
 0x166   : > { %v1341_v49 = vpop.f32.mrf.mxu0 }
 0x167   : > { %v7826_v62 = vadd.f32 %v1175_v38, %v1052_v41  ;;  %v1410_v25 = vadd.f32 %v1341_v49, %v7716_v26 }
 0x168   : > { %v1521_v57 = vpop.f32.mrf.mxu1 }
 0x169   : > { %v7829_v40 = vadd.f32 %v1521_v57, %v1410_v25  ;;  %v1187_v20 = vpop.f32.mrf.mxu3 }
 0x16c   : > { %v999_v16 = vpop.f32.mrf.mxu2 }
 0x16d   : > { %v1053_v17 = vadd.f32 %v999_v16, %v7683_v8  ;;  %1895 = vmatmul.bf16.gmra.mxu3 %v7465_v33 }
 0x16e   : > { %v1344_v4 = vpop.f32.mrf.mxu0 }
 0x16f   : > { %v7835_v38 = vadd.f32 %v1177_v29, %v1053_v17  ;;  %v1411_v26 = vadd.f32 %v1344_v4, %v7725_v54 }
 0x170   : > { %v1524_v61 = vpop.f32.mrf.mxu1 }
 0x171   : > { %v7838_v51 = vadd.f32 %v1524_v61, %v1411_v26  ;;  %1383 = vmatmul.bf16.gmra.mxu0 %v7607_v21  ;;  %1696 = vmatmul.bf16.vlgmr.msrb.gmra.mxu2 %v7347_v37  ;;  %v1190_v25 = vpop.f32.mrf.mxu3 }
 0x173   : > { %1563 = vmatmul.bf16.gmra.mxu1 %v7738_v22 }
 0x174   : > { %v1002_v41 = vpop.f32.mrf.mxu2 }
 0x175   : > { %v1054_v55 = vadd.f32 %v1002_v41, %v7694_v31 }
 0x176   : > { %v1346_v8 = vpop.f32.mrf.mxu0 }
 0x177   : > { %v7845_v29 = vadd.f32 %v1180_v15, %v1054_v55  ;;  %v1412_v54 = vadd.f32 %v1346_v8, %v7740_v42  ;;  %v6805_v42 = vld [vmem:[#allocation2 + $0x30] sm:$0xff] }
 0x178   : > { %v1526_v49 = vpop.f32.mrf.mxu1  ;;  %2637 = vmatpush.bf16.msra.mxu2 %v6805_v42 }
 0x179   : > { %v7848_v57 = vadd.f32 %v1526_v49, %v1412_v54  ;;  %v1192_v33 = vpop.f32.mrf.mxu3 }
 0x17c   : > { %v1004_v39 = vpop.f32.mrf.mxu2 }
 0x17d   : > { %v1055_v36 = vadd.f32 %v1004_v39, %v7709_v46  ;;  %1900 = vmatmul.bf16.gmra.mxu3 %v7480_v43 }
 0x17e   : > { %v1349_v37 = vpop.f32.mrf.mxu0 }
 0x17f   : > { %v7851_v16 = vadd.f32 %v1182_v45, %v1055_v36  ;;  %v7854_v17 = vadd.f32 %v1349_v37, %v7752_v53  ;;  %v6813_v45 = vld [vmem:[#allocation2 + $0x70] sm:$0xff]  ;;  %v6791_v53 = vld [vmem:[%s9492_s1 + $0x200] sm:$0xff] }
 0x180   : > { %v7856_v31 = vpop.f32.mrf.mxu1  ;;  %2508 = vmatpush.bf16.msra.mxu1 %v6813_v45  ;;  %2064 = vmatpush.bf16.msra.mxu0 %v6791_v53  ;;  %v6804_v45 = vld [vmem:[#allocation2 + $0x28] sm:$0xff] }
 0x181   : > { %1388 = vmatmul.bf16.gmra.mxu0 %v7335_v34  ;;  %1701 = vmatmul.bf16.gmra.mxu2 %v7371_v50  ;;  %v1195_v41 = vpop.f32.mrf.mxu3 }
 0x182   : > { %2638 = vmatpush.bf16.msra.mxu2 %v6804_v45 }
 0x183   : > { %1568 = vmatmul.bf16.gmra.mxu1 %v7759_v9 }
 0x184   : > { %v1007_v15 = vpop.f32.mrf.mxu2 }
 0x185   : > { %v1056_v46 = vadd.f32 %v1007_v15, %v7718_v59  ;;  %v7895_v15 = vrot.slane %v7768_v30, 1 }
 0x186   : > { %v1351_v4 = vpop.f32.mrf.mxu0 }
 0x187   : > { %v7866_v26 = vadd.f32 %v1185_v27, %v1056_v46  ;;  %v7869_v61 = vadd.f32 %v1351_v4, %v7761_v14 }
 0x188   : > { %v7871_v50 = vpop.f32.mrf.mxu1 }
 0x189   : > { %v1197_v27 = vpop.f32.mrf.mxu3 }
 0x18c   : > { %v1009_v55 = vpop.f32.mrf.mxu2 }
 0x18d   : > { %v1057_v59 = vadd.f32 %v1009_v55, %v7727_v10  ;;  %1905 = vmatmul.bf16.gmra.mxu3 %v7497_v56 }
 0x18e   : > { %v1354_v43 = vpop.f32.mrf.mxu0 }
 0x18f   : > { %v7874_v8 = vadd.f32 %v1187_v20, %v1057_v59  ;;  %v7877_v54 = vadd.f32 %v1354_v43, %v7776_v47  ;;  %v1249_v20 = vshll.u32 %v7768_v30, 16  ;;  %v7913_v43 = vsel %vm851_vm3, %v7784_v5, %v7895_v15 }
 0x190   : > { %v7879_v49 = vpop.f32.mrf.mxu1  ;;  %v1253_v5 = vshrl.u32 %v7768_v30, 16 }
 0x191   : > { %1393 = vmatmul.bf16.gmra.mxu0 %v7363_v48  ;;  %1706 = vmatmul.bf16.gmra.mxu2 %v7398_v0  ;;  %v1200_v42 = vpop.f32.mrf.mxu3  ;;  %v1251_v0 = vrot.slane %v1249_v20, 1 }
 0x193   : > { %1573 = vmatmul.bf16.gmra.mxu1 %v7795_v13  ;;  %v7900_v53 = vsel %vm431_vm0, %v7379_v58, %v1251_v0  ;;  %v6812_v58 = vld [vmem:[#allocation2 + $0x68] sm:$0xff]  ;;  %v7928_v45 = vor.u32 %v1253_v5, %v1251_v0 }
 0x194   : > { %v1012_v14 = vpop.f32.mrf.mxu2  ;;  %2509 = vmatpush.bf16.msra.mxu1 %v6812_v58 }
 0x195   : > { %v1058_v39 = vadd.f32 %v1012_v14, %v7742_v32 }
 0x196   : > { %v1356_v10 = vpop.f32.mrf.mxu0 }
 0x197   : > { %v7887_v47 = vadd.f32 %v1190_v25, %v1058_v39  ;;  %v7890_v36 = vadd.f32 %v1356_v10, %v7797_v52  ;;  %v7075_v25 = vld [vmem:[%s7279_s14 + $0x8] sm:$0xff]  }
 0x198   : > { %v7892_v37 = vpop.f32.mrf.mxu1  ;;  %v6949_v4 = vunpack.c.l.b16 %v7075_v25 }
 0x19c   : > { %v1014_v46 = vpop.f32.mrf.mxu2 }
 0x19d   : > { %v1059_v32 = vadd.f32 %v1014_v46, %v7754_v1  ;;  %v1202_v1 = vpop.f32.mrf.mxu3  ;;  %1910 = vmatmul.bf16.gmra.mxu3 %v7513_v3 }
 0x19e   : > { %v1359_v56 = vpop.f32.mrf.mxu0 }
 0x19f   : > { %v7903_v52 = vadd.f32 %v1192_v33, %v1059_v32  ;;  %v7906_v55 = vadd.f32 %v1359_v56, %v7809_v6  ;;  %v1258_v33 = vpack.c.b16 %v6949_v4, %v6949_v4 }
 0x1a0   : > { %v7908_v59 = vpop.f32.mrf.mxu1 }
 0x1a1   : > { %1398 = vmatmul.bf16.gmra.mxu0 %v7900_v53  ;;  %1711 = vmatmul.bf16.gmra.mxu2 %v7436_v19  ;;  %v1260_v10 = vshll.u32 %v1258_v33, 16  ;;  %v1440_v25 = vrot.slane %v1258_v33, 1 }
 0x1a3   : > { %1578 = vmatmul.bf16.gmra.mxu1 %v7913_v43  ;;  %v1262_v56 = vrot.slane %v1260_v10, 1  ;;  %v1443_v0 = vsel %vm851_vm3, %v7895_v15, %v1440_v25 }
 0x1a4   : > { %v1017_v6 = vpop.f32.mrf.mxu2 }
 0x1a5   : > { %v1060_v14 = vadd.f32 %v1017_v6, %v7763_v12  ;;  %v1205_v32 = vpop.f32.mrf.mxu3  ;;  %v1264_v58 = vsel %vm7382_vm2, %v7928_v45, %v1262_v56  ;;  %v6803_v56 = vld [vmem:[#allocation2 + $0x20] sm:$0xff] }
 0x1a6   : > { %v1361_v39 = vpop.f32.mrf.mxu0  ;;  %2639 = vmatpush.bf16.msra.mxu2 %v6803_v56 }
 0x1a7   : > { %v7921_v20 = vadd.f32 %v1195_v41, %v1060_v14  ;;  %v7924_v46 = vadd.f32 %v1361_v39, %v7817_v2 }
 0x1a8   : > { %v7926_v19 = vpop.f32.mrf.mxu1 }
 0x1ac   : > { %v1019_v4 = vpop.f32.mrf.mxu2 }
 0x1ad   : > { %v1061_v12 = vadd.f32 %v1019_v4, %v7778_v23  ;;  %v1207_v14 = vpop.f32.mrf.mxu3  ;;  %1915 = vmatmul.bf16.gmra.mxu3 %v7544_v24  ;;  %v6811_v4 = vld [vmem:[#allocation2 + $0x60] sm:$0xff] }
 0x1ae   : > { %v1364_v3 = vpop.f32.mrf.mxu0  ;;  %2510 = vmatpush.bf16.msra.mxu1 %v6811_v4 }
 0x1af   : > { %v7934_v41 = vadd.f32 %v1197_v27, %v1061_v12  ;;  %v7937_v2 = vadd.f32 %v1364_v3, %v7826_v62 }
 0x1b0   : > { %v7939_v6 = vpop.f32.mrf.mxu1 }
 0x1b1   : > { %1403 = vmatmul.bf16.gmra.mxu0 %v1264_v58  ;;  %1716 = vmatmul.bf16.gmra.mxu2 %v7471_v35 }
 0x1b3   : > { %1583 = vmatmul.bf16.gmra.mxu1 %v1443_v0  ;;  %v9539_v0 = vld [vmem:[#allocation16_spill] sm:$0xff] }
 0x1b4   : > { %v1022_v23 = vpop.f32.mrf.mxu2 }
 0x1b5   : > { %v1062_v33 = vadd.f32 %v1022_v23, %v7802_v7  ;;  %v1210_v10 = vpop.f32.mrf.mxu3 }
 0x1b6   : > { %v1366_v27 = vpop.f32.mrf.mxu0 }
 0x1b7   : > { %v7946_v39 = vadd.f32 %v1200_v42, %v1062_v33  ;;  %v7949_v62 = vadd.f32 %v1366_v27, %v7835_v38  ;;  %v9538_v42 = vld [vmem:[#allocation11_spill] sm:$0xff] }
 0x1b8   : > { %v7951_v5 = vpop.f32.mrf.mxu1 }
 0x1bc   : > { %v1024_v25 = vpop.f32.mrf.mxu2 }
 0x1bd   : > { %v1063_v35 = vadd.f32 %v1024_v25, %v7811_v63  ;;  %v1212_v38 = vpop.f32.mrf.mxu3  ;;  %1920 = vmatmul.bf16.gmra.mxu3 %v7584_v11  ;;  %v9542_v25 = vld [vmem:[#allocation17_spill] sm:$0xff] }
 0x1be   : > { %v1369_v12 = vpop.f32.mrf.mxu0 }
 0x1bf   : > { %v7954_v3 = vadd.f32 %v1202_v1, %v1063_v35  ;;  %v7957_v24 = vadd.f32 %v1369_v12, %v7845_v29 }
 0x1c0   : > { %v7959_v7 = vpop.f32.mrf.mxu1 }
 0x1c1   : > { %1721 = vmatmul.bf16.gmra.mxu2 %v7486_v44  ;;  %2065 = vmatmul.bf16.vlgmr.msra.gmra.mxu0 %v9538_v42 }
 0x1c4   : > { %v1027_v58 = vpop.f32.mrf.mxu2 }
 0x1c5   : > { %v1064_v23 = vadd.f32 %v1027_v58, %v9539_v0  ;;  %v1215_v27 = vpop.f32.mrf.mxu3  ;;  %v9546_v58 = vld [vmem:[#allocation13_spill] sm:$0xff]  ;;  %v9547_v0 = vld [vmem:[#allocation19_spill] sm:$0xff] }
 0x1c6   : > { %v1371_v63 = vpop.f32.mrf.mxu0 }
 0x1c7   : > { %v7965_v33 = vadd.f32 %v1205_v32, %v1064_v23  ;;  %v7968_v1 = vadd.f32 %v1371_v63, %v7851_v16  ;;  %v9545_v32 = vld [vmem:[#allocation9_spill] sm:$0xff]  ;;  %v6802_v63 = vld [vmem:[#allocation2 + $0x18] sm:$0xff] }
 0x1c8   : > { %v7970_v29 = vpop.f32.mrf.mxu1  ;;  %2640 = vmatpush.bf16.msra.mxu2 %v6802_v63  ;;  %v9554_v63 = vld [vmem:[#allocation14_spill] sm:$0xff] }
 0x1c9   : > { %9540 = vst [vmem:[#allocation11_spill] sm:$0xff] %v7968_v1 }
 0x1ca   : > { %9541 = vst [vmem:[#allocation16_spill] sm:$0xff] %v7970_v29 }
 0x1cc   : > { %v1029_v56 = vpop.f32.mrf.mxu2 }
 0x1cd   : > { %v1065_v35 = vadd.f32 %v1029_v56, %v9542_v25  ;;  %v1217_v11 = vpop.f32.mrf.mxu3  ;;  %1925 = vmatmul.bf16.gmra.mxu3 %v7607_v21 }
 0x1ce   : > { %v1374_v44 = vpop.f32.mrf.mxu0 }
 0x1cf   : > { %v7973_v4 = vadd.f32 %v1207_v14, %v1065_v35  ;;  %v7976_v12 = vadd.f32 %v1374_v44, %v7866_v26  ;;  %v6810_v44 = vld [vmem:[#allocation2 + $0x58] sm:$0xff] }
 0x1d0   : > { %v7978_v42 = vpop.f32.mrf.mxu1  ;;  %2511 = vmatpush.bf16.msra.mxu1 %v6810_v44 }
 0x1d1   : > { %9543 = vst [vmem:[#allocation17_spill] sm:$0xff] %v7976_v12  ;;  %1726 = vmatmul.bf16.gmra.mxu2 %v9545_v32  ;;  %2070 = vmatmul.bf16.gmra.mxu0 %v9546_v58  ;;  %v9550_v58 = vld [vmem:[#allocation20_spill] sm:$0xff] }
 0x1d2   : > { %9544 = vst [vmem:[#allocation25_spill] sm:$0xff] %v7978_v42 }
 0x1d4   : > { %v1032_v16 = vpop.f32.mrf.mxu2 }
 0x1d5   : > { %v1066_v23 = vadd.f32 %v1032_v16, %v9547_v0  ;;  %v7991_v35 = vpop.f32.mrf.mxu3 }
 0x1d6   : > { %v1376_v56 = vpop.f32.mrf.mxu0 }
 0x1d7   : > { %v7984_v25 = vadd.f32 %v1210_v10, %v1066_v23  ;;  %v7987_v14 = vadd.f32 %v1376_v56, %v7874_v8  ;;  %v9553_v23 = vld [vmem:[#allocation10_spill] sm:$0xff] }
 0x1d8   : > { %v7989_v26 = vpop.f32.mrf.mxu1 }
 0x1d9   : > { %9548 = vst [vmem:[#allocation9_spill] sm:$0xff] %v7987_v14 }
 0x1da   : > { %9549 = vst [vmem:[#allocation13_spill] sm:$0xff] %v7989_v26  ;;  %v9555_v26 = vld [vmem:[#allocation22_spill] sm:$0xff] }
 0x1dc   : > { %v1034_v32 = vpop.f32.mrf.mxu2 }
 0x1dd   : > { %v1067_v42 = vadd.f32 %v1034_v32, %v9550_v58  ;;  %v8001_v8 = vpop.f32.mrf.mxu3  ;;  %1930 = vmatmul.bf16.gmra.mxu3 %v7335_v34 }
 0x1de   : > { %v1379_v16 = vpop.f32.mrf.mxu0 }
 0x1df   : > { %v7994_v0 = vadd.f32 %v1212_v38, %v1067_v42  ;;  %v7997_v21 = vadd.f32 %v1379_v16, %v7887_v47 }
 0x1e0   : > { %v7999_v10 = vpop.f32.mrf.mxu1 }
 0x1e1   : > { %9551 = vst [vmem:[#allocation19_spill] sm:$0xff] %v7997_v21  ;;  %1731 = vmatmul.bf16.gmra.mxu2 %v9553_v23  ;;  %2075 = vmatmul.bf16.gmra.mxu0 %v9554_v63 }
 0x1e2   : > { %9552 = vst [vmem:[#allocation20_spill] sm:$0xff] %v7999_v10  ;;  %v9558_v10 = vld [vmem:[#allocation23_spill] sm:$0xff] }
 0x1e4   : > { %v1037_v56 = vpop.f32.mrf.mxu2 }
 0x1e5   : > { %v1068_v44 = vadd.f32 %v1037_v56, %v9555_v26  ;;  %v8014_v42 = vpop.f32.mrf.mxu3  ;;  %v9562_v56 = vld [vmem:[#allocation15_spill] sm:$0xff] }
 0x1e6   : > { %v1381_v32 = vpop.f32.mrf.mxu0 }
 0x1e7   : > { %v8007_v58 = vadd.f32 %v1215_v27, %v1068_v44  ;;  %v8010_v38 = vadd.f32 %v1381_v32, %v7903_v52  ;;  %v9561_v27 = vld [vmem:[#allocation12_spill] sm:$0xff]  ;;  %v6801_v44 = vld [vmem:[#allocation2 + $0x10] sm:$0xff] }
 0x1e8   : > { %v8012_v47 = vpop.f32.mrf.mxu1  ;;  %2641 = vmatpush.bf16.msra.mxu2 %v6801_v44 }
 0x1e9   : > { %9556 = vst [vmem:[#allocation10_spill] sm:$0xff] %v8010_v38 }
 0x1ea   : > { %9557 = vst [vmem:[#allocation14_spill] sm:$0xff] %v8012_v47 }
 0x1ec   : > { %v1039_v16 = vpop.f32.mrf.mxu2 }
 0x1ed   : > { %v1069_v23 = vadd.f32 %v1039_v16, %v9558_v10  ;;  %v8026_v52 = vpop.f32.mrf.mxu3  ;;  %1935 = vmatmul.bf16.gmra.mxu3 %v7363_v48  ;;  %v7076_v48 = vld [vmem:[%s7279_s14 + $0x58] sm:$0xff] }
 0x1ee   : > { %v1384_v21 = vpop.f32.mrf.mxu0 }
 0x1ef   : > { %v8017_v63 = vadd.f32 %v1217_v11, %v1069_v23  ;;  %v8020_v26 = vadd.f32 %v1384_v21, %v7921_v20  ;;  %v6809_v11 = vld [vmem:[#allocation2 + $0x50] sm:$0xff] }
 0x1f0   : > { %v8022_v34 = vpop.f32.mrf.mxu1  ;;  %2512 = vmatpush.bf16.msra.mxu1 %v6809_v11 }
 0x1f1   : > { %9559 = vst [vmem:[#allocation22_spill] sm:$0xff] %v8020_v26  ;;  %1736 = vmatmul.bf16.gmra.mxu2 %v9561_v27  ;;  %2080 = vmatmul.bf16.gmra.mxu0 %v9562_v56 }
 0x1f2   : > { %9560 = vst [vmem:[#allocation23_spill] sm:$0xff] %v8022_v34  ;;  %v9567_v34 = vld [vmem:[#allocation18_spill] sm:$0xff] }
 0x1f4   : > { %v8028_v32 = vpop.f32.mrf.mxu2 }
 0x1f5   : > { %v8036_v16 = vpop.f32.mrf.mxu3 }
 0x1f6   : > { %v1386_v10 = vpop.f32.mrf.mxu0 }
 0x1f7   : > { %v8032_v20 = vadd.f32 %v1386_v10, %v7934_v41 }
 0x1f8   : > { %v8034_v21 = vpop.f32.mrf.mxu1 }
 0x1f9   : > { %9563 = vst [vmem:[#allocation12_spill] sm:$0xff] %v8032_v20 }
 0x1fa   : > { %9564 = vst [vmem:[#allocation15_spill] sm:$0xff] %v8034_v21 }
 0x1fc   : > { %v8038_v23 = vpop.f32.mrf.mxu2 }
 0x1fd   : > { %v8049_v10 = vpop.f32.mrf.mxu3  ;;  %1940 = vmatmul.bf16.gmra.mxu3 %v7900_v53 }
 0x1fe   : > { %v1389_v27 = vpop.f32.mrf.mxu0 }
 0x1ff   : > { %v8041_v56 = vadd.f32 %v1389_v27, %v7946_v39  ;;  %v6800_v27 = vld [vmem:[#allocation2 + $0x8] sm:$0xff] }
 0x200   : > { %v8043_v44 = vpop.f32.mrf.mxu1  ;;  %2642 = vmatpush.bf16.msra.mxu2 %v6800_v27 }
 0x201   : > { %9565 = vst [vmem:[#allocation26_spill] sm:$0xff] %v8041_v56  ;;  %1741 = vmatmul.bf16.gmra.mxu2 %v7076_v48  ;;  %2085 = vmatmul.bf16.gmra.mxu0 %v9567_v34 }
 0x202   : > { %9566 = vst [vmem:[#allocation27_spill] sm:$0xff] %v8043_v44  ;;  %v8060_v44 = vld [vmem:[%s7279_s14 + $0x78] sm:$0xff] }
 0x203   : > { %v1796_v53 = vshll.u32 %v8060_v44, 16 }
 0x204   : > { %v8047_v41 = vpop.f32.mrf.mxu2 }
 0x205   : > { %v8067_v26 = vpop.f32.mrf.mxu3  ;;  %v1798_v47 = vrot.slane %v1796_v53, 1 }
 0x206   : > { %v1391_v11 = vpop.f32.mrf.mxu0 }
 0x207   : > { %v8053_v21 = vadd.f32 %v1391_v11, %v7954_v3  ;;  %v7077_v3 = vld [vmem:[%s7279_s14 + $0x60] sm:$0xff]  ;;  %v9572_v11 = vld [vmem:[#allocation21_spill] sm:$0xff] }
 0x208   : > { %v8055_v20 = vpop.f32.mrf.mxu1 }
 0x209   : > { %9568 = vst [vmem:[#allocation18_spill] sm:$0xff] %v8053_v21  ;;  %v6822_v21 = vld [vmem:[#allocation2 + $0xb8] sm:$0xff] }
 0x20a   : > { %9569 = vst [vmem:[#allocation28_spill] sm:$0xff] %v8055_v20  ;;  %v6808_v20 = vld [vmem:[#allocation2 + $0x48] sm:$0xff]  ;;  %2809 = vmatpush.bf16.msra.mxu3 %v6822_v21 }
 0x20b   : > { %2513 = vmatpush.bf16.msra.mxu1 %v6808_v20 }
 0x20c   : > { %v8057_v39 = vpop.f32.mrf.mxu2 }
 0x20e   : > { %v1394_v48 = vpop.f32.mrf.mxu0 }
 0x20f   : > { %v8063_v34 = vadd.f32 %v1394_v48, %v7965_v33  ;;  %v1799_v33 = vsel %vm431_vm0, %v7928_v45, %v1798_v47 }
 0x210   : > { %v8065_v56 = vpop.f32.mrf.mxu1  ;;  %1945 = vmatmul.bf16.gmra.mxu3 %v1799_v33  ;;  %v1800_v33 = vshrl.u32 %v8060_v44, 16 }
 0x211   : > { %9570 = vst [vmem:[#allocation29_spill] sm:$0xff] %v8063_v34  ;;  %1746 = vmatmul.bf16.gmra.mxu2 %v7077_v3  ;;  %2090 = vmatmul.bf16.gmra.mxu0 %v9572_v11  ;;  %v8081_v3 = vpop.f32.mrf.mxu3  ;;  %v7078_v11 = vld [vmem:[%s7279_s14 + $0x10] sm:$0xff]  }
 0x212   : > { %9571 = vst [vmem:[#allocation30_spill] sm:$0xff] %v8065_v56  ;;  %v6953_v38 = vunpack.c.l.b16 %v7078_v11 }
 0x214   : > { %v8074_v48 = vpop.f32.mrf.mxu2  ;;  %v8086_v20 = vpack.c.b16 %v6953_v38, %v6953_v38 }
 0x216   : > { %v1396_v27 = vpop.f32.mrf.mxu0  ;;  %v1807_v12 = vshll.u32 %v8086_v20, 16 }
 0x217   : > { %v8077_v56 = vadd.f32 %v1396_v27, %v7973_v4  ;;  %v7079_v27 = vld [vmem:[%s7279_s14 + $0x68] sm:$0xff] }
 0x218   : > { %v8079_v34 = vpop.f32.mrf.mxu1  ;;  %v1809_v11 = vrot.slane %v1807_v12, 1 }
 0x219   : > { %9573 = vst [vmem:[#allocation21_spill] sm:$0xff] %v8077_v56  ;;  %v1802_v56 = vor.u32 %v1800_v33, %v1798_v47  ;;  %v8095_v29 = vpop.f32.mrf.mxu3 }
 0x21a   : > { %9574 = vst [vmem:[#allocation31_spill] sm:$0xff] %v8079_v34  ;;  %v9575_v34 = vld [vmem:[#allocation24_spill] sm:$0xff] }
 0x21b   : > { %v1811_v38 = vsel %vm7382_vm2, %v1802_v56, %v1809_v11  ;;  %v6799_v11 = vld [vmem:[#allocation2] sm:$0xff] }
 0x21c   : > { %v8084_v53 = vpop.f32.mrf.mxu2  ;;  %2643 = vmatpush.bf16.msra.mxu2 %v6799_v11  ;;  %v6816_v11 = vld [vmem:[#allocation2 + $0x88] sm:$0xff] }
 0x21e   : > { %v1399_v21 = vpop.f32.mrf.mxu0 }
 0x21f   : > { %v1433_v45 = vadd.f32 %v1399_v21, %v7984_v25 }
 0x220   : > { %v1579_v14 = vpop.f32.mrf.mxu1  ;;  %1950 = vmatmul.bf16.gmra.mxu3 %v1811_v38 }
 0x221   : > { %v8091_v4 = vadd.f32 %v1579_v14, %v1433_v45  ;;  %1751 = vmatmul.bf16.gmra.mxu2 %v7079_v27  ;;  %2095 = vmatmul.bf16.gmra.mxu0 %v9575_v34  ;;  %v6821_v45 = vld [vmem:[#allocation2 + $0xb0] sm:$0xff]  ;;  %v8108_v47 = vpop.f32.mrf.mxu3  ;;  %v6820_v34 = vld [vmem:[#allocation2 + $0xa8] sm:$0xff] }
 0x222   : > { %2810 = vmatpush.bf16.msra.mxu3 %v6821_v45 }
 0x224   : > { %v8099_v1 = vpop.f32.mrf.mxu2 }
 0x226   : > { %v1401_v25 = vpop.f32.mrf.mxu0  ;;  %2811 = vmatpush.bf16.msra.mxu3 %v6820_v34  ;;  %v6817_v34 = vld [vmem:[#allocation2 + $0x90] sm:$0xff] }
 0x227   : > { %v8102_v21 = vadd.f32 %v1401_v25, %v7994_v0  ;;  %v6807_v0 = vld [vmem:[#allocation2 + $0x40] sm:$0xff] }
 0x228   : > { %v8104_v14 = vpop.f32.mrf.mxu1  ;;  %v6819_v25 = vld [vmem:[#allocation2 + $0xa0] sm:$0xff]  ;;  %2514 = vmatpush.bf16.msra.mxu1 %v6807_v0 }
 0x229   : > { %9576 = vst [vmem:[#allocation24_spill] sm:$0xff] %v8104_v14  ;;  %v6818_v14 = vld [vmem:[#allocation2 + $0x98] sm:$0xff] }
 0x22a   : > { %2812 = vmatpush.bf16.msra.mxu3 %v6819_v25 }
 0x22c   : > { %v8106_v27 = vpop.f32.mrf.mxu2 }
 0x22e   : > { %v1404_v12 = vpop.f32.mrf.mxu0  ;;  %2813 = vmatpush.bf16.msra.mxu3 %v6818_v14 }
 0x22f   : > { %v1435_v33 = vadd.f32 %v1404_v12, %v8007_v58  ;;  %v8120_v12 = vpop.f32.mrf.mxu3 }
 0x230   : > { %v1584_v56 = vpop.f32.mrf.mxu1 }
 0x231   : > { %v8111_v38 = vadd.f32 %v1584_v56, %v1435_v33  ;;  %1756 = vmatmul.bf16.gmra.mxu2 %v7768_v30  ;;  %2100 = vmatmul.bf16.gmra.mxu0 %v7714_v28  ;;  %v1767_v30 = vadd.f32 %v8028_v32, %v7820_v18  ;;  %v6815_v32 = vld [vmem:[#allocation2 + $0x80] sm:$0xff] }
 0x232   : > { %2814 = vmatpush.bf16.msra.mxu3 %v6817_v34 }
 0x233   : > { %9577 = vst [vmem:[#allocation32_spill] sm:$0xff] %v8111_v38  ;;  %v1956_v33 = vadd.f32 %v7991_v35, %v1767_v30 }
 0x234   : > { %v8115_v45 = vpop.f32.mrf.mxu2 }
 0x236   : > { %v1406_v60 = vpop.f32.mrf.mxu0  ;;  %2815 = vmatpush.bf16.msra.mxu3 %v6816_v11 }
 0x237   : > { %v8118_v58 = vadd.f32 %v1406_v60, %v8017_v63  ;;  %v8130_v60 = vld [vmem:[%s9493_s2] ss:$0 sm:$0xff]  ;;  %v1768_v63 = vadd.f32 %v8038_v23, %v7829_v40  ;;  %v8136_v18 = vpop.f32.mrf.mxu3  ;;  %v1769_v40 = vadd.f32 %v8047_v41, %v7838_v51  ;;  %v1770_v51 = vadd.f32 %v8057_v39, %v7848_v57 }
 0x239   : > { %9578 = vst [vmem:[#allocation33_spill] sm:$0xff] %v8118_v58  ;;  %v1957_v25 = vadd.f32 %v8001_v8, %v1768_v63 }
 0x23a   : > { %2816 = vmatpush.bf16.msra.mxu3 %v6815_v32  ;;  %v1958_v32 = vadd.f32 %v8014_v42, %v1769_v40  ;;  %v1959_v42 = vadd.f32 %v8026_v52, %v1770_v51  ;;  %v1594_v51 = vadd.f32 %v7871_v50, %v7869_v61 }
 0x23c   : > { %v8124_v28 = vpop.f32.mrf.mxu2 }
 0x23e   : > { %v2066_v56 = vpop.f32.mrf.mxu0 }
 0x23f   : > { %v2136_v0 = vadd.f32 %v2066_v56, %v1956_v33  ;;  %v6838_v56 = vld [vmem:[#allocation2 + $0x138] sm:$0xff]  ;;  %v8145_v58 = vpop.f32.mrf.mxu3 }
 0x240   : > { %3148 = vmatpush.bf16.msrb.mxu2 %v6838_v56 }
 0x241   : > { %1761 = vmatmul.bf16.gmra.mxu2 %v8060_v44  ;;  %2105 = vmatmul.bf16.gmra.mxu0 %v7738_v22  ;;  %v2168_v35 = vadd.f32 %v8130_v60, %v2136_v0 }
 0x243   : > { %v2196_v34 = vmax.f32 %v2168_v35, 0.0 }
 0x244   : > { %v8139_v14 = vpop.f32.mrf.mxu2 }
 0x245   : > { %v2224_v22 = vpack.c.bf16 %v2196_v34, %v2196_v34 }
 0x246   : > { %v2068_v30 = vpop.f32.mrf.mxu0 }
 0x247   : > { %v2137_v33 = vadd.f32 %v2068_v30, %v1957_v25  ;;  %v8150_v63 = vunpack.c.l.b16 %v2224_v22  ;;  %v6830_v30 = vld [vmem:[#allocation2 + $0xf8] sm:$0xff]  ;;  %v8160_v40 = vpop.f32.mrf.mxu3 }
 0x248   : > { %2973 = vmatpush.bf16.msrb.mxu1 %v6830_v30 }
 0x249   : > { %v2169_v23 = vadd.f32 %v8130_v60, %v2137_v33 }
 0x24b   : > { %v2197_v11 = vmax.f32 %v2169_v23, 0.0  ;;  %v1593_v23 = vadd.f32 %v7856_v31, %v7854_v17 }
 0x24c   : > { %v8147_v0 = vpop.f32.mrf.mxu2 }
 0x24d   : > { %v2225_v38 = vpack.c.bf16 %v2197_v11, %v2197_v11  ;;  %v1771_v56 = vadd.f32 %v8074_v48, %v1593_v23  ;;  %v1772_v48 = vadd.f32 %v8084_v53, %v1594_v51  ;;  %v6854_v23 = vld [vmem:[#allocation2 + $0x1b8] sm:$0xff] }
 0x24e   : > { %v2071_v8 = vpop.f32.mrf.mxu0  ;;  %3478 = vmatpush.bf16.msrb.mxu0 %v6854_v23 }
 0x24f   : > { %v2293_v35 = vunpack.c.l.b16 %v2225_v38  ;;  %v2138_v25 = vadd.f32 %v2071_v8, %v1958_v32  ;;  %v1960_v8 = vadd.f32 %v8036_v16, %v1771_v56 }
 0x251   : > { %v2316_v41 = vpack.c.b16 %v2293_v35, %v8150_v63  ;;  %2110 = vmatmul.bf16.gmra.mxu0 %v7759_v9  ;;  %v2170_v34 = vadd.f32 %v8130_v60, %v2138_v25 }
 0x253   : > { %2644 = vmatmul.bf16.vlgmr.msra.gmra.mxu2 %v2316_v41  ;;  %v2198_v57 = vmax.f32 %v2170_v34, 0.0  ;;  %v2331_v52 = vshll.u32 %v2316_v41, 16  ;;  %v8173_v34 = vpop.f32.mrf.mxu3  ;;  %v2329_v50 = vshrl.u32 %v2316_v41, 16 }
 0x254   : > { %v8157_v33 = vpop.f32.mrf.mxu2 }
 0x255   : > { %v2226_v22 = vpack.c.bf16 %v2198_v57, %v2198_v57  ;;  %v2333_v16 = vrot.slane %v2331_v52, 1  ;;  %v2705_v57 = vrot.slane %v2316_v41, 1  ;;  %v1595_v52 = vadd.f32 %v7879_v49, %v7877_v54 }
 0x256   : > { %v2073_v38 = vpop.f32.mrf.mxu0 }
 0x257   : > { %v2139_v39 = vadd.f32 %v2073_v38, %v1959_v42  ;;  %v8171_v30 = vunpack.c.l.b16 %v2226_v22  ;;  %v6837_v38 = vld [vmem:[#allocation2 + $0x130] sm:$0xff]  ;;  %v2334_v22 = vor.u32 %v2333_v16, %v2329_v50  ;;  %v6852_v16 = vld [vmem:[#allocation2 + $0x1a8] sm:$0xff] }
 0x258   : > { %3149 = vmatpush.bf16.msrb.mxu2 %v6837_v38 }
 0x259   : > { %v2171_v9 = vadd.f32 %v8130_v60, %v2139_v39  ;;  %9579 = vst [vmem:[#allocation34_spill] sm:$0xff] %v8171_v30 }
 0x25b   : > { %v2199_v11 = vmax.f32 %v2171_v9, 0.0  ;;  %v1961_v9 = vadd.f32 %v8049_v10, %v1772_v48  ;;  %v8193_v48 = vpop.f32.mrf.mxu3 }
 0x25c   : > { %v8166_v32 = vpop.f32.mrf.mxu2 }
 0x25d   : > { %v2227_v35 = vpack.c.bf16 %v2199_v11, %v2199_v11 }
 0x25e   : > { %v2076_v25 = vpop.f32.mrf.mxu0 }
 0x25f   : > { %v2295_v17 = vunpack.c.l.b16 %v2227_v35  ;;  %v2140_v31 = vadd.f32 %v2076_v25, %v1960_v8  ;;  %v6853_v8 = vld [vmem:[#allocation2 + $0x1b0] sm:$0xff] }
 0x260   : > { %3479 = vmatpush.bf16.msrb.mxu0 %v6853_v8 }
 0x261   : > { %v8177_v42 = vpack.c.b16 %v2295_v17, %v8171_v30  ;;  %2115 = vmatmul.bf16.gmra.mxu0 %v7795_v13  ;;  %v2172_v39 = vadd.f32 %v8130_v60, %v2140_v31  ;;  %v6829_v17 = vld [vmem:[#allocation2 + $0xf0] sm:$0xff]  ;;  %v1773_v31 = vadd.f32 %v8099_v1, %v1595_v52  ;;  %v9605_v30 = vld [vmem:[#allocation31_spill] sm:$0xff] }
 0x262   : > { %2974 = vmatpush.bf16.msrb.mxu1 %v6829_v17 }
 0x263   : > { %2649 = vmatmul.bf16.gmra.mxu2 %v8177_v42  ;;  %v2706_v61 = vrot.slane %v8177_v42, 1  ;;  %v2336_v56 = vshll.u32 %v8177_v42, 16  ;;  %v2200_v25 = vmax.f32 %v2172_v39, 0.0  ;;  %v1962_v54 = vadd.f32 %v8067_v26, %v1773_v31  ;;  %v6851_v39 = vld [vmem:[#allocation2 + $0x1a0] sm:$0xff]  ;;  %v8209_v52 = vpop.f32.mrf.mxu3  ;;  %v6849_v31 = vld [vmem:[#allocation2 + $0x190] sm:$0xff] }
 0x264   : > { %v8184_v53 = vpop.f32.mrf.mxu2  ;;  %3480 = vmatpush.bf16.msrb.mxu0 %v6852_v16  ;;  %v1597_v16 = vadd.f32 %v7908_v59, %v7906_v55 }
 0x265   : > { %v2707_v13 = vsel %vm851_vm3, %v2705_v57, %v2706_v61  ;;  %v2338_v11 = vrot.slane %v2336_v56, 1  ;;  %v2228_v38 = vpack.c.bf16 %v2200_v25, %v2200_v25  ;;  %v1596_v56 = vadd.f32 %v7892_v37, %v7890_v36 }
 0x266   : > { %v2078_v35 = vpop.f32.mrf.mxu0  ;;  %2817 = vmatmul.bf16.vlgmr.msra.gmra.mxu3 %v2707_v13  ;;  %v2340_v37 = vshrl.u32 %v8177_v42, 16 }
 0x267   : > { %v2141_v41 = vadd.f32 %v2078_v35, %v1961_v9  ;;  %v2339_v51 = vsel %vm431_vm0, %v2334_v22, %v2338_v11  ;;  %v8200_v1 = vunpack.c.l.b16 %v2228_v38  ;;  %v1774_v22 = vadd.f32 %v8106_v27, %v1596_v56  ;;  %v6850_v35 = vld [vmem:[#allocation2 + $0x198] sm:$0xff] }
 0x268   : > { %2515 = vmatmul.bf16.vlgmr.msra.gmra.mxu1 %v2339_v51  ;;  %3481 = vmatpush.bf16.msrb.mxu0 %v6851_v39  ;;  %v2342_v51 = vor.u32 %v2340_v37, %v2338_v11  ;;  %v6848_v11 = vld [vmem:[#allocation2 + $0x188] sm:$0xff]  ;;  %v1984_v39 = vrot.slane %v8060_v44, 1 }
 0x269   : > { %v2173_v10 = vadd.f32 %v8130_v60, %v2141_v41  ;;  %v1963_v41 = vadd.f32 %v8081_v3, %v1774_v22  ;;  %v1775_v3 = vadd.f32 %v8115_v45, %v1597_v16  ;;  %v6847_v22 = vld [vmem:[#allocation2 + $0x180] sm:$0xff] }
 0x26a   : > { %v1985_v45 = vsel %vm851_vm3, %v7895_v15, %v1984_v39 }
 0x26b   : > { %v2201_v23 = vmax.f32 %v2173_v10, 0.0  ;;  %v1964_v59 = vadd.f32 %v8095_v29, %v1775_v3  ;;  %v6828_v29 = vld [vmem:[#allocation2 + $0xe8] sm:$0xff]  ;;  %v1599_v3 = vadd.f32 %v7939_v6, %v7937_v2 }
 0x26c   : > { %v8195_v57 = vpop.f32.mrf.mxu2  ;;  %3482 = vmatpush.bf16.msrb.mxu0 %v6850_v35  ;;  %2975 = vmatpush.bf16.msrb.mxu1 %v6828_v29  ;;  %v6835_v29 = vld [vmem:[#allocation2 + $0x120] sm:$0xff] }
 0x26d   : > { %v2229_v49 = vpack.c.bf16 %v2201_v23, %v2201_v23 }
 0x26e   : > { %v2081_v50 = vpop.f32.mrf.mxu0 }
 0x26f   : > { %v2297_v9 = vunpack.c.l.b16 %v2229_v49  ;;  %v2142_v13 = vadd.f32 %v2081_v50, %v1962_v54  ;;  %v6836_v49 = vld [vmem:[#allocation2 + $0x128] sm:$0xff] }
 0x270   : > { %3483 = vmatpush.bf16.msrb.mxu0 %v6849_v31  ;;  %3150 = vmatpush.bf16.msrb.mxu2 %v6836_v49 }
 0x271   : > { %v8204_v8 = vpack.c.b16 %v2297_v9, %v8200_v1  ;;  %2120 = vmatmul.bf16.gmra.mxu0 %v7913_v43  ;;  %v2174_v26 = vadd.f32 %v8130_v60, %v2142_v13  ;;  %v8233_v13 = vpop.f32.mrf.mxu3 }
 0x273   : > { %2654 = vmatmul.bf16.gmra.mxu2 %v8204_v8  ;;  %v2708_v36 = vrot.slane %v8204_v8, 1  ;;  %v2344_v25 = vshll.u32 %v8204_v8, 16  ;;  %v2202_v38 = vmax.f32 %v2174_v26, 0.0  ;;  %v1598_v26 = vadd.f32 %v7926_v19, %v7924_v46 }
 0x274   : > { %v8214_v27 = vpop.f32.mrf.mxu2  ;;  %3484 = vmatpush.bf16.msrb.mxu0 %v6848_v11  ;;  %v2348_v15 = vshrl.u32 %v8204_v8, 16  ;;  %3151 = vmatpush.bf16.msrb.mxu2 %v6835_v29 }
 0x275   : > { %v8218_v43 = vsel %vm851_vm3, %v2706_v61, %v2708_v36  ;;  %v2346_v17 = vrot.slane %v2344_v25, 1  ;;  %v2230_v50 = vpack.c.bf16 %v2202_v38, %v2202_v38 }
 0x276   : > { %v2083_v10 = vpop.f32.mrf.mxu0  ;;  %2822 = vmatmul.bf16.gmra.mxu3 %v8218_v43 }
 0x277   : > { %v2143_v23 = vadd.f32 %v2083_v10, %v1963_v41  ;;  %v8224_v54 = vsel %vm431_vm0, %v2342_v51, %v2346_v17  ;;  %v2298_v37 = vunpack.c.l.b16 %v2230_v50  ;;  %v1776_v41 = vadd.f32 %v8124_v28, %v1598_v26 }
 0x278   : > { %2520 = vmatmul.bf16.gmra.mxu1 %v8224_v54  ;;  %3485 = vmatpush.bf16.msrb.mxu0 %v6847_v22  ;;  %v2350_v38 = vor.u32 %v2348_v15, %v2346_v17  ;;  %v1987_v17 = vrot.slane %v8086_v20, 1  ;;  %v1600_v26 = vadd.f32 %v7951_v5, %v7949_v62 }
 0x279   : > { %v2175_v61 = vadd.f32 %v8130_v60, %v2143_v23  ;;  %v1965_v16 = vadd.f32 %v8108_v47, %v1776_v41  ;;  %v8256_v11 = vpop.f32.mrf.mxu3  ;;  %v1777_v47 = vadd.f32 %v8139_v14, %v1599_v3 }
 0x27b   : > { %v2203_v56 = vmax.f32 %v2175_v61, 0.0  ;;  %v1966_v2 = vadd.f32 %v8120_v12, %v1777_v47  ;;  %v6827_v47 = vld [vmem:[#allocation2 + $0xe0] sm:$0xff] }
 0x27c   : > { %v8230_v55 = vpop.f32.mrf.mxu2  ;;  %2976 = vmatpush.bf16.msrb.mxu1 %v6827_v47 }
 0x27d   : > { %v2231_v9 = vpack.c.bf16 %v2203_v56, %v2203_v56 }
 0x27e   : > { %v2086_v35 = vpop.f32.mrf.mxu0 }
 0x27f   : > { %v2299_v44 = vunpack.c.l.b16 %v2231_v9  ;;  %v2144_v25 = vadd.f32 %v2086_v35, %v1964_v59 }
 0x281   : > { %v8240_v51 = vpack.c.b16 %v2299_v44, %v2298_v37  ;;  %2125 = vmatmul.bf16.gmra.mxu0 %v1985_v45  ;;  %v2176_v31 = vadd.f32 %v8130_v60, %v2144_v25  ;;  %v1990_v45 = vsel %vm851_vm3, %v1984_v39, %v1987_v17  ;;  %v1778_v25 = vadd.f32 %v8147_v0, %v1600_v26  ;;  %v8274_v20 = vpop.f32.mrf.mxu3 }
 0x283   : > { %2659 = vmatmul.bf16.gmra.mxu2 %v8240_v51  ;;  %v2710_v10 = vrot.slane %v8240_v51, 1  ;;  %v2352_v46 = vshll.u32 %v8240_v51, 16  ;;  %v2204_v61 = vmax.f32 %v2176_v31, 0.0  ;;  %v2356_v31 = vshrl.u32 %v8240_v51, 16 }
 0x284   : > { %v8247_v19 = vpop.f32.mrf.mxu2  ;;  %v1967_v0 = vadd.f32 %v8136_v18, %v1778_v25 }
 0x285   : > { %v8251_v28 = vsel %vm851_vm3, %v2708_v36, %v2710_v10  ;;  %v2354_v23 = vrot.slane %v2352_v46, 1  ;;  %v2232_v59 = vpack.c.bf16 %v2204_v61, %v2204_v61 }
 0x286   : > { %v2088_v49 = vpop.f32.mrf.mxu0  ;;  %2827 = vmatmul.bf16.gmra.mxu3 %v8251_v28 }
 0x287   : > { %v2145_v50 = vadd.f32 %v2088_v49, %v1965_v16  ;;  %v8259_v56 = vsel %vm431_vm0, %v2350_v38, %v2354_v23  ;;  %v2300_v37 = vunpack.c.l.b16 %v2232_v59  ;;  %v2358_v46 = vor.u32 %v2356_v31, %v2354_v23 }
 0x288   : > { %2525 = vmatmul.bf16.gmra.mxu1 %v8259_v56  ;;  %v1601_v49 = vadd.f32 %v7959_v7, %v7957_v24 }
 0x289   : > { %v2177_v36 = vadd.f32 %v8130_v60, %v2145_v50 }
 0x28a   : > { %v1779_v18 = vadd.f32 %v8157_v33, %v1601_v49  ;;  %v9582_v49 = vld [vmem:[#allocation17_spill] sm:$0xff] }
 0x28b   : > { %v2205_v9 = vmax.f32 %v2177_v36, 0.0  ;;  %v8296_v36 = vpop.f32.mrf.mxu3 }
 0x28c   : > { %v8265_v22 = vpop.f32.mrf.mxu2  ;;  %v1968_v24 = vadd.f32 %v8145_v58, %v1779_v18 }
 0x28d   : > { %v2233_v6 = vpack.c.bf16 %v2205_v9, %v2205_v9 }
 0x28e   : > { %v2091_v35 = vpop.f32.mrf.mxu0 }
 0x28f   : > { %v2301_v44 = vunpack.c.l.b16 %v2233_v6  ;;  %v2146_v14 = vadd.f32 %v2091_v35, %v1966_v2  ;;  %v9580_v2 = vld [vmem:[#allocation11_spill] sm:$0xff]  ;;  %v9581_v6 = vld [vmem:[#allocation16_spill] sm:$0xff] }
 0x290   : > { %v1602_v35 = vadd.f32 %v9581_v6, %v9580_v2  ;;  %v9584_v2 = vld [vmem:[#allocation9_spill] sm:$0xff] }
 0x291   : > { %v8272_v41 = vpack.c.b16 %v2301_v44, %v2300_v37  ;;  %2130 = vmatmul.bf16.gmra.mxu0 %v1990_v45  ;;  %v2178_v12 = vadd.f32 %v8130_v60, %v2146_v14  ;;  %v9585_v6 = vld [vmem:[#allocation13_spill] sm:$0xff] }
 0x292   : > { %v1780_v33 = vadd.f32 %v8166_v32, %v1602_v35  ;;  %v1604_v35 = vadd.f32 %v9585_v6, %v9584_v2 }
 0x293   : > { %2664 = vmatmul.bf16.gmra.mxu2 %v8272_v41  ;;  %v2712_v39 = vrot.slane %v8272_v41, 1  ;;  %v2360_v62 = vshll.u32 %v8272_v41, 16  ;;  %v2206_v3 = vmax.f32 %v2178_v12, 0.0  ;;  %v2364_v25 = vshrl.u32 %v8272_v41, 16 }
 0x294   : > { %v8281_v5 = vpop.f32.mrf.mxu2  ;;  %v1969_v31 = vadd.f32 %v8160_v40, %v1780_v33 }
 0x295   : > { %v8285_v15 = vsel %vm851_vm3, %v2710_v10, %v2712_v39  ;;  %v2362_v16 = vrot.slane %v2360_v62, 1  ;;  %v2234_v23 = vpack.c.bf16 %v2206_v3, %v2206_v3  ;;  %v8315_v62 = vpop.f32.mrf.mxu3  ;;  %v9583_v3 = vld [vmem:[#allocation25_spill] sm:$0xff] }
 0x296   : > { %v2093_v38 = vpop.f32.mrf.mxu0  ;;  %2832 = vmatmul.bf16.gmra.mxu3 %v8285_v15 }
 0x297   : > { %v2147_v61 = vadd.f32 %v2093_v38, %v1967_v0  ;;  %v8291_v50 = vsel %vm431_vm0, %v2358_v46, %v2362_v16  ;;  %v2302_v45 = vunpack.c.l.b16 %v2234_v23  ;;  %v2366_v0 = vor.u32 %v2364_v25, %v2362_v16  ;;  %v6834_v23 = vld [vmem:[#allocation2 + $0x118] sm:$0xff] }
 0x298   : > { %2530 = vmatmul.bf16.gmra.mxu1 %v8291_v50  ;;  %3152 = vmatpush.bf16.msrb.mxu2 %v6834_v23 }
 0x299   : > { %v2179_v10 = vadd.f32 %v8130_v60, %v2147_v61  ;;  %v1603_v61 = vadd.f32 %v9583_v3, %v9582_v49 }
 0x29b   : > { %v2207_v17 = vmax.f32 %v2179_v10, 0.0  ;;  %v1781_v40 = vadd.f32 %v8184_v53, %v1603_v61  ;;  %v1782_v53 = vadd.f32 %v8195_v57, %v1604_v35 }
 0x29c   : > { %v8298_v59 = vpop.f32.mrf.mxu2 }
 0x29d   : > { %v2235_v7 = vpack.c.bf16 %v2207_v17, %v2207_v17  ;;  %v1971_v49 = vadd.f32 %v8193_v48, %v1782_v53  ;;  %v9589_v53 = vld [vmem:[#allocation10_spill] sm:$0xff] }
 0x29e   : > { %v2096_v9 = vpop.f32.mrf.mxu0 }
 0x29f   : > { %v2303_v26 = vunpack.c.l.b16 %v2235_v7  ;;  %v2148_v37 = vadd.f32 %v2096_v9, %v1968_v24  ;;  %v1970_v7 = vadd.f32 %v8173_v34, %v1781_v40  ;;  %v9586_v40 = vld [vmem:[#allocation19_spill] sm:$0xff] }
 0x2a1   : > { %v8304_v44 = vpack.c.b16 %v2303_v26, %v2302_v45  ;;  %3486 = vmatmul.bf16.vlgmr.msrb.gmra.mxu0 %v8204_v8  ;;  %v2180_v14 = vadd.f32 %v8130_v60, %v2148_v37  ;;  %v8334_v37 = vpop.f32.mrf.mxu3 }
 0x2a3   : > { %2669 = vmatmul.bf16.gmra.mxu2 %v8304_v44  ;;  %v2714_v58 = vrot.slane %v8304_v44, 1  ;;  %v2368_v29 = vshll.u32 %v8304_v44, 16  ;;  %v2208_v47 = vmax.f32 %v2180_v14, 0.0 }
 0x2a4   : > { %v8312_v12 = vpop.f32.mrf.mxu2 }
 0x2a5   : > { %v8318_v32 = vsel %vm851_vm3, %v2712_v39, %v2714_v58  ;;  %v2370_v46 = vrot.slane %v2368_v29, 1  ;;  %v2236_v16 = vpack.c.bf16 %v2208_v47, %v2208_v47  ;;  %v6826_v29 = vld [vmem:[#allocation2 + $0xd8] sm:$0xff] }
 0x2a6   : > { %v2098_v38 = vpop.f32.mrf.mxu0  ;;  %2837 = vmatmul.bf16.gmra.mxu3 %v8318_v32  ;;  %2977 = vmatpush.bf16.msrb.mxu1 %v6826_v29  ;;  %v9590_v29 = vld [vmem:[#allocation14_spill] sm:$0xff] }
 0x2a7   : > { %v2149_v18 = vadd.f32 %v2098_v38, %v1969_v31  ;;  %v8324_v10 = vsel %vm431_vm0, %v2366_v0, %v2370_v46  ;;  %v2304_v26 = vunpack.c.l.b16 %v2236_v16  ;;  %v2372_v0 = vshrl.u32 %v8304_v44, 16 }
 0x2a8   : > { %2535 = vmatmul.bf16.gmra.mxu1 %v8324_v10 }
 0x2a9   : > { %v2181_v39 = vadd.f32 %v8130_v60, %v2149_v18  ;;  %v2374_v47 = vor.u32 %v2372_v0, %v2370_v46  ;;  %v8360_v48 = vpop.f32.mrf.mxu3  ;;  %v9588_v46 = vld [vmem:[#allocation24_spill] sm:$0xff] }
 0x2aa   : > { %v1614_v2 = vadd.f32 %v9588_v46, %v8102_v21  ;;  %v6833_v21 = vld [vmem:[#allocation2 + $0x110] sm:$0xff] }
 0x2ab   : > { %v2209_v17 = vmax.f32 %v2181_v39, 0.0  ;;  %v9587_v39 = vld [vmem:[#allocation20_spill] sm:$0xff]  ;;  %3153 = vmatpush.bf16.msrb.mxu2 %v6833_v21 }
 0x2ac   : > { %v8329_v24 = vpop.f32.mrf.mxu2  ;;  %v1605_v16 = vadd.f32 %v9587_v39, %v9586_v40 }
 0x2ad   : > { %v2237_v9 = vpack.c.bf16 %v2209_v17, %v2209_v17 }
 0x2ae   : > { %v2101_v45 = vpop.f32.mrf.mxu0 }
 0x2af   : > { %v2305_v33 = vunpack.c.l.b16 %v2237_v9  ;;  %v2150_v14 = vadd.f32 %v2101_v45, %v1970_v7 }
 0x2b1   : > { %v8337_v25 = vpack.c.b16 %v2305_v33, %v2304_v26  ;;  %3491 = vmatmul.bf16.gmra.mxu0 %v8240_v51  ;;  %v2182_v31 = vadd.f32 %v8130_v60, %v2150_v14 }
 0x2b3   : > { %2674 = vmatmul.bf16.gmra.mxu2 %v8337_v25  ;;  %v2716_v34 = vrot.slane %v8337_v25, 1  ;;  %v2376_v38 = vshll.u32 %v8337_v25, 16  ;;  %v2210_v17 = vmax.f32 %v2182_v31, 0.0  ;;  %v1606_v31 = vadd.f32 %v9590_v29, %v9589_v53  ;;  %v6825_v29 = vld [vmem:[#allocation2 + $0xd0] sm:$0xff] }
 0x2b4   : > { %v1757_v3 = vpop.f32.mrf.mxu2  ;;  %v2380_v39 = vshrl.u32 %v8337_v25, 16  ;;  %2978 = vmatpush.bf16.msrb.mxu1 %v6825_v29 }
 0x2b5   : > { %v8347_v57 = vadd.f32 %v1757_v3, %v8091_v4  ;;  %v8350_v61 = vsel %vm851_vm3, %v2714_v58, %v2716_v34  ;;  %v2378_v18 = vrot.slane %v2376_v38, 1  ;;  %v1783_v4 = vadd.f32 %v8214_v27, %v1605_v16 }
 0x2b6   : > { %v2103_v23 = vpop.f32.mrf.mxu0  ;;  %2842 = vmatmul.bf16.gmra.mxu3 %v8350_v61  ;;  %v2238_v6 = vpack.c.bf16 %v2210_v17, %v2210_v17  ;;  %v1784_v3 = vadd.f32 %v8230_v55, %v1606_v31  ;;  %v1586_v31 = vpop.f32.mrf.mxu1 }
 0x2b7   : > { %v2151_v7 = vadd.f32 %v2103_v23, %v1971_v49  ;;  %v8356_v9 = vsel %vm431_vm0, %v2374_v47, %v2378_v18  ;;  %v1972_v26 = vadd.f32 %v8209_v52, %v1783_v4  ;;  %v8374_v23 = vpop.f32.mrf.mxu3  ;;  %v2382_v46 = vor.u32 %v2380_v39, %v2378_v18 }
 0x2b8   : > { %2540 = vmatmul.bf16.gmra.mxu1 %v8356_v9  ;;  %v2306_v27 = vunpack.c.l.b16 %v2238_v6  ;;  %v1973_v17 = vadd.f32 %v8233_v13, %v1784_v3 }
 0x2b9   : > { %v2183_v58 = vadd.f32 %v8130_v60, %v2151_v7  ;;  %v9591_v7 = vld [vmem:[#allocation32_spill] sm:$0xff] }
 0x2bb   : > { %v2211_v35 = vmax.f32 %v2183_v58, 0.0 }
 0x2bc   : > { %v1759_v45 = vpop.f32.mrf.mxu2 }
 0x2bd   : > { %v2239_v33 = vpack.c.bf16 %v2211_v35, %v2211_v35  ;;  %v8366_v14 = vadd.f32 %v1759_v45, %v1614_v2  ;;  %v9592_v35 = vld [vmem:[#allocation22_spill] sm:$0xff]  ;;  %v9593_v45 = vld [vmem:[#allocation23_spill] sm:$0xff] }
 0x2be   : > { %v2106_v0 = vpop.f32.mrf.mxu0 }
 0x2bf   : > { %v2307_v38 = vunpack.c.l.b16 %v2239_v33  ;;  %v2152_v49 = vadd.f32 %v2106_v0, %v1972_v26  ;;  %v1607_v26 = vadd.f32 %v9593_v45, %v9592_v35  ;;  %v9594_v0 = vld [vmem:[#allocation33_spill] sm:$0xff] }
 0x2c1   : > { %v8371_v47 = vpack.c.b16 %v2307_v38, %v2306_v27  ;;  %3496 = vmatmul.bf16.gmra.mxu0 %v8272_v41  ;;  %v2184_v52 = vadd.f32 %v8130_v60, %v2152_v49  ;;  %v1616_v27 = vadd.f32 %v1586_v31, %v9594_v0 }
 0x2c3   : > { %2679 = vmatmul.bf16.gmra.mxu2 %v8371_v47  ;;  %v2718_v40 = vrot.slane %v8371_v47, 1  ;;  %v2384_v16 = vshll.u32 %v8371_v47, 16  ;;  %v2212_v33 = vmax.f32 %v2184_v52, 0.0  ;;  %v8399_v52 = vpop.f32.mrf.mxu3 }
 0x2c4   : > { %v1762_v55 = vpop.f32.mrf.mxu2 }
 0x2c5   : > { %v8383_v4 = vadd.f32 %v1762_v55, %v9591_v7  ;;  %v8386_v58 = vsel %vm851_vm3, %v2716_v34, %v2718_v40  ;;  %v2386_v2 = vrot.slane %v2384_v16, 1  ;;  %v1785_v34 = vadd.f32 %v8247_v19, %v1607_v26  ;;  %v9595_v55 = vld [vmem:[#allocation12_spill] sm:$0xff]  ;;  %v9596_v7 = vld [vmem:[#allocation15_spill] sm:$0xff] }
 0x2c6   : > { %v2108_v6 = vpop.f32.mrf.mxu0  ;;  %2847 = vmatmul.bf16.gmra.mxu3 %v8386_v58  ;;  %v2240_v38 = vpack.c.bf16 %v2212_v33, %v2212_v33 }
 0x2c7   : > { %v2153_v53 = vadd.f32 %v2108_v6, %v1973_v17  ;;  %v8392_v13 = vsel %vm431_vm0, %v2382_v46, %v2386_v2  ;;  %v1974_v21 = vadd.f32 %v8256_v11, %v1785_v34  ;;  %v1608_v46 = vadd.f32 %v9596_v7, %v9595_v55 }
 0x2c8   : > { %2545 = vmatmul.bf16.gmra.mxu1 %v8392_v13  ;;  %v2308_v19 = vunpack.c.l.b16 %v2240_v38  ;;  %v9597_v38 = vld [vmem:[#allocation26_spill] sm:$0xff] }
 0x2c9   : > { %v2185_v18 = vadd.f32 %v8130_v60, %v2153_v53  ;;  %v1786_v45 = vadd.f32 %v8265_v22, %v1608_v46  ;;  %v2388_v53 = vshrl.u32 %v8371_v47, 16 }
 0x2cb   : > { %v2213_v49 = vmax.f32 %v2185_v18, 0.0  ;;  %v1975_v31 = vadd.f32 %v8274_v20, %v1786_v45  ;;  %v2390_v22 = vor.u32 %v2388_v53, %v2386_v2  ;;  %v6832_v20 = vld [vmem:[#allocation2 + $0x108] sm:$0xff]  ;;  %v9600_v53 = vld [vmem:[#allocation28_spill] sm:$0xff] }
 0x2cc   : > { %v1764_v3 = vpop.f32.mrf.mxu2  ;;  %3154 = vmatpush.bf16.msrb.mxu2 %v6832_v20 }
 0x2cd   : > { %v2241_v39 = vpack.c.bf16 %v2213_v49, %v2213_v49  ;;  %v8401_v16 = vadd.f32 %v1764_v3, %v1616_v27  ;;  %v9598_v49 = vld [vmem:[#allocation27_spill] sm:$0xff] }
 0x2ce   : > { %v2111_v17 = vpop.f32.mrf.mxu0  ;;  %v1609_v3 = vadd.f32 %v9598_v49, %v9597_v38 }
 0x2cf   : > { %v2309_v6 = vunpack.c.l.b16 %v2241_v39  ;;  %v2154_v35 = vadd.f32 %v2111_v17, %v1974_v21  ;;  %v8421_v21 = vpop.f32.mrf.mxu3 }
 0x2d1   : > { %v8406_v26 = vpack.c.b16 %v2309_v6, %v2308_v19  ;;  %3501 = vmatmul.bf16.gmra.mxu0 %v8304_v44  ;;  %v2186_v11 = vadd.f32 %v8130_v60, %v2154_v35 }
 0x2d3   : > { %2684 = vmatmul.bf16.gmra.mxu2 %v8406_v26  ;;  %v2720_v33 = vrot.slane %v8406_v26, 1  ;;  %v2392_v29 = vshll.u32 %v8406_v26, 16  ;;  %v2214_v39 = vmax.f32 %v2186_v11, 0.0  ;;  %v9599_v11 = vld [vmem:[#allocation18_spill] sm:$0xff] }
 0x2d5   : > { %v8416_v34 = vsel %vm851_vm3, %v2718_v40, %v2720_v33  ;;  %v2394_v18 = vrot.slane %v2392_v29, 1  ;;  %v1787_v40 = vadd.f32 %v8281_v5, %v1609_v3  ;;  %v2242_v7 = vpack.c.bf16 %v2214_v39, %v2214_v39  ;;  %v6824_v3 = vld [vmem:[#allocation2 + $0xc8] sm:$0xff] }
 0x2d6   : > { %v2113_v0 = vpop.f32.mrf.mxu0  ;;  %v2645_v27 = vpop.f32.mrf.mxu2  ;;  %2852 = vmatmul.bf16.gmra.mxu3 %v8416_v34  ;;  %v1610_v29 = vadd.f32 %v9600_v53, %v9599_v11  ;;  %2979 = vmatpush.bf16.msrb.mxu1 %v6824_v3  ;;  %v6846_v11 = vld [vmem:[#allocation2 + $0x178] sm:$0xff]  ;;  %v9602_v53 = vld [vmem:[#allocation29_spill] sm:$0xff] }
 0x2d7   : > { %v2155_v17 = vadd.f32 %v2113_v0, %v1975_v31  ;;  %v8424_v55 = vsel %vm431_vm0, %v2390_v22, %v2394_v18  ;;  %v1976_v19 = vadd.f32 %v8296_v36, %v1787_v40  ;;  %v2310_v31 = vunpack.c.l.b16 %v2242_v7  ;;  %v8433_v49 = vpop.f32.mrf.mxu3  ;;  %3314 = vmatpush.bf16.msrb.mxu3 %v6846_v11  ;;  %v9604_v11 = vld [vmem:[#allocation21_spill] sm:$0xff] }
 0x2d8   : > { %2550 = vmatmul.bf16.gmra.mxu1 %v8424_v55  ;;  %v1788_v38 = vadd.f32 %v8298_v59, %v1610_v29  ;;  %v9603_v29 = vld [vmem:[#allocation30_spill] sm:$0xff] }
 0x2d9   : > { %v2187_v2 = vadd.f32 %v8130_v60, %v2155_v17  ;;  %v2396_v17 = vshrl.u32 %v8406_v26, 16 }
 0x2da   : > { %v1977_v59 = vadd.f32 %v8315_v62, %v1788_v38  ;;  %v6845_v38 = vld [vmem:[#allocation2 + $0x170] sm:$0xff] }
 0x2db   : > { %v2215_v46 = vmax.f32 %v2187_v2, 0.0  ;;  %v2398_v7 = vor.u32 %v2396_v17, %v2394_v18  ;;  %3315 = vmatpush.bf16.msrb.mxu3 %v6845_v38 }
 0x2dd   : > { %v2243_v6 = vpack.c.bf16 %v2215_v46, %v2215_v46 }
 0x2de   : > { %v2116_v35 = vpop.f32.mrf.mxu0  ;;  %v2647_v45 = vpop.f32.mrf.mxu2 }
 0x2df   : > { %v2311_v22 = vunpack.c.l.b16 %v2243_v6  ;;  %v2156_v0 = vadd.f32 %v2116_v35, %v1976_v19 }
 0x2e1   : > { %v8435_v5 = vpack.c.b16 %v2311_v22, %v2310_v31  ;;  %3506 = vmatmul.bf16.gmra.mxu0 %v8337_v25  ;;  %v2188_v36 = vadd.f32 %v8130_v60, %v2156_v0  ;;  %v1611_v31 = vadd.f32 %v9603_v29, %v9602_v53  ;;  %v6844_v29 = vld [vmem:[#allocation2 + $0x168] sm:$0xff] }
 0x2e2   : > { %3316 = vmatpush.bf16.msrb.mxu3 %v6844_v29  ;;  %v6842_v29 = vld [vmem:[#allocation2 + $0x158] sm:$0xff] }
 0x2e3   : > { %2689 = vmatmul.bf16.gmra.mxu2 %v8435_v5  ;;  %v2722_v39 = vrot.slane %v8435_v5, 1  ;;  %v2400_v20 = vshll.u32 %v8435_v5, 16  ;;  %v2216_v22 = vmax.f32 %v2188_v36, 0.0  ;;  %v1789_v62 = vadd.f32 %v8312_v12, %v1611_v31 }
 0x2e4   : > { %v1612_v12 = vadd.f32 %v9605_v30, %v9604_v11  ;;  %v2404_v38 = vshrl.u32 %v8435_v5, 16 }
 0x2e5   : > { %v2516_v40 = vpop.f32.mrf.mxu1  ;;  %v8445_v2 = vsel %vm851_vm3, %v2720_v33, %v2722_v39  ;;  %v2402_v46 = vrot.slane %v2400_v20, 1  ;;  %v2244_v17 = vpack.c.bf16 %v2216_v22, %v2216_v22  ;;  %v1978_v36 = vadd.f32 %v8334_v37, %v1789_v62 }
 0x2e6   : > { %9601 = vst [vmem:[#allocation11_spill] sm:$0xff] %v8445_v2  ;;  %v2646_v19 = vadd.f32 %v2645_v27, %v2516_v40  ;;  %v2118_v6 = vpop.f32.mrf.mxu0  ;;  %v2650_v35 = vpop.f32.mrf.mxu2  ;;  %2857 = vmatmul.bf16.gmra.mxu3 %v8445_v2  ;;  %v1790_v22 = vadd.f32 %v8329_v24, %v1612_v12 }
 0x2e7   : > { %v2157_v0 = vadd.f32 %v2118_v6, %v1977_v59  ;;  %v8451_v3 = vsel %vm431_vm0, %v2398_v7, %v2402_v46  ;;  %v2312_v31 = vunpack.c.l.b16 %v2244_v17 }
 0x2e8   : > { %2555 = vmatmul.bf16.gmra.mxu1 %v8451_v3  ;;  %v1979_v24 = vadd.f32 %v8360_v48, %v1790_v22 }
 0x2e9   : > { %v2189_v33 = vadd.f32 %v8130_v60, %v2157_v0  ;;  %v2818_v18 = vpop.f32.mrf.mxu3 }
 0x2ea   : > { %v8456_v27 = vadd.f32 %v2818_v18, %v2646_v19  ;;  %v6831_v19 = vld [vmem:[#allocation2 + $0x100] sm:$0xff] }
 0x2eb   : > { %v2217_v20 = vmax.f32 %v2189_v33, 0.0  ;;  %3155 = vmatpush.bf16.msrb.mxu2 %v6831_v19 }
 0x2ed   : > { %v2245_v59 = vpack.c.bf16 %v2217_v20, %v2217_v20  ;;  %v2518_v40 = vpop.f32.mrf.mxu1 }
 0x2ee   : > { %v2648_v7 = vadd.f32 %v2647_v45, %v2518_v40  ;;  %v2121_v6 = vpop.f32.mrf.mxu0  ;;  %v2652_v53 = vpop.f32.mrf.mxu2  ;;  %v6843_v45 = vld [vmem:[#allocation2 + $0x160] sm:$0xff] }
 0x2ef   : > { %v2313_v0 = vunpack.c.l.b16 %v2245_v59  ;;  %v2158_v2 = vadd.f32 %v2121_v6, %v1978_v36  ;;  %3317 = vmatpush.bf16.msrb.mxu3 %v6843_v45  ;;  %v2406_v59 = vor.u32 %v2404_v38, %v2402_v46 }
 0x2f1   : > { %v8462_v33 = vpack.c.b16 %v2313_v0, %v2312_v31  ;;  %v2820_v18 = vpop.f32.mrf.mxu3  ;;  %3511 = vmatmul.bf16.gmra.mxu0 %v8371_v47  ;;  %v2190_v62 = vadd.f32 %v8130_v60, %v2158_v2  ;;  %v6823_v0 = vld [vmem:[#allocation2 + $0xc0] sm:$0xff] }
 0x2f2   : > { %v8465_v37 = vadd.f32 %v2820_v18, %v2648_v7  ;;  %2980 = vmatpush.bf16.msrb.mxu1 %v6823_v0  ;;  %v1980_v18 = vadd.f32 %v8374_v23, %v8347_v57  ;;  %v6839_v0 = vld [vmem:[#allocation2 + $0x140] sm:$0xff] }
 0x2f3   : > { %2694 = vmatmul.bf16.gmra.mxu2 %v8462_v33  ;;  %v2724_v30 = vrot.slane %v8462_v33, 1  ;;  %v2408_v17 = vshll.u32 %v8462_v33, 16  ;;  %v2218_v11 = vmax.f32 %v2190_v62, 0.0  ;;  %3318 = vmatpush.bf16.msrb.mxu3 %v6842_v29 }
 0x2f5   : > { %v2521_v20 = vpop.f32.mrf.mxu1  ;;  %v8474_v36 = vsel %vm851_vm3, %v2722_v39, %v2724_v30  ;;  %v2410_v40 = vrot.slane %v2408_v17, 1  ;;  %v2246_v19 = vpack.c.bf16 %v2218_v11, %v2218_v11 }
 0x2f6   : > { %v2651_v7 = vadd.f32 %v2650_v35, %v2521_v20  ;;  %v2123_v6 = vpop.f32.mrf.mxu0  ;;  %v2655_v2 = vpop.f32.mrf.mxu2  ;;  %2862 = vmatmul.bf16.gmra.mxu3 %v8474_v36  ;;  %v6841_v35 = vld [vmem:[#allocation2 + $0x150] sm:$0xff]  ;;  %v6840_v20 = vld [vmem:[#allocation2 + $0x148] sm:$0xff] }
 0x2f7   : > { %v2159_v12 = vadd.f32 %v2123_v6, %v1979_v24  ;;  %v8478_v31 = vsel %vm431_vm0, %v2406_v59, %v2410_v40  ;;  %3319 = vmatpush.bf16.msrb.mxu3 %v6841_v35  ;;  %v2314_v59 = vunpack.c.l.b16 %v2246_v19  ;;  %v1981_v35 = vadd.f32 %v8399_v52, %v8366_v14  ;;  %v6862_v14 = vld [vmem:[#allocation2 + $0x1f8] sm:$0xff] }
 0x2f8   : > { %2560 = vmatmul.bf16.gmra.mxu1 %v8478_v31 }
 0x2f9   : > { %v2191_v48 = vadd.f32 %v8130_v60, %v2159_v12  ;;  %v2823_v39 = vpop.f32.mrf.mxu3  ;;  %3653 = vmatpush.bf16.msra.mxu1 %v6862_v14 }
 0x2fa   : > { %v8482_v46 = vadd.f32 %v2823_v39, %v2651_v7  ;;  %v6870_v39 = vld [vmem:[#allocation2 + $0x238] sm:$0xff] }
 0x2fb   : > { %v2219_v22 = vmax.f32 %v2191_v48, 0.0  ;;  %3320 = vmatpush.bf16.msrb.mxu3 %v6840_v20  ;;  %3819 = vmatpush.bf16.msra.mxu2 %v6870_v39 }
 0x2fd   : > { %v2247_v45 = vpack.c.bf16 %v2219_v22, %v2219_v22  ;;  %v2523_v62 = vpop.f32.mrf.mxu1 }
 0x2fe   : > { %v2653_v38 = vadd.f32 %v2652_v53, %v2523_v62  ;;  %v2126_v17 = vpop.f32.mrf.mxu0  ;;  %v2657_v24 = vpop.f32.mrf.mxu2  ;;  %v2412_v53 = vshrl.u32 %v8462_v33, 16 }
 0x2ff   : > { %v2315_v6 = vunpack.c.l.b16 %v2247_v45  ;;  %v2160_v29 = vadd.f32 %v2126_v17, %v1980_v18  ;;  %3321 = vmatpush.bf16.msrb.mxu3 %v6839_v0  ;;  %v1982_v0 = vadd.f32 %v8421_v21, %v8383_v4  ;;  %v7080_v4 = vld [vmem:[%s9493_s2] ss:$0 sm:$0xff] }
 0x300   : > { %v2414_v18 = vor.u32 %v2412_v53, %v2410_v40 }
 0x301   : > { %v8486_v12 = vpack.c.b16 %v2315_v6, %v2314_v59  ;;  %v2825_v7 = vpop.f32.mrf.mxu3  ;;  %3516 = vmatmul.bf16.gmra.mxu0 %v8406_v26  ;;  %v2192_v57 = vadd.f32 %v8130_v60, %v2160_v29 }
 0x302   : > { %v8489_v11 = vadd.f32 %v2825_v7, %v2653_v38  ;;  %v2435_v7 = vpack.c.b16 %v8150_v63, %v8150_v63 }
 0x303   : > { %2699 = vmatmul.bf16.gmra.mxu2 %v8486_v12  ;;  %v8494_v23 = vrot.slane %v8486_v12, 1  ;;  %v2416_v48 = vshll.u32 %v8486_v12, 16  ;;  %v2220_v20 = vmax.f32 %v2192_v57, 0.0 }
 0x305   : > { %v2526_v19 = vpop.f32.mrf.mxu1  ;;  %v8502_v22 = vsel %vm851_vm3, %v2724_v30, %v8494_v23  ;;  %v2418_v45 = vrot.slane %v2416_v48, 1  ;;  %v2248_v40 = vpack.c.bf16 %v2220_v20, %v2220_v20  ;;  %v2420_v20 = vshrl.u32 %v8486_v12, 16 }
 0x306   : > { %v2656_v62 = vadd.f32 %v2655_v2, %v2526_v19  ;;  %v2128_v38 = vpop.f32.mrf.mxu0  ;;  %v2660_v17 = vpop.f32.mrf.mxu2  ;;  %2867 = vmatmul.bf16.gmra.mxu3 %v8502_v22 }
 0x307   : > { %v2161_v59 = vadd.f32 %v2128_v38, %v1981_v35  ;;  %v8506_v6 = vsel %vm431_vm0, %v2414_v18, %v2418_v45  ;;  %v2921_v19 = vunpack.c.l.b16 %v2248_v40  ;;  %v8526_v14 = vor.u32 %v2420_v20, %v2418_v45 }
 0x308   : > { %9606 = vst [vmem:[#allocation16_spill] sm:$0xff] %v8506_v6  ;;  %2565 = vmatmul.bf16.gmra.mxu1 %v8506_v6 }
 0x309   : > { %v2193_v52 = vadd.f32 %v8130_v60, %v2161_v59  ;;  %v2828_v30 = vpop.f32.mrf.mxu3  ;;  %v2437_v59 = vshll.u32 %v2435_v7, 16 }
 0x30a   : > { %v8510_v29 = vadd.f32 %v2828_v30, %v2656_v62 }
 0x30b   : > { %v2221_v2 = vmax.f32 %v2193_v52, 0.0  ;;  %v1983_v52 = vadd.f32 %v8433_v49, %v8401_v16  ;;  %v6869_v16 = vld [vmem:[#allocation2 + $0x230] sm:$0xff] }
 0x30c   : > { %3820 = vmatpush.bf16.msra.mxu2 %v6869_v16 }
 0x30d   : > { %v2249_v57 = vpack.c.bf16 %v2221_v2, %v2221_v2  ;;  %v2528_v53 = vpop.f32.mrf.mxu1  ;;  %v2439_v2 = vrot.slane %v2437_v59, 1  ;;  %v3581_v59 = vpack.c.b16 %v8200_v1, %v8200_v1 }
 0x30e   : > { %v2658_v48 = vadd.f32 %v2657_v24, %v2528_v53  ;;  %v2131_v39 = vpop.f32.mrf.mxu0  ;;  %v2662_v35 = vpop.f32.mrf.mxu2  ;;  %v2739_v24 = vrot.slane %v2435_v7, 1 }
 0x30f   : > { %v2922_v18 = vunpack.c.l.b16 %v2249_v57  ;;  %v2162_v60 = vadd.f32 %v2131_v39, %v1982_v0 }
 0x310   : > { %v2742_v40 = vsel %vm851_vm3, %v8494_v23, %v2739_v24 }
 0x311   : > { %v8516_v38 = vpack.c.b16 %v2922_v18, %v2921_v19  ;;  %v2830_v62 = vpop.f32.mrf.mxu3  ;;  %3521 = vmatmul.bf16.gmra.mxu0 %v8435_v5  ;;  %v2194_v21 = vadd.f32 %v7080_v4, %v2162_v60 }
 0x312   : > { %v8520_v63 = vadd.f32 %v2830_v62, %v2658_v48 }
 0x313   : > { %3156 = vmatmul.bf16.vlgmr.msrb.gmra.mxu2 %v8224_v54  ;;  %v2222_v48 = vmax.f32 %v2194_v21, 0.0  ;;  %v2441_v54 = vsel %vm7382_vm2, %v8526_v14, %v2439_v2  ;;  %v8550_v1 = vrot.slane %v8516_v38, 1 }
 0x315   : > { %v2531_v30 = vpop.f32.mrf.mxu1  ;;  %v2250_v49 = vpack.c.bf16 %v2222_v48, %v2222_v48  ;;  %v3071_v48 = vshrl.u32 %v8516_v38, 16 }
 0x316   : > { %v2661_v0 = vadd.f32 %v2660_v17, %v2531_v30  ;;  %v2133_v57 = vpop.f32.mrf.mxu0  ;;  %v2665_v53 = vpop.f32.mrf.mxu2  ;;  %2872 = vmatmul.bf16.gmra.mxu3 %v2742_v40  ;;  %v3067_v17 = vshll.u32 %v8516_v38, 16 }
 0x317   : > { %v2163_v39 = vadd.f32 %v2133_v57, %v1983_v52  ;;  %v6861_v52 = vld [vmem:[#allocation2 + $0x1f0] sm:$0xff]  ;;  %v3426_v30 = vunpack.c.l.b16 %v2250_v49 }
 0x318   : > { %2570 = vmatmul.bf16.gmra.mxu1 %v2441_v54 }
 0x319   : > { %v2195_v45 = vadd.f32 %v7080_v4, %v2163_v39  ;;  %v2833_v7 = vpop.f32.mrf.mxu3  ;;  %3654 = vmatpush.bf16.msra.mxu1 %v6861_v52  ;;  %v8540_v4 = vrot.slane %v3067_v17, 1  ;;  %v3749_v39 = vrot.slane %v3581_v59, 1 }
 0x31a   : > { %v8535_v18 = vadd.f32 %v2833_v7, %v2661_v0 }
 0x31b   : > { %v2223_v60 = vmax.f32 %v2195_v45, 0.0  ;;  %v3583_v45 = vshll.u32 %v3581_v59, 16  ;;  %v8555_v7 = vor.u32 %v3071_v48, %v8540_v4 }
 0x31d   : > { %v2251_v62 = vpack.c.bf16 %v2223_v60, %v2223_v60  ;;  %v2533_v20 = vpop.f32.mrf.mxu1 }
 0x31e   : > { %v2663_v21 = vadd.f32 %v2662_v35, %v2533_v20  ;;  %v2667_v24 = vpop.f32.mrf.mxu2 }
 0x31f   : > { %v3427_v40 = vunpack.c.l.b16 %v2251_v62 }
 0x321   : > { %v8542_v2 = vpack.c.b16 %v3427_v40, %v3426_v30  ;;  %v2835_v0 = vpop.f32.mrf.mxu3  ;;  %3526 = vmatmul.bf16.gmra.mxu0 %v8462_v33  ;;  %v8572_v30 = vrot.slane %v3583_v45, 1  ;;  %v6868_v45 = vld [vmem:[#allocation2 + $0x228] sm:$0xff] }
 0x322   : > { %v8545_v57 = vadd.f32 %v2835_v0, %v2663_v21  ;;  %3821 = vmatpush.bf16.msra.mxu2 %v6868_v45 }
 0x323   : > { %3161 = vmatmul.bf16.gmra.mxu2 %v8259_v56  ;;  %v3746_v35 = vrot.slane %v8542_v2, 1  ;;  %v3572_v54 = vshll.u32 %v8542_v2, 16  ;;  %v3576_v62 = vshrl.u32 %v8542_v2, 16  ;;  %9612 = vst [vmem:[#allocation19_spill] sm:$0xff] %v8572_v30  ;;  %v6859_v30 = vld [vmem:[#allocation2 + $0x1e0] sm:$0xff] }
 0x325   : > { %v2536_v16 = vpop.f32.mrf.mxu1  ;;  %v8559_v49 = vsel %vm851_vm3, %v8550_v1, %v3746_v35  ;;  %v8562_v60 = vsel %vm851_vm3, %v3746_v35, %v3749_v39  ;;  %v3574_v17 = vrot.slane %v3572_v54, 1 }
 0x326   : > { %9608 = vst [vmem:[#allocation17_spill] sm:$0xff] %v8559_v49  ;;  %v2666_v20 = vadd.f32 %v2665_v53, %v2536_v16  ;;  %v2670_v21 = vpop.f32.mrf.mxu2  ;;  %3322 = vmatmul.bf16.vlgmr.msrb.gmra.mxu3 %v8218_v43  ;;  %v9614_v49 = vld [vmem:[#allocation11_spill] sm:$0xff] }
 0x327   : > { %9609 = vst [vmem:[#allocation25_spill] sm:$0xff] %v8562_v60  ;;  %v8568_v59 = vsel %vm431_vm0, %v8555_v7, %v3574_v17  ;;  %v8570_v52 = vor.u32 %v3576_v62, %v3574_v17  ;;  %v6860_v62 = vld [vmem:[#allocation2 + $0x1e8] sm:$0xff] }
 0x328   : > { %9610 = vst [vmem:[#allocation9_spill] sm:$0xff] %v8568_v59  ;;  %2981 = vmatmul.bf16.vlgmr.msrb.gmra.mxu1 %v8177_v42 }
 0x329   : > { %9611 = vst [vmem:[#allocation13_spill] sm:$0xff] %v8570_v52  ;;  %v2838_v40 = vpop.f32.mrf.mxu3  ;;  %3655 = vmatpush.bf16.msra.mxu1 %v6860_v62  ;;  %v6867_v62 = vld [vmem:[#allocation2 + $0x220] sm:$0xff] }
 0x32a   : > { %v8579_v53 = vadd.f32 %v2838_v40, %v2666_v20  ;;  %3822 = vmatpush.bf16.msra.mxu2 %v6867_v62 }
 0x32d   : > { %v2538_v48 = vpop.f32.mrf.mxu1  ;;  %3656 = vmatpush.bf16.msra.mxu1 %v6859_v30 }
 0x32e   : > { %v2668_v43 = vadd.f32 %v2667_v24, %v2538_v48  ;;  %v2672_v39 = vpop.f32.mrf.mxu2 }
 0x331   : > { %v2840_v35 = vpop.f32.mrf.mxu3  ;;  %3531 = vmatmul.bf16.gmra.mxu0 %v8486_v12 }
 0x332   : > { %v8582_v54 = vadd.f32 %v2840_v35, %v2668_v43 }
 0x333   : > { %3166 = vmatmul.bf16.gmra.mxu2 %v8291_v50 }
 0x335   : > { %v2541_v42 = vpop.f32.mrf.mxu1 }
 0x336   : > { %v2671_v16 = vadd.f32 %v2670_v21, %v2541_v42  ;;  %v2675_v17 = vpop.f32.mrf.mxu2  ;;  %3327 = vmatmul.bf16.gmra.mxu3 %v8251_v28 }
 0x338   : > { %2986 = vmatmul.bf16.gmra.mxu1 %v8204_v8 }
 0x339   : > { %v2843_v20 = vpop.f32.mrf.mxu3 }
 0x33a   : > { %v8587_v24 = vadd.f32 %v2843_v20, %v2671_v16 }
 0x33d   : > { %v2543_v40 = vpop.f32.mrf.mxu1 }
 0x33e   : > { %v2673_v48 = vadd.f32 %v2672_v39, %v2543_v40  ;;  %v2677_v43 = vpop.f32.mrf.mxu2 }
 0x341   : > { %v2845_v35 = vpop.f32.mrf.mxu3  ;;  %3536 = vmatmul.bf16.gmra.mxu0 %v8516_v38 }
 0x342   : > { %v8590_v0 = vadd.f32 %v2845_v35, %v2673_v48 }
 0x343   : > { %3171 = vmatmul.bf16.gmra.mxu2 %v8324_v10 }
 0x345   : > { %v2546_v21 = vpop.f32.mrf.mxu1 }
 0x346   : > { %v2676_v45 = vadd.f32 %v2675_v17, %v2546_v21  ;;  %v2680_v42 = vpop.f32.mrf.mxu2  ;;  %3332 = vmatmul.bf16.gmra.mxu3 %v8285_v15 }
 0x348   : > { %2991 = vmatmul.bf16.gmra.mxu1 %v8240_v51 }
 0x349   : > { %v2848_v8 = vpop.f32.mrf.mxu3 }
 0x34a   : > { %v8595_v16 = vadd.f32 %v2848_v8, %v2676_v45 }
 0x34d   : > { %v2548_v39 = vpop.f32.mrf.mxu1 }
 0x34e   : > { %v2678_v20 = vadd.f32 %v2677_v43, %v2548_v39  ;;  %v2682_v40 = vpop.f32.mrf.mxu2 }
 0x351   : > { %v2850_v48 = vpop.f32.mrf.mxu3  ;;  %3541 = vmatmul.bf16.gmra.mxu0 %v8542_v2  ;;  %v6866_v2 = vld [vmem:[#allocation2 + $0x218] sm:$0xff] }
 0x352   : > { %v8598_v35 = vadd.f32 %v2850_v48, %v2678_v20  ;;  %3823 = vmatpush.bf16.msra.mxu2 %v6866_v2 }
 0x353   : > { %3176 = vmatmul.bf16.gmra.mxu2 %v8356_v9 }
 0x355   : > { %v2551_v17 = vpop.f32.mrf.mxu1 }
 0x356   : > { %v2681_v21 = vadd.f32 %v2680_v42, %v2551_v17  ;;  %v2685_v51 = vpop.f32.mrf.mxu2  ;;  %3337 = vmatmul.bf16.gmra.mxu3 %v8318_v32 }
 0x358   : > { %2996 = vmatmul.bf16.gmra.mxu1 %v8272_v41  ;;  %v6858_v41 = vld [vmem:[#allocation2 + $0x1d8] sm:$0xff] }
 0x359   : > { %v2853_v45 = vpop.f32.mrf.mxu3  ;;  %3657 = vmatpush.bf16.msra.mxu1 %v6858_v41 }
 0x35a   : > { %v8603_v8 = vadd.f32 %v2853_v45, %v2681_v21 }
 0x35d   : > { %v2553_v43 = vpop.f32.mrf.mxu1 }
 0x35e   : > { %v2683_v62 = vadd.f32 %v2682_v40, %v2553_v43  ;;  %v2687_v30 = vpop.f32.mrf.mxu2 }
 0x361   : > { %v2855_v39 = vpop.f32.mrf.mxu3 }
 0x362   : > { %v8605_v52 = vadd.f32 %v2855_v39, %v2683_v62 }
 0x363   : > { %3181 = vmatmul.bf16.gmra.mxu2 %v8392_v13 }
 0x365   : > { %v2556_v20 = vpop.f32.mrf.mxu1 }
 0x366   : > { %v2686_v42 = vadd.f32 %v2685_v51, %v2556_v20  ;;  %v2690_v48 = vpop.f32.mrf.mxu2  ;;  %3342 = vmatmul.bf16.gmra.mxu3 %v8350_v61 }
 0x368   : > { %3001 = vmatmul.bf16.gmra.mxu1 %v8304_v44 }
 0x369   : > { %v2858_v17 = vpop.f32.mrf.mxu3 }
 0x36a   : > { %v8610_v21 = vadd.f32 %v2858_v17, %v2686_v42  ;;  %v6865_v42 = vld [vmem:[#allocation2 + $0x210] sm:$0xff] }
 0x36b   : > { %3824 = vmatpush.bf16.msra.mxu2 %v6865_v42 }
 0x36d   : > { %v2558_v40 = vpop.f32.mrf.mxu1 }
 0x36e   : > { %v2688_v45 = vadd.f32 %v2687_v30, %v2558_v40  ;;  %v2692_v43 = vpop.f32.mrf.mxu2  ;;  %v6857_v40 = vld [vmem:[#allocation2 + $0x1d0] sm:$0xff] }
 0x36f   : > { %3658 = vmatpush.bf16.msra.mxu1 %v6857_v40 }
 0x371   : > { %v2860_v62 = vpop.f32.mrf.mxu3 }
 0x372   : > { %v8612_v39 = vadd.f32 %v2860_v62, %v2688_v45 }
 0x373   : > { %3186 = vmatmul.bf16.gmra.mxu2 %v8424_v55 }
 0x375   : > { %v2561_v2 = vpop.f32.mrf.mxu1 }
 0x376   : > { %v2691_v51 = vadd.f32 %v2690_v48, %v2561_v2  ;;  %v2695_v20 = vpop.f32.mrf.mxu2  ;;  %3347 = vmatmul.bf16.gmra.mxu3 %v8386_v58 }
 0x378   : > { %3006 = vmatmul.bf16.gmra.mxu1 %v8337_v25 }
 0x379   : > { %v2863_v44 = vpop.f32.mrf.mxu3 }
 0x37a   : > { %v8617_v59 = vadd.f32 %v2863_v44, %v2691_v51 }
 0x37d   : > { %v2563_v41 = vpop.f32.mrf.mxu1 }
 0x37e   : > { %v2693_v30 = vadd.f32 %v2692_v43, %v2563_v41  ;;  %v2697_v17 = vpop.f32.mrf.mxu2 }
 0x381   : > { %v2865_v45 = vpop.f32.mrf.mxu3 }
 0x382   : > { %v8619_v62 = vadd.f32 %v2865_v45, %v2693_v30  ;;  %v6864_v30 = vld [vmem:[#allocation2 + $0x208] sm:$0xff] }
 0x383   : > { %3191 = vmatmul.bf16.gmra.mxu2 %v8451_v3 }
 0x384   : > { %3825 = vmatpush.bf16.msra.mxu2 %v6864_v30 }
 0x385   : > { %v2566_v48 = vpop.f32.mrf.mxu1 }
 0x386   : > { %v2696_v2 = vadd.f32 %v2695_v20, %v2566_v48  ;;  %v2700_v60 = vpop.f32.mrf.mxu2  ;;  %3352 = vmatmul.bf16.gmra.mxu3 %v8416_v34 }
 0x388   : > { %3011 = vmatmul.bf16.gmra.mxu1 %v8371_v47  ;;  %v6856_v47 = vld [vmem:[#allocation2 + $0x1c8] sm:$0xff] }
 0x389   : > { %v2868_v25 = vpop.f32.mrf.mxu3  ;;  %3659 = vmatpush.bf16.msra.mxu1 %v6856_v47  ;;  %v6878_v47 = vld [vmem:[#allocation4 + $0x38] sm:$0xff] }
 0x38a   : > { %v8624_v51 = vadd.f32 %v2868_v25, %v2696_v2  ;;  %4332 = vmatpush.bf16.msra.mxu0 %v6878_v47 }
 0x38d   : > { %v2568_v44 = vpop.f32.mrf.mxu1 }
 0x38e   : > { %v2698_v43 = vadd.f32 %v2697_v17, %v2568_v44  ;;  %v2702_v42 = vpop.f32.mrf.mxu2 }
 0x391   : > { %v2870_v41 = vpop.f32.mrf.mxu3 }
 0x392   : > { %v8626_v40 = vadd.f32 %v2870_v41, %v2698_v43 }
 0x393   : > { %3196 = vmatmul.bf16.gmra.mxu2 %v8478_v31 }
 0x394   : > { %9613 = vst [vmem:[#allocation20_spill] sm:$0xff] %v8626_v40 }
 0x395   : > { %v2571_v45 = vpop.f32.mrf.mxu1 }
 0x396   : > { %v2701_v20 = vadd.f32 %v2700_v60, %v2571_v45  ;;  %v3157_v48 = vpop.f32.mrf.mxu2  ;;  %3357 = vmatmul.bf16.gmra.mxu3 %v9614_v49 }
 0x398   : > { %3016 = vmatmul.bf16.gmra.mxu1 %v8406_v26 }
 0x399   : > { %v2873_v2 = vpop.f32.mrf.mxu3 }
 0x39a   : > { %v8631_v25 = vadd.f32 %v2873_v2, %v2701_v20 }
 0x39d   : > { %v2573_v17 = vpop.f32.mrf.mxu1 }
 0x39e   : > { %v2703_v44 = vadd.f32 %v2702_v42, %v2573_v17  ;;  %v3159_v43 = vpop.f32.mrf.mxu2  ;;  %v6863_v42 = vld [vmem:[#allocation2 + $0x200] sm:$0xff] }
 0x39f   : > { %3826 = vmatpush.bf16.msra.mxu2 %v6863_v42 }
 0x3a1   : > { %v2875_v41 = vpop.f32.mrf.mxu3 }
 0x3a2   : > { %v8633_v40 = vadd.f32 %v2875_v41, %v2703_v44  ;;  %v6855_v41 = vld [vmem:[#allocation2 + $0x1c0] sm:$0xff] }
 0x3a3   : > { %3201 = vmatmul.bf16.gmra.mxu2 %v8506_v6  ;;  %3660 = vmatpush.bf16.msra.mxu1 %v6855_v41 }
 0x3a5   : > { %v2982_v30 = vpop.f32.mrf.mxu1 }
 0x3a6   : > { %v3042_v60 = vadd.f32 %v2982_v30, %v8456_v27  ;;  %v3162_v45 = vpop.f32.mrf.mxu2  ;;  %3362 = vmatmul.bf16.gmra.mxu3 %v8474_v36 }
 0x3a8   : > { %3021 = vmatmul.bf16.gmra.mxu1 %v8435_v5  ;;  %v8639_v26 = vadd.f32 %v3157_v48, %v3042_v60  ;;  %v8651_v5 = vsel %vm431_vm0, %v8526_v14, %v8540_v4  ;;  %v6886_v48 = vld [vmem:[#allocation4 + $0x78] sm:$0xff] }
 0x3a9   : > { %v8641_v20 = vpop.f32.mrf.mxu3  ;;  %9615 = vst [vmem:[#allocation24_spill] sm:$0xff] %v8651_v5  ;;  %4215 = vmatpush.bf16.msra.mxu3 %v6886_v48 }
 0x3ad   : > { %v2984_v2 = vpop.f32.mrf.mxu1 }
 0x3ae   : > { %v3043_v17 = vadd.f32 %v2984_v2, %v8465_v37  ;;  %v3164_v44 = vpop.f32.mrf.mxu2 }
 0x3b0   : > { %v8644_v6 = vadd.f32 %v3159_v43, %v3043_v17  ;;  %v9616_v43 = vld [vmem:[#allocation34_spill] sm:$0xff] }
 0x3b1   : > { %v8646_v27 = vpop.f32.mrf.mxu3  ;;  %v3076_v47 = vpack.c.b16 %v9616_v43, %v9616_v43 }
 0x3b3   : > { %3206 = vmatmul.bf16.gmra.mxu2 %v8651_v5  ;;  %v3078_v14 = vshll.u32 %v3076_v47, 16  ;;  %v6877_v5 = vld [vmem:[#allocation4 + $0x30] sm:$0xff] }
 0x3b4   : > { %4333 = vmatpush.bf16.msra.mxu0 %v6877_v5 }
 0x3b5   : > { %v2987_v30 = vpop.f32.mrf.mxu1 }
 0x3b6   : > { %v3044_v60 = vadd.f32 %v2987_v30, %v8482_v46  ;;  %v3167_v37 = vpop.f32.mrf.mxu2  ;;  %3367 = vmatmul.bf16.gmra.mxu3 %v8502_v22  ;;  %v3080_v46 = vrot.slane %v3078_v14, 1 }
 0x3b8   : > { %3026 = vmatmul.bf16.gmra.mxu1 %v8462_v33  ;;  %v8659_v42 = vadd.f32 %v3162_v45, %v3044_v60  ;;  %v3082_v43 = vsel %vm7382_vm2, %v8555_v7, %v3080_v46  ;;  %v8674_v45 = vsel %vm851_vm3, %v8494_v23, %v8550_v1  ;;  %v6885_v7 = vld [vmem:[#allocation4 + $0x70] sm:$0xff] }
 0x3b9   : > { %v8661_v2 = vpop.f32.mrf.mxu3  ;;  %4216 = vmatpush.bf16.msra.mxu3 %v6885_v7 }
 0x3bd   : > { %v2989_v4 = vpop.f32.mrf.mxu1 }
 0x3be   : > { %v3045_v17 = vadd.f32 %v2989_v4, %v8489_v11  ;;  %v3169_v41 = vpop.f32.mrf.mxu2 }
 0x3c0   : > { %v8664_v48 = vadd.f32 %v3164_v44, %v3045_v17 }
 0x3c1   : > { %v8666_v30 = vpop.f32.mrf.mxu3 }
 0x3c3   : > { %3211 = vmatmul.bf16.gmra.mxu2 %v3082_v43 }
 0x3c5   : > { %v2992_v33 = vpop.f32.mrf.mxu1 }
 0x3c6   : > { %v3046_v11 = vadd.f32 %v2992_v33, %v8510_v29  ;;  %v3172_v44 = vpop.f32.mrf.mxu2  ;;  %3372 = vmatmul.bf16.gmra.mxu3 %v8674_v45  ;;  %v3244_v29 = vrot.slane %v3076_v47, 1 }
 0x3c8   : > { %3031 = vmatmul.bf16.gmra.mxu1 %v8486_v12  ;;  %v8679_v60 = vadd.f32 %v3167_v37, %v3046_v11  ;;  %v3247_v12 = vsel %vm851_vm3, %v8550_v1, %v3244_v29  ;;  %v6884_v1 = vld [vmem:[#allocation4 + $0x68] sm:$0xff] }
 0x3c9   : > { %v8681_v14 = vpop.f32.mrf.mxu3  ;;  %4217 = vmatpush.bf16.msra.mxu3 %v6884_v1 }
 0x3cd   : > { %v2994_v5 = vpop.f32.mrf.mxu1 }
 0x3ce   : > { %v3047_v4 = vadd.f32 %v2994_v5, %v8520_v63  ;;  %v3174_v17 = vpop.f32.mrf.mxu2 }
 0x3d0   : > { %v8684_v46 = vadd.f32 %v3169_v41, %v3047_v4  ;;  %v6876_v41 = vld [vmem:[#allocation4 + $0x28] sm:$0xff] }
 0x3d1   : > { %v8686_v23 = vpop.f32.mrf.mxu3  ;;  %4334 = vmatpush.bf16.msra.mxu0 %v6876_v41 }
 0x3d3   : > { %3827 = vmatmul.bf16.vlgmr.msra.gmra.mxu2 %v8251_v28 }
 0x3d5   : > { %v2997_v43 = vpop.f32.mrf.mxu1 }
 0x3d6   : > { %v3048_v37 = vadd.f32 %v2997_v43, %v8535_v18  ;;  %v3177_v33 = vpop.f32.mrf.mxu2  ;;  %3377 = vmatmul.bf16.gmra.mxu3 %v3247_v12 }
 0x3d8   : > { %3036 = vmatmul.bf16.gmra.mxu1 %v8516_v38  ;;  %v8693_v11 = vadd.f32 %v3172_v44, %v3048_v37 }
 0x3d9   : > { %v8695_v63 = vpop.f32.mrf.mxu3 }
 0x3dd   : > { %v2999_v7 = vpop.f32.mrf.mxu1 }
 0x3de   : > { %v3049_v28 = vadd.f32 %v2999_v7, %v8545_v57  ;;  %v3179_v47 = vpop.f32.mrf.mxu2 }
 0x3e0   : > { %v8698_v5 = vadd.f32 %v3174_v17, %v3049_v28 }
 0x3e1   : > { %v8700_v4 = vpop.f32.mrf.mxu3 }
 0x3e3   : > { %3832 = vmatmul.bf16.gmra.mxu2 %v8285_v15  ;;  %v6875_v15 = vld [vmem:[#allocation4 + $0x20] sm:$0xff] }
 0x3e4   : > { %4335 = vmatpush.bf16.msra.mxu0 %v6875_v15  ;;  %v6874_v15 = vld [vmem:[#allocation4 + $0x18] sm:$0xff] }
 0x3e5   : > { %v3002_v18 = vpop.f32.mrf.mxu1 }
 0x3e6   : > { %v3050_v38 = vadd.f32 %v3002_v18, %v8579_v53  ;;  %v3182_v44 = vpop.f32.mrf.mxu2 }
 0x3e8   : > { %3661 = vmatmul.bf16.vlgmr.msra.gmra.mxu1 %v8259_v56  ;;  %v8705_v29 = vadd.f32 %v3177_v33, %v3050_v38  ;;  %4336 = vmatpush.bf16.msra.mxu0 %v6874_v15 }
 0x3e9   : > { %v8707_v43 = vpop.f32.mrf.mxu3 }
 0x3ed   : > { %v3004_v57 = vpop.f32.mrf.mxu1 }
 0x3ee   : > { %v3051_v17 = vadd.f32 %v3004_v57, %v8582_v54  ;;  %v3184_v12 = vpop.f32.mrf.mxu2  ;;  %v6883_v54 = vld [vmem:[#allocation4 + $0x60] sm:$0xff] }
 0x3ef   : > { %4218 = vmatpush.bf16.msra.mxu3 %v6883_v54 }
 0x3f0   : > { %v8710_v37 = vadd.f32 %v3179_v47, %v3051_v17 }
 0x3f1   : > { %v8712_v41 = vpop.f32.mrf.mxu3 }
 0x3f3   : > { %3837 = vmatmul.bf16.gmra.mxu2 %v8318_v32 }
 0x3f5   : > { %v3007_v53 = vpop.f32.mrf.mxu1 }
 0x3f6   : > { %v3052_v7 = vadd.f32 %v3007_v53, %v8587_v24  ;;  %v3187_v56 = vpop.f32.mrf.mxu2  ;;  %v8733_v53 = vpop.f32.mrf.mxu0 }
 0x3f8   : > { %3666 = vmatmul.bf16.gmra.mxu1 %v8291_v50  ;;  %v8717_v33 = vadd.f32 %v3182_v44, %v3052_v7 }
 0x3f9   : > { %v8719_v28 = vpop.f32.mrf.mxu3 }
 0x3fd   : > { %v3009_v47 = vpop.f32.mrf.mxu1 }
 0x3fe   : > { %v3053_v1 = vadd.f32 %v3009_v47, %v8590_v0  ;;  %v3189_v18 = vpop.f32.mrf.mxu2 }
 0x400   : > { %v8722_v38 = vadd.f32 %v3184_v12, %v3053_v1 }
 0x401   : > { %v8724_v32 = vpop.f32.mrf.mxu3 }
 0x403   : > { %3842 = vmatmul.bf16.gmra.mxu2 %v8350_v61 }
 0x405   : > { %v3012_v24 = vpop.f32.mrf.mxu1 }
 0x406   : > { %v3054_v57 = vadd.f32 %v3012_v24, %v8595_v16  ;;  %v3192_v50 = vpop.f32.mrf.mxu2  ;;  %v6882_v16 = vld [vmem:[#allocation4 + $0x58] sm:$0xff] }
 0x407   : > { %4219 = vmatpush.bf16.msra.mxu3 %v6882_v16  ;;  %v6873_v16 = vld [vmem:[#allocation4 + $0x10] sm:$0xff] }
 0x408   : > { %3671 = vmatmul.bf16.gmra.mxu1 %v8324_v10  ;;  %v8729_v44 = vadd.f32 %v3187_v56, %v3054_v57  ;;  %v8741_v10 = vpop.f32.mrf.mxu0  ;;  %4337 = vmatpush.bf16.msra.mxu0 %v6873_v16 }
 0x409   : > { %v8731_v17 = vpop.f32.mrf.mxu3 }
 0x40d   : > { %v3014_v0 = vpop.f32.mrf.mxu1 }
 0x40e   : > { %v3055_v12 = vadd.f32 %v3014_v0, %v8598_v35  ;;  %v3194_v7 = vpop.f32.mrf.mxu2 }
 0x410   : > { %v8736_v54 = vadd.f32 %v3189_v18, %v3055_v12  ;;  %v8750_v0 = vpop.f32.mrf.mxu0 }
 0x411   : > { %v8738_v61 = vpop.f32.mrf.mxu3 }
 0x413   : > { %3847 = vmatmul.bf16.gmra.mxu2 %v8386_v58 }
 0x415   : > { %v3017_v56 = vpop.f32.mrf.mxu1 }
 0x416   : > { %v3056_v47 = vadd.f32 %v3017_v56, %v8603_v8  ;;  %v3197_v1 = vpop.f32.mrf.mxu2 }
 0x418   : > { %3676 = vmatmul.bf16.gmra.mxu1 %v8356_v9  ;;  %v8745_v24 = vadd.f32 %v3192_v50, %v3056_v47 }
 0x419   : > { %v8747_v35 = vpop.f32.mrf.mxu3 }
 0x41d   : > { %v3019_v18 = vpop.f32.mrf.mxu1 }
 0x41e   : > { %v3057_v57 = vadd.f32 %v3019_v18, %v8605_v52  ;;  %v3199_v15 = vpop.f32.mrf.mxu2  ;;  %v8761_v52 = vpop.f32.mrf.mxu0 }
 0x420   : > { %v8752_v58 = vadd.f32 %v3194_v7, %v3057_v57  ;;  %v6881_v7 = vld [vmem:[#allocation4 + $0x50] sm:$0xff] }
 0x421   : > { %v8754_v12 = vpop.f32.mrf.mxu3  ;;  %4220 = vmatpush.bf16.msra.mxu3 %v6881_v7 }
 0x422   : > { %9617 = vst [vmem:[#allocation10_spill] sm:$0xff] %v8754_v12 }
 0x423   : > { %3852 = vmatmul.bf16.gmra.mxu2 %v8416_v34 }
 0x425   : > { %v3022_v8 = vpop.f32.mrf.mxu1 }
 0x426   : > { %v3058_v9 = vadd.f32 %v3022_v8, %v8610_v21  ;;  %v3202_v50 = vpop.f32.mrf.mxu2  ;;  %v8770_v21 = vpop.f32.mrf.mxu0 }
 0x428   : > { %3681 = vmatmul.bf16.gmra.mxu1 %v8392_v13  ;;  %v8759_v56 = vadd.f32 %v3197_v1, %v3058_v9 }
 0x429   : > { %v8763_v47 = vpop.f32.mrf.mxu3 }
 0x42d   : > { %v3024_v18 = vpop.f32.mrf.mxu1 }
 0x42e   : > { %v3059_v57 = vadd.f32 %v3024_v18, %v8612_v39  ;;  %v3204_v12 = vpop.f32.mrf.mxu2  ;;  %v6872_v39 = vld [vmem:[#allocation4 + $0x8] sm:$0xff] }
 0x42f   : > { %4338 = vmatpush.bf16.msra.mxu0 %v6872_v39 }
 0x430   : > { %v8766_v34 = vadd.f32 %v3199_v15, %v3059_v57  ;;  %v8779_v15 = vpop.f32.mrf.mxu0 }
 0x431   : > { %v8768_v16 = vpop.f32.mrf.mxu3 }
 0x432   : > { %9618 = vst [vmem:[#allocation14_spill] sm:$0xff] %v8766_v34 }
 0x433   : > { %9619 = vst [vmem:[#allocation32_spill] sm:$0xff] %v8768_v16  ;;  %3857 = vmatmul.bf16.gmra.mxu2 %v9614_v49 }
 0x435   : > { %v3027_v13 = vpop.f32.mrf.mxu1 }
 0x436   : > { %v3060_v1 = vadd.f32 %v3027_v13, %v8617_v59  ;;  %v3207_v8 = vpop.f32.mrf.mxu2  ;;  %v6880_v59 = vld [vmem:[#allocation4 + $0x48] sm:$0xff] }
 0x437   : > { %4221 = vmatpush.bf16.msra.mxu3 %v6880_v59 }
 0x438   : > { %3686 = vmatmul.bf16.gmra.mxu1 %v8424_v55  ;;  %v8775_v9 = vadd.f32 %v3202_v50, %v3060_v1  ;;  %v8788_v1 = vpop.f32.mrf.mxu0 }
 0x439   : > { %v8777_v7 = vpop.f32.mrf.mxu3 }
 0x43d   : > { %v3029_v18 = vpop.f32.mrf.mxu1 }
 0x43e   : > { %v3061_v57 = vadd.f32 %v3029_v18, %v8619_v62  ;;  %v3209_v16 = vpop.f32.mrf.mxu2  ;;  %v9623_v18 = vld [vmem:[#allocation20_spill] sm:$0xff] }
 0x440   : > { %v8782_v34 = vadd.f32 %v3204_v12, %v3061_v57 }
 0x441   : > { %v8784_v49 = vpop.f32.mrf.mxu3 }
 0x442   : > { %9620 = vst [vmem:[#allocation22_spill] sm:$0xff] %v8782_v34 }
 0x443   : > { %9621 = vst [vmem:[#allocation23_spill] sm:$0xff] %v8784_v49  ;;  %3862 = vmatmul.bf16.gmra.mxu2 %v8474_v36  ;;  %v8798_v36 = vpop.f32.mrf.mxu0 }
 0x445   : > { %v3032_v55 = vpop.f32.mrf.mxu1 }
 0x446   : > { %v3062_v50 = vadd.f32 %v3032_v55, %v8624_v51  ;;  %v3212_v13 = vpop.f32.mrf.mxu2  ;;  %v6910_v51 = vld [vmem:[#allocation4 + $0x138] sm:$0xff] }
 0x447   : > { %4800 = vmatpush.bf16.msrb.mxu1 %v6910_v51  ;;  %v3383_v51 = vadd.f32 %v8641_v20, %v8639_v26  ;;  %v3384_v26 = vadd.f32 %v8646_v27, %v8644_v6 }
 0x448   : > { %3691 = vmatmul.bf16.gmra.mxu1 %v8451_v3  ;;  %v8791_v39 = vadd.f32 %v3207_v8, %v3062_v50 }
 0x449   : > { %v8793_v62 = vpop.f32.mrf.mxu3 }
 0x44a   : > { %9622 = vst [vmem:[#allocation33_spill] sm:$0xff] %v8793_v62  ;;  %v6871_v62 = vld [vmem:[#allocation4] sm:$0xff] }
 0x44b   : > { %4339 = vmatpush.bf16.msra.mxu0 %v6871_v62 }
 0x44d   : > { %v3034_v12 = vpop.f32.mrf.mxu1 }
 0x44e   : > { %v3063_v57 = vadd.f32 %v3034_v12, %v9623_v18  ;;  %v3214_v49 = vpop.f32.mrf.mxu2 }
 0x450   : > { %v8796_v34 = vadd.f32 %v3209_v16, %v3063_v57  ;;  %v8807_v16 = vpop.f32.mrf.mxu0 }
 0x451   : > { %v8800_v59 = vpop.f32.mrf.mxu3 }
 0x452   : > { %9624 = vst [vmem:[#allocation12_spill] sm:$0xff] %v8796_v34 }
 0x453   : > { %9625 = vst [vmem:[#allocation15_spill] sm:$0xff] %v8800_v59  ;;  %3867 = vmatmul.bf16.gmra.mxu2 %v8502_v22  ;;  %v6918_v22 = vld [vmem:[#allocation4 + $0x178] sm:$0xff] }
 0x454   : > { %4952 = vmatpush.bf16.msrb.mxu2 %v6918_v22  ;;  %v3548_v22 = vadd.f32 %v8741_v10, %v3384_v26  ;;  %v9627_v10 = vld [vmem:[#allocation17_spill] sm:$0xff]  ;;  %v6913_v26 = vld [vmem:[#allocation4 + $0x150] sm:$0xff] }
 0x455   : > { %v3037_v55 = vpop.f32.mrf.mxu1 }
 0x456   : > { %v3064_v3 = vadd.f32 %v3037_v55, %v8631_v25  ;;  %v3828_v8 = vpop.f32.mrf.mxu2  ;;  %v3547_v55 = vadd.f32 %v8733_v53, %v3383_v51  ;;  %v6909_v53 = vld [vmem:[#allocation4 + $0x130] sm:$0xff] }
 0x457   : > { %4801 = vmatpush.bf16.msrb.mxu1 %v6909_v53 }
 0x458   : > { %3696 = vmatmul.bf16.gmra.mxu1 %v8478_v31  ;;  %v3239_v50 = vadd.f32 %v3212_v13, %v3064_v3  ;;  %v6879_v31 = vld [vmem:[#allocation4 + $0x40] sm:$0xff]  ;;  %v6917_v13 = vld [vmem:[#allocation4 + $0x170] sm:$0xff]  ;;  %v8816_v62 = vpop.f32.mrf.mxu0 }
 0x459   : > { %v3378_v12 = vpop.f32.mrf.mxu3  ;;  %4222 = vmatpush.bf16.msra.mxu3 %v6879_v31  ;;  %4953 = vmatpush.bf16.msrb.mxu2 %v6917_v13  ;;  %v3385_v13 = vadd.f32 %v8661_v2, %v8659_v42 }
 0x45a   : > { %v8805_v18 = vadd.f32 %v3378_v12, %v3239_v50  ;;  %v6916_v12 = vld [vmem:[#allocation4 + $0x168] sm:$0xff] }
 0x45d   : > { %v3039_v57 = vpop.f32.mrf.mxu1  ;;  %4954 = vmatpush.bf16.msrb.mxu2 %v6916_v12 }
 0x45e   : > { %v3065_v59 = vadd.f32 %v3039_v57, %v8633_v40  ;;  %v3830_v34 = vpop.f32.mrf.mxu2 }
 0x460   : > { %v8812_v25 = vadd.f32 %v3214_v49, %v3065_v59  ;;  %v8823_v49 = vld [vmem:[%s9495_s4] ss:$0 sm:$0xff]  ;;  %v8828_v27 = vpop.f32.mrf.mxu0 }
 0x461   : > { %v6915_v59 = vld [vmem:[#allocation4 + $0x160] sm:$0xff] }
 0x462   : > { %4955 = vmatpush.bf16.msrb.mxu2 %v6915_v59  ;;  %v3549_v59 = vadd.f32 %v8750_v0, %v3385_v13 }
 0x463   : > { %3872 = vmatmul.bf16.gmra.mxu2 %v8674_v45  ;;  %v9626_v45 = vld [vmem:[#allocation16_spill] sm:$0xff] }
 0x465   : > { %v3662_v3 = vpop.f32.mrf.mxu1 }
 0x466   : > { %v3722_v40 = vadd.f32 %v3662_v3, %v3547_v55  ;;  %v3833_v50 = vpop.f32.mrf.mxu2 }
 0x468   : > { %v3888_v20 = vadd.f32 %v3828_v8, %v3722_v40  ;;  %3701 = vmatmul.bf16.gmra.mxu1 %v9626_v45  ;;  %v6914_v8 = vld [vmem:[#allocation4 + $0x158] sm:$0xff]  ;;  %v6908_v40 = vld [vmem:[#allocation4 + $0x128] sm:$0xff]  ;;  %v8840_v0 = vpop.f32.mrf.mxu0 }
 0x469   : > { %4956 = vmatpush.bf16.msrb.mxu2 %v6914_v8  ;;  %4802 = vmatpush.bf16.msrb.mxu1 %v6908_v40 }
 0x46a   : > { %v3916_v57 = vadd.f32 %v8823_v49, %v3888_v20  ;;  %v6902_v20 = vld [vmem:[#allocation4 + $0xf8] sm:$0xff] }
 0x46b   : > { %4639 = vmatpush.bf16.msrb.mxu0 %v6902_v20  ;;  %v6894_v20 = vld [vmem:[#allocation4 + $0xb8] sm:$0xff] }
 0x46c   : > { %v3940_v55 = vmax.f32 %v3916_v57, 0.0  ;;  %v6912_v57 = vld [vmem:[#allocation4 + $0x148] sm:$0xff]  ;;  %4489 = vmatpush.bf16.msrb.mxu3 %v6894_v20 }
 0x46d   : > { %v3664_v51 = vpop.f32.mrf.mxu1  ;;  %4957 = vmatpush.bf16.msrb.mxu2 %v6913_v26 }
 0x46e   : > { %v3723_v31 = vadd.f32 %v3664_v51, %v3548_v22  ;;  %v3835_v6 = vpop.f32.mrf.mxu2  ;;  %v3964_v45 = vpack.c.bf16 %v3940_v55, %v3940_v55  ;;  %v6907_v22 = vld [vmem:[#allocation4 + $0x120] sm:$0xff] }
 0x46f   : > { %4803 = vmatpush.bf16.msrb.mxu1 %v6907_v22  ;;  %v9628_v55 = vld [vmem:[#allocation24_spill] sm:$0xff] }
 0x470   : > { %v3889_v3 = vadd.f32 %v3830_v34, %v3723_v31  ;;  %v3386_v31 = vadd.f32 %v8666_v30, %v8664_v48  ;;  %v8837_v8 = vunpack.c.l.b16 %v3964_v45  ;;  %v6905_v30 = vld [vmem:[#allocation4 + $0x110] sm:$0xff] }
 0x471   : > { %4958 = vmatpush.bf16.msrb.mxu2 %v6912_v57  ;;  %v8848_v57 = vpop.f32.mrf.mxu0 }
 0x472   : > { %v3917_v12 = vadd.f32 %v8823_v49, %v3889_v3  ;;  %v3550_v48 = vadd.f32 %v8761_v52, %v3386_v31 }
 0x473   : > { %3877 = vmatmul.bf16.gmra.mxu2 %v9627_v10  ;;  %v6911_v10 = vld [vmem:[#allocation4 + $0x140] sm:$0xff] }
 0x474   : > { %v3941_v53 = vmax.f32 %v3917_v12, 0.0  ;;  %v6906_v12 = vld [vmem:[#allocation4 + $0x118] sm:$0xff] }
 0x475   : > { %v3667_v51 = vpop.f32.mrf.mxu1  ;;  %4804 = vmatpush.bf16.msrb.mxu1 %v6906_v12  ;;  %4959 = vmatpush.bf16.msrb.mxu2 %v6911_v10 }
 0x476   : > { %v3965_v42 = vpack.c.bf16 %v3941_v53, %v3941_v53  ;;  %v3724_v2 = vadd.f32 %v3667_v51, %v3549_v59  ;;  %v3838_v34 = vpop.f32.mrf.mxu2  ;;  %v3387_v59 = vadd.f32 %v8681_v14, %v8679_v60  ;;  %v3388_v14 = vadd.f32 %v8686_v23, %v8684_v46 }
 0x478   : > { %v4025_v3 = vunpack.c.l.b16 %v3965_v42  ;;  %v3890_v40 = vadd.f32 %v3833_v50, %v3724_v2  ;;  %3706 = vmatmul.bf16.gmra.mxu1 %v9628_v55  ;;  %v6904_v42 = vld [vmem:[#allocation4 + $0x108] sm:$0xff]  ;;  %v6903_v55 = vld [vmem:[#allocation4 + $0x100] sm:$0xff] }
 0x479   : > { %4805 = vmatpush.bf16.msrb.mxu1 %v6905_v30 }
 0x47a   : > { %v4044_v13 = vpack.c.b16 %v4025_v3, %v8837_v8  ;;  %v3918_v26 = vadd.f32 %v8823_v49, %v3890_v40  ;;  %v9629_v3 = vld [vmem:[#allocation25_spill] sm:$0xff]  ;;  %v3551_v40 = vadd.f32 %v8770_v21, %v3387_v59  ;;  %v6901_v59 = vld [vmem:[#allocation4 + $0xf0] sm:$0xff] }
 0x47b   : > { %4640 = vmatpush.bf16.msrb.mxu0 %v6901_v59 }
 0x47c   : > { %4340 = vmatmul.bf16.vlgmr.msra.gmra.mxu0 %v4044_v13  ;;  %v3942_v22 = vmax.f32 %v3918_v26, 0.0  ;;  %v4057_v60 = vshll.u32 %v4044_v13, 16 }
 0x47d   : > { %v3669_v45 = vpop.f32.mrf.mxu1  ;;  %4806 = vmatpush.bf16.msrb.mxu1 %v6904_v42 }
 0x47e   : > { %v3725_v50 = vadd.f32 %v3669_v45, %v3550_v48  ;;  %v3840_v53 = vpop.f32.mrf.mxu2  ;;  %v3966_v52 = vpack.c.bf16 %v3942_v22, %v3942_v22  ;;  %v9630_v45 = vld [vmem:[#allocation9_spill] sm:$0xff]  ;;  %v4059_v21 = vrot.slane %v4057_v60, 1  ;;  %v3552_v22 = vadd.f32 %v8779_v15, %v3388_v14  ;;  %v6893_v14 = vld [vmem:[#allocation4 + $0xb0] sm:$0xff] }
 0x47f   : > { %4490 = vmatpush.bf16.msrb.mxu3 %v6893_v14 }
 0x480   : > { %v3891_v51 = vadd.f32 %v3835_v6, %v3725_v50  ;;  %v8854_v6 = vunpack.c.l.b16 %v3966_v52 }
 0x481   : > { %4807 = vmatpush.bf16.msrb.mxu1 %v6903_v55 }
 0x482   : > { %v3919_v2 = vadd.f32 %v8823_v49, %v3891_v51  ;;  %v4055_v51 = vshrl.u32 %v4044_v13, 16 }
 0x483   : > { %3882 = vmatmul.bf16.gmra.mxu2 %v9629_v3 }
 0x484   : > { %v3943_v31 = vmax.f32 %v3919_v2, 0.0  ;;  %v4391_v2 = vrot.slane %v4044_v13, 1 }
 0x485   : > { %v3672_v12 = vpop.f32.mrf.mxu1 }
 0x486   : > { %v3967_v20 = vpack.c.bf16 %v3943_v31, %v3943_v31  ;;  %v3726_v10 = vadd.f32 %v3672_v12, %v3551_v40  ;;  %v3843_v48 = vpop.f32.mrf.mxu2  ;;  %v4060_v40 = vor.u32 %v4059_v21, %v4055_v51  ;;  %v3389_v12 = vadd.f32 %v8695_v63, %v8693_v11 }
 0x487   : > { %v3390_v11 = vadd.f32 %v8700_v4, %v8698_v5 }
 0x488   : > { %v4027_v26 = vunpack.c.l.b16 %v3967_v20  ;;  %v3892_v30 = vadd.f32 %v3838_v34, %v3726_v10  ;;  %3711 = vmatmul.bf16.gmra.mxu1 %v9630_v45  ;;  %v8865_v34 = vpop.f32.mrf.mxu0  ;;  %v3553_v45 = vadd.f32 %v8788_v1, %v3389_v12 }
 0x489   : > { %v3554_v12 = vadd.f32 %v8798_v36, %v3390_v11  ;;  %v3391_v36 = vadd.f32 %v8707_v43, %v8705_v29  ;;  %v3392_v29 = vadd.f32 %v8712_v41, %v8710_v37 }
 0x48a   : > { %v8858_v50 = vpack.c.b16 %v4027_v26, %v8854_v6  ;;  %v3920_v42 = vadd.f32 %v8823_v49, %v3892_v30 }
 0x48c   : > { %4345 = vmatmul.bf16.gmra.mxu0 %v8858_v50  ;;  %v4062_v46 = vshll.u32 %v8858_v50, 16  ;;  %v4392_v23 = vrot.slane %v8858_v50, 1  ;;  %v3944_v20 = vmax.f32 %v3920_v42, 0.0  ;;  %v4066_v4 = vshrl.u32 %v8858_v50, 16 }
 0x48d   : > { %v3674_v3 = vpop.f32.mrf.mxu1 }
 0x48e   : > { %v3727_v52 = vadd.f32 %v3674_v3, %v3552_v22  ;;  %v3845_v31 = vpop.f32.mrf.mxu2  ;;  %v4064_v55 = vrot.slane %v4062_v46, 1  ;;  %v8868_v15 = vsel %vm851_vm3, %v4391_v2, %v4392_v23  ;;  %v3968_v26 = vpack.c.bf16 %v3944_v20, %v3944_v20  ;;  %v9631_v2 = vld [vmem:[#allocation13_spill] sm:$0xff]  ;;  %v9632_v3 = vld [vmem:[#allocation19_spill] sm:$0xff] }
 0x490   : > { %v3893_v10 = vadd.f32 %v3840_v53, %v3727_v52  ;;  %v4065_v60 = vsel %vm431_vm0, %v4060_v40, %v4064_v55  ;;  %v8875_v46 = vpop.f32.mrf.mxu0  ;;  %v8879_v63 = vunpack.c.l.b16 %v3968_v26  ;;  %v9633_v52 = vsel %vm7382_vm2, %v9631_v2, %v9632_v3  ;;  %v6900_v40 = vld [vmem:[#allocation4 + $0xe8] sm:$0xff] }
 0x491   : > { %4223 = vmatmul.bf16.vlgmr.msra.gmra.mxu3 %v4065_v60  ;;  %4641 = vmatpush.bf16.msrb.mxu0 %v6900_v40  ;;  %v4068_v26 = vor.u32 %v4066_v4, %v4064_v55  ;;  %v3555_v55 = vadd.f32 %v8807_v16, %v3391_v36 }
 0x492   : > { %v3921_v13 = vadd.f32 %v8823_v49, %v3893_v10 }
 0x494   : > { %v3945_v30 = vmax.f32 %v3921_v13, 0.0 }
 0x495   : > { %v3677_v21 = vpop.f32.mrf.mxu1 }
 0x496   : > { %v3969_v59 = vpack.c.bf16 %v3945_v30, %v3945_v30  ;;  %v3728_v22 = vadd.f32 %v3677_v21, %v3553_v45  ;;  %v3848_v51 = vpop.f32.mrf.mxu2 }
 0x498   : > { %v4029_v53 = vunpack.c.l.b16 %v3969_v59  ;;  %v3894_v42 = vadd.f32 %v3843_v48, %v3728_v22  ;;  %3716 = vmatmul.bf16.gmra.mxu1 %v9633_v52  ;;  %v6892_v22 = vld [vmem:[#allocation4 + $0xa8] sm:$0xff]  ;;  %v8902_v11 = vpop.f32.mrf.mxu0 }
 0x499   : > { %4491 = vmatpush.bf16.msrb.mxu3 %v6892_v22 }
 0x49a   : > { %v8887_v1 = vpack.c.b16 %v4029_v53, %v8879_v63  ;;  %v3922_v20 = vadd.f32 %v8823_v49, %v3894_v42 }
 0x49c   : > { %4350 = vmatmul.bf16.gmra.mxu0 %v8887_v1  ;;  %v4394_v5 = vrot.slane %v8887_v1, 1  ;;  %v4070_v48 = vshll.u32 %v8887_v1, 16  ;;  %v3946_v45 = vmax.f32 %v3922_v20, 0.0 }
 0x49d   : > { %v3679_v10 = vpop.f32.mrf.mxu1 }
 0x49e   : > { %v3729_v60 = vadd.f32 %v3679_v10, %v3554_v12  ;;  %v3850_v14 = vpop.f32.mrf.mxu2  ;;  %v8896_v13 = vsel %vm851_vm3, %v4392_v23, %v4394_v5  ;;  %v4072_v30 = vrot.slane %v4070_v48, 1  ;;  %v3970_v23 = vpack.c.bf16 %v3946_v45, %v3946_v45 }
 0x49f   : > { %4960 = vmatmul.bf16.vlgmr.msrb.gmra.mxu2 %v8896_v13  ;;  %v3556_v48 = vadd.f32 %v8816_v62, %v3392_v29  ;;  %v3393_v62 = vadd.f32 %v8719_v28, %v8717_v33 }
 0x4a0   : > { %v3895_v21 = vadd.f32 %v3845_v31, %v3729_v60  ;;  %v4073_v59 = vsel %vm431_vm0, %v4068_v26, %v4072_v30  ;;  %v4030_v43 = vunpack.c.l.b16 %v3970_v23  ;;  %v8910_v4 = vpop.f32.mrf.mxu0  ;;  %v4074_v60 = vshrl.u32 %v8887_v1, 16  ;;  %v6899_v23 = vld [vmem:[#allocation4 + $0xe0] sm:$0xff] }
 0x4a1   : > { %4228 = vmatmul.bf16.gmra.mxu3 %v4073_v59  ;;  %4642 = vmatpush.bf16.msrb.mxu0 %v6899_v23 }
 0x4a2   : > { %v3923_v53 = vadd.f32 %v8823_v49, %v3895_v21  ;;  %v4076_v45 = vor.u32 %v4074_v60, %v4072_v30  ;;  %v3557_v30 = vadd.f32 %v8828_v27, %v3393_v62 }
 0x4a4   : > { %v3947_v42 = vmax.f32 %v3923_v53, 0.0 }
 0x4a5   : > { %v3682_v2 = vpop.f32.mrf.mxu1 }
 0x4a6   : > { %v3971_v3 = vpack.c.bf16 %v3947_v42, %v3947_v42  ;;  %v3730_v52 = vadd.f32 %v3682_v2, %v3555_v55  ;;  %v3853_v40 = vpop.f32.mrf.mxu2 }
 0x4a8   : > { %v4031_v31 = vunpack.c.l.b16 %v3971_v3  ;;  %v3896_v12 = vadd.f32 %v3848_v51, %v3730_v52  ;;  %4808 = vmatmul.bf16.vlgmr.msrb.gmra.mxu1 %v4073_v59  ;;  %v8930_v2 = vpop.f32.mrf.mxu0 }
 0x4aa   : > { %v8908_v20 = vpack.c.b16 %v4031_v31, %v4030_v43  ;;  %v3924_v10 = vadd.f32 %v8823_v49, %v3896_v12 }
 0x4ac   : > { %4355 = vmatmul.bf16.gmra.mxu0 %v8908_v20  ;;  %v4396_v16 = vrot.slane %v8908_v20, 1  ;;  %v4078_v37 = vshll.u32 %v8908_v20, 16  ;;  %v3948_v59 = vmax.f32 %v3924_v10, 0.0 }
 0x4ad   : > { %v3684_v41 = vpop.f32.mrf.mxu1 }
 0x4ae   : > { %v3731_v26 = vadd.f32 %v3684_v41, %v3556_v48  ;;  %v3855_v51 = vpop.f32.mrf.mxu2  ;;  %v8919_v36 = vsel %vm851_vm3, %v4394_v5, %v4396_v16  ;;  %v4080_v21 = vrot.slane %v4078_v37, 1  ;;  %v3972_v5 = vpack.c.bf16 %v3948_v59, %v3948_v59  ;;  %v6891_v48 = vld [vmem:[#allocation4 + $0xa0] sm:$0xff] }
 0x4af   : > { %4965 = vmatmul.bf16.gmra.mxu2 %v8919_v36  ;;  %v4082_v37 = vshrl.u32 %v8908_v20, 16  ;;  %4492 = vmatpush.bf16.msrb.mxu3 %v6891_v48  ;;  %v3395_v59 = vadd.f32 %v8731_v17, %v8729_v44  ;;  %v3396_v44 = vadd.f32 %v8738_v61, %v8736_v54  ;;  %v6890_v48 = vld [vmem:[#allocation4 + $0x98] sm:$0xff] }
 0x4b0   : > { %v3897_v22 = vadd.f32 %v3850_v14, %v3731_v26  ;;  %v8925_v53 = vsel %vm431_vm0, %v4076_v45, %v4080_v21  ;;  %v3394_v14 = vadd.f32 %v8724_v32, %v8722_v38  ;;  %v4032_v29 = vunpack.c.l.b16 %v3972_v5  ;;  %v6898_v5 = vld [vmem:[#allocation4 + $0xd8] sm:$0xff] }
 0x4b1   : > { %4233 = vmatmul.bf16.gmra.mxu3 %v8925_v53  ;;  %v4084_v45 = vor.u32 %v4082_v37, %v4080_v21  ;;  %4643 = vmatpush.bf16.msrb.mxu0 %v6898_v5 }
 0x4b2   : > { %v3925_v42 = vadd.f32 %v8823_v49, %v3897_v22  ;;  %v3558_v10 = vadd.f32 %v8840_v0, %v3394_v14  ;;  %v8946_v0 = vpop.f32.mrf.mxu0 }
 0x4b3   : > { %4493 = vmatpush.bf16.msrb.mxu3 %v6890_v48 }
 0x4b4   : > { %v3949_v55 = vmax.f32 %v3925_v42, 0.0 }
 0x4b5   : > { %v3687_v3 = vpop.f32.mrf.mxu1 }
 0x4b6   : > { %v3973_v52 = vpack.c.bf16 %v3949_v55, %v3949_v55  ;;  %v3732_v33 = vadd.f32 %v3687_v3, %v3557_v30  ;;  %v3858_v28 = vpop.f32.mrf.mxu2  ;;  %v3559_v30 = vadd.f32 %v8848_v57, %v3395_v59 }
 0x4b8   : > { %v4033_v43 = vunpack.c.l.b16 %v3973_v52  ;;  %v3898_v31 = vadd.f32 %v3853_v40, %v3732_v33  ;;  %4813 = vmatmul.bf16.gmra.mxu1 %v8925_v53 }
 0x4ba   : > { %v8935_v12 = vpack.c.b16 %v4033_v43, %v4032_v29  ;;  %v3926_v27 = vadd.f32 %v8823_v49, %v3898_v31  ;;  %v8960_v43 = vpop.f32.mrf.mxu0 }
 0x4bc   : > { %4360 = vmatmul.bf16.gmra.mxu0 %v8935_v12  ;;  %v4398_v60 = vrot.slane %v8935_v12, 1  ;;  %v4086_v38 = vshll.u32 %v8935_v12, 16  ;;  %v3950_v22 = vmax.f32 %v3926_v27, 0.0  ;;  %v4090_v54 = vshrl.u32 %v8935_v12, 16 }
 0x4bd   : > { %v3689_v32 = vpop.f32.mrf.mxu1 }
 0x4be   : > { %v3733_v40 = vadd.f32 %v3689_v32, %v3558_v10  ;;  %v3860_v41 = vpop.f32.mrf.mxu2  ;;  %v8944_v26 = vsel %vm851_vm3, %v4396_v16, %v4398_v60  ;;  %v4088_v62 = vrot.slane %v4086_v38, 1  ;;  %v3974_v21 = vpack.c.bf16 %v3950_v22, %v3950_v22 }
 0x4bf   : > { %4970 = vmatmul.bf16.gmra.mxu2 %v8944_v26  ;;  %v3560_v10 = vadd.f32 %v8865_v34, %v3396_v44  ;;  %v3397_v34 = vadd.f32 %v8747_v35, %v8745_v24  ;;  %v9634_v24 = vld [vmem:[#allocation10_spill] sm:$0xff] }
 0x4c0   : > { %v3899_v23 = vadd.f32 %v3855_v51, %v3733_v40  ;;  %v8952_v42 = vsel %vm431_vm0, %v4084_v45, %v4088_v62  ;;  %v4034_v17 = vunpack.c.l.b16 %v3974_v21  ;;  %v4092_v32 = vor.u32 %v4090_v54, %v4088_v62 }
 0x4c1   : > { %4238 = vmatmul.bf16.gmra.mxu3 %v8952_v42  ;;  %v3561_v21 = vadd.f32 %v8875_v46, %v3397_v34  ;;  %v3398_v35 = vadd.f32 %v9634_v24, %v8752_v58 }
 0x4c2   : > { %v3927_v16 = vadd.f32 %v8823_v49, %v3899_v23 }
 0x4c4   : > { %v3951_v55 = vmax.f32 %v3927_v16, 0.0  ;;  %v8981_v16 = vpop.f32.mrf.mxu0 }
 0x4c5   : > { %v3692_v3 = vpop.f32.mrf.mxu1 }
 0x4c6   : > { %v3975_v52 = vpack.c.bf16 %v3951_v55, %v3951_v55  ;;  %v3734_v33 = vadd.f32 %v3692_v3, %v3559_v30  ;;  %v3863_v14 = vpop.f32.mrf.mxu2 }
 0x4c8   : > { %v4035_v51 = vunpack.c.l.b16 %v3975_v52  ;;  %v3900_v29 = vadd.f32 %v3858_v28, %v3734_v33  ;;  %4818 = vmatmul.bf16.gmra.mxu1 %v8952_v42 }
 0x4ca   : > { %v8962_v31 = vpack.c.b16 %v4035_v51, %v4034_v17  ;;  %v3928_v57 = vadd.f32 %v8823_v49, %v3900_v29  ;;  %v6897_v51 = vld [vmem:[#allocation4 + $0xd0] sm:$0xff]  ;;  %v3562_v29 = vadd.f32 %v8902_v11, %v3398_v35 }
 0x4cb   : > { %4644 = vmatpush.bf16.msrb.mxu0 %v6897_v51 }
 0x4cc   : > { %4365 = vmatmul.bf16.gmra.mxu0 %v8962_v31  ;;  %v4400_v27 = vrot.slane %v8962_v31, 1  ;;  %v4094_v61 = vshll.u32 %v8962_v31, 16  ;;  %v3952_v59 = vmax.f32 %v3928_v57, 0.0  ;;  %v8995_v57 = vpop.f32.mrf.mxu0 }
 0x4cd   : > { %v3694_v28 = vpop.f32.mrf.mxu1 }
 0x4ce   : > { %v3735_v37 = vadd.f32 %v3694_v28, %v3560_v10  ;;  %v8971_v38 = vsel %vm851_vm3, %v4398_v60, %v4400_v27  ;;  %v4096_v40 = vrot.slane %v4094_v61, 1  ;;  %v3865_v45 = vpop.f32.mrf.mxu2  ;;  %v3976_v60 = vpack.c.bf16 %v3952_v59, %v3952_v59 }
 0x4cf   : > { %4975 = vmatmul.bf16.gmra.mxu2 %v8971_v38  ;;  %v4098_v10 = vshrl.u32 %v8962_v31, 16 }
 0x4d0   : > { %v3901_v22 = vadd.f32 %v3860_v41, %v3735_v37  ;;  %v8977_v23 = vsel %vm431_vm0, %v4092_v32, %v4096_v40  ;;  %v4036_v41 = vunpack.c.l.b16 %v3976_v60  ;;  %v3399_v37 = vadd.f32 %v8763_v47, %v8759_v56  ;;  %v9635_v47 = vld [vmem:[#allocation14_spill] sm:$0xff] }
 0x4d1   : > { %4243 = vmatmul.bf16.gmra.mxu3 %v8977_v23  ;;  %v4100_v28 = vor.u32 %v4098_v10, %v4096_v40 }
 0x4d2   : > { %v3929_v5 = vadd.f32 %v8823_v49, %v3901_v22  ;;  %v6889_v22 = vld [vmem:[#allocation4 + $0x90] sm:$0xff] }
 0x4d3   : > { %4494 = vmatpush.bf16.msrb.mxu3 %v6889_v22 }
 0x4d4   : > { %v3953_v62 = vmax.f32 %v3929_v5, 0.0  ;;  %v9009_v56 = vpop.f32.mrf.mxu0 }
 0x4d5   : > { %v3697_v55 = vpop.f32.mrf.mxu1 }
 0x4d6   : > { %v3977_v30 = vpack.c.bf16 %v3953_v62, %v3953_v62  ;;  %v3736_v3 = vadd.f32 %v3697_v55, %v3561_v21  ;;  %v3868_v44 = vpop.f32.mrf.mxu2  ;;  %v3563_v62 = vadd.f32 %v8910_v4, %v3399_v37 }
 0x4d8   : > { %v4037_v52 = vunpack.c.l.b16 %v3977_v30  ;;  %v3902_v33 = vadd.f32 %v3863_v14, %v3736_v3  ;;  %4823 = vmatmul.bf16.gmra.mxu1 %v8977_v23 }
 0x4da   : > { %v8987_v17 = vpack.c.b16 %v4037_v52, %v4036_v41  ;;  %v3930_v48 = vadd.f32 %v8823_v49, %v3902_v33  ;;  %v6896_v33 = vld [vmem:[#allocation4 + $0xc8] sm:$0xff] }
 0x4db   : > { %4645 = vmatpush.bf16.msrb.mxu0 %v6896_v33 }
 0x4dc   : > { %4370 = vmatmul.bf16.gmra.mxu0 %v8987_v17  ;;  %v4402_v46 = vrot.slane %v8987_v17, 1  ;;  %v4102_v58 = vshll.u32 %v8987_v17, 16  ;;  %v3954_v32 = vmax.f32 %v3930_v48, 0.0  ;;  %v4106_v48 = vshrl.u32 %v8987_v17, 16 }
 0x4dd   : > { %v3699_v14 = vpop.f32.mrf.mxu1 }
 0x4de   : > { %v3737_v54 = vadd.f32 %v3699_v14, %v3562_v29  ;;  %v8998_v61 = vsel %vm851_vm3, %v4400_v27, %v4402_v46  ;;  %v4104_v11 = vrot.slane %v4102_v58, 1  ;;  %v3870_v27 = vpop.f32.mrf.mxu2  ;;  %v3978_v60 = vpack.c.bf16 %v3954_v32, %v3954_v32 }
 0x4df   : > { %4980 = vmatmul.bf16.gmra.mxu2 %v8998_v61 }
 0x4e0   : > { %v3903_v34 = vadd.f32 %v3865_v45, %v3737_v54  ;;  %v9004_v59 = vsel %vm431_vm0, %v4100_v28, %v4104_v11  ;;  %v9636_v45 = vld [vmem:[#allocation32_spill] sm:$0xff]  ;;  %v4038_v24 = vunpack.c.l.b16 %v3978_v60  ;;  %v4108_v28 = vor.u32 %v4106_v48, %v4104_v11  ;;  %v9031_v60 = vpop.f32.mrf.mxu0 }
 0x4e1   : > { %4248 = vmatmul.bf16.gmra.mxu3 %v9004_v59  ;;  %v3400_v3 = vadd.f32 %v9636_v45, %v9635_v47 }
 0x4e2   : > { %v3931_v5 = vadd.f32 %v8823_v49, %v3903_v34 }
 0x4e3   : > { %v3564_v51 = vadd.f32 %v8930_v2, %v3400_v3  ;;  %v3401_v2 = vadd.f32 %v8777_v7, %v8775_v9  ;;  %v9637_v7 = vld [vmem:[#allocation22_spill] sm:$0xff] }
 0x4e4   : > { %v3955_v40 = vmax.f32 %v3931_v5, 0.0  ;;  %v6888_v5 = vld [vmem:[#allocation4 + $0x88] sm:$0xff] }
 0x4e5   : > { %v3702_v21 = vpop.f32.mrf.mxu1  ;;  %4495 = vmatpush.bf16.msrb.mxu3 %v6888_v5 }
 0x4e6   : > { %v3979_v55 = vpack.c.bf16 %v3955_v40, %v3955_v40  ;;  %v3738_v30 = vadd.f32 %v3702_v21, %v3563_v62  ;;  %v3873_v58 = vpop.f32.mrf.mxu2  ;;  %v3565_v62 = vadd.f32 %v8946_v0, %v3401_v2 }
 0x4e8   : > { %v4039_v35 = vunpack.c.l.b16 %v3979_v55  ;;  %v3904_v41 = vadd.f32 %v3868_v44, %v3738_v30  ;;  %4828 = vmatmul.bf16.gmra.mxu1 %v9004_v59 }
 0x4ea   : > { %v9014_v52 = vpack.c.b16 %v4039_v35, %v4038_v24  ;;  %v3932_v4 = vadd.f32 %v8823_v49, %v3904_v41  ;;  %v6895_v35 = vld [vmem:[#allocation4 + $0xc0] sm:$0xff] }
 0x4eb   : > { %4646 = vmatpush.bf16.msrb.mxu0 %v6895_v35 }
 0x4ec   : > { %4375 = vmatmul.bf16.gmra.mxu0 %v9014_v52  ;;  %v4404_v29 = vrot.slane %v9014_v52, 1  ;;  %v4110_v10 = vshll.u32 %v9014_v52, 16  ;;  %v3956_v32 = vmax.f32 %v3932_v4, 0.0  ;;  %v4114_v48 = vshrl.u32 %v9014_v52, 16 }
 0x4ed   : > { %v3704_v14 = vpop.f32.mrf.mxu1 }
 0x4ee   : > { %v3739_v44 = vadd.f32 %v3704_v14, %v3564_v51  ;;  %v9023_v54 = vsel %vm851_vm3, %v4402_v46, %v4404_v29  ;;  %v4112_v37 = vrot.slane %v4110_v10, 1  ;;  %v3980_v11 = vpack.c.bf16 %v3956_v32, %v3956_v32  ;;  %v3875_v47 = vpop.f32.mrf.mxu2  ;;  %v9639_v32 = vld [vmem:[#allocation33_spill] sm:$0xff] }
 0x4ef   : > { %4985 = vmatmul.bf16.gmra.mxu2 %v9023_v54 }
 0x4f0   : > { %v3905_v34 = vadd.f32 %v3870_v27, %v3739_v44  ;;  %v9029_v22 = vsel %vm431_vm0, %v4108_v28, %v4112_v37  ;;  %v9638_v27 = vld [vmem:[#allocation23_spill] sm:$0xff]  ;;  %v4040_v45 = vunpack.c.l.b16 %v3980_v11  ;;  %v4116_v28 = vor.u32 %v4114_v48, %v4112_v37  ;;  %v6925_v37 = vld [vmem:[#allocation4 + $0x1b0] sm:$0xff] }
 0x4f1   : > { %4253 = vmatmul.bf16.gmra.mxu3 %v9029_v22  ;;  %v3402_v30 = vadd.f32 %v9638_v27, %v9637_v7  ;;  %v9068_v48 = vpack.c.b16 %v8837_v8, %v8837_v8 }
 0x4f2   : > { %v3933_v46 = vadd.f32 %v8823_v49, %v3905_v34  ;;  %v3403_v34 = vadd.f32 %v9639_v32, %v8791_v39 }
 0x4f3   : > { %v3566_v0 = vadd.f32 %v8960_v43, %v3402_v30  ;;  %v6926_v43 = vld [vmem:[#allocation4 + $0x1b8] sm:$0xff]  ;;  %v9640_v30 = vld [vmem:[#allocation12_spill] sm:$0xff] }
 0x4f4   : > { %v3957_v40 = vmax.f32 %v3933_v46, 0.0  ;;  %5102 = vmatpush.bf16.msra.mxu2 %v6926_v43 }
 0x4f5   : > { %v3707_v21 = vpop.f32.mrf.mxu1 }
 0x4f6   : > { %v3981_v55 = vpack.c.bf16 %v3957_v40, %v3957_v40  ;;  %v3740_v9 = vadd.f32 %v3707_v21, %v3565_v62  ;;  %v3878_v40 = vpop.f32.mrf.mxu2 }
 0x4f8   : > { %v4041_v3 = vunpack.c.l.b16 %v3981_v55  ;;  %v3906_v24 = vadd.f32 %v3873_v58, %v3740_v9  ;;  %4833 = vmatmul.bf16.gmra.mxu1 %v9029_v22  ;;  %v3567_v9 = vadd.f32 %v8981_v16, %v3403_v34  ;;  %5103 = vmatpush.bf16.msra.mxu2 %v6925_v37  ;;  %v6923_v34 = vld [vmem:[#allocation4 + $0x1a0] sm:$0xff] }
 0x4f9   : > { %v9039_v41 = vpop.f32.mrf.mxu0 }
 0x4fa   : > { %v9041_v33 = vpack.c.b16 %v4041_v3, %v4040_v45  ;;  %v3934_v51 = vadd.f32 %v8823_v49, %v3906_v24  ;;  %v6924_v3 = vld [vmem:[#allocation4 + $0x1a8] sm:$0xff] }
 0x4fc   : > { %4380 = vmatmul.bf16.gmra.mxu0 %v9041_v33  ;;  %v4406_v4 = vrot.slane %v9041_v33, 1  ;;  %v4118_v10 = vshll.u32 %v9041_v33, 16  ;;  %v3958_v5 = vmax.f32 %v3934_v51, 0.0  ;;  %v6942_v51 = vld [vmem:[#allocation4 + $0x238] sm:$0xff]  ;;  %5104 = vmatpush.bf16.msra.mxu2 %v6924_v3 }
 0x4fd   : > { %v3709_v58 = vpop.f32.mrf.mxu1  ;;  %5415 = vmatpush.bf16.msra.mxu1 %v6942_v51 }
 0x4fe   : > { %v3741_v14 = vadd.f32 %v3709_v58, %v3566_v0  ;;  %v9050_v44 = vsel %vm851_vm3, %v4404_v29, %v4406_v4  ;;  %v4120_v2 = vrot.slane %v4118_v10, 1  ;;  %v3982_v21 = vpack.c.bf16 %v3958_v5, %v3958_v5  ;;  %v6887_v58 = vld [vmem:[#allocation4 + $0x80] sm:$0xff]  ;;  %v3380_v5 = vpop.f32.mrf.mxu3 }
 0x4ff   : > { %4990 = vmatmul.bf16.gmra.mxu2 %v9050_v44  ;;  %4496 = vmatpush.bf16.msrb.mxu3 %v6887_v58 }
 0x500   : > { %v3907_v46 = vadd.f32 %v3875_v47, %v3741_v14  ;;  %v9056_v11 = vsel %vm431_vm0, %v4116_v28, %v4120_v2  ;;  %v9641_v47 = vld [vmem:[#allocation15_spill] sm:$0xff]  ;;  %v4042_v24 = vunpack.c.l.b16 %v3982_v21  ;;  %v3880_v28 = vpop.f32.mrf.mxu2  ;;  %v6941_v21 = vld [vmem:[#allocation4 + $0x230] sm:$0xff]  ;;  %5105 = vmatpush.bf16.msra.mxu2 %v6923_v34 }
 0x501   : > { %4258 = vmatmul.bf16.gmra.mxu3 %v9056_v11  ;;  %v9059_v62 = vpop.f32.mrf.mxu0  ;;  %v3404_v45 = vadd.f32 %v9641_v47, %v9640_v30  ;;  %v6934_v14 = vld [vmem:[#allocation4 + $0x1f8] sm:$0xff]  ;;  %5416 = vmatpush.bf16.msra.mxu1 %v6941_v21 }
 0x502   : > { %v3935_v29 = vadd.f32 %v8823_v49, %v3907_v46  ;;  %5263 = vmatpush.bf16.msra.mxu0 %v6934_v14  ;;  %v6922_v30 = vld [vmem:[#allocation4 + $0x198] sm:$0xff] }
 0x503   : > { %v3568_v32 = vadd.f32 %v8995_v57, %v3404_v45  ;;  %v4419_v57 = vrot.slane %v9068_v48, 1  ;;  %7032 = vmatpush.bf16.msra.mxu3 %v6926_v43  ;;  %v6921_v43 = vld [vmem:[#allocation4 + $0x190] sm:$0xff] }
 0x504   : > { %v3959_v55 = vmax.f32 %v3935_v29, 0.0  ;;  %5106 = vmatpush.bf16.msra.mxu2 %v6922_v30 }
 0x505   : > { %v3712_v7 = vpop.f32.mrf.mxu1 }
 0x506   : > { %v3983_v39 = vpack.c.bf16 %v3959_v55, %v3959_v55  ;;  %v3742_v27 = vadd.f32 %v3712_v7, %v3567_v9 }
 0x507   : > { %7033 = vmatpush.bf16.msra.mxu3 %v6925_v37  ;;  %v3406_v37 = vadd.f32 %v3380_v5, %v8812_v25 }
 0x508   : > { %v4043_v35 = vunpack.c.l.b16 %v3983_v39  ;;  %v3908_v0 = vadd.f32 %v3878_v40, %v3742_v27  ;;  %4838 = vmatmul.bf16.gmra.mxu1 %v9056_v11  ;;  %v4122_v40 = vshrl.u32 %v9041_v33, 16  ;;  %5107 = vmatpush.bf16.msra.mxu2 %v6921_v43 }
 0x509   : > { %v9070_v10 = vpop.f32.mrf.mxu0 }
 0x50a   : > { %v9072_v16 = vpack.c.b16 %v4043_v35, %v4042_v24  ;;  %v3936_v46 = vadd.f32 %v8823_v49, %v3908_v0  ;;  %v4124_v39 = vor.u32 %v4122_v40, %v4120_v2  ;;  %v6940_v0 = vld [vmem:[#allocation4 + $0x228] sm:$0xff] }
 0x50b   : > { %5417 = vmatpush.bf16.msra.mxu1 %v6940_v0  ;;  %7034 = vmatpush.bf16.msra.mxu3 %v6924_v3  ;;  %v4145_v0 = vshll.u32 %v9068_v48, 16  ;;  %v6919_v3 = vld [vmem:[#allocation4 + $0x180] sm:$0xff]  ;;  %v6933_v48 = vld [vmem:[#allocation4 + $0x1f0] sm:$0xff] }
 0x50c   : > { %4385 = vmatmul.bf16.gmra.mxu0 %v9072_v16  ;;  %v9078_v8 = vrot.slane %v9072_v16, 1  ;;  %v4126_v29 = vshll.u32 %v9072_v16, 16  ;;  %v3960_v45 = vmax.f32 %v3936_v46, 0.0  ;;  %v3883_v46 = vpop.f32.mrf.mxu2 }
 0x50d   : > { %v3714_v55 = vpop.f32.mrf.mxu1  ;;  %5264 = vmatpush.bf16.msra.mxu0 %v6933_v48 }
 0x50e   : > { %v3743_v9 = vadd.f32 %v3714_v55, %v3568_v32  ;;  %v9085_v7 = vsel %vm851_vm3, %v4406_v4, %v9078_v8  ;;  %v4128_v27 = vrot.slane %v4126_v29, 1  ;;  %v9090_v47 = vsel %vm851_vm3, %v9078_v8, %v4419_v57  ;;  %v6939_v32 = vld [vmem:[#allocation4 + $0x220] sm:$0xff]  ;;  %v6920_v57 = vld [vmem:[#allocation4 + $0x188] sm:$0xff] }
 0x50f   : > { %4995 = vmatmul.bf16.gmra.mxu2 %v9085_v7  ;;  %v3984_v51 = vpack.c.bf16 %v3960_v45, %v3960_v45  ;;  %5418 = vmatpush.bf16.msra.mxu1 %v6939_v32 }
 0x510   : > { %v3909_v24 = vadd.f32 %v3880_v28, %v3743_v9  ;;  %v9093_v35 = vsel %vm431_vm0, %v4124_v39, %v4128_v27  ;;  %v3569_v28 = vadd.f32 %v9009_v56, %v8805_v18  ;;  %v6938_v18 = vld [vmem:[#allocation4 + $0x218] sm:$0xff]  ;;  %5108 = vmatpush.bf16.msra.mxu2 %v6920_v57  ;;  %7035 = vmatpush.bf16.msra.mxu3 %v6923_v34 }
 0x511   : > { %4263 = vmatmul.bf16.gmra.mxu3 %v9093_v35  ;;  %v9096_v4 = vpop.f32.mrf.mxu0  ;;  %v4587_v9 = vunpack.c.l.b16 %v3984_v51 }
 0x512   : > { %v3937_v2 = vadd.f32 %v8823_v49, %v3909_v24  ;;  %v4130_v24 = vshrl.u32 %v9072_v16, 16 }
 0x513   : > { %5419 = vmatpush.bf16.msra.mxu1 %v6938_v18  ;;  %v6935_v18 = vld [vmem:[#allocation4 + $0x200] sm:$0xff] }
 0x514   : > { %v3961_v58 = vmax.f32 %v3937_v2, 0.0  ;;  %v4224_v14 = vpop.f32.mrf.mxu3  ;;  %v3570_v2 = vadd.f32 %v9031_v60, %v3406_v37  ;;  %5109 = vmatpush.bf16.msra.mxu2 %v6919_v3  ;;  %7036 = vmatpush.bf16.msra.mxu3 %v6922_v30  ;;  %v3885_v60 = vpop.f32.mrf.mxu2 }
 0x515   : > { %v9102_v40 = vadd.f32 %v9039_v41, %v4224_v14  ;;  %v3717_v29 = vpop.f32.mrf.mxu1  ;;  %v6937_v14 = vld [vmem:[#allocation4 + $0x210] sm:$0xff] }
 0x516   : > { %v3985_v21 = vpack.c.bf16 %v3961_v58, %v3961_v58  ;;  %v3744_v55 = vadd.f32 %v3717_v29, %v3569_v28  ;;  %v4132_v58 = vor.u32 %v4130_v24, %v4128_v27 }
 0x517   : > { %5420 = vmatpush.bf16.msra.mxu1 %v6937_v14 }
 0x518   : > { %v4588_v39 = vunpack.c.l.b16 %v3985_v21  ;;  %v3910_v45 = vadd.f32 %v3883_v46, %v3744_v55  ;;  %4843 = vmatmul.bf16.gmra.mxu1 %v9093_v35  ;;  %v6936_v55 = vld [vmem:[#allocation4 + $0x208] sm:$0xff]  ;;  %7037 = vmatpush.bf16.msra.mxu3 %v6921_v43 }
 0x519   : > { %v9106_v56 = vpop.f32.mrf.mxu0 }
 0x51a   : > { %v9108_v41 = vpack.c.b16 %v4588_v39, %v4587_v9  ;;  %v3938_v25 = vadd.f32 %v8823_v49, %v3910_v45 }
 0x51b   : > { %5421 = vmatpush.bf16.msra.mxu1 %v6936_v55 }
 0x51c   : > { %v4226_v5 = vpop.f32.mrf.mxu3  ;;  %4647 = vmatmul.bf16.vlgmr.msrb.gmra.mxu0 %v8858_v50  ;;  %v9116_v51 = vrot.slane %v9108_v41, 1  ;;  %v4147_v50 = vrot.slane %v4145_v0, 1  ;;  %v4719_v27 = vshll.u32 %v9108_v41, 16  ;;  %7038 = vmatpush.bf16.msra.mxu3 %v6920_v57  ;;  %v4723_v48 = vshrl.u32 %v9108_v41, 16 }
 0x51d   : > { %v9119_v28 = vadd.f32 %v9059_v62, %v4226_v5  ;;  %v3719_v32 = vpop.f32.mrf.mxu1  ;;  %v3962_v62 = vmax.f32 %v3938_v25, 0.0  ;;  %v4728_v5 = vpack.c.b16 %v8854_v6, %v8854_v6 }
 0x51e   : > { %v3745_v34 = vadd.f32 %v3719_v32, %v3570_v2  ;;  %v9124_v46 = vsel %vm851_vm3, %v9078_v8, %v9116_v51  ;;  %v4149_v21 = vsel %vm7382_vm2, %v4132_v58, %v4147_v50  ;;  %v4721_v9 = vrot.slane %v4719_v27, 1  ;;  %v6932_v50 = vld [vmem:[#allocation4 + $0x1e8] sm:$0xff] }
 0x51f   : > { %5000 = vmatmul.bf16.gmra.mxu2 %v9124_v46  ;;  %v3986_v30 = vpack.c.bf16 %v3962_v62, %v3962_v62  ;;  %5422 = vmatpush.bf16.msra.mxu1 %v6935_v18 }
 0x520   : > { %v3911_v29 = vadd.f32 %v3885_v60, %v3745_v34  ;;  %v9135_v25 = vsel %vm431_vm0, %v4132_v58, %v4721_v9  ;;  %7039 = vmatpush.bf16.msra.mxu3 %v6919_v3  ;;  %v4730_v34 = vshll.u32 %v4728_v5, 16  ;;  %v9150_v60 = vor.u32 %v4723_v48, %v4721_v9  ;;  %5265 = vmatpush.bf16.msra.mxu0 %v6932_v50 }
 0x521   : > { %4268 = vmatmul.bf16.gmra.mxu3 %v4149_v21  ;;  %v4353_v37 = vpop.f32.mrf.mxu0 }
 0x522   : > { %v3939_v8 = vadd.f32 %v8823_v49, %v3911_v29  ;;  %v5050_v49 = vunpack.c.l.b16 %v3986_v30  ;;  %v6931_v30 = vld [vmem:[#allocation4 + $0x1e0] sm:$0xff]  ;;  %v9190_v50 = vpop.f32.mrf.mxu2 }
 0x524   : > { %v3963_v39 = vmax.f32 %v3939_v8, 0.0  ;;  %v4229_v45 = vpop.f32.mrf.mxu3  ;;  %5266 = vmatpush.bf16.msra.mxu0 %v6931_v30 }
 0x525   : > { %v9132_v24 = vadd.f32 %v9070_v10, %v4229_v45  ;;  %v4882_v10 = vrot.slane %v4728_v5, 1  ;;  %v9163_v8 = vpop.f32.mrf.mxu1 }
 0x526   : > { %v3987_v0 = vpack.c.bf16 %v3963_v39, %v3963_v39 }
 0x527   : > { %v4885_v58 = vsel %vm851_vm3, %v9116_v51, %v4882_v10 }
 0x528   : > { %v5051_v2 = vunpack.c.l.b16 %v3987_v0  ;;  %4848 = vmatmul.bf16.gmra.mxu1 %v9135_v25 }
 0x529   : > { %v4356_v43 = vpop.f32.mrf.mxu0 }
 0x52a   : > { %v9140_v14 = vpack.c.b16 %v5051_v2, %v5050_v49  ;;  %v6930_v2 = vld [vmem:[#allocation4 + $0x1d8] sm:$0xff] }
 0x52b   : > { %5267 = vmatpush.bf16.msra.mxu0 %v6930_v2  ;;  %v6928_v2 = vld [vmem:[#allocation4 + $0x1c8] sm:$0xff] }
 0x52c   : > { %v4231_v32 = vpop.f32.mrf.mxu3  ;;  %4652 = vmatmul.bf16.gmra.mxu0 %v8887_v1 }
 0x52d   : > { %v9144_v57 = vadd.f32 %v9096_v4, %v4231_v32  ;;  %v4732_v4 = vrot.slane %v4730_v34, 1  ;;  %v9168_v45 = vpop.f32.mrf.mxu1 }
 0x52f   : > { %5005 = vmatmul.bf16.gmra.mxu2 %v4885_v58  ;;  %v4734_v62 = vsel %vm7382_vm2, %v9150_v60, %v4732_v4 }
 0x531   : > { %v4358_v6 = vpop.f32.mrf.mxu0  ;;  %4497 = vmatmul.bf16.vlgmr.msrb.gmra.mxu3 %v8868_v15 }
 0x534   : > { %v4234_v3 = vpop.f32.mrf.mxu3 }
 0x535   : > { %v9153_v27 = vadd.f32 %v9106_v56, %v4234_v3  ;;  %v9176_v5 = vpop.f32.mrf.mxu1 }
 0x538   : > { %4853 = vmatmul.bf16.gmra.mxu1 %v4734_v62  ;;  %v6929_v62 = vld [vmem:[#allocation4 + $0x1d0] sm:$0xff] }
 0x539   : > { %v4361_v29 = vpop.f32.mrf.mxu0  ;;  %5268 = vmatpush.bf16.msra.mxu0 %v6929_v62 }
 0x53c   : > { %v4236_v21 = vpop.f32.mrf.mxu3  ;;  %4657 = vmatmul.bf16.gmra.mxu0 %v8908_v20 }
 0x53d   : > { %v9159_v15 = vadd.f32 %v4353_v37, %v4236_v21  ;;  %v9182_v10 = vpop.f32.mrf.mxu1  ;;  %5269 = vmatpush.bf16.msra.mxu0 %v6928_v2 }
 0x53e   : > { %9642 = vst [vmem:[#allocation26_spill] sm:$0xff] %v9182_v10 }
 0x53f   : > { %5110 = vmatmul.bf16.vlgmr.msra.gmra.mxu2 %v8887_v1 }
 0x541   : > { %v4363_v55 = vpop.f32.mrf.mxu0  ;;  %4502 = vmatmul.bf16.gmra.mxu3 %v8896_v13 }
 0x544   : > { %v4239_v56 = vpop.f32.mrf.mxu3 }
 0x545   : > { %v9165_v9 = vadd.f32 %v4356_v43, %v4239_v56  ;;  %v9188_v34 = vpop.f32.mrf.mxu1  ;;  %v9664_v19 = vld [vmem:[#allocation26_spill] sm:$0xff] }
 0x546   : > { %9643 = vst [vmem:[#allocation27_spill] sm:$0xff] %v9188_v34 }
 0x548   : > { %5423 = vmatmul.bf16.vlgmr.msra.gmra.mxu1 %v8919_v36 }
 0x549   : > { %v4366_v39 = vpop.f32.mrf.mxu0 }
 0x54c   : > { %v4241_v18 = vpop.f32.mrf.mxu3  ;;  %4662 = vmatmul.bf16.gmra.mxu0 %v8935_v12 }
 0x54d   : > { %v9171_v37 = vadd.f32 %v4358_v6, %v4241_v18 }
 0x551   : > { %v4368_v1 = vpop.f32.mrf.mxu0  ;;  %4507 = vmatmul.bf16.gmra.mxu3 %v8919_v36 }
 0x554   : > { %v4244_v13 = vpop.f32.mrf.mxu3 }
 0x555   : > { %v9174_v0 = vadd.f32 %v4361_v29, %v4244_v13 }
 0x558   : > { %5428 = vmatmul.bf16.gmra.mxu1 %v8944_v26 }
 0x559   : > { %v4371_v49 = vpop.f32.mrf.mxu0 }
 0x55c   : > { %v4246_v43 = vpop.f32.mrf.mxu3  ;;  %4667 = vmatmul.bf16.gmra.mxu0 %v8962_v31 }
 0x55d   : > { %v9180_v32 = vadd.f32 %v4363_v55, %v4246_v43  ;;  %v9198_v55 = vpop.f32.mrf.mxu2 }
 0x561   : > { %v4373_v58 = vpop.f32.mrf.mxu0  ;;  %4512 = vmatmul.bf16.gmra.mxu3 %v8944_v26  ;;  %v9196_v26 = vpop.f32.mrf.mxu1 }
 0x562   : > { %9644 = vst [vmem:[#allocation18_spill] sm:$0xff] %v9196_v26 }
 0x564   : > { %v4249_v36 = vpop.f32.mrf.mxu3 }
 0x565   : > { %v9185_v6 = vadd.f32 %v4366_v39, %v4249_v36  ;;  %v9208_v13 = vpop.f32.mrf.mxu2 }
 0x568   : > { %5433 = vmatmul.bf16.gmra.mxu1 %v8971_v38 }
 0x569   : > { %v4376_v48 = vpop.f32.mrf.mxu0 }
 0x56c   : > { %v4251_v3 = vpop.f32.mrf.mxu3  ;;  %4672 = vmatmul.bf16.gmra.mxu0 %v8987_v17 }
 0x56d   : > { %v9193_v4 = vadd.f32 %v4368_v1, %v4251_v3  ;;  %v9206_v1 = vpop.f32.mrf.mxu1  ;;  %v9216_v3 = vpop.f32.mrf.mxu2 }
 0x56e   : > { %9645 = vst [vmem:[#allocation28_spill] sm:$0xff] %v9206_v1 }
 0x56f   : > { %9647 = vst [vmem:[#allocation30_spill] sm:$0xff] %v9216_v3 }
 0x571   : > { %v4378_v29 = vpop.f32.mrf.mxu0  ;;  %4517 = vmatmul.bf16.gmra.mxu3 %v8971_v38 }
 0x574   : > { %v4254_v21 = vpop.f32.mrf.mxu3 }
 0x575   : > { %v9200_v56 = vadd.f32 %v4371_v49, %v4254_v21  ;;  %v9213_v36 = vpop.f32.mrf.mxu1  ;;  %v9224_v2 = vpop.f32.mrf.mxu2 }
 0x576   : > { %9646 = vst [vmem:[#allocation29_spill] sm:$0xff] %v9213_v36  ;;  %v6927_v36 = vld [vmem:[#allocation4 + $0x1c0] sm:$0xff] }
 0x577   : > { %9649 = vst [vmem:[#allocation31_spill] sm:$0xff] %v9224_v2  ;;  %5270 = vmatpush.bf16.msra.mxu0 %v6927_v36 }
 0x578   : > { %5438 = vmatmul.bf16.gmra.mxu1 %v8998_v61 }
 0x579   : > { %v4381_v30 = vpop.f32.mrf.mxu0 }
 0x57c   : > { %v4256_v39 = vpop.f32.mrf.mxu3  ;;  %4677 = vmatmul.bf16.gmra.mxu0 %v9014_v52 }
 0x57d   : > { %v9204_v18 = vadd.f32 %v4373_v58, %v4256_v39 }
 0x581   : > { %v4383_v38 = vpop.f32.mrf.mxu0  ;;  %4522 = vmatmul.bf16.gmra.mxu3 %v8998_v61  ;;  %v9222_v61 = vpop.f32.mrf.mxu1 }
 0x582   : > { %9648 = vst [vmem:[#allocation21_spill] sm:$0xff] %v9222_v61 }
 0x584   : > { %v4259_v43 = vpop.f32.mrf.mxu3 }
 0x585   : > { %v9211_v49 = vadd.f32 %v4376_v48, %v4259_v43 }
 0x588   : > { %5443 = vmatmul.bf16.gmra.mxu1 %v9023_v54 }
 0x589   : > { %v4386_v58 = vpop.f32.mrf.mxu0  ;;  %v9229_v26 = vpop.f32.mrf.mxu1 }
 0x58a   : > { %9650 = vst [vmem:[#allocation8_spill] sm:$0xff] %v9229_v26 }
 0x58c   : > { %v4261_v62 = vpop.f32.mrf.mxu3  ;;  %4682 = vmatmul.bf16.gmra.mxu0 %v9041_v33 }
 0x58d   : > { %v9219_v21 = vadd.f32 %v4378_v29, %v4261_v62  ;;  %v9232_v29 = vpop.f32.mrf.mxu2 }
 0x58e   : > { %9651 = vst [vmem:[#allocation11_spill] sm:$0xff] %v9232_v29 }
 0x591   : > { %v4388_v39 = vpop.f32.mrf.mxu0  ;;  %4527 = vmatmul.bf16.gmra.mxu3 %v9023_v54 }
 0x594   : > { %v4264_v48 = vpop.f32.mrf.mxu3 }
 0x595   : > { %v9226_v43 = vadd.f32 %v4381_v30, %v4264_v48  ;;  %v9239_v48 = vpop.f32.mrf.mxu1  ;;  %v9241_v2 = vpop.f32.mrf.mxu2 }
 0x596   : > { %9652 = vst [vmem:[#allocation34_spill] sm:$0xff] %v9239_v48 }
 0x597   : > { %9653 = vst [vmem:[#allocation20_spill] sm:$0xff] %v9241_v2 }
 0x598   : > { %5448 = vmatmul.bf16.gmra.mxu1 %v9050_v44 }
 0x599   : > { %v4648_v1 = vpop.f32.mrf.mxu0 }
 0x59c   : > { %v4266_v34 = vpop.f32.mrf.mxu3  ;;  %4687 = vmatmul.bf16.gmra.mxu0 %v9072_v16 }
 0x59d   : > { %v9234_v54 = vadd.f32 %v4383_v38, %v4266_v34  ;;  %v9247_v34 = vpop.f32.mrf.mxu1  ;;  %v9249_v38 = vpop.f32.mrf.mxu2 }
 0x59e   : > { %9654 = vst [vmem:[#allocation16_spill] sm:$0xff] %v9247_v34 }
 0x5a1   : > { %4532 = vmatmul.bf16.gmra.mxu3 %v9050_v44  ;;  %v4650_v62 = vpop.f32.mrf.mxu0 }
 0x5a4   : > { %v4269_v61 = vpop.f32.mrf.mxu3 }
 0x5a5   : > { %v9237_v30 = vadd.f32 %v4386_v58, %v4269_v61  ;;  %v9256_v29 = vpop.f32.mrf.mxu1  ;;  %v9258_v10 = vpop.f32.mrf.mxu2 }
 0x5a6   : > { %9655 = vst [vmem:[#allocation17_spill] sm:$0xff] %v9256_v29 }
 0x5a8   : > { %5453 = vmatmul.bf16.gmra.mxu1 %v9085_v7 }
 0x5a9   : > { %v4653_v36 = vpop.f32.mrf.mxu0 }
 0x5ac   : > { %v4271_v26 = vpop.f32.mrf.mxu3  ;;  %4692 = vmatmul.bf16.gmra.mxu0 %v9108_v41 }
 0x5ad   : > { %v9245_v3 = vadd.f32 %v4388_v39, %v4271_v26 }
 0x5b1   : > { %4537 = vmatmul.bf16.gmra.mxu3 %v9085_v7  ;;  %v4655_v44 = vpop.f32.mrf.mxu0 }
 0x5b4   : > { %v4498_v58 = vpop.f32.mrf.mxu3 }
 0x5b5   : > { %v4548_v61 = vadd.f32 %v4498_v58, %v9102_v40  ;;  %v5342_v40 = vrot.slane %v9140_v14, 1  ;;  %v9268_v58 = vpop.f32.mrf.mxu2 }
 0x5b7   : > { %v9253_v48 = vadd.f32 %v4648_v1, %v4548_v61  ;;  %v9266_v1 = vpop.f32.mrf.mxu1 }
 0x5b8   : > { %5458 = vmatmul.bf16.gmra.mxu1 %v9124_v46  ;;  %9656 = vst [vmem:[#allocation24_spill] sm:$0xff] %v9266_v1 }
 0x5b9   : > { %v4658_v2 = vpop.f32.mrf.mxu0 }
 0x5bc   : > { %v4500_v26 = vpop.f32.mrf.mxu3  ;;  %5271 = vmatmul.bf16.vlgmr.msra.gmra.mxu0 %v8925_v53  ;;  %v5343_v53 = vsel %vm851_vm3, %v9116_v51, %v5342_v40 }
 0x5bd   : > { %v4549_v39 = vadd.f32 %v4500_v26, %v9119_v28 }
 0x5bf   : > { %v9262_v34 = vadd.f32 %v4650_v62, %v4549_v39  ;;  %v9277_v26 = vpop.f32.mrf.mxu1  ;;  %v9279_v39 = vpop.f32.mrf.mxu2 }
 0x5c1   : > { %4542 = vmatmul.bf16.gmra.mxu3 %v9090_v47  ;;  %v4660_v7 = vpop.f32.mrf.mxu0 }
 0x5c4   : > { %v4503_v46 = vpop.f32.mrf.mxu3 }
 0x5c5   : > { %v4550_v61 = vadd.f32 %v4503_v46, %v9132_v24  ;;  %v9285_v24 = vpack.c.b16 %v8879_v63, %v8879_v63 }
 0x5c7   : > { %v9271_v29 = vadd.f32 %v4653_v36, %v4550_v61 }
 0x5c8   : > { %5463 = vmatmul.bf16.gmra.mxu1 %v5343_v53  ;;  %v9293_v53 = vpop.f32.mrf.mxu1 }
 0x5c9   : > { %v4663_v28 = vpop.f32.mrf.mxu0  ;;  %9657 = vst [vmem:[#allocation25_spill] sm:$0xff] %v9293_v53 }
 0x5cc   : > { %v4505_v62 = vpop.f32.mrf.mxu3  ;;  %5276 = vmatmul.bf16.gmra.mxu0 %v8952_v42  ;;  %v5345_v42 = vrot.slane %v9285_v24, 1 }
 0x5cd   : > { %v4551_v47 = vadd.f32 %v4505_v62, %v9144_v57 }
 0x5ce   : > { %v5348_v57 = vsel %vm851_vm3, %v5342_v40, %v5345_v42 }
 0x5cf   : > { %v9281_v1 = vadd.f32 %v4655_v44, %v4551_v47  ;;  %v9295_v44 = vpop.f32.mrf.mxu2 }
 0x5d1   : > { %v4665_v36 = vpop.f32.mrf.mxu0  ;;  %5115 = vmatmul.bf16.vlgmr.msra.gmra.mxu3 %v8908_v20 }
 0x5d4   : > { %v4508_v51 = vpop.f32.mrf.mxu3 }
 0x5d5   : > { %v4552_v46 = vadd.f32 %v4508_v51, %v9153_v27 }
 0x5d7   : > { %v9290_v61 = vadd.f32 %v4658_v2, %v4552_v46  ;;  %v9302_v2 = vpop.f32.mrf.mxu2 }
 0x5d8   : > { %5468 = vmatmul.bf16.gmra.mxu1 %v5348_v57 }
 0x5d9   : > { %v4668_v62 = vpop.f32.mrf.mxu0 }
 0x5dc   : > { %v4510_v63 = vpop.f32.mrf.mxu3  ;;  %5281 = vmatmul.bf16.gmra.mxu0 %v8977_v23 }
 0x5dd   : > { %v4553_v20 = vadd.f32 %v4510_v63, %v9159_v15 }
 0x5df   : > { %v9299_v47 = vadd.f32 %v4660_v7, %v4553_v20  ;;  %v9308_v53 = vpop.f32.mrf.mxu2 }
 0x5e1   : > { %v4670_v27 = vpop.f32.mrf.mxu0  ;;  %5120 = vmatmul.bf16.gmra.mxu3 %v8935_v12 }
 0x5e4   : > { %v4513_v51 = vpop.f32.mrf.mxu3 }
 0x5e5   : > { %v4554_v40 = vadd.f32 %v4513_v51, %v9165_v9  ;;  %v9319_v51 = vpop.f32.mrf.mxu1 }
 0x5e7   : > { %v9305_v46 = vadd.f32 %v4663_v28, %v4554_v40  ;;  %v9315_v20 = vpop.f32.mrf.mxu2 }
 0x5e9   : > { %v4673_v42 = vpop.f32.mrf.mxu0 }
 0x5ec   : > { %v4515_v57 = vpop.f32.mrf.mxu3  ;;  %5286 = vmatmul.bf16.gmra.mxu0 %v9004_v59 }
 0x5ed   : > { %v4555_v23 = vadd.f32 %v4515_v57, %v9171_v37 }
 0x5ef   : > { %v9311_v15 = vadd.f32 %v4665_v36, %v4555_v23  ;;  %v9325_v40 = vpop.f32.mrf.mxu2 }
 0x5f1   : > { %v4675_v7 = vpop.f32.mrf.mxu0  ;;  %5125 = vmatmul.bf16.gmra.mxu3 %v8962_v31 }
 0x5f4   : > { %v4518_v12 = vpop.f32.mrf.mxu3 }
 0x5f5   : > { %v4556_v63 = vadd.f32 %v4518_v12, %v9174_v0  ;;  %v9328_v0 = vpop.f32.mrf.mxu1 }
 0x5f6   : > { %9658 = vst [vmem:[#allocation9_spill] sm:$0xff] %v9328_v0 }
 0x5f7   : > { %v9317_v9 = vadd.f32 %v4668_v62, %v4556_v63  ;;  %v9333_v63 = vpop.f32.mrf.mxu2 }
 0x5f9   : > { %v4678_v28 = vpop.f32.mrf.mxu0 }
 0x5fc   : > { %v4520_v59 = vpop.f32.mrf.mxu3  ;;  %5291 = vmatmul.bf16.gmra.mxu0 %v9029_v22 }
 0x5fd   : > { %v4557_v37 = vadd.f32 %v4520_v59, %v9180_v32 }
 0x5ff   : > { %v9323_v36 = vadd.f32 %v4670_v27, %v4557_v37  ;;  %v9337_v27 = vpop.f32.mrf.mxu1  ;;  %v9342_v0 = vpop.f32.mrf.mxu2 }
 0x600   : > { %9659 = vst [vmem:[#allocation13_spill] sm:$0xff] %v9337_v27 }
 0x601   : > { %v4680_v31 = vpop.f32.mrf.mxu0  ;;  %5130 = vmatmul.bf16.gmra.mxu3 %v8987_v17  ;;  %9660 = vst [vmem:[#allocation19_spill] sm:$0xff] %v9342_v0 }
 0x604   : > { %v4523_v57 = vpop.f32.mrf.mxu3 }
 0x605   : > { %v4558_v62 = vadd.f32 %v4523_v57, %v9185_v6 }
 0x607   : > { %v9331_v23 = vadd.f32 %v4673_v42, %v4558_v62  ;;  %v9347_v57 = vpop.f32.mrf.mxu1 }
 0x608   : > { %9661 = vst [vmem:[#allocation10_spill] sm:$0xff] %v9347_v57 }
 0x609   : > { %v4683_v12 = vpop.f32.mrf.mxu0 }
 0x60c   : > { %v4525_v22 = vpop.f32.mrf.mxu3  ;;  %5296 = vmatmul.bf16.gmra.mxu0 %v9056_v11 }
 0x60d   : > { %v4559_v32 = vadd.f32 %v4525_v22, %v9193_v4 }
 0x60f   : > { %v9339_v59 = vadd.f32 %v4675_v7, %v4559_v32  ;;  %v9351_v7 = vpop.f32.mrf.mxu2  ;;  %v5424_v32 = vpop.f32.mrf.mxu1 }
 0x610   : > { %9662 = vst [vmem:[#allocation14_spill] sm:$0xff] %v9351_v7 }
 0x611   : > { %v4685_v17 = vpop.f32.mrf.mxu0  ;;  %5135 = vmatmul.bf16.gmra.mxu3 %v9014_v52 }
 0x614   : > { %v4528_v37 = vpop.f32.mrf.mxu3 }
 0x615   : > { %v4560_v6 = vadd.f32 %v4528_v37, %v9200_v56 }
 0x617   : > { %v9345_v42 = vadd.f32 %v4678_v28, %v4560_v6  ;;  %v9359_v37 = vpop.f32.mrf.mxu2  ;;  %v5426_v57 = vpop.f32.mrf.mxu1 }
 0x618   : > { %9663 = vst [vmem:[#allocation32_spill] sm:$0xff] %v9359_v37 }
 0x619   : > { %v4688_v62 = vpop.f32.mrf.mxu0 }
 0x61c   : > { %v4530_v11 = vpop.f32.mrf.mxu3  ;;  %5301 = vmatmul.bf16.gmra.mxu0 %v9093_v35 }
 0x61d   : > { %v4561_v4 = vadd.f32 %v4530_v11, %v9204_v18 }
 0x61f   : > { %v9353_v22 = vadd.f32 %v4680_v31, %v4561_v4  ;;  %v5182_v4 = vshll.u32 %v9140_v14, 16 }
 0x621   : > { %v4690_v52 = vpop.f32.mrf.mxu0  ;;  %5140 = vmatmul.bf16.gmra.mxu3 %v9041_v33  ;;  %v5111_v33 = vpop.f32.mrf.mxu2 }
 0x624   : > { %v4533_v27 = vpop.f32.mrf.mxu3 }
 0x625   : > { %v4562_v56 = vadd.f32 %v4533_v27, %v9211_v49  ;;  %v4859_v49 = vadd.f32 %v9163_v8, %v9253_v48 }
 0x627   : > { %v9357_v28 = vadd.f32 %v4683_v12, %v4562_v56  ;;  %v5429_v56 = vpop.f32.mrf.mxu1 }
 0x629   : > { %v4693_v6 = vpop.f32.mrf.mxu0  ;;  %v5113_v8 = vpop.f32.mrf.mxu2 }
 0x62c   : > { %v4535_v35 = vpop.f32.mrf.mxu3  ;;  %5306 = vmatmul.bf16.gmra.mxu0 %v9135_v25  ;;  %v5184_v25 = vrot.slane %v5182_v4, 1 }
 0x62d   : > { %v4563_v18 = vadd.f32 %v4535_v35, %v9219_v21  ;;  %v5011_v21 = vadd.f32 %v9190_v50, %v4859_v49 }
 0x62f   : > { %v9363_v31 = vadd.f32 %v4685_v17, %v4563_v18  ;;  %v5161_v35 = vadd.f32 %v5111_v33, %v5011_v21  ;;  %v5185_v18 = vsel %vm431_vm0, %v9150_v60, %v5184_v25  ;;  %v5431_v4 = vpop.f32.mrf.mxu1 }
 0x631   : > { %v4695_v11 = vpop.f32.mrf.mxu0  ;;  %5145 = vmatmul.bf16.gmra.mxu3 %v9072_v16  ;;  %v4860_v16 = vadd.f32 %v9168_v45, %v9262_v34  ;;  %v9384_v45 = vld [vmem:[%s9497_s6] ss:$0 sm:$0xff] }
 0x633   : > { %v5012_v48 = vadd.f32 %v9198_v55, %v4860_v16 }
 0x634   : > { %v4538_v12 = vpop.f32.mrf.mxu3 }
 0x635   : > { %v4564_v27 = vadd.f32 %v4538_v12, %v9226_v43  ;;  %v5162_v50 = vadd.f32 %v5113_v8, %v5012_v48 }
 0x637   : > { %v9370_v37 = vadd.f32 %v4688_v62, %v4564_v27 }
 0x639   : > { %v5272_v17 = vpop.f32.mrf.mxu0 }
 0x63a   : > { %v5322_v7 = vadd.f32 %v5272_v17, %v5161_v35 }
 0x63c   : > { %v4540_v0 = vpop.f32.mrf.mxu3  ;;  %5311 = vmatmul.bf16.gmra.mxu0 %v5185_v18  ;;  %v5474_v33 = vadd.f32 %v5424_v32, %v5322_v7  ;;  %v5193_v7 = vshll.u32 %v9285_v24, 16  ;;  %v4861_v18 = vadd.f32 %v9176_v5, %v9271_v29 }
 0x63d   : > { %v4565_v43 = vadd.f32 %v4540_v0, %v9234_v54  ;;  %v5186_v0 = vshrl.u32 %v9140_v14, 16 }
 0x63e   : > { %v5498_v49 = vadd.f32 %v9384_v45, %v5474_v33  ;;  %v5195_v17 = vrot.slane %v5193_v7, 1 }
 0x63f   : > { %v9379_v62 = vadd.f32 %v4690_v52, %v4565_v43  ;;  %v5188_v27 = vor.u32 %v5186_v0, %v5184_v25  ;;  %v5013_v43 = vadd.f32 %v9208_v13, %v4861_v18 }
 0x640   : > { %v5518_v21 = vmax.f32 %v5498_v49, 0.0 }
 0x641   : > { %5150 = vmatmul.bf16.gmra.mxu3 %v9108_v41  ;;  %v5274_v60 = vpop.f32.mrf.mxu0  ;;  %v5197_v24 = vsel %vm7382_vm2, %v5188_v27, %v5195_v17 }
 0x642   : > { %v5323_v34 = vadd.f32 %v5274_v60, %v5162_v50  ;;  %v4862_v60 = vadd.f32 %v9664_v19, %v9281_v1  ;;  %v9667_v1 = vld [vmem:[#allocation31_spill] sm:$0xff] }
 0x644   : > { %v5475_v12 = vadd.f32 %v5426_v57, %v5323_v34  ;;  %v4543_v54 = vpop.f32.mrf.mxu3 }
 0x645   : > { %v4566_v55 = vadd.f32 %v4543_v54, %v9237_v30  ;;  %v5434_v30 = vpop.f32.mrf.mxu1 }
 0x646   : > { %v5499_v52 = vadd.f32 %v9384_v45, %v5475_v12  ;;  %v9665_v12 = vld [vmem:[#allocation30_spill] sm:$0xff] }
 0x647   : > { %v9393_v32 = vadd.f32 %v4693_v6, %v4566_v55 }
 0x648   : > { %v5519_v41 = vmax.f32 %v5499_v52, 0.0 }
 0x649   : > { %v5277_v57 = vpop.f32.mrf.mxu0 }
 0x64a   : > { %v6958_v35 = vpack.c.bf16 %v5519_v41, %v5518_v21 }
 0x64c   : > { %6959 = vst [vmem:[%s9398_s12] sm:$0xff] %v6958_v35   ;;  %v4545_v16 = vpop.f32.mrf.mxu3  ;;  %5316 = vmatmul.bf16.gmra.mxu0 %v5197_v24  ;;  %v9668_v24 = vld [vmem:[#allocation18_spill] sm:$0xff] }
 0x64d   : > { %v4567_v6 = vadd.f32 %v4545_v16, %v9245_v3  ;;  %v5436_v48 = vpop.f32.mrf.mxu1  ;;  %v5014_v3 = vadd.f32 %v9665_v12, %v4862_v60  ;;  %v4864_v16 = vadd.f32 %v9668_v24, %v9299_v47  ;;  %v9670_v60 = vld [vmem:[#allocation28_spill] sm:$0xff] }
 0x64f   : > { %v9404_v25 = vadd.f32 %v4695_v11, %v4567_v6 }
 0x651   : > { %5155 = vmatmul.bf16.gmra.mxu3 %v9140_v14  ;;  %v5279_v8 = vpop.f32.mrf.mxu0  ;;  %v9666_v14 = vld [vmem:[#allocation27_spill] sm:$0xff] }
 0x652   : > { %v4863_v0 = vadd.f32 %v9666_v14, %v9290_v61 }
 0x654   : > { %v5116_v50 = vpop.f32.mrf.mxu3  ;;  %v5015_v21 = vadd.f32 %v9667_v1, %v4863_v0 }
 0x655   : > { %v5163_v33 = vadd.f32 %v5116_v50, %v5013_v43  ;;  %v5439_v5 = vpop.f32.mrf.mxu1 }
 0x657   : > { %v5324_v34 = vadd.f32 %v5277_v57, %v5163_v33 }
 0x659   : > { %v5282_v49 = vpop.f32.mrf.mxu0  ;;  %v5476_v54 = vadd.f32 %v5429_v56, %v5324_v34  ;;  %v4865_v34 = vadd.f32 %v9670_v60, %v9305_v46 }
 0x65b   : > { %v5500_v13 = vadd.f32 %v9384_v45, %v5476_v54 }
 0x65c   : > { %v5118_v11 = vpop.f32.mrf.mxu3 }
 0x65d   : > { %v5164_v55 = vadd.f32 %v5118_v11, %v5014_v3  ;;  %v5520_v57 = vmax.f32 %v5500_v13, 0.0  ;;  %v5441_v6 = vpop.f32.mrf.mxu1 }
 0x65f   : > { %v5325_v29 = vadd.f32 %v5279_v8, %v5164_v55  ;;  %v9669_v8 = vld [vmem:[#allocation11_spill] sm:$0xff]  ;;  %v9671_v55 = vld [vmem:[#allocation20_spill] sm:$0xff] }
 0x660   : > { %v5016_v43 = vadd.f32 %v9669_v8, %v4864_v16 }
 0x661   : > { %v5477_v7 = vadd.f32 %v5431_v4, %v5325_v29  ;;  %v5284_v52 = vpop.f32.mrf.mxu0 }
 0x663   : > { %v5501_v27 = vadd.f32 %v9384_v45, %v5477_v7  ;;  %v9672_v7 = vld [vmem:[#allocation29_spill] sm:$0xff] }
 0x664   : > { %v5121_v41 = vpop.f32.mrf.mxu3 }
 0x665   : > { %v5521_v17 = vmax.f32 %v5501_v27, 0.0  ;;  %v5165_v35 = vadd.f32 %v5121_v41, %v5015_v21  ;;  %v5444_v54 = vpop.f32.mrf.mxu1 }
 0x667   : > { %v6963_v56 = vpack.c.bf16 %v5521_v17, %v5520_v57  ;;  %v5326_v18 = vadd.f32 %v5282_v49, %v5165_v35  ;;  %v5017_v49 = vadd.f32 %v9671_v55, %v4865_v34  ;;  %v9673_v35 = vld [vmem:[#allocation21_spill] sm:$0xff] }
 0x669   : > { %7007 = vst [vmem:[%s9398_s12 + $0x8] sm:$0xff] %v6963_v56   ;;  %v5287_v61 = vpop.f32.mrf.mxu0  ;;  %v5478_v50 = vadd.f32 %v5434_v30, %v5326_v18  ;;  %v4867_v56 = vadd.f32 %v9673_v35, %v9317_v9 }
 0x66b   : > { %v5502_v12 = vadd.f32 %v9384_v45, %v5478_v50 }
 0x66c   : > { %v5123_v4 = vpop.f32.mrf.mxu3 }
 0x66d   : > { %v5166_v33 = vadd.f32 %v5123_v4, %v5016_v43  ;;  %v5522_v14 = vmax.f32 %v5502_v12, 0.0 }
 0x66f   : > { %v5327_v19 = vadd.f32 %v5284_v52, %v5166_v33  ;;  %v4866_v52 = vadd.f32 %v9672_v7, %v9311_v15  ;;  %v9674_v33 = vld [vmem:[#allocation8_spill] sm:$0xff] }
 0x671   : > { %v5479_v3 = vadd.f32 %v5436_v48, %v5327_v19  ;;  %v5289_v11 = vpop.f32.mrf.mxu0  ;;  %v5018_v1 = vadd.f32 %v9249_v38, %v4866_v52  ;;  %v5446_v48 = vpop.f32.mrf.mxu1  ;;  %v4868_v19 = vadd.f32 %v9674_v33, %v9323_v36  ;;  %v9676_v52 = vld [vmem:[#allocation16_spill] sm:$0xff] }
 0x673   : > { %v5503_v47 = vadd.f32 %v9384_v45, %v5479_v3  ;;  %v5020_v34 = vadd.f32 %v9268_v58, %v4868_v19 }
 0x674   : > { %v5126_v29 = vpop.f32.mrf.mxu3 }
 0x675   : > { %v5523_v0 = vmax.f32 %v5503_v47, 0.0  ;;  %v5167_v13 = vadd.f32 %v5126_v29, %v5017_v49 }
 0x677   : > { %v6968_v30 = vpack.c.bf16 %v5523_v0, %v5522_v14  ;;  %v5328_v27 = vadd.f32 %v5287_v61, %v5167_v13  ;;  %v5019_v61 = vadd.f32 %v9258_v10, %v4867_v56  ;;  %v9675_v10 = vld [vmem:[#allocation34_spill] sm:$0xff] }
 0x678   : > { %v4869_v47 = vadd.f32 %v9675_v10, %v9331_v23 }
 0x679   : > { %7008 = vst [vmem:[%s9398_s12 + $0x10] sm:$0xff] %v6968_v30   ;;  %v5292_v46 = vpop.f32.mrf.mxu0  ;;  %v5480_v41 = vadd.f32 %v5439_v5, %v5328_v27  ;;  %v5449_v50 = vpop.f32.mrf.mxu1  ;;  %v4870_v27 = vadd.f32 %v9676_v52, %v9339_v59 }
 0x67a   : > { %v5021_v0 = vadd.f32 %v9279_v39, %v4869_v47  ;;  %v9677_v39 = vld [vmem:[#allocation17_spill] sm:$0xff] }
 0x67b   : > { %v5504_v24 = vadd.f32 %v9384_v45, %v5480_v41  ;;  %v4871_v35 = vadd.f32 %v9677_v39, %v9345_v42 }
 0x67c   : > { %v5128_v21 = vpop.f32.mrf.mxu3 }
 0x67d   : > { %v5168_v57 = vadd.f32 %v5128_v21, %v5018_v1  ;;  %v5524_v43 = vmax.f32 %v5504_v24, 0.0  ;;  %v5022_v21 = vadd.f32 %v9295_v44, %v4870_v27 }
 0x67f   : > { %v5329_v17 = vadd.f32 %v5289_v11, %v5168_v57 }
 0x681   : > { %v5481_v16 = vadd.f32 %v5441_v6, %v5329_v17  ;;  %v5294_v18 = vpop.f32.mrf.mxu0  ;;  %v5451_v55 = vpop.f32.mrf.mxu1 }
 0x683   : > { %v5505_v15 = vadd.f32 %v9384_v45, %v5481_v16 }
 0x684   : > { %v5131_v8 = vpop.f32.mrf.mxu3 }
 0x685   : > { %v5525_v38 = vmax.f32 %v5505_v15, 0.0  ;;  %v5169_v4 = vadd.f32 %v5131_v8, %v5019_v61 }
 0x687   : > { %v6973_v5 = vpack.c.bf16 %v5525_v38, %v5524_v43  ;;  %v5330_v60 = vadd.f32 %v5292_v46, %v5169_v4  ;;  %v9678_v4 = vld [vmem:[#allocation24_spill] sm:$0xff] }
 0x689   : > { %7009 = vst [vmem:[%s9398_s12 + $0x18] sm:$0xff] %v6973_v5   ;;  %v5297_v9 = vpop.f32.mrf.mxu0  ;;  %v5482_v12 = vadd.f32 %v5444_v54, %v5330_v60  ;;  %v5454_v1 = vpop.f32.mrf.mxu1 }
 0x68b   : > { %v5506_v49 = vadd.f32 %v9384_v45, %v5482_v12 }
 0x68c   : > { %v5133_v6 = vpop.f32.mrf.mxu3 }
 0x68d   : > { %v5170_v3 = vadd.f32 %v5133_v6, %v5020_v34  ;;  %v5526_v30 = vmax.f32 %v5506_v49, 0.0  ;;  %v4873_v6 = vadd.f32 %v9277_v26, %v9357_v28 }
 0x68f   : > { %v5331_v11 = vadd.f32 %v5294_v18, %v5170_v3  ;;  %v5023_v18 = vadd.f32 %v9302_v2, %v4871_v35 }
 0x691   : > { %v5483_v29 = vadd.f32 %v5446_v48, %v5331_v11  ;;  %v5299_v14 = vpop.f32.mrf.mxu0  ;;  %v5456_v15 = vpop.f32.mrf.mxu1 }
 0x693   : > { %v5507_v36 = vadd.f32 %v9384_v45, %v5483_v29 }
 0x694   : > { %v5136_v13 = vpop.f32.mrf.mxu3 }
 0x695   : > { %v5527_v58 = vmax.f32 %v5507_v36, 0.0  ;;  %v5171_v7 = vadd.f32 %v5136_v13, %v5021_v0 }
 0x697   : > { %v6978_v54 = vpack.c.bf16 %v5527_v58, %v5526_v30  ;;  %v5332_v46 = vadd.f32 %v5297_v9, %v5171_v7 }
 0x699   : > { %7010 = vst [vmem:[%s9398_s12 + $0x20] sm:$0xff] %v6978_v54   ;;  %v5302_v23 = vpop.f32.mrf.mxu0  ;;  %v5484_v41 = vadd.f32 %v5449_v50, %v5332_v46  ;;  %v4872_v50 = vadd.f32 %v9678_v4, %v9353_v22  ;;  %v5459_v34 = vpop.f32.mrf.mxu1  ;;  %v5025_v22 = vadd.f32 %v9315_v20, %v4873_v6  ;;  %v4875_v20 = vadd.f32 %v9319_v51, %v9370_v37  ;;  %v9681_v37 = vld [vmem:[#allocation19_spill] sm:$0xff] }
 0x69b   : > { %v5508_v56 = vadd.f32 %v9384_v45, %v5484_v41  ;;  %v5024_v42 = vadd.f32 %v9308_v53, %v4872_v50 }
 0x69c   : > { %v5138_v48 = vpop.f32.mrf.mxu3 }
 0x69d   : > { %v5172_v57 = vadd.f32 %v5138_v48, %v5022_v21  ;;  %v5528_v8 = vmax.f32 %v5508_v56, 0.0 }
 0x69f   : > { %v5333_v17 = vadd.f32 %v5299_v14, %v5172_v57  ;;  %v9679_v14 = vld [vmem:[#allocation25_spill] sm:$0xff] }
 0x6a0   : > { %v4874_v36 = vadd.f32 %v9679_v14, %v9363_v31  ;;  %v9680_v57 = vld [vmem:[#allocation9_spill] sm:$0xff] }
 0x6a1   : > { %v5485_v24 = vadd.f32 %v5451_v55, %v5333_v17  ;;  %v5304_v16 = vpop.f32.mrf.mxu0  ;;  %v5461_v0 = vpop.f32.mrf.mxu1  ;;  %v4876_v17 = vadd.f32 %v9680_v57, %v9379_v62  ;;  %v9683_v62 = vld [vmem:[#allocation14_spill] sm:$0xff] }
 0x6a2   : > { %v5026_v26 = vadd.f32 %v9325_v40, %v4874_v36 }
 0x6a3   : > { %v5509_v59 = vadd.f32 %v9384_v45, %v5485_v24  ;;  %v5028_v35 = vadd.f32 %v9681_v37, %v4876_v17 }
 0x6a4   : > { %v5141_v61 = vpop.f32.mrf.mxu3 }
 0x6a5   : > { %v5529_v44 = vmax.f32 %v5509_v59, 0.0  ;;  %v5173_v43 = vadd.f32 %v5141_v61, %v5023_v18 }
 0x6a7   : > { %v6983_v38 = vpack.c.bf16 %v5529_v44, %v5528_v8  ;;  %v5334_v5 = vadd.f32 %v5302_v23, %v5173_v43  ;;  %v5027_v23 = vadd.f32 %v9333_v63, %v4875_v20  ;;  %v9682_v63 = vld [vmem:[#allocation13_spill] sm:$0xff] }
 0x6a9   : > { %7011 = vst [vmem:[%s9398_s12 + $0x28] sm:$0xff] %v6983_v38   ;;  %v5307_v33 = vpop.f32.mrf.mxu0  ;;  %v5486_v60 = vadd.f32 %v5454_v1, %v5334_v5  ;;  %v5464_v46 = vpop.f32.mrf.mxu1 }
 0x6ab   : > { %v5510_v12 = vadd.f32 %v9384_v45, %v5486_v60  ;;  %v9684_v60 = vld [vmem:[#allocation10_spill] sm:$0xff] }
 0x6ac   : > { %v5143_v19 = vpop.f32.mrf.mxu3 }
 0x6ad   : > { %v5174_v9 = vadd.f32 %v5143_v19, %v5024_v42  ;;  %v5530_v47 = vmax.f32 %v5510_v12, 0.0 }
 0x6af   : > { %v5335_v2 = vadd.f32 %v5304_v16, %v5174_v9  ;;  %v4878_v9 = vadd.f32 %v9684_v60, %v9404_v25 }
 0x6b1   : > { %v5487_v3 = vadd.f32 %v5456_v15, %v5335_v2  ;;  %v5309_v49 = vpop.f32.mrf.mxu0  ;;  %v5466_v56 = vpop.f32.mrf.mxu1  ;;  %v4877_v15 = vadd.f32 %v9682_v63, %v9393_v32 }
 0x6b3   : > { %v5511_v11 = vadd.f32 %v9384_v45, %v5487_v3  ;;  %v5029_v43 = vadd.f32 %v9683_v62, %v4877_v15 }
 0x6b4   : > { %v5146_v10 = vpop.f32.mrf.mxu3 }
 0x6b5   : > { %v5531_v53 = vmax.f32 %v5511_v11, 0.0  ;;  %v5175_v55 = vadd.f32 %v5146_v10, %v5025_v22 }
 0x6b7   : > { %v6988_v29 = vpack.c.bf16 %v5531_v53, %v5530_v47  ;;  %v5336_v13 = vadd.f32 %v5307_v33, %v5175_v55 }
 0x6b9   : > { %7012 = vst [vmem:[%s9398_s12 + $0x30] sm:$0xff] %v6988_v29   ;;  %v5488_v30 = vadd.f32 %v5459_v34, %v5336_v13  ;;  %v5312_v54 = vpop.f32.mrf.mxu0  ;;  %v5469_v33 = vpop.f32.mrf.mxu1  ;;  %v9685_v34 = vld [vmem:[#allocation32_spill] sm:$0xff] }
 0x6ba   : > { %v5030_v2 = vadd.f32 %v9685_v34, %v4878_v9 }
 0x6bb   : > { %v5512_v52 = vadd.f32 %v9384_v45, %v5488_v30 }
 0x6bc   : > { %v5148_v28 = vpop.f32.mrf.mxu3 }
 0x6bd   : > { %v5176_v58 = vadd.f32 %v5148_v28, %v5026_v26  ;;  %v5532_v21 = vmax.f32 %v5512_v52, 0.0 }
 0x6bf   : > { %v5337_v7 = vadd.f32 %v5309_v49, %v5176_v58 }
 0x6c1   : > { %v5489_v27 = vadd.f32 %v5461_v0, %v5337_v7  ;;  %v5314_v51 = vpop.f32.mrf.mxu0  ;;  %v5471_v10 = vpop.f32.mrf.mxu1 }
 0x6c3   : > { %v5513_v31 = vadd.f32 %v9384_v45, %v5489_v27 }
 0x6c4   : > { %v5151_v1 = vpop.f32.mrf.mxu3 }
 0x6c5   : > { %v5533_v40 = vmax.f32 %v5513_v31, 0.0  ;;  %v5177_v48 = vadd.f32 %v5151_v1, %v5027_v23 }
 0x6c7   : > { %v6993_v41 = vpack.c.bf16 %v5533_v40, %v5532_v21  ;;  %v5338_v39 = vadd.f32 %v5312_v54, %v5177_v48 }
 0x6c9   : > { %7013 = vst [vmem:[%s9398_s12 + $0x38] sm:$0xff] %v6993_v41   ;;  %v5490_v16 = vadd.f32 %v5464_v46, %v5338_v39  ;;  %v5317_v38 = vpop.f32.mrf.mxu0 }
 0x6cb   : > { %v5514_v61 = vadd.f32 %v9384_v45, %v5490_v16 }
 0x6cc   : > { %v5153_v24 = vpop.f32.mrf.mxu3 }
 0x6cd   : > { %v5178_v59 = vadd.f32 %v5153_v24, %v5028_v35  ;;  %v5534_v50 = vmax.f32 %v5514_v61, 0.0 }
 0x6cf   : > { %v5339_v18 = vadd.f32 %v5314_v51, %v5178_v59 }
 0x6d1   : > { %v5491_v8 = vadd.f32 %v5466_v56, %v5339_v18  ;;  %v5319_v11 = vpop.f32.mrf.mxu0 }
 0x6d3   : > { %v5515_v44 = vadd.f32 %v9384_v45, %v5491_v8 }
 0x6d4   : > { %v5156_v4 = vpop.f32.mrf.mxu3 }
 0x6d5   : > { %v5535_v5 = vmax.f32 %v5515_v44, 0.0  ;;  %v5179_v42 = vadd.f32 %v5156_v4, %v5029_v43 }
 0x6d7   : > { %v6998_v19 = vpack.c.bf16 %v5535_v5, %v5534_v50  ;;  %v5340_v32 = vadd.f32 %v5317_v38, %v5179_v42 }
 0x6d9   : > { %7014 = vst [vmem:[%s9398_s12 + $0x40] sm:$0xff] %v6998_v19   ;;  %v5492_v12 = vadd.f32 %v5469_v33, %v5340_v32 }
 0x6db   : > { %v5516_v47 = vadd.f32 %v9384_v45, %v5492_v12 }
 0x6dc   : > { %v5158_v6 = vpop.f32.mrf.mxu3 }
 0x6dd   : > { %v5180_v3 = vadd.f32 %v5158_v6, %v5030_v2  ;;  %v5536_v49 = vmax.f32 %v5516_v47, 0.0 }
 0x6df   : > { %v5341_v22 = vadd.f32 %v5319_v11, %v5180_v3 }
 0x6e1   : > { %v5493_v53 = vadd.f32 %v5471_v10, %v5341_v22 }
 0x6e3   : > { %v5517_v55 = vadd.f32 %v9384_v45, %v5493_v53 }
 0x6e5   : > { %v5537_v29 = vmax.f32 %v5517_v55, 0.0 }
 0x6e7   : > { %v7003_v14 = vpack.c.bf16 %v5537_v29, %v5536_v49 }
 0x6e9   : > { %7015 = vst [vmem:[%s9398_s12 + $0x48] sm:$0xff] %v7003_v14  }
 0x6ea PF: > { %s19_s24 = sadd.s32 1, %s7155_s24  }
 0x6eb   : > { %p16_p7 = scmp.ge.s32.totalorder %s19_s24, 4  }
 0x6ed   :  { %18 = sbr.rel (!%p16_p7) target bundleno = 2 (0x2), region = 111 }
 0x6f2   :  { %5599 = vsyncpa [#allocation3], 1 }
 0x6f3   :  { %5601 = vsyncpa [#allocation3 + $0x1], 1 }
 0x6f4   :  { %5602 = vsyncpa [#allocation5], 1 }

</bundles_post_ra>
